<compile_context>
chip_gen: v7x
topology: tpu7x:2x2x1
jax: 0.10.0
libtpu: 0.0.40
codegen_flags: <defaults>
</compile_context>

<pallas_src>
import functools

import jax
import jax.numpy as jnp
from jax import lax
from jax.experimental import pallas as pl
from jax.experimental.pallas import tpu as pltpu


def _cdiv(a, b):
    return -(-a // b)


# ---------------------------------------------------------------------------
# Kernel
# ---------------------------------------------------------------------------
def _conv_block(xwin, w_ref, scale_ref, shift_ref, relu, rows, W):
    """One 3x3 conv (+ folded-BN affine + optional ReLU) over a VMEM window.

    xwin:  (rows + 2, W + 2, Cin) bf16 window with zero borders already applied
    w_ref: (3, 3*Cin, Cout) bf16 weights, (ky, kx*Cin + ci) tap ordering
    Returns (rows, W, Cout) f32.
    """
    cin = xwin.shape[-1]
    cout = w_ref.shape[-1]
    acc = jnp.zeros((rows * W, cout), jnp.float32)
    # Per-dy grouping: three MXU matmuls with K = 3*Cin, f32 accumulation.
    for dy in range(3):
        win = xwin[dy:dy + rows]                                    # (rows, W+2, Cin)
        patches = jnp.concatenate(
            [win[:, dx:dx + W, :] for dx in range(3)], axis=-1)     # (rows, W, 3*Cin)
        acc = acc + jnp.dot(patches.reshape(rows * W, 3 * cin), w_ref[dy],
                            preferred_element_type=jnp.float32)
    y = acc * scale_ref[...] + shift_ref[...]
    if relu:
        y = jnp.maximum(y, 0.0)
    return y.reshape(rows, W, cout)


def _conv_group_kernel(*refs, TH, W, H, depth, relus, mask_tail):
    """`depth` (1 or 2) fused Conv3x3(+BN affine)(+ReLU) layers over one row strip.

    refs (in order):
      top_ref:  (1, depth, W, Cin)   rows just above the strip (clamped blocks)
      core_ref: (1, TH,    W, Cin)   the strip itself
      bot_ref:  (1, depth, W, Cin)   rows just below the strip (clamped blocks)
      per layer: w (3, 3*Cin, Cout) bf16, scale (1, Cout) f32, shift (1, Cout) f32
      o_ref:    (1, TH, W, Cout)
    """
    top_ref, core_ref, bot_ref = refs[0], refs[1], refs[2]
    o_ref = refs[3 + 3 * depth]
    i = pl.program_id(1)
    last = pl.num_programs(1) - 1

    # Assemble the row window; zero the halo rows that fall outside the image.
    top = top_ref[0]
    bot = bot_ref[0]
    top = jnp.where(i == 0, jnp.zeros_like(top), top)
    bot = jnp.where(i == last, jnp.zeros_like(bot), bot)
    x = jnp.concatenate([top, core_ref[0], bot], axis=0)    # (TH + 2*depth, W, Cin)

    for li in range(depth):
        rows = TH + 2 * (depth - 1 - li)                     # rows produced by layer li
        w_ref = refs[3 + 3 * li]
        s_ref = refs[4 + 3 * li]
        b_ref = refs[5 + 3 * li]

        # Add the W-halo (zero padding) in VMEM; stores stay unpadded/aligned.
        cin = x.shape[-1]
        zcol = jnp.zeros((rows + 2, 1, cin), x.dtype)
        xwin = jnp.concatenate([zcol, x, zcol], axis=1)      # (rows+2, W+2, Cin)

        y = _conv_block(xwin, w_ref, s_ref, b_ref, relus[li], rows, W)

        if li + 1 < depth:
            # Intermediate rows outside the true image must act as zero padding
            # for the next fused conv.
            gid = (i * TH - (depth - 1 - li)
                   + lax.broadcasted_iota(jnp.int32, (rows, 1, 1), 0))
            y = jnp.where((gid >= 0) & (gid < H), y, 0.0)
            x = y.astype(jnp.bfloat16)
        else:
            if mask_tail:
                # Keep the "stored rows >= H are zero" invariant for the next layer.
                gid = i * TH + lax.broadcasted_iota(jnp.int32, (rows, 1, 1), 0)
                y = jnp.where(gid < H, y, 0.0)
            o_ref[0] = y.astype(o_ref.dtype)                 # full, offset-0 store


# ---------------------------------------------------------------------------
# Per-group wrapper
# ---------------------------------------------------------------------------
def _vmem_budget():
    """Generation-aware VMEM budgets (v5e/v6e: 128 MiB physical, v7x: 64 MiB)."""
    try:
        cap = int(pltpu.get_tpu_info().vmem_capacity_bytes)
    except Exception:
        cap = 64 * 1024 * 1024                               # conservative fallback
    budget = min(cap * 3 // 8, 48 * 1024 * 1024)             # ~48 MiB v5e/v6e, ~24 MiB v7x
    limit = min(cap // 2, 64 * 1024 * 1024)                  # scoped-VMEM limit
    return budget, limit


def _pick_tile_rows(H, W, group_info, budget_bytes):
    """Largest multiple-of-8 row strip fitting the VMEM estimate, capped so every
    image still yields >= 2 strips (both v7x TensorCores get work at batch 1)."""
    Wp = W + 2

    def est_group(th, chans, out_bytes):
        d = len(chans) - 1
        b = 2 * th * W * chans[0] * 2              # core input block (double buffered)
        b += 2 * 2 * d * W * chans[0] * 2          # halo row blocks
        b += 2 * th * W * chans[-1] * out_bytes    # output block (double buffered)
        for li in range(d):
            rows = th + 2 * (d - 1 - li)
            cin, cout = chans[li], chans[li + 1]
            b += (rows + 2) * Wp * cin * 2         # assembled input window
            b += 2 * rows * W * 3 * cin * 2        # per-dy im2col patches (2 live)
            b += 2 * rows * W * cout * 4           # f32 accumulator + epilogue
            b += rows * W * cout * 2               # bf16 intermediate
            b += 2 * 9 * cin * cout * 2            # weights
        return b + (2 << 20)

    def est(th):
        return max(est_group(th, chans, ob) for chans, ob in group_info)

    cap2 = 8 * _cdiv(_cdiv(H, 2), 8) if H > 8 else 8
    th = 8
    for cand in range(16, 257, 8):
        if cand > cap2 or est(cand) > budget_bytes:
            break
        th = cand
    return th


def conv_group(x, layers, *, tile_rows, true_h, out_dtype, vmem_limit):
    """Apply `len(layers)` (1 or 2) fused conv layers to x: (N, H_pad, W, Cin) bf16."""
    N, H_pad, W, Cin = x.shape
    depth = len(layers)
    halo = depth
    TH = tile_rows
    assert H_pad % TH == 0 and TH % halo == 0
    n_tiles = H_pad // TH
    Cout = layers[-1]["w"].shape[-1]

    inputs = [x, x, x]
    in_specs = [
        pl.BlockSpec((1, halo, W, Cin),
                     lambda n, i: (n, jnp.maximum(i * (TH // halo) - 1, 0), 0, 0)),
        pl.BlockSpec((1, TH, W, Cin), lambda n, i: (n, i, 0, 0)),
        pl.BlockSpec((1, halo, W, Cin),
                     lambda n, i: (n, jnp.minimum((i + 1) * (TH // halo),
                                                  H_pad // halo - 1), 0, 0)),
    ]
    relus = []
    for layer in layers:
        cin_l, cout_l = layer["w"].shape[2], layer["w"].shape[3]
        inputs.append(layer["w"].reshape(3, 3 * cin_l, cout_l).astype(jnp.bfloat16))
        inputs.append(layer["scale"].reshape(1, cout_l).astype(jnp.float32))
        inputs.append(layer["shift"].reshape(1, cout_l).astype(jnp.float32))
        in_specs.append(pl.BlockSpec((3, 3 * cin_l, cout_l), lambda n, i: (0, 0, 0)))
        in_specs.append(pl.BlockSpec((1, cout_l), lambda n, i: (0, 0)))
        in_specs.append(pl.BlockSpec((1, cout_l), lambda n, i: (0, 0)))
        relus.append(bool(layer["relu"]))

    kernel = functools.partial(
        _conv_group_kernel, TH=TH, W=W, H=true_h, depth=depth,
        relus=tuple(relus), mask_tail=(H_pad > true_h))

    return pl.pallas_call(
        kernel,
        out_shape=jax.ShapeDtypeStruct((N, H_pad, W, Cout), out_dtype),
        grid=(N, n_tiles),
        in_specs=in_specs,
        out_specs=pl.BlockSpec((1, TH, W, Cout), lambda n, i: (n, i, 0, 0)),
        compiler_params=pltpu.CompilerParams(
            dimension_semantics=("parallel", "parallel"),
            vmem_limit_bytes=vmem_limit),
    )(*inputs)


# ---------------------------------------------------------------------------
# Model: parameters + forward
# ---------------------------------------------------------------------------
def init_dncnn_params(key, in_channels=3, out_channels=3, num_filters=64,
                      num_layers=20):
    """Synthetic parameters matching DnCNN.__init__ shapes.

    Each layer dict: {'w': (3,3,Cin,Cout) HWIO, 'scale': (Cout,), 'shift': (Cout,),
    'relu': bool}. BatchNorm (eval mode, PyTorch defaults: gamma=1, beta=0,
    running_mean=0, running_var=1, eps=1e-5) is folded into scale/shift.
    """
    eps = 1e-5
    layers = []

    def conv_w(k, cin, cout):
        return jax.random.normal(k, (3, 3, cin, cout), jnp.float32) * 0.05

    keys = jax.random.split(key, num_layers)

    layers.append(dict(w=conv_w(keys[0], in_channels, num_filters),
                       scale=jnp.ones((num_filters,), jnp.float32),
                       shift=jnp.zeros((num_filters,), jnp.float32),
                       relu=True))
    bn_scale = jnp.full((num_filters,), 1.0 / jnp.sqrt(1.0 + eps), jnp.float32)
    bn_shift = jnp.zeros((num_filters,), jnp.float32)
    for i in range(num_layers - 2):
        layers.append(dict(w=conv_w(keys[1 + i], num_filters, num_filters),
                           scale=bn_scale, shift=bn_shift, relu=True))
    layers.append(dict(w=conv_w(keys[-1], num_filters, out_channels),
                       scale=jnp.ones((out_channels,), jnp.float32),
                       shift=jnp.zeros((out_channels,), jnp.float32),
                       relu=False))
    return layers


def dncnn_forward(x_nchw, params, *, fuse_pairs=True):
    """Full DnCNN forward. Input/output NCHW (PyTorch convention)."""
    N, C, H, W = x_nchw.shape
    x = jnp.transpose(x_nchw, (0, 2, 3, 1)).astype(jnp.bfloat16)     # NCHW -> NHWC

    # Pad the first layer's input channels to a multiple of 8 (zero channels with
    # zero weights) so the fused K=3*Cin matmul path applies to every layer.
    cpad = (-C) % 8
    plist = list(params)
    if cpad:
        x = jnp.pad(x, ((0, 0), (0, 0), (0, 0), (0, cpad)))
        plist[0] = dict(params[0],
                        w=jnp.pad(params[0]["w"], ((0, 0), (0, 0), (0, cpad), (0, 0))))

    # Group consecutive layers in pairs (cuts activation HBM traffic ~2x).
    groups = []
    idx = 0
    while idx < len(plist):
        d = 2 if (fuse_pairs and idx + 1 < len(plist)) else 1
        groups.append(plist[idx: idx + d])
        idx += d

    # One row-tile size for the whole network (shared padded-H layout).
    budget, vmem_limit = _vmem_budget()
    group_info = []
    for gi, g in enumerate(groups):
        chans = [g[0]["w"].shape[2]] + [l["w"].shape[3] for l in g]
        group_info.append((chans, 4 if gi == len(groups) - 1 else 2))
    TH = _pick_tile_rows(H, W, group_info, budget)
    n_tiles = _cdiv(H, TH)
    H_pad = n_tiles * TH
    if H_pad > H:
        x = jnp.pad(x, ((0, 0), (0, H_pad - H), (0, 0), (0, 0)))     # zero tail rows

    for gi, g in enumerate(groups):
        last = gi == len(groups) - 1
        x = conv_group(x, g, tile_rows=TH, true_h=H,
                       out_dtype=jnp.float32 if last else jnp.bfloat16,
                       vmem_limit=vmem_limit)
    x = x[:, :H]                                                     # drop padded rows
    return jnp.transpose(x, (0, 3, 1, 2))                            # NHWC -> NCHW


def dncnn_reference(x_nchw, params):
    """Pure-JAX reference with the same bf16-in / f32-accumulate policy."""
    x = jnp.transpose(x_nchw, (0, 2, 3, 1)).astype(jnp.bfloat16)
    nl = len(params)
    for li, layer in enumerate(params):
        y = lax.conv_general_dilated(
            x.astype(jnp.bfloat16), layer["w"].astype(jnp.bfloat16),
            window_strides=(1, 1), padding=((1, 1), (1, 1)),
            dimension_numbers=("NHWC", "HWIO", "NHWC"),
            preferred_element_type=jnp.float32)
        y = y * layer["scale"][None, None, None, :] + layer["shift"][None, None, None, :]
        if layer["relu"]:
            y = jnp.maximum(y, 0.0)
        x = y.astype(jnp.float32 if li == nl - 1 else jnp.bfloat16)
    return jnp.transpose(x, (0, 3, 1, 2))


if __name__ == "__main__":
    key = jax.random.PRNGKey(0)
    k_x, k_p = jax.random.split(key)

    # Small, module-consistent shapes: batch=2, in/out channels=3, 20x16 image,
    # num_filters=32, num_layers=7. H=20 is deliberately not a multiple of the
    # row tile so the remainder-strip masking path is exercised; 7 layers give
    # three fused conv pairs plus one trailing single-conv group.
    N, C, H, W = 2, 3, 20, 16
    x = jax.random.normal(k_x, (N, C, H, W), jnp.float32)

    params = init_dncnn_params(k_p, in_channels=C, out_channels=C,
                               num_filters=32, num_layers=7)

    fwd = jax.jit(lambda xx: dncnn_forward(xx, params))
    out = jax.block_until_ready(fwd(x))
    assert out.shape == (N, C, H, W), out.shape

    ref = jax.block_until_ready(dncnn_reference(x, params))
    err = float(jnp.max(jnp.abs(out - ref)))
    assert jnp.allclose(out, ref, atol=2e-2, rtol=2e-2), err

    print("KERNEL_OK")
</pallas_src>

<mosaic_0001>
module attributes {stable_mosaic.version = 11 : i64} {
  func.func @_conv_group_kernel(%arg0: i32, %arg1: i32, %arg2: memref<1x2x16x8xbf16, #tpu.memory_space<vmem>>, %arg3: memref<1x16x16x8xbf16, #tpu.memory_space<vmem>>, %arg4: memref<1x2x16x8xbf16, #tpu.memory_space<vmem>>, %arg5: memref<3x24x32xbf16, #tpu.memory_space<vmem>>, %arg6: memref<1x32xf32, #tpu.memory_space<vmem>>, %arg7: memref<1x32xf32, #tpu.memory_space<vmem>>, %arg8: memref<3x96x32xbf16, #tpu.memory_space<vmem>>, %arg9: memref<1x32xf32, #tpu.memory_space<vmem>>, %arg10: memref<1x32xf32, #tpu.memory_space<vmem>>, %arg11: memref<1x16x16x32xbf16, #tpu.memory_space<vmem>>) attributes {dimension_semantics = [#tpu.dimension_semantics<parallel>, #tpu.dimension_semantics<parallel>], iteration_bounds = array<i64: 2, 2>, scalar_prefetch = 0 : i64, scratch_operands = 0 : i64, tpu.core_type = #tpu.core_type<tc>, window_params = [{transform_indices = @transform_0, window_bounds = array<i64: 1, 2, 16, 8>}, {transform_indices = @transform_1, window_bounds = array<i64: 1, 16, 16, 8>}, {transform_indices = @transform_2, window_bounds = array<i64: 1, 2, 16, 8>}, {pipeline_mode = #tpu.pipeline_mode<synchronous>, transform_indices = @transform_3, window_bounds = array<i64: 3, 24, 32>}, {pipeline_mode = #tpu.pipeline_mode<synchronous>, transform_indices = @transform_4, window_bounds = array<i64: 1, 32>}, {pipeline_mode = #tpu.pipeline_mode<synchronous>, transform_indices = @transform_5, window_bounds = array<i64: 1, 32>}, {pipeline_mode = #tpu.pipeline_mode<synchronous>, transform_indices = @transform_6, window_bounds = array<i64: 3, 96, 32>}, {pipeline_mode = #tpu.pipeline_mode<synchronous>, transform_indices = @transform_7, window_bounds = array<i64: 1, 32>}, {pipeline_mode = #tpu.pipeline_mode<synchronous>, transform_indices = @transform_8, window_bounds = array<i64: 1, 32>}, {transform_indices = @transform_9, window_bounds = array<i64: 1, 16, 16, 32>}]} {
    %c0 = arith.constant 0 : index
    %c0_0 = arith.constant 0 : index
    %c0_1 = arith.constant 0 : index
    %c0_2 = arith.constant 0 : index
    %0 = vector.load %arg2[%c0, %c0_0, %c0_1, %c0_2] : memref<1x2x16x8xbf16, #tpu.memory_space<vmem>>, vector<1x2x16x8xbf16>
    %1 = vector.shape_cast %0 : vector<1x2x16x8xbf16> to vector<2x16x8xbf16>
    %c0_3 = arith.constant 0 : index
    %c0_4 = arith.constant 0 : index
    %c0_5 = arith.constant 0 : index
    %c0_6 = arith.constant 0 : index
    %2 = vector.load %arg4[%c0_3, %c0_4, %c0_5, %c0_6] : memref<1x2x16x8xbf16, #tpu.memory_space<vmem>>, vector<1x2x16x8xbf16>
    %3 = vector.shape_cast %2 : vector<1x2x16x8xbf16> to vector<2x16x8xbf16>
    %c0_i32 = arith.constant 0 : i32
    %4 = arith.cmpi eq, %arg1, %c0_i32 : i32
    %cst = arith.constant 0.000000e+00 : bf16
    %5 = vector.broadcast %cst : bf16 to vector<2x16x8xbf16>
    %6 = arith.select %4, %5, %1 : vector<2x16x8xbf16>
    %c1_i32 = arith.constant 1 : i32
    %7 = arith.cmpi eq, %arg1, %c1_i32 : i32
    %cst_7 = arith.constant 0.000000e+00 : bf16
    %8 = vector.broadcast %cst_7 : bf16 to vector<2x16x8xbf16>
    %9 = arith.select %7, %8, %3 : vector<2x16x8xbf16>
    %c0_8 = arith.constant 0 : index
    %c0_9 = arith.constant 0 : index
    %c0_10 = arith.constant 0 : index
    %c0_11 = arith.constant 0 : index
    %10 = vector.load %arg3[%c0_8, %c0_9, %c0_10, %c0_11] : memref<1x16x16x8xbf16, #tpu.memory_space<vmem>>, vector<1x16x16x8xbf16>
    %11 = vector.shape_cast %10 : vector<1x16x16x8xbf16> to vector<16x16x8xbf16>
    %12 = tpu.concatenate %6, %11, %9 in 0 : vector<2x16x8xbf16>, vector<16x16x8xbf16>, vector<2x16x8xbf16> -> vector<20x16x8xbf16>
    %cst_12 = arith.constant 0.000000e+00 : bf16
    %13 = vector.broadcast %cst_12 : bf16 to vector<20x1x8xbf16>
    %14 = tpu.concatenate %13, %12, %13 in 1 : vector<20x1x8xbf16>, vector<20x16x8xbf16>, vector<20x1x8xbf16> -> vector<20x18x8xbf16>
    %cst_13 = arith.constant 0.000000e+00 : f32
    %15 = vector.broadcast %cst_13 : f32 to vector<288x32xf32>
    %16 = vector.extract_strided_slice %14 {offsets = [0, 0, 0], sizes = [18, 18, 8], strides = [1, 1, 1]} : vector<20x18x8xbf16> to vector<18x18x8xbf16>
    %17 = vector.extract_strided_slice %16 {offsets = [0, 0, 0], sizes = [18, 16, 8], strides = [1, 1, 1]} : vector<18x18x8xbf16> to vector<18x16x8xbf16>
    %18 = vector.extract_strided_slice %16 {offsets = [0, 1, 0], sizes = [18, 16, 8], strides = [1, 1, 1]} : vector<18x18x8xbf16> to vector<18x16x8xbf16>
    %19 = vector.extract_strided_slice %16 {offsets = [0, 2, 0], sizes = [18, 16, 8], strides = [1, 1, 1]} : vector<18x18x8xbf16> to vector<18x16x8xbf16>
    %20 = tpu.concatenate %17, %18, %19 in 2 : vector<18x16x8xbf16>, vector<18x16x8xbf16>, vector<18x16x8xbf16> -> vector<18x16x24xbf16>
    %21 = vector.shape_cast %20 : vector<18x16x24xbf16> to vector<288x24xbf16>
    %c0_14 = arith.constant 0 : index
    %c0_15 = arith.constant 0 : index
    %c0_16 = arith.constant 0 : index
    %22 = vector.load %arg5[%c0_14, %c0_15, %c0_16] : memref<3x24x32xbf16, #tpu.memory_space<vmem>>, vector<1x24x32xbf16>
    %23 = vector.shape_cast %22 : vector<1x24x32xbf16> to vector<24x32xbf16>
    %cst_17 = arith.constant dense<0.000000e+00> : vector<288x32xf32>
    %24 = tpu.matmul %21, %23, %cst_17 {dimension_numbers = #tpu.dot_dimension_numbers<[1], [0], [0], [1], [0, 0, 1, 1], [], []>} : vector<288x24xbf16>, vector<24x32xbf16>, vector<288x32xf32> -> vector<288x32xf32>
    %25 = arith.addf %15, %24 : vector<288x32xf32>
    %26 = vector.extract_strided_slice %14 {offsets = [1, 0, 0], sizes = [18, 18, 8], strides = [1, 1, 1]} : vector<20x18x8xbf16> to vector<18x18x8xbf16>
    %27 = vector.extract_strided_slice %26 {offsets = [0, 0, 0], sizes = [18, 16, 8], strides = [1, 1, 1]} : vector<18x18x8xbf16> to vector<18x16x8xbf16>
    %28 = vector.extract_strided_slice %26 {offsets = [0, 1, 0], sizes = [18, 16, 8], strides = [1, 1, 1]} : vector<18x18x8xbf16> to vector<18x16x8xbf16>
    %29 = vector.extract_strided_slice %26 {offsets = [0, 2, 0], sizes = [18, 16, 8], strides = [1, 1, 1]} : vector<18x18x8xbf16> to vector<18x16x8xbf16>
    %30 = tpu.concatenate %27, %28, %29 in 2 : vector<18x16x8xbf16>, vector<18x16x8xbf16>, vector<18x16x8xbf16> -> vector<18x16x24xbf16>
    %31 = vector.shape_cast %30 : vector<18x16x24xbf16> to vector<288x24xbf16>
    %c1 = arith.constant 1 : index
    %c0_18 = arith.constant 0 : index
    %c0_19 = arith.constant 0 : index
    %32 = vector.load %arg5[%c1, %c0_18, %c0_19] : memref<3x24x32xbf16, #tpu.memory_space<vmem>>, vector<1x24x32xbf16>
    %33 = vector.shape_cast %32 : vector<1x24x32xbf16> to vector<24x32xbf16>
    %cst_20 = arith.constant dense<0.000000e+00> : vector<288x32xf32>
    %34 = tpu.matmul %31, %33, %cst_20 {dimension_numbers = #tpu.dot_dimension_numbers<[1], [0], [0], [1], [0, 0, 1, 1], [], []>} : vector<288x24xbf16>, vector<24x32xbf16>, vector<288x32xf32> -> vector<288x32xf32>
    %35 = arith.addf %25, %34 : vector<288x32xf32>
    %36 = vector.extract_strided_slice %14 {offsets = [2, 0, 0], sizes = [18, 18, 8], strides = [1, 1, 1]} : vector<20x18x8xbf16> to vector<18x18x8xbf16>
    %37 = vector.extract_strided_slice %36 {offsets = [0, 0, 0], sizes = [18, 16, 8], strides = [1, 1, 1]} : vector<18x18x8xbf16> to vector<18x16x8xbf16>
    %38 = vector.extract_strided_slice %36 {offsets = [0, 1, 0], sizes = [18, 16, 8], strides = [1, 1, 1]} : vector<18x18x8xbf16> to vector<18x16x8xbf16>
    %39 = vector.extract_strided_slice %36 {offsets = [0, 2, 0], sizes = [18, 16, 8], strides = [1, 1, 1]} : vector<18x18x8xbf16> to vector<18x16x8xbf16>
    %40 = tpu.concatenate %37, %38, %39 in 2 : vector<18x16x8xbf16>, vector<18x16x8xbf16>, vector<18x16x8xbf16> -> vector<18x16x24xbf16>
    %41 = vector.shape_cast %40 : vector<18x16x24xbf16> to vector<288x24xbf16>
    %c2 = arith.constant 2 : index
    %c0_21 = arith.constant 0 : index
    %c0_22 = arith.constant 0 : index
    %42 = vector.load %arg5[%c2, %c0_21, %c0_22] : memref<3x24x32xbf16, #tpu.memory_space<vmem>>, vector<1x24x32xbf16>
    %43 = vector.shape_cast %42 : vector<1x24x32xbf16> to vector<24x32xbf16>
    %cst_23 = arith.constant dense<0.000000e+00> : vector<288x32xf32>
    %44 = tpu.matmul %41, %43, %cst_23 {dimension_numbers = #tpu.dot_dimension_numbers<[1], [0], [0], [1], [0, 0, 1, 1], [], []>} : vector<288x24xbf16>, vector<24x32xbf16>, vector<288x32xf32> -> vector<288x32xf32>
    %45 = arith.addf %35, %44 : vector<288x32xf32>
    %c0_24 = arith.constant 0 : index
    %c0_25 = arith.constant 0 : index
    %46 = vector.load %arg6[%c0_24, %c0_25] : memref<1x32xf32, #tpu.memory_space<vmem>>, vector<1x32xf32>
    %47 = vector.broadcast %46 : vector<1x32xf32> to vector<288x32xf32>
    %48 = arith.mulf %45, %47 : vector<288x32xf32>
    %c0_26 = arith.constant 0 : index
    %c0_27 = arith.constant 0 : index
    %49 = vector.load %arg7[%c0_26, %c0_27] : memref<1x32xf32, #tpu.memory_space<vmem>>, vector<1x32xf32>
    %50 = vector.broadcast %49 : vector<1x32xf32> to vector<288x32xf32>
    %51 = arith.addf %48, %50 : vector<288x32xf32>
    %cst_28 = arith.constant 0.000000e+00 : f32
    %52 = vector.broadcast %cst_28 : f32 to vector<288x32xf32>
    %53 = arith.maximumf %51, %52 : vector<288x32xf32>
    %54 = vector.shape_cast %53 : vector<288x32xf32> to vector<18x16x32xf32>
    %c16_i32 = arith.constant 16 : i32
    %55 = arith.muli %arg1, %c16_i32 : i32
    %c1_i32_29 = arith.constant 1 : i32
    %56 = arith.subi %55, %c1_i32_29 : i32
    %57 = tpu.iota {dimensions = array<i32: 0>} : vector<18x1x1xi32>
    %58 = vector.broadcast %56 : i32 to vector<18x1x1xi32>
    %59 = arith.addi %58, %57 : vector<18x1x1xi32>
    %c0_i32_30 = arith.constant 0 : i32
    %60 = vector.broadcast %c0_i32_30 : i32 to vector<18x1x1xi32>
    %61 = arith.cmpi sge, %59, %60 : vector<18x1x1xi32>
    %c20_i32 = arith.constant 20 : i32
    %62 = vector.broadcast %c20_i32 : i32 to vector<18x1x1xi32>
    %63 = arith.cmpi slt, %59, %62 : vector<18x1x1xi32>
    %64 = arith.andi %61, %63 : vector<18x1x1xi1>
    %cst_31 = arith.constant 0.000000e+00 : f32
    %65 = vector.shape_cast %64 : vector<18x1x1xi1> to vector<18x1x1xi1>
    %66 = vector.broadcast %65 : vector<18x1x1xi1> to vector<18x16x32xi1>
    %67 = vector.broadcast %cst_31 : f32 to vector<18x16x32xf32>
    %68 = arith.select %66, %54, %67 : vector<18x16x32xi1>, vector<18x16x32xf32>
    %69 = arith.truncf %68 : vector<18x16x32xf32> to vector<18x16x32xbf16>
    %cst_32 = arith.constant 0.000000e+00 : bf16
    %70 = vector.broadcast %cst_32 : bf16 to vector<18x1x32xbf16>
    %71 = tpu.concatenate %70, %69, %70 in 1 : vector<18x1x32xbf16>, vector<18x16x32xbf16>, vector<18x1x32xbf16> -> vector<18x18x32xbf16>
    %cst_33 = arith.constant 0.000000e+00 : f32
    %72 = vector.broadcast %cst_33 : f32 to vector<256x32xf32>
    %73 = vector.extract_strided_slice %71 {offsets = [0, 0, 0], sizes = [16, 18, 32], strides = [1, 1, 1]} : vector<18x18x32xbf16> to vector<16x18x32xbf16>
    %74 = vector.extract_strided_slice %73 {offsets = [0, 0, 0], sizes = [16, 16, 32], strides = [1, 1, 1]} : vector<16x18x32xbf16> to vector<16x16x32xbf16>
    %75 = vector.extract_strided_slice %73 {offsets = [0, 1, 0], sizes = [16, 16, 32], strides = [1, 1, 1]} : vector<16x18x32xbf16> to vector<16x16x32xbf16>
    %76 = vector.extract_strided_slice %73 {offsets = [0, 2, 0], sizes = [16, 16, 32], strides = [1, 1, 1]} : vector<16x18x32xbf16> to vector<16x16x32xbf16>
    %77 = tpu.concatenate %74, %75, %76 in 2 : vector<16x16x32xbf16>, vector<16x16x32xbf16>, vector<16x16x32xbf16> -> vector<16x16x96xbf16>
    %78 = vector.shape_cast %77 : vector<16x16x96xbf16> to vector<256x96xbf16>
    %c0_34 = arith.constant 0 : index
    %c0_35 = arith.constant 0 : index
    %c0_36 = arith.constant 0 : index
    %79 = vector.load %arg8[%c0_34, %c0_35, %c0_36] : memref<3x96x32xbf16, #tpu.memory_space<vmem>>, vector<1x96x32xbf16>
    %80 = vector.shape_cast %79 : vector<1x96x32xbf16> to vector<96x32xbf16>
    %cst_37 = arith.constant dense<0.000000e+00> : vector<256x32xf32>
    %81 = tpu.matmul %78, %80, %cst_37 {dimension_numbers = #tpu.dot_dimension_numbers<[1], [0], [0], [1], [0, 0, 1, 1], [], []>} : vector<256x96xbf16>, vector<96x32xbf16>, vector<256x32xf32> -> vector<256x32xf32>
    %82 = arith.addf %72, %81 : vector<256x32xf32>
    %83 = vector.extract_strided_slice %71 {offsets = [1, 0, 0], sizes = [16, 18, 32], strides = [1, 1, 1]} : vector<18x18x32xbf16> to vector<16x18x32xbf16>
    %84 = vector.extract_strided_slice %83 {offsets = [0, 0, 0], sizes = [16, 16, 32], strides = [1, 1, 1]} : vector<16x18x32xbf16> to vector<16x16x32xbf16>
    %85 = vector.extract_strided_slice %83 {offsets = [0, 1, 0], sizes = [16, 16, 32], strides = [1, 1, 1]} : vector<16x18x32xbf16> to vector<16x16x32xbf16>
    %86 = vector.extract_strided_slice %83 {offsets = [0, 2, 0], sizes = [16, 16, 32], strides = [1, 1, 1]} : vector<16x18x32xbf16> to vector<16x16x32xbf16>
    %87 = tpu.concatenate %84, %85, %86 in 2 : vector<16x16x32xbf16>, vector<16x16x32xbf16>, vector<16x16x32xbf16> -> vector<16x16x96xbf16>
    %88 = vector.shape_cast %87 : vector<16x16x96xbf16> to vector<256x96xbf16>
    %c1_38 = arith.constant 1 : index
    %c0_39 = arith.constant 0 : index
    %c0_40 = arith.constant 0 : index
    %89 = vector.load %arg8[%c1_38, %c0_39, %c0_40] : memref<3x96x32xbf16, #tpu.memory_space<vmem>>, vector<1x96x32xbf16>
    %90 = vector.shape_cast %89 : vector<1x96x32xbf16> to vector<96x32xbf16>
    %cst_41 = arith.constant dense<0.000000e+00> : vector<256x32xf32>
    %91 = tpu.matmul %88, %90, %cst_41 {dimension_numbers = #tpu.dot_dimension_numbers<[1], [0], [0], [1], [0, 0, 1, 1], [], []>} : vector<256x96xbf16>, vector<96x32xbf16>, vector<256x32xf32> -> vector<256x32xf32>
    %92 = arith.addf %82, %91 : vector<256x32xf32>
    %93 = vector.extract_strided_slice %71 {offsets = [2, 0, 0], sizes = [16, 18, 32], strides = [1, 1, 1]} : vector<18x18x32xbf16> to vector<16x18x32xbf16>
    %94 = vector.extract_strided_slice %93 {offsets = [0, 0, 0], sizes = [16, 16, 32], strides = [1, 1, 1]} : vector<16x18x32xbf16> to vector<16x16x32xbf16>
    %95 = vector.extract_strided_slice %93 {offsets = [0, 1, 0], sizes = [16, 16, 32], strides = [1, 1, 1]} : vector<16x18x32xbf16> to vector<16x16x32xbf16>
    %96 = vector.extract_strided_slice %93 {offsets = [0, 2, 0], sizes = [16, 16, 32], strides = [1, 1, 1]} : vector<16x18x32xbf16> to vector<16x16x32xbf16>
    %97 = tpu.concatenate %94, %95, %96 in 2 : vector<16x16x32xbf16>, vector<16x16x32xbf16>, vector<16x16x32xbf16> -> vector<16x16x96xbf16>
    %98 = vector.shape_cast %97 : vector<16x16x96xbf16> to vector<256x96xbf16>
    %c2_42 = arith.constant 2 : index
    %c0_43 = arith.constant 0 : index
    %c0_44 = arith.constant 0 : index
    %99 = vector.load %arg8[%c2_42, %c0_43, %c0_44] : memref<3x96x32xbf16, #tpu.memory_space<vmem>>, vector<1x96x32xbf16>
    %100 = vector.shape_cast %99 : vector<1x96x32xbf16> to vector<96x32xbf16>
    %cst_45 = arith.constant dense<0.000000e+00> : vector<256x32xf32>
    %101 = tpu.matmul %98, %100, %cst_45 {dimension_numbers = #tpu.dot_dimension_numbers<[1], [0], [0], [1], [0, 0, 1, 1], [], []>} : vector<256x96xbf16>, vector<96x32xbf16>, vector<256x32xf32> -> vector<256x32xf32>
    %102 = arith.addf %92, %101 : vector<256x32xf32>
    %c0_46 = arith.constant 0 : index
    %c0_47 = arith.constant 0 : index
    %103 = vector.load %arg9[%c0_46, %c0_47] : memref<1x32xf32, #tpu.memory_space<vmem>>, vector<1x32xf32>
    %104 = vector.broadcast %103 : vector<1x32xf32> to vector<256x32xf32>
    %105 = arith.mulf %102, %104 : vector<256x32xf32>
    %c0_48 = arith.constant 0 : index
    %c0_49 = arith.constant 0 : index
    %106 = vector.load %arg10[%c0_48, %c0_49] : memref<1x32xf32, #tpu.memory_space<vmem>>, vector<1x32xf32>
    %107 = vector.broadcast %106 : vector<1x32xf32> to vector<256x32xf32>
    %108 = arith.addf %105, %107 : vector<256x32xf32>
    %cst_50 = arith.constant 0.000000e+00 : f32
    %109 = vector.broadcast %cst_50 : f32 to vector<256x32xf32>
    %110 = arith.maximumf %108, %109 : vector<256x32xf32>
    %111 = vector.shape_cast %110 : vector<256x32xf32> to vector<16x16x32xf32>
    %c16_i32_51 = arith.constant 16 : i32
    %112 = arith.muli %arg1, %c16_i32_51 : i32
    %113 = tpu.iota {dimensions = array<i32: 0>} : vector<16x1x1xi32>
    %114 = vector.broadcast %112 : i32 to vector<16x1x1xi32>
    %115 = arith.addi %114, %113 : vector<16x1x1xi32>
    %c20_i32_52 = arith.constant 20 : i32
    %116 = vector.broadcast %c20_i32_52 : i32 to vector<16x1x1xi32>
    %117 = arith.cmpi slt, %115, %116 : vector<16x1x1xi32>
    %cst_53 = arith.constant 0.000000e+00 : f32
    %118 = vector.shape_cast %117 : vector<16x1x1xi1> to vector<16x1x1xi1>
    %119 = vector.broadcast %118 : vector<16x1x1xi1> to vector<16x16x32xi1>
    %120 = vector.broadcast %cst_53 : f32 to vector<16x16x32xf32>
    %121 = arith.select %119, %111, %120 : vector<16x16x32xi1>, vector<16x16x32xf32>
    %122 = arith.truncf %121 : vector<16x16x32xf32> to vector<16x16x32xbf16>
    %c0_54 = arith.constant 0 : index
    %c0_55 = arith.constant 0 : index
    %c0_56 = arith.constant 0 : index
    %c0_57 = arith.constant 0 : index
    %123 = vector.load %arg11[%c0_54, %c0_55, %c0_56, %c0_57] : memref<1x16x16x32xbf16, #tpu.memory_space<vmem>>, vector<1x16x16x32xbf16>
    %124 = vector.shape_cast %123 : vector<1x16x16x32xbf16> to vector<16x16x32xbf16>
    %125 = vector.shape_cast %122 : vector<16x16x32xbf16> to vector<1x16x16x32xbf16>
    tpu.vector_store %arg11[%c0_54, %c0_55, %c0_56, %c0_57], %125 {strides = array<i32>} : memref<1x16x16x32xbf16, #tpu.memory_space<vmem>>, vector<1x16x16x32xbf16>,
    return
  }
  func.func @transform_0(%arg0: i32, %arg1: i32) -> (i32, i32, i32, i32) {
    %c8_i32 = arith.constant 8 : i32
    %0 = arith.muli %arg1, %c8_i32 : i32
    %c1_i32 = arith.constant 1 : i32
    %1 = arith.subi %0, %c1_i32 : i32
    %c0_i32 = arith.constant 0 : i32
    %2 = arith.maxsi %1, %c0_i32 : i32
    %c0_i32_0 = arith.constant 0 : i32
    %c0_i32_1 = arith.constant 0 : i32
    %c0_i32_2 = arith.constant 0 : i32
    return %arg0, %2, %c0_i32_0, %c0_i32_1 : i32, i32, i32, i32
  }
  func.func @transform_1(%arg0: i32, %arg1: i32) -> (i32, i32, i32, i32) {
    %c0_i32 = arith.constant 0 : i32
    %c0_i32_0 = arith.constant 0 : i32
    %c0_i32_1 = arith.constant 0 : i32
    return %arg0, %arg1, %c0_i32, %c0_i32_0 : i32, i32, i32, i32
  }
  func.func @transform_2(%arg0: i32, %arg1: i32) -> (i32, i32, i32, i32) {
    %c1_i32 = arith.constant 1 : i32
    %0 = arith.addi %arg1, %c1_i32 : i32
    %c8_i32 = arith.constant 8 : i32
    %1 = arith.muli %0, %c8_i32 : i32
    %c15_i32 = arith.constant 15 : i32
    %2 = arith.minsi %1, %c15_i32 : i32
    %c0_i32 = arith.constant 0 : i32
    %c0_i32_0 = arith.constant 0 : i32
    %c0_i32_1 = arith.constant 0 : i32
    return %arg0, %2, %c0_i32, %c0_i32_0 : i32, i32, i32, i32
  }
  func.func @transform_3(%arg0: i32, %arg1: i32) -> (i32, i32, i32) {
    %c0_i32 = arith.constant 0 : i32
    %c0_i32_0 = arith.constant 0 : i32
    %c0_i32_1 = arith.constant 0 : i32
    %c0_i32_2 = arith.constant 0 : i32
    return %c0_i32, %c0_i32_0, %c0_i32_1 : i32, i32, i32
  }
  func.func @transform_4(%arg0: i32, %arg1: i32) -> (i32, i32) {
    %c0_i32 = arith.constant 0 : i32
    %c0_i32_0 = arith.constant 0 : i32
    %c0_i32_1 = arith.constant 0 : i32
    return %c0_i32, %c0_i32_0 : i32, i32
  }
  func.func @transform_5(%arg0: i32, %arg1: i32) -> (i32, i32) {
    %c0_i32 = arith.constant 0 : i32
    %c0_i32_0 = arith.constant 0 : i32
    %c0_i32_1 = arith.constant 0 : i32
    return %c0_i32, %c0_i32_0 : i32, i32
  }
  func.func @transform_6(%arg0: i32, %arg1: i32) -> (i32, i32, i32) {
    %c0_i32 = arith.constant 0 : i32
    %c0_i32_0 = arith.constant 0 : i32
    %c0_i32_1 = arith.constant 0 : i32
    %c0_i32_2 = arith.constant 0 : i32
    return %c0_i32, %c0_i32_0, %c0_i32_1 : i32, i32, i32
  }
  func.func @transform_7(%arg0: i32, %arg1: i32) -> (i32, i32) {
    %c0_i32 = arith.constant 0 : i32
    %c0_i32_0 = arith.constant 0 : i32
    %c0_i32_1 = arith.constant 0 : i32
    return %c0_i32, %c0_i32_0 : i32, i32
  }
  func.func @transform_8(%arg0: i32, %arg1: i32) -> (i32, i32) {
    %c0_i32 = arith.constant 0 : i32
    %c0_i32_0 = arith.constant 0 : i32
    %c0_i32_1 = arith.constant 0 : i32
    return %c0_i32, %c0_i32_0 : i32, i32
  }
  func.func @transform_9(%arg0: i32, %arg1: i32) -> (i32, i32, i32, i32) {
    %c0_i32 = arith.constant 0 : i32
    %c0_i32_0 = arith.constant 0 : i32
    %c0_i32_1 = arith.constant 0 : i32
    return %arg0, %arg1, %c0_i32, %c0_i32_0 : i32, i32, i32, i32
  }
}

module attributes {stable_mosaic.version = 11 : i64} {
  func.func @_conv_group_kernel(%arg0: i32, %arg1: i32, %arg2: memref<1x2x16x32xbf16, #tpu.memory_space<vmem>>, %arg3: memref<1x16x16x32xbf16, #tpu.memory_space<vmem>>, %arg4: memref<1x2x16x32xbf16, #tpu.memory_space<vmem>>, %arg5: memref<3x96x32xbf16, #tpu.memory_space<vmem>>, %arg6: memref<1x32xf32, #tpu.memory_space<vmem>>, %arg7: memref<1x32xf32, #tpu.memory_space<vmem>>, %arg8: memref<3x96x32xbf16, #tpu.memory_space<vmem>>, %arg9: memref<1x32xf32, #tpu.memory_space<vmem>>, %arg10: memref<1x32xf32, #tpu.memory_space<vmem>>, %arg11: memref<1x16x16x32xbf16, #tpu.memory_space<vmem>>) attributes {dimension_semantics = [#tpu.dimension_semantics<parallel>, #tpu.dimension_semantics<parallel>], iteration_bounds = array<i64: 2, 2>, scalar_prefetch = 0 : i64, scratch_operands = 0 : i64, tpu.core_type = #tpu.core_type<tc>, window_params = [{transform_indices = @transform_0, window_bounds = array<i64: 1, 2, 16, 32>}, {transform_indices = @transform_1, window_bounds = array<i64: 1, 16, 16, 32>}, {transform_indices = @transform_2, window_bounds = array<i64: 1, 2, 16, 32>}, {pipeline_mode = #tpu.pipeline_mode<synchronous>, transform_indices = @transform_3, window_bounds = array<i64: 3, 96, 32>}, {pipeline_mode = #tpu.pipeline_mode<synchronous>, transform_indices = @transform_4, window_bounds = array<i64: 1, 32>}, {pipeline_mode = #tpu.pipeline_mode<synchronous>, transform_indices = @transform_5, window_bounds = array<i64: 1, 32>}, {pipeline_mode = #tpu.pipeline_mode<synchronous>, transform_indices = @transform_6, window_bounds = array<i64: 3, 96, 32>}, {pipeline_mode = #tpu.pipeline_mode<synchronous>, transform_indices = @transform_7, window_bounds = array<i64: 1, 32>}, {pipeline_mode = #tpu.pipeline_mode<synchronous>, transform_indices = @transform_8, window_bounds = array<i64: 1, 32>}, {transform_indices = @transform_9, window_bounds = array<i64: 1, 16, 16, 32>}]} {
    %c0 = arith.constant 0 : index
    %c0_0 = arith.constant 0 : index
    %c0_1 = arith.constant 0 : index
    %c0_2 = arith.constant 0 : index
    %0 = vector.load %arg2[%c0, %c0_0, %c0_1, %c0_2] : memref<1x2x16x32xbf16, #tpu.memory_space<vmem>>, vector<1x2x16x32xbf16>
    %1 = vector.shape_cast %0 : vector<1x2x16x32xbf16> to vector<2x16x32xbf16>
    %c0_3 = arith.constant 0 : index
    %c0_4 = arith.constant 0 : index
    %c0_5 = arith.constant 0 : index
    %c0_6 = arith.constant 0 : index
    %2 = vector.load %arg4[%c0_3, %c0_4, %c0_5, %c0_6] : memref<1x2x16x32xbf16, #tpu.memory_space<vmem>>, vector<1x2x16x32xbf16>
    %3 = vector.shape_cast %2 : vector<1x2x16x32xbf16> to vector<2x16x32xbf16>
    %c0_i32 = arith.constant 0 : i32
    %4 = arith.cmpi eq, %arg1, %c0_i32 : i32
    %cst = arith.constant 0.000000e+00 : bf16
    %5 = vector.broadcast %cst : bf16 to vector<2x16x32xbf16>
    %6 = arith.select %4, %5, %1 : vector<2x16x32xbf16>
    %c1_i32 = arith.constant 1 : i32
    %7 = arith.cmpi eq, %arg1, %c1_i32 : i32
    %cst_7 = arith.constant 0.000000e+00 : bf16
    %8 = vector.broadcast %cst_7 : bf16 to vector<2x16x32xbf16>
    %9 = arith.select %7, %8, %3 : vector<2x16x32xbf16>
    %c0_8 = arith.constant 0 : index
    %c0_9 = arith.constant 0 : index
    %c0_10 = arith.constant 0 : index
    %c0_11 = arith.constant 0 : index
    %10 = vector.load %arg3[%c0_8, %c0_9, %c0_10, %c0_11] : memref<1x16x16x32xbf16, #tpu.memory_space<vmem>>, vector<1x16x16x32xbf16>
    %11 = vector.shape_cast %10 : vector<1x16x16x32xbf16> to vector<16x16x32xbf16>
    %12 = tpu.concatenate %6, %11, %9 in 0 : vector<2x16x32xbf16>, vector<16x16x32xbf16>, vector<2x16x32xbf16> -> vector<20x16x32xbf16>
    %cst_12 = arith.constant 0.000000e+00 : bf16
    %13 = vector.broadcast %cst_12 : bf16 to vector<20x1x32xbf16>
    %14 = tpu.concatenate %13, %12, %13 in 1 : vector<20x1x32xbf16>, vector<20x16x32xbf16>, vector<20x1x32xbf16> -> vector<20x18x32xbf16>
    %cst_13 = arith.constant 0.000000e+00 : f32
    %15 = vector.broadcast %cst_13 : f32 to vector<288x32xf32>
    %16 = vector.extract_strided_slice %14 {offsets = [0, 0, 0], sizes = [18, 18, 32], strides = [1, 1, 1]} : vector<20x18x32xbf16> to vector<18x18x32xbf16>
    %17 = vector.extract_strided_slice %16 {offsets = [0, 0, 0], sizes = [18, 16, 32], strides = [1, 1, 1]} : vector<18x18x32xbf16> to vector<18x16x32xbf16>
    %18 = vector.extract_strided_slice %16 {offsets = [0, 1, 0], sizes = [18, 16, 32], strides = [1, 1, 1]} : vector<18x18x32xbf16> to vector<18x16x32xbf16>
    %19 = vector.extract_strided_slice %16 {offsets = [0, 2, 0], sizes = [18, 16, 32], strides = [1, 1, 1]} : vector<18x18x32xbf16> to vector<18x16x32xbf16>
    %20 = tpu.concatenate %17, %18, %19 in 2 : vector<18x16x32xbf16>, vector<18x16x32xbf16>, vector<18x16x32xbf16> -> vector<18x16x96xbf16>
    %21 = vector.shape_cast %20 : vector<18x16x96xbf16> to vector<288x96xbf16>
    %c0_14 = arith.constant 0 : index
    %c0_15 = arith.constant 0 : index
    %c0_16 = arith.constant 0 : index
    %22 = vector.load %arg5[%c0_14, %c0_15, %c0_16] : memref<3x96x32xbf16, #tpu.memory_space<vmem>>, vector<1x96x32xbf16>
    %23 = vector.shape_cast %22 : vector<1x96x32xbf16> to vector<96x32xbf16>
    %cst_17 = arith.constant dense<0.000000e+00> : vector<288x32xf32>
    %24 = tpu.matmul %21, %23, %cst_17 {dimension_numbers = #tpu.dot_dimension_numbers<[1], [0], [0], [1], [0, 0, 1, 1], [], []>} : vector<288x96xbf16>, vector<96x32xbf16>, vector<288x32xf32> -> vector<288x32xf32>
    %25 = arith.addf %15, %24 : vector<288x32xf32>
    %26 = vector.extract_strided_slice %14 {offsets = [1, 0, 0], sizes = [18, 18, 32], strides = [1, 1, 1]} : vector<20x18x32xbf16> to vector<18x18x32xbf16>
    %27 = vector.extract_strided_slice %26 {offsets = [0, 0, 0], sizes = [18, 16, 32], strides = [1, 1, 1]} : vector<18x18x32xbf16> to vector<18x16x32xbf16>
    %28 = vector.extract_strided_slice %26 {offsets = [0, 1, 0], sizes = [18, 16, 32], strides = [1, 1, 1]} : vector<18x18x32xbf16> to vector<18x16x32xbf16>
    %29 = vector.extract_strided_slice %26 {offsets = [0, 2, 0], sizes = [18, 16, 32], strides = [1, 1, 1]} : vector<18x18x32xbf16> to vector<18x16x32xbf16>
    %30 = tpu.concatenate %27, %28, %29 in 2 : vector<18x16x32xbf16>, vector<18x16x32xbf16>, vector<18x16x32xbf16> -> vector<18x16x96xbf16>
    %31 = vector.shape_cast %30 : vector<18x16x96xbf16> to vector<288x96xbf16>
    %c1 = arith.constant 1 : index
    %c0_18 = arith.constant 0 : index
    %c0_19 = arith.constant 0 : index
    %32 = vector.load %arg5[%c1, %c0_18, %c0_19] : memref<3x96x32xbf16, #tpu.memory_space<vmem>>, vector<1x96x32xbf16>
    %33 = vector.shape_cast %32 : vector<1x96x32xbf16> to vector<96x32xbf16>
    %cst_20 = arith.constant dense<0.000000e+00> : vector<288x32xf32>
    %34 = tpu.matmul %31, %33, %cst_20 {dimension_numbers = #tpu.dot_dimension_numbers<[1], [0], [0], [1], [0, 0, 1, 1], [], []>} : vector<288x96xbf16>, vector<96x32xbf16>, vector<288x32xf32> -> vector<288x32xf32>
    %35 = arith.addf %25, %34 : vector<288x32xf32>
    %36 = vector.extract_strided_slice %14 {offsets = [2, 0, 0], sizes = [18, 18, 32], strides = [1, 1, 1]} : vector<20x18x32xbf16> to vector<18x18x32xbf16>
    %37 = vector.extract_strided_slice %36 {offsets = [0, 0, 0], sizes = [18, 16, 32], strides = [1, 1, 1]} : vector<18x18x32xbf16> to vector<18x16x32xbf16>
    %38 = vector.extract_strided_slice %36 {offsets = [0, 1, 0], sizes = [18, 16, 32], strides = [1, 1, 1]} : vector<18x18x32xbf16> to vector<18x16x32xbf16>
    %39 = vector.extract_strided_slice %36 {offsets = [0, 2, 0], sizes = [18, 16, 32], strides = [1, 1, 1]} : vector<18x18x32xbf16> to vector<18x16x32xbf16>
    %40 = tpu.concatenate %37, %38, %39 in 2 : vector<18x16x32xbf16>, vector<18x16x32xbf16>, vector<18x16x32xbf16> -> vector<18x16x96xbf16>
    %41 = vector.shape_cast %40 : vector<18x16x96xbf16> to vector<288x96xbf16>
    %c2 = arith.constant 2 : index
    %c0_21 = arith.constant 0 : index
    %c0_22 = arith.constant 0 : index
    %42 = vector.load %arg5[%c2, %c0_21, %c0_22] : memref<3x96x32xbf16, #tpu.memory_space<vmem>>, vector<1x96x32xbf16>
    %43 = vector.shape_cast %42 : vector<1x96x32xbf16> to vector<96x32xbf16>
    %cst_23 = arith.constant dense<0.000000e+00> : vector<288x32xf32>
    %44 = tpu.matmul %41, %43, %cst_23 {dimension_numbers = #tpu.dot_dimension_numbers<[1], [0], [0], [1], [0, 0, 1, 1], [], []>} : vector<288x96xbf16>, vector<96x32xbf16>, vector<288x32xf32> -> vector<288x32xf32>
    %45 = arith.addf %35, %44 : vector<288x32xf32>
    %c0_24 = arith.constant 0 : index
    %c0_25 = arith.constant 0 : index
    %46 = vector.load %arg6[%c0_24, %c0_25] : memref<1x32xf32, #tpu.memory_space<vmem>>, vector<1x32xf32>
    %47 = vector.broadcast %46 : vector<1x32xf32> to vector<288x32xf32>
    %48 = arith.mulf %45, %47 : vector<288x32xf32>
    %c0_26 = arith.constant 0 : index
    %c0_27 = arith.constant 0 : index
    %49 = vector.load %arg7[%c0_26, %c0_27] : memref<1x32xf32, #tpu.memory_space<vmem>>, vector<1x32xf32>
    %50 = vector.broadcast %49 : vector<1x32xf32> to vector<288x32xf32>
    %51 = arith.addf %48, %50 : vector<288x32xf32>
    %cst_28 = arith.constant 0.000000e+00 : f32
    %52 = vector.broadcast %cst_28 : f32 to vector<288x32xf32>
    %53 = arith.maximumf %51, %52 : vector<288x32xf32>
    %54 = vector.shape_cast %53 : vector<288x32xf32> to vector<18x16x32xf32>
    %c16_i32 = arith.constant 16 : i32
    %55 = arith.muli %arg1, %c16_i32 : i32
    %c1_i32_29 = arith.constant 1 : i32
    %56 = arith.subi %55, %c1_i32_29 : i32
    %57 = tpu.iota {dimensions = array<i32: 0>} : vector<18x1x1xi32>
    %58 = vector.broadcast %56 : i32 to vector<18x1x1xi32>
    %59 = arith.addi %58, %57 : vector<18x1x1xi32>
    %c0_i32_30 = arith.constant 0 : i32
    %60 = vector.broadcast %c0_i32_30 : i32 to vector<18x1x1xi32>
    %61 = arith.cmpi sge, %59, %60 : vector<18x1x1xi32>
    %c20_i32 = arith.constant 20 : i32
    %62 = vector.broadcast %c20_i32 : i32 to vector<18x1x1xi32>
    %63 = arith.cmpi slt, %59, %62 : vector<18x1x1xi32>
    %64 = arith.andi %61, %63 : vector<18x1x1xi1>
    %cst_31 = arith.constant 0.000000e+00 : f32
    %65 = vector.shape_cast %64 : vector<18x1x1xi1> to vector<18x1x1xi1>
    %66 = vector.broadcast %65 : vector<18x1x1xi1> to vector<18x16x32xi1>
    %67 = vector.broadcast %cst_31 : f32 to vector<18x16x32xf32>
    %68 = arith.select %66, %54, %67 : vector<18x16x32xi1>, vector<18x16x32xf32>
    %69 = arith.truncf %68 : vector<18x16x32xf32> to vector<18x16x32xbf16>
    %cst_32 = arith.constant 0.000000e+00 : bf16
    %70 = vector.broadcast %cst_32 : bf16 to vector<18x1x32xbf16>
    %71 = tpu.concatenate %70, %69, %70 in 1 : vector<18x1x32xbf16>, vector<18x16x32xbf16>, vector<18x1x32xbf16> -> vector<18x18x32xbf16>
    %cst_33 = arith.constant 0.000000e+00 : f32
    %72 = vector.broadcast %cst_33 : f32 to vector<256x32xf32>
    %73 = vector.extract_strided_slice %71 {offsets = [0, 0, 0], sizes = [16, 18, 32], strides = [1, 1, 1]} : vector<18x18x32xbf16> to vector<16x18x32xbf16>
    %74 = vector.extract_strided_slice %73 {offsets = [0, 0, 0], sizes = [16, 16, 32], strides = [1, 1, 1]} : vector<16x18x32xbf16> to vector<16x16x32xbf16>
    %75 = vector.extract_strided_slice %73 {offsets = [0, 1, 0], sizes = [16, 16, 32], strides = [1, 1, 1]} : vector<16x18x32xbf16> to vector<16x16x32xbf16>
    %76 = vector.extract_strided_slice %73 {offsets = [0, 2, 0], sizes = [16, 16, 32], strides = [1, 1, 1]} : vector<16x18x32xbf16> to vector<16x16x32xbf16>
    %77 = tpu.concatenate %74, %75, %76 in 2 : vector<16x16x32xbf16>, vector<16x16x32xbf16>, vector<16x16x32xbf16> -> vector<16x16x96xbf16>
    %78 = vector.shape_cast %77 : vector<16x16x96xbf16> to vector<256x96xbf16>
    %c0_34 = arith.constant 0 : index
    %c0_35 = arith.constant 0 : index
    %c0_36 = arith.constant 0 : index
    %79 = vector.load %arg8[%c0_34, %c0_35, %c0_36] : memref<3x96x32xbf16, #tpu.memory_space<vmem>>, vector<1x96x32xbf16>
    %80 = vector.shape_cast %79 : vector<1x96x32xbf16> to vector<96x32xbf16>
    %cst_37 = arith.constant dense<0.000000e+00> : vector<256x32xf32>
    %81 = tpu.matmul %78, %80, %cst_37 {dimension_numbers = #tpu.dot_dimension_numbers<[1], [0], [0], [1], [0, 0, 1, 1], [], []>} : vector<256x96xbf16>, vector<96x32xbf16>, vector<256x32xf32> -> vector<256x32xf32>
    %82 = arith.addf %72, %81 : vector<256x32xf32>
    %83 = vector.extract_strided_slice %71 {offsets = [1, 0, 0], sizes = [16, 18, 32], strides = [1, 1, 1]} : vector<18x18x32xbf16> to vector<16x18x32xbf16>
    %84 = vector.extract_strided_slice %83 {offsets = [0, 0, 0], sizes = [16, 16, 32], strides = [1, 1, 1]} : vector<16x18x32xbf16> to vector<16x16x32xbf16>
    %85 = vector.extract_strided_slice %83 {offsets = [0, 1, 0], sizes = [16, 16, 32], strides = [1, 1, 1]} : vector<16x18x32xbf16> to vector<16x16x32xbf16>
    %86 = vector.extract_strided_slice %83 {offsets = [0, 2, 0], sizes = [16, 16, 32], strides = [1, 1, 1]} : vector<16x18x32xbf16> to vector<16x16x32xbf16>
    %87 = tpu.concatenate %84, %85, %86 in 2 : vector<16x16x32xbf16>, vector<16x16x32xbf16>, vector<16x16x32xbf16> -> vector<16x16x96xbf16>
    %88 = vector.shape_cast %87 : vector<16x16x96xbf16> to vector<256x96xbf16>
    %c1_38 = arith.constant 1 : index
    %c0_39 = arith.constant 0 : index
    %c0_40 = arith.constant 0 : index
    %89 = vector.load %arg8[%c1_38, %c0_39, %c0_40] : memref<3x96x32xbf16, #tpu.memory_space<vmem>>, vector<1x96x32xbf16>
    %90 = vector.shape_cast %89 : vector<1x96x32xbf16> to vector<96x32xbf16>
    %cst_41 = arith.constant dense<0.000000e+00> : vector<256x32xf32>
    %91 = tpu.matmul %88, %90, %cst_41 {dimension_numbers = #tpu.dot_dimension_numbers<[1], [0], [0], [1], [0, 0, 1, 1], [], []>} : vector<256x96xbf16>, vector<96x32xbf16>, vector<256x32xf32> -> vector<256x32xf32>
    %92 = arith.addf %82, %91 : vector<256x32xf32>
    %93 = vector.extract_strided_slice %71 {offsets = [2, 0, 0], sizes = [16, 18, 32], strides = [1, 1, 1]} : vector<18x18x32xbf16> to vector<16x18x32xbf16>
    %94 = vector.extract_strided_slice %93 {offsets = [0, 0, 0], sizes = [16, 16, 32], strides = [1, 1, 1]} : vector<16x18x32xbf16> to vector<16x16x32xbf16>
    %95 = vector.extract_strided_slice %93 {offsets = [0, 1, 0], sizes = [16, 16, 32], strides = [1, 1, 1]} : vector<16x18x32xbf16> to vector<16x16x32xbf16>
    %96 = vector.extract_strided_slice %93 {offsets = [0, 2, 0], sizes = [16, 16, 32], strides = [1, 1, 1]} : vector<16x18x32xbf16> to vector<16x16x32xbf16>
    %97 = tpu.concatenate %94, %95, %96 in 2 : vector<16x16x32xbf16>, vector<16x16x32xbf16>, vector<16x16x32xbf16> -> vector<16x16x96xbf16>
    %98 = vector.shape_cast %97 : vector<16x16x96xbf16> to vector<256x96xbf16>
    %c2_42 = arith.constant 2 : index
    %c0_43 = arith.constant 0 : index
    %c0_44 = arith.constant 0 : index
    %99 = vector.load %arg8[%c2_42, %c0_43, %c0_44] : memref<3x96x32xbf16, #tpu.memory_space<vmem>>, vector<1x96x32xbf16>
    %100 = vector.shape_cast %99 : vector<1x96x32xbf16> to vector<96x32xbf16>
    %cst_45 = arith.constant dense<0.000000e+00> : vector<256x32xf32>
    %101 = tpu.matmul %98, %100, %cst_45 {dimension_numbers = #tpu.dot_dimension_numbers<[1], [0], [0], [1], [0, 0, 1, 1], [], []>} : vector<256x96xbf16>, vector<96x32xbf16>, vector<256x32xf32> -> vector<256x32xf32>
    %102 = arith.addf %92, %101 : vector<256x32xf32>
    %c0_46 = arith.constant 0 : index
    %c0_47 = arith.constant 0 : index
    %103 = vector.load %arg9[%c0_46, %c0_47] : memref<1x32xf32, #tpu.memory_space<vmem>>, vector<1x32xf32>
    %104 = vector.broadcast %103 : vector<1x32xf32> to vector<256x32xf32>
    %105 = arith.mulf %102, %104 : vector<256x32xf32>
    %c0_48 = arith.constant 0 : index
    %c0_49 = arith.constant 0 : index
    %106 = vector.load %arg10[%c0_48, %c0_49] : memref<1x32xf32, #tpu.memory_space<vmem>>, vector<1x32xf32>
    %107 = vector.broadcast %106 : vector<1x32xf32> to vector<256x32xf32>
    %108 = arith.addf %105, %107 : vector<256x32xf32>
    %cst_50 = arith.constant 0.000000e+00 : f32
    %109 = vector.broadcast %cst_50 : f32 to vector<256x32xf32>
    %110 = arith.maximumf %108, %109 : vector<256x32xf32>
    %111 = vector.shape_cast %110 : vector<256x32xf32> to vector<16x16x32xf32>
    %c16_i32_51 = arith.constant 16 : i32
    %112 = arith.muli %arg1, %c16_i32_51 : i32
    %113 = tpu.iota {dimensions = array<i32: 0>} : vector<16x1x1xi32>
    %114 = vector.broadcast %112 : i32 to vector<16x1x1xi32>
    %115 = arith.addi %114, %113 : vector<16x1x1xi32>
    %c20_i32_52 = arith.constant 20 : i32
    %116 = vector.broadcast %c20_i32_52 : i32 to vector<16x1x1xi32>
    %117 = arith.cmpi slt, %115, %116 : vector<16x1x1xi32>
    %cst_53 = arith.constant 0.000000e+00 : f32
    %118 = vector.shape_cast %117 : vector<16x1x1xi1> to vector<16x1x1xi1>
    %119 = vector.broadcast %118 : vector<16x1x1xi1> to vector<16x16x32xi1>
    %120 = vector.broadcast %cst_53 : f32 to vector<16x16x32xf32>
    %121 = arith.select %119, %111, %120 : vector<16x16x32xi1>, vector<16x16x32xf32>
    %122 = arith.truncf %121 : vector<16x16x32xf32> to vector<16x16x32xbf16>
    %c0_54 = arith.constant 0 : index
    %c0_55 = arith.constant 0 : index
    %c0_56 = arith.constant 0 : index
    %c0_57 = arith.constant 0 : index
    %123 = vector.load %arg11[%c0_54, %c0_55, %c0_56, %c0_57] : memref<1x16x16x32xbf16, #tpu.memory_space<vmem>>, vector<1x16x16x32xbf16>
    %124 = vector.shape_cast %123 : vector<1x16x16x32xbf16> to vector<16x16x32xbf16>
    %125 = vector.shape_cast %122 : vector<16x16x32xbf16> to vector<1x16x16x32xbf16>
    tpu.vector_store %arg11[%c0_54, %c0_55, %c0_56, %c0_57], %125 {strides = array<i32>} : memref<1x16x16x32xbf16, #tpu.memory_space<vmem>>, vector<1x16x16x32xbf16>,
    return
  }
  func.func @transform_0(%arg0: i32, %arg1: i32) -> (i32, i32, i32, i32) {
    %c8_i32 = arith.constant 8 : i32
    %0 = arith.muli %arg1, %c8_i32 : i32
    %c1_i32 = arith.constant 1 : i32
    %1 = arith.subi %0, %c1_i32 : i32
    %c0_i32 = arith.constant 0 : i32
    %2 = arith.maxsi %1, %c0_i32 : i32
    %c0_i32_0 = arith.constant 0 : i32
    %c0_i32_1 = arith.constant 0 : i32
    %c0_i32_2 = arith.constant 0 : i32
    return %arg0, %2, %c0_i32_0, %c0_i32_1 : i32, i32, i32, i32
  }
  func.func @transform_1(%arg0: i32, %arg1: i32) -> (i32, i32, i32, i32) {
    %c0_i32 = arith.constant 0 : i32
    %c0_i32_0 = arith.constant 0 : i32
    %c0_i32_1 = arith.constant 0 : i32
    return %arg0, %arg1, %c0_i32, %c0_i32_0 : i32, i32, i32, i32
  }
  func.func @transform_2(%arg0: i32, %arg1: i32) -> (i32, i32, i32, i32) {
    %c1_i32 = arith.constant 1 : i32
    %0 = arith.addi %arg1, %c1_i32 : i32
    %c8_i32 = arith.constant 8 : i32
    %1 = arith.muli %0, %c8_i32 : i32
    %c15_i32 = arith.constant 15 : i32
    %2 = arith.minsi %1, %c15_i32 : i32
    %c0_i32 = arith.constant 0 : i32
    %c0_i32_0 = arith.constant 0 : i32
    %c0_i32_1 = arith.constant 0 : i32
    return %arg0, %2, %c0_i32, %c0_i32_0 : i32, i32, i32, i32
  }
  func.func @transform_3(%arg0: i32, %arg1: i32) -> (i32, i32, i32) {
    %c0_i32 = arith.constant 0 : i32
    %c0_i32_0 = arith.constant 0 : i32
    %c0_i32_1 = arith.constant 0 : i32
    %c0_i32_2 = arith.constant 0 : i32
    return %c0_i32, %c0_i32_0, %c0_i32_1 : i32, i32, i32
  }
  func.func @transform_4(%arg0: i32, %arg1: i32) -> (i32, i32) {
    %c0_i32 = arith.constant 0 : i32
    %c0_i32_0 = arith.constant 0 : i32
    %c0_i32_1 = arith.constant 0 : i32
    return %c0_i32, %c0_i32_0 : i32, i32
  }
  func.func @transform_5(%arg0: i32, %arg1: i32) -> (i32, i32) {
    %c0_i32 = arith.constant 0 : i32
    %c0_i32_0 = arith.constant 0 : i32
    %c0_i32_1 = arith.constant 0 : i32
    return %c0_i32, %c0_i32_0 : i32, i32
  }
  func.func @transform_6(%arg0: i32, %arg1: i32) -> (i32, i32, i32) {
    %c0_i32 = arith.constant 0 : i32
    %c0_i32_0 = arith.constant 0 : i32
    %c0_i32_1 = arith.constant 0 : i32
    %c0_i32_2 = arith.constant 0 : i32
    return %c0_i32, %c0_i32_0, %c0_i32_1 : i32, i32, i32
  }
  func.func @transform_7(%arg0: i32, %arg1: i32) -> (i32, i32) {
    %c0_i32 = arith.constant 0 : i32
    %c0_i32_0 = arith.constant 0 : i32
    %c0_i32_1 = arith.constant 0 : i32
    return %c0_i32, %c0_i32_0 : i32, i32
  }
  func.func @transform_8(%arg0: i32, %arg1: i32) -> (i32, i32) {
    %c0_i32 = arith.constant 0 : i32
    %c0_i32_0 = arith.constant 0 : i32
    %c0_i32_1 = arith.constant 0 : i32
    return %c0_i32, %c0_i32_0 : i32, i32
  }
  func.func @transform_9(%arg0: i32, %arg1: i32) -> (i32, i32, i32, i32) {
    %c0_i32 = arith.constant 0 : i32
    %c0_i32_0 = arith.constant 0 : i32
    %c0_i32_1 = arith.constant 0 : i32
    return %arg0, %arg1, %c0_i32, %c0_i32_0 : i32, i32, i32, i32
  }
}

module attributes {stable_mosaic.version = 11 : i64} {
  func.func @_conv_group_kernel(%arg0: i32, %arg1: i32, %arg2: memref<1x1x16x32xbf16, #tpu.memory_space<vmem>>, %arg3: memref<1x16x16x32xbf16, #tpu.memory_space<vmem>>, %arg4: memref<1x1x16x32xbf16, #tpu.memory_space<vmem>>, %arg5: memref<3x96x3xbf16, #tpu.memory_space<vmem>>, %arg6: memref<1x3xf32, #tpu.memory_space<vmem>>, %arg7: memref<1x3xf32, #tpu.memory_space<vmem>>, %arg8: memref<1x16x16x3xf32, #tpu.memory_space<vmem>>) attributes {dimension_semantics = [#tpu.dimension_semantics<parallel>, #tpu.dimension_semantics<parallel>], iteration_bounds = array<i64: 2, 2>, scalar_prefetch = 0 : i64, scratch_operands = 0 : i64, tpu.core_type = #tpu.core_type<tc>, window_params = [{transform_indices = @transform_0, window_bounds = array<i64: 1, 1, 16, 32>}, {transform_indices = @transform_1, window_bounds = array<i64: 1, 16, 16, 32>}, {transform_indices = @transform_2, window_bounds = array<i64: 1, 1, 16, 32>}, {pipeline_mode = #tpu.pipeline_mode<synchronous>, transform_indices = @transform_3, window_bounds = array<i64: 3, 96, 3>}, {pipeline_mode = #tpu.pipeline_mode<synchronous>, transform_indices = @transform_4, window_bounds = array<i64: 1, 3>}, {pipeline_mode = #tpu.pipeline_mode<synchronous>, transform_indices = @transform_5, window_bounds = array<i64: 1, 3>}, {transform_indices = @transform_6, window_bounds = array<i64: 1, 16, 16, 3>}]} {
    %c0 = arith.constant 0 : index
    %c0_0 = arith.constant 0 : index
    %c0_1 = arith.constant 0 : index
    %c0_2 = arith.constant 0 : index
    %0 = vector.load %arg2[%c0, %c0_0, %c0_1, %c0_2] : memref<1x1x16x32xbf16, #tpu.memory_space<vmem>>, vector<1x1x16x32xbf16>
    %1 = vector.shape_cast %0 : vector<1x1x16x32xbf16> to vector<1x16x32xbf16>
    %c0_3 = arith.constant 0 : index
    %c0_4 = arith.constant 0 : index
    %c0_5 = arith.constant 0 : index
    %c0_6 = arith.constant 0 : index
    %2 = vector.load %arg4[%c0_3, %c0_4, %c0_5, %c0_6] : memref<1x1x16x32xbf16, #tpu.memory_space<vmem>>, vector<1x1x16x32xbf16>
    %3 = vector.shape_cast %2 : vector<1x1x16x32xbf16> to vector<1x16x32xbf16>
    %c0_i32 = arith.constant 0 : i32
    %4 = arith.cmpi eq, %arg1, %c0_i32 : i32
    %cst = arith.constant 0.000000e+00 : bf16
    %5 = vector.broadcast %cst : bf16 to vector<1x16x32xbf16>
    %6 = arith.select %4, %5, %1 : vector<1x16x32xbf16>
    %c1_i32 = arith.constant 1 : i32
    %7 = arith.cmpi eq, %arg1, %c1_i32 : i32
    %cst_7 = arith.constant 0.000000e+00 : bf16
    %8 = vector.broadcast %cst_7 : bf16 to vector<1x16x32xbf16>
    %9 = arith.select %7, %8, %3 : vector<1x16x32xbf16>
    %c0_8 = arith.constant 0 : index
    %c0_9 = arith.constant 0 : index
    %c0_10 = arith.constant 0 : index
    %c0_11 = arith.constant 0 : index
    %10 = vector.load %arg3[%c0_8, %c0_9, %c0_10, %c0_11] : memref<1x16x16x32xbf16, #tpu.memory_space<vmem>>, vector<1x16x16x32xbf16>
    %11 = vector.shape_cast %10 : vector<1x16x16x32xbf16> to vector<16x16x32xbf16>
    %12 = tpu.concatenate %6, %11, %9 in 0 : vector<1x16x32xbf16>, vector<16x16x32xbf16>, vector<1x16x32xbf16> -> vector<18x16x32xbf16>
    %cst_12 = arith.constant 0.000000e+00 : bf16
    %13 = vector.broadcast %cst_12 : bf16 to vector<18x1x32xbf16>
    %14 = tpu.concatenate %13, %12, %13 in 1 : vector<18x1x32xbf16>, vector<18x16x32xbf16>, vector<18x1x32xbf16> -> vector<18x18x32xbf16>
    %cst_13 = arith.constant 0.000000e+00 : f32
    %15 = vector.broadcast %cst_13 : f32 to vector<256x3xf32>
    %16 = vector.extract_strided_slice %14 {offsets = [0, 0, 0], sizes = [16, 18, 32], strides = [1, 1, 1]} : vector<18x18x32xbf16> to vector<16x18x32xbf16>
    %17 = vector.extract_strided_slice %16 {offsets = [0, 0, 0], sizes = [16, 16, 32], strides = [1, 1, 1]} : vector<16x18x32xbf16> to vector<16x16x32xbf16>
    %18 = vector.extract_strided_slice %16 {offsets = [0, 1, 0], sizes = [16, 16, 32], strides = [1, 1, 1]} : vector<16x18x32xbf16> to vector<16x16x32xbf16>
    %19 = vector.extract_strided_slice %16 {offsets = [0, 2, 0], sizes = [16, 16, 32], strides = [1, 1, 1]} : vector<16x18x32xbf16> to vector<16x16x32xbf16>
    %20 = tpu.concatenate %17, %18, %19 in 2 : vector<16x16x32xbf16>, vector<16x16x32xbf16>, vector<16x16x32xbf16> -> vector<16x16x96xbf16>
    %21 = vector.shape_cast %20 : vector<16x16x96xbf16> to vector<256x96xbf16>
    %c0_14 = arith.constant 0 : index
    %c0_15 = arith.constant 0 : index
    %c0_16 = arith.constant 0 : index
    %22 = vector.load %arg5[%c0_14, %c0_15, %c0_16] : memref<3x96x3xbf16, #tpu.memory_space<vmem>>, vector<1x96x3xbf16>
    %23 = vector.shape_cast %22 : vector<1x96x3xbf16> to vector<96x3xbf16>
    %cst_17 = arith.constant dense<0.000000e+00> : vector<256x3xf32>
    %24 = tpu.matmul %21, %23, %cst_17 {dimension_numbers = #tpu.dot_dimension_numbers<[1], [0], [0], [1], [0, 0, 1, 1], [], []>} : vector<256x96xbf16>, vector<96x3xbf16>, vector<256x3xf32> -> vector<256x3xf32>
    %25 = arith.addf %15, %24 : vector<256x3xf32>
    %26 = vector.extract_strided_slice %14 {offsets = [1, 0, 0], sizes = [16, 18, 32], strides = [1, 1, 1]} : vector<18x18x32xbf16> to vector<16x18x32xbf16>
    %27 = vector.extract_strided_slice %26 {offsets = [0, 0, 0], sizes = [16, 16, 32], strides = [1, 1, 1]} : vector<16x18x32xbf16> to vector<16x16x32xbf16>
    %28 = vector.extract_strided_slice %26 {offsets = [0, 1, 0], sizes = [16, 16, 32], strides = [1, 1, 1]} : vector<16x18x32xbf16> to vector<16x16x32xbf16>
    %29 = vector.extract_strided_slice %26 {offsets = [0, 2, 0], sizes = [16, 16, 32], strides = [1, 1, 1]} : vector<16x18x32xbf16> to vector<16x16x32xbf16>
    %30 = tpu.concatenate %27, %28, %29 in 2 : vector<16x16x32xbf16>, vector<16x16x32xbf16>, vector<16x16x32xbf16> -> vector<16x16x96xbf16>
    %31 = vector.shape_cast %30 : vector<16x16x96xbf16> to vector<256x96xbf16>
    %c1 = arith.constant 1 : index
    %c0_18 = arith.constant 0 : index
    %c0_19 = arith.constant 0 : index
    %32 = vector.load %arg5[%c1, %c0_18, %c0_19] : memref<3x96x3xbf16, #tpu.memory_space<vmem>>, vector<1x96x3xbf16>
    %33 = vector.shape_cast %32 : vector<1x96x3xbf16> to vector<96x3xbf16>
    %cst_20 = arith.constant dense<0.000000e+00> : vector<256x3xf32>
    %34 = tpu.matmul %31, %33, %cst_20 {dimension_numbers = #tpu.dot_dimension_numbers<[1], [0], [0], [1], [0, 0, 1, 1], [], []>} : vector<256x96xbf16>, vector<96x3xbf16>, vector<256x3xf32> -> vector<256x3xf32>
    %35 = arith.addf %25, %34 : vector<256x3xf32>
    %36 = vector.extract_strided_slice %14 {offsets = [2, 0, 0], sizes = [16, 18, 32], strides = [1, 1, 1]} : vector<18x18x32xbf16> to vector<16x18x32xbf16>
    %37 = vector.extract_strided_slice %36 {offsets = [0, 0, 0], sizes = [16, 16, 32], strides = [1, 1, 1]} : vector<16x18x32xbf16> to vector<16x16x32xbf16>
    %38 = vector.extract_strided_slice %36 {offsets = [0, 1, 0], sizes = [16, 16, 32], strides = [1, 1, 1]} : vector<16x18x32xbf16> to vector<16x16x32xbf16>
    %39 = vector.extract_strided_slice %36 {offsets = [0, 2, 0], sizes = [16, 16, 32], strides = [1, 1, 1]} : vector<16x18x32xbf16> to vector<16x16x32xbf16>
    %40 = tpu.concatenate %37, %38, %39 in 2 : vector<16x16x32xbf16>, vector<16x16x32xbf16>, vector<16x16x32xbf16> -> vector<16x16x96xbf16>
    %41 = vector.shape_cast %40 : vector<16x16x96xbf16> to vector<256x96xbf16>
    %c2 = arith.constant 2 : index
    %c0_21 = arith.constant 0 : index
    %c0_22 = arith.constant 0 : index
    %42 = vector.load %arg5[%c2, %c0_21, %c0_22] : memref<3x96x3xbf16, #tpu.memory_space<vmem>>, vector<1x96x3xbf16>
    %43 = vector.shape_cast %42 : vector<1x96x3xbf16> to vector<96x3xbf16>
    %cst_23 = arith.constant dense<0.000000e+00> : vector<256x3xf32>
    %44 = tpu.matmul %41, %43, %cst_23 {dimension_numbers = #tpu.dot_dimension_numbers<[1], [0], [0], [1], [0, 0, 1, 1], [], []>} : vector<256x96xbf16>, vector<96x3xbf16>, vector<256x3xf32> -> vector<256x3xf32>
    %45 = arith.addf %35, %44 : vector<256x3xf32>
    %c0_24 = arith.constant 0 : index
    %c0_25 = arith.constant 0 : index
    %46 = vector.load %arg6[%c0_24, %c0_25] : memref<1x3xf32, #tpu.memory_space<vmem>>, vector<1x3xf32>
    %47 = vector.broadcast %46 : vector<1x3xf32> to vector<256x3xf32>
    %48 = arith.mulf %45, %47 : vector<256x3xf32>
    %c0_26 = arith.constant 0 : index
    %c0_27 = arith.constant 0 : index
    %49 = vector.load %arg7[%c0_26, %c0_27] : memref<1x3xf32, #tpu.memory_space<vmem>>, vector<1x3xf32>
    %50 = vector.broadcast %49 : vector<1x3xf32> to vector<256x3xf32>
    %51 = arith.addf %48, %50 : vector<256x3xf32>
    %52 = vector.shape_cast %51 : vector<256x3xf32> to vector<16x16x3xf32>
    %c16_i32 = arith.constant 16 : i32
    %53 = arith.muli %arg1, %c16_i32 : i32
    %54 = tpu.iota {dimensions = array<i32: 0>} : vector<16x1x1xi32>
    %55 = vector.broadcast %53 : i32 to vector<16x1x1xi32>
    %56 = arith.addi %55, %54 : vector<16x1x1xi32>
    %c20_i32 = arith.constant 20 : i32
    %57 = vector.broadcast %c20_i32 : i32 to vector<16x1x1xi32>
    %58 = arith.cmpi slt, %56, %57 : vector<16x1x1xi32>
    %cst_28 = arith.constant 0.000000e+00 : f32
    %59 = vector.shape_cast %58 : vector<16x1x1xi1> to vector<16x1x1xi1>
    %60 = vector.broadcast %59 : vector<16x1x1xi1> to vector<16x16x3xi1>
    %61 = vector.broadcast %cst_28 : f32 to vector<16x16x3xf32>
    %62 = arith.select %60, %52, %61 : vector<16x16x3xi1>, vector<16x16x3xf32>
    %c0_29 = arith.constant 0 : index
    %c0_30 = arith.constant 0 : index
    %c0_31 = arith.constant 0 : index
    %c0_32 = arith.constant 0 : index
    %63 = vector.load %arg8[%c0_29, %c0_30, %c0_31, %c0_32] : memref<1x16x16x3xf32, #tpu.memory_space<vmem>>, vector<1x16x16x3xf32>
    %64 = vector.shape_cast %63 : vector<1x16x16x3xf32> to vector<16x16x3xf32>
    %65 = vector.shape_cast %62 : vector<16x16x3xf32> to vector<1x16x16x3xf32>
    tpu.vector_store %arg8[%c0_29, %c0_30, %c0_31, %c0_32], %65 {strides = array<i32>} : memref<1x16x16x3xf32, #tpu.memory_space<vmem>>, vector<1x16x16x3xf32>,
    return
  }
  func.func @transform_0(%arg0: i32, %arg1: i32) -> (i32, i32, i32, i32) {
    %c16_i32 = arith.constant 16 : i32
    %0 = arith.muli %arg1, %c16_i32 : i32
    %c1_i32 = arith.constant 1 : i32
    %1 = arith.subi %0, %c1_i32 : i32
    %c0_i32 = arith.constant 0 : i32
    %2 = arith.maxsi %1, %c0_i32 : i32
    %c0_i32_0 = arith.constant 0 : i32
    %c0_i32_1 = arith.constant 0 : i32
    %c0_i32_2 = arith.constant 0 : i32
    return %arg0, %2, %c0_i32_0, %c0_i32_1 : i32, i32, i32, i32
  }
  func.func @transform_1(%arg0: i32, %arg1: i32) -> (i32, i32, i32, i32) {
    %c0_i32 = arith.constant 0 : i32
    %c0_i32_0 = arith.constant 0 : i32
    %c0_i32_1 = arith.constant 0 : i32
    return %arg0, %arg1, %c0_i32, %c0_i32_0 : i32, i32, i32, i32
  }
  func.func @transform_2(%arg0: i32, %arg1: i32) -> (i32, i32, i32, i32) {
    %c1_i32 = arith.constant 1 : i32
    %0 = arith.addi %arg1, %c1_i32 : i32
    %c16_i32 = arith.constant 16 : i32
    %1 = arith.muli %0, %c16_i32 : i32
    %c31_i32 = arith.constant 31 : i32
    %2 = arith.minsi %1, %c31_i32 : i32
    %c0_i32 = arith.constant 0 : i32
    %c0_i32_0 = arith.constant 0 : i32
    %c0_i32_1 = arith.constant 0 : i32
    return %arg0, %2, %c0_i32, %c0_i32_0 : i32, i32, i32, i32
  }
  func.func @transform_3(%arg0: i32, %arg1: i32) -> (i32, i32, i32) {
    %c0_i32 = arith.constant 0 : i32
    %c0_i32_0 = arith.constant 0 : i32
    %c0_i32_1 = arith.constant 0 : i32
    %c0_i32_2 = arith.constant 0 : i32
    return %c0_i32, %c0_i32_0, %c0_i32_1 : i32, i32, i32
  }
  func.func @transform_4(%arg0: i32, %arg1: i32) -> (i32, i32) {
    %c0_i32 = arith.constant 0 : i32
    %c0_i32_0 = arith.constant 0 : i32
    %c0_i32_1 = arith.constant 0 : i32
    return %c0_i32, %c0_i32_0 : i32, i32
  }
  func.func @transform_5(%arg0: i32, %arg1: i32) -> (i32, i32) {
    %c0_i32 = arith.constant 0 : i32
    %c0_i32_0 = arith.constant 0 : i32
    %c0_i32_1 = arith.constant 0 : i32
    return %c0_i32, %c0_i32_0 : i32, i32
  }
  func.func @transform_6(%arg0: i32, %arg1: i32) -> (i32, i32, i32, i32) {
    %c0_i32 = arith.constant 0 : i32
    %c0_i32_0 = arith.constant 0 : i32
    %c0_i32_1 = arith.constant 0 : i32
    return %arg0, %arg1, %c0_i32, %c0_i32_0 : i32, i32, i32, i32
  }
}

</mosaic_0001>

<bundles_post_ra>
// kernel: _lambda_.7
= control target key start
LH: loop header
LB: loop body
LE: loop exit
PB: predicated region body
PF: predicated region fallthrough
CT: control target
= control target key end

     0   :  { %s2846_s21 = smov 0   ;;  %s2848_s22 = smov 0   ;;  %s3669_s0 = inlined_call_operand.vmem [shape: bf16[2,32,16,32], index: 0, kind: input, shape index: {}, may-alias: {0,1,2}]   ;;  %s3670_s1 = inlined_call_operand.vmem [shape: bf16[2,32,16,32], index: 1, kind: input, shape index: {}, may-alias: {0,1,2}]   ;;  %s3671_s2 = inlined_call_operand.vmem [shape: bf16[2,32,16,32], index: 2, kind: input, shape index: {}, may-alias: {0,1,2}]   ;;  %s3672_s3 = inlined_call_operand.vmem [shape: bf16[3,96,3], index: 3, kind: input, shape index: {}]   ;;  %s3673_s4 = inlined_call_operand.vmem [shape: f32[1,3], index: 4, kind: input, shape index: {}]   ;;  %s3674_s5 = inlined_call_operand.vmem [shape: f32[1,3], index: 5, kind: input, shape index: {}]   ;;  %s3675_s6 = inlined_call_operand.vmem [shape: f32[2,32,16,3], index: 6, kind: output, shape index: {}]  }
   0x1   :  { %s2850_s23 = smov 0   ;;  %s2852_s24 = smov 0  }
   0x2   :  { %s2854_s25 = smov 0  }
   0x3 LB: > { %s25_s26 = sadd.s32 1, %s2799_s23  ;;  %s28_s27 = sadd.s32 1, %s2803_s24  ;;  %s2807_s25 = sphi %s2854_s25, %s16_s25   ;;  %s2803_s24 = sphi %s2852_s24, %s3684_s24   ;;  %s2799_s23 = sphi %s2850_s23, %s3683_s23   ;;  %s2795_s22 = sphi %s2848_s22, %s3682_s22   ;;  %s2791_s21 = sphi %s2846_s21, %s3681_s21  }
   0x4   : > { %p26_p0 = scmp.ge.s32.totalorder %s25_s26, 2  ;;  %p2271_p1 = scmp.ge.s32.totalorder %s2807_s25, 1 }
   0x5   : > { %p298_p2 = scmp.lt.s32.totalorder %s2807_s25, 5 }
   0x6   : > { %s3686_s26 = smov (%p26_p0, %s25_s26), 0  ;;  %s3688_s27 = smov (!%p26_p0, %s28_s27), %s2803_s24 }
   0x7   : > { %p299_p3 = pnand %p2271_p1, %p298_p2  ;;  %p30_p4 = scmp.ge.s32.totalorder %s3688_s27, 2 }
   0x8   : > { %s2879_s28 = sshll.u32 (!%p299_p3), %s2791_s21, 4  ;;  %p368_p5 = scmp.lt.s32.totalorder (!%p299_p3), %s2795_s22, 1  ;;  %v2750_v0 = vld [vmem:[%s3672_s3 + $0x30] sm:$0xff] (!%p299_p3)   ;;  %vm722_vm0 = vsmask.f32 (!%p299_p3), 256  ;;  %v2889_v1 = vld [vmem:[%s3672_s3] sm:$0xff] (!%p299_p3)  }
   0x9   : > { %s3690_s27 = smov (%p30_p4, %s3688_s27), 0  ;;  %302 = sbr.rel (%p299_p3) target bundleno = 481 (0x1e1), region = 44 }
   0xa   : > { %p384_p6 = scmp.lt.s32.totalorder (!%p299_p3), %s2879_s28, 31  ;;  %s2273_s11 = sadd.s32 (!%p299_p3), 4294967295, %s2879_s28  ;;  %2484 = vmatprep.subr.bf16.mxu1 (!%p299_p3), %v2750_v0  ;;  %v2752_v2 = vld [vmem:[%s3672_s3 + $0x38] sm:$0xff] (!%p299_p3)   ;;  %v2900_v3 = vld [vmem:[%s3672_s3 + $0x8] sm:$0xff] (!%p299_p3)   ;;  %2528 = vmatprep.subr.bf16.mxu0 (!%p299_p3), %v2889_v1  ;;  %v2754_v4 = vld [vmem:[%s3672_s3 + $0x40] sm:$0xff] (!%p299_p3)   ;;  %vm721_vm1 = vcmask (!%p299_p3), 1040384  }
   0xb   : > { %p366_p7 = scmp.gt.s32.totalorder (!%p299_p3), %s2273_s11, 0  ;;  %2485 = vmatpush3.bf16.msra.mxu1 (!%p299_p3), %v2750_v0  ;;  %2529 = vmatpush3.bf16.msra.mxu0 (!%p299_p3), %v2889_v1  ;;  %p2274_p8 = scmp.lt.s32.totalorder (!%p299_p3), %s2273_s11, 31  ;;  %v2921_v5 = vld [vmem:[%s3672_s3 + $0x10] sm:$0xff] (!%p299_p3)   ;;  %vm760_vm2 = vsmask.f32 (!%p299_p3), 7424  ;;  %vm2934_vm3 = vmand (!%p299_p3), %vm721_vm1, %vm722_vm0  ;;  %vm1017_vm5 = vcmask (!%p299_p3), 1046528  }
   0xc   : > { %2486 = vmatprep.subr.bf16.mxu1 (!%p299_p3), %v2752_v2  ;;  %2530 = vmatprep.subr.bf16.mxu0 (!%p299_p3), %v2900_v3  ;;  %p425_p9 = scmp.eq.s32.totalorder (!%p299_p3), %s2791_s21, 0  ;;  %s2809_s19 = smov (!%p299_p3), 32   ;;  %vm1131_vm7 = vcmask (!%p299_p3), 523264   ;;  %vm1098_vm8 = vcmask (!%p299_p3), 261120   ;;  %vm1250_vm9 = vcmask (!%p299_p3), 785408   ;;  %vm2087_vm11 = vcmask (!%p299_p3), 23552  }
   0xd   : > { %p431_p11 = scmp.eq.s32.totalorder (!%p299_p3), %s2791_s21, 1 }
   0xf   : > { %2487 = vmatpush3.bf16.msra.mxu1 (!%p299_p3), %v2752_v2  ;;  %2531 = vmatpush3.bf16.msra.mxu0 (!%p299_p3), %v2900_v3 }
  0x10   : > { %s3692_s22 = smov (!%p368_p5, %s2795_s22), 1  ;;  %2488 = vmatprep.subr.bf16.mxu1 %v2754_v4  ;;  %2532 = vmatprep.subr.bf16.mxu0 %v2921_v5 }
  0x11   : > { %s385_s7 = scalar_select %p384_p6, %s2879_s28, 31 }
  0x12   : > { %s2891_s10 = sshll.u32 %s3692_s22, 6  ;;  %s2417_s22 = sadd.s32 16, %s2879_s28 }
  0x13   : > { %s2283_s16 = sshll.u32 %s385_s7, 1  ;;  %2489 = vmatpush3.bf16.msra.mxu1 %v2754_v4  ;;  %2533 = vmatpush3.bf16.msra.mxu0 %v2921_v5  ;;  %p3136_p10 = scmp.lt.s32.totalorder %s2417_s22, 31 }
  0x14   : > { %s2904_s17 = sadd.s32 %s2283_s16, %s2891_s10 }
  0x15   : > { %s2285_s20 = sshll.u32 %s2904_s17, 2  ;;  %s3696_s22 = smov (!%p3136_p10, %s2417_s22), 31 }
  0x16   : > { %s2915_s30 = scalar_lea.vmem %s3670_s1, %s2285_s20  ;;  %s2810_s20 = smov 64  }
  0x17   : > { %v2734_v6 = vld [vmem:[%s2915_s30 + $0x8] sm:$0xff]   ;;  %s367_s9 = scalar_select %p366_p7, %s2273_s11, 0  ;;  %v2735_v7 = vld [vmem:[%s2915_s30] sm:$0xff]   ;;  %v2736_v10 = vld [vmem:[%s2915_s30 + $0x18] sm:$0xff]  }
  0x18   : > { %v574_v8 = vshrl.u32 %v2734_v6, 16  ;;  %v577_v9 = vshll.u32 %v2734_v6, 16  ;;  %v567_v11 = vshrl.u32 %v2735_v7, 16  ;;  %v570_v12 = vshll.u32 %v2735_v7, 16  ;;  %s426_s12 = scalar_select %p425_p9, 1, 0 }
  0x19   : > { %s3694_s9 = smov (!%p2274_p8, %s367_s9), 31  ;;  %v588_v14 = vshrl.u32 %v2736_v10, 16  ;;  %v591_v15 = vshll.u32 %v2736_v10, 16  ;;  %v2737_v38 = vld [vmem:[%s2915_s30 + $0x10] sm:$0xff]   ;;  %v2738_v47 = vld [vmem:[%s2915_s30 + $0x28] sm:$0xff]   ;;  %s3698_s22 = smov (!%p3136_p10, %s3696_s22), 31 }
  0x1a   : > { %v576_v13 = vrot.slane %v574_v8, 7  ;;  %s2279_s13 = sshll.u32 %s3694_s9, 1  ;;  %v569_v17 = vrot.slane %v567_v11, 7  ;;  %v427_v18 = vstv %s426_s12  ;;  %v581_v57 = vshrl.u32 %v2737_v38, 16  ;;  %s3208_s9 = sshll.u32 %s3698_s22, 1 }
  0x1b   : > { %s374_s11 = sadd.s32 %s2891_s10, %s2279_s13  ;;  %v590_v21 = vrot.slane %v588_v14, 7  ;;  %vm2947_vm4 = vcmp.eq.s32.totalorder %v427_v18, 1  ;;  %v584_v61 = vshll.u32 %v2737_v38, 16  ;;  %v602_v8 = vshrl.u32 %v2738_v47, 16  ;;  %s402_s12 = sadd.s32 %s3208_s9, %s2891_s10 }
  0x1c   : > { %v579_v19 = vor.u32 %v577_v9, %v576_v13  ;;  %v744_v20 = vsel %vm2934_vm3, %v576_v13, 0  ;;  %s2281_s14 = sshll.u32 %s374_s11, 2  ;;  %v572_v23 = vor.u32 %v570_v12, %v569_v17  ;;  %v743_v24 = vsel %vm2934_vm3, %v569_v17, 0  ;;  %v2739_v13 = vld [vmem:[%s2915_s30 + $0x20] sm:$0xff]   ;;  %s2292_s10 = sshll.u32 %s402_s12, 2 }
  0x1d   : > { %v793_v22 = vshll.u32 %v744_v20, 16  ;;  %s376_s18 = scalar_lea.vmem %s3669_s0, %s2281_s14  ;;  %v781_v27 = vshll.u32 %v743_v24, 16  ;;  %v593_v30 = vor.u32 %v591_v15, %v590_v21  ;;  %v1025_v37 = vrot.slane %v744_v20, 1  ;;  %s404_s14 = scalar_lea.vmem %s3671_s2, %s2292_s10 }
  0x1e   : > { %v2953_v26 = vsel %vm2934_vm3, 0, %v579_v19  ;;  %v421_v28 = vld [vmem:[%s376_s18] sm:$0xf]  ;;  %v422_v29 = vld [vmem:[%s376_s18 + $0x4] sm:$0xf]  ;;  %v2959_v33 = vsel %vm2934_vm3, 0, %v572_v23 }
  0x1f   : > { %v786_v31 = vshrl.u32 %v2953_v26, 16  ;;  %v788_v32 = vshll.u32 %v2953_v26, 16  ;;  %v774_v34 = vshrl.u32 %v2959_v33, 16  ;;  %v776_v35 = vshll.u32 %v2959_v33, 16  ;;  %s2296_s13 = sshll.u32 %s2904_s17, 3 }
  0x20   : > { %v429_v36 = vsel %vm2947_vm4, 0, %v421_v28  ;;  %v795_v40 = vrot.slane %v793_v22, 1  ;;  %v783_v41 = vrot.slane %v781_v27, 1  ;;  %v430_v42 = vsel %vm2947_vm4, 0, %v422_v29 }
  0x21   : > { %v790_v39 = vrot.slane %v788_v32, 1  ;;  %v778_v43 = vrot.slane %v776_v35, 1  ;;  %v2297_v44 = vcombine.low %v429_v36, %v430_v42  ;;  %v1024_v45 = vrot.slane %v2953_v26, 1  ;;  %v2741_v42 = vld [vmem:[%s2915_s30 + $0x30] sm:$0xff]  }
  0x22   : > { %v2971_v46 = vsel %vm2934_vm3, 0, %v593_v30  ;;  %v1021_v49 = vrot.slane %v2959_v33, 1  ;;  %v746_v50 = vsel %vm2934_vm3, %v590_v21, 0  ;;  %v1022_v55 = vrot.slane %v743_v24, 1 }
  0x23   : > { %v791_v48 = vor.u32 %v790_v39, %v786_v31  ;;  %v779_v51 = vor.u32 %v778_v43, %v774_v34  ;;  %v560_v52 = vshrl.u32 %v2297_v44, 16  ;;  %v563_v53 = vshll.u32 %v2297_v44, 16 }
  0x24   : > { %v812_v56 = vshll.u32 %v2971_v46, 16  ;;  %v1026_v60 = vsel %vm1017_vm5, %v1024_v45, %v1025_v37  ;;  %v810_v62 = vshrl.u32 %v2971_v46, 16  ;;  %v817_v63 = vshll.u32 %v746_v50, 16  ;;  %v2740_v37 = vld [vmem:[%s2915_s30 + $0x38] sm:$0xff]  }
  0x25   : > { %v796_v54 = vsel %vm760_vm2, %v791_v48, %v795_v40  ;;  %v784_v58 = vsel %vm760_vm2, %v779_v51, %v783_v41  ;;  %v562_v59 = vrot.slane %v560_v52, 7  ;;  %v583_v0 = vrot.slane %v581_v57, 7  ;;  %v2756_v52 = vld [vmem:[%s3672_s3 + $0x48] sm:$0xff]   ;;  %v3036_v57 = vld [vmem:[%s3672_s3 + $0x18] sm:$0xff]  }
  0x26   : > { %957 = vrot.lane.b32.xlu1 %v796_v54, %s2809_s19  ;;  %955 = vrot.lane.b32.xlu0 %v784_v58, %s2809_s19  ;;  %v1030_v2 = vrot.slane %v2971_v46, 1  ;;  %v814_v7 = vrot.slane %v812_v56, 1  ;;  %v2988_v11 = vsel %vm1017_vm5, %v1021_v49, %v1022_v55  ;;  %v604_v17 = vrot.slane %v602_v8, 7 }
  0x27   : > { %v565_v4 = vor.u32 %v563_v53, %v562_v59  ;;  %v742_v6 = vsel %vm2934_vm3, %v562_v59, 0  ;;  %v586_v12 = vor.u32 %v584_v61, %v583_v0  ;;  %v745_v15 = vsel %vm2934_vm3, %v583_v0, 0  ;;  %2490 = vmatprep.subr.bf16.mxu1 %v2756_v52  ;;  %2534 = vmatprep.subr.bf16.mxu0 %v3036_v57 }
  0x28   : > { %v1019_v9 = vrot.slane %v742_v6, 1  ;;  %v769_v10 = vshll.u32 %v742_v6, 16  ;;  %v605_v18 = vshll.u32 %v2738_v47, 16  ;;  %v819_v22 = vrot.slane %v817_v63, 1  ;;  %2491 = vmatpush3.bf16.msra.mxu1 %v2756_v52  ;;  %v3050_v6 = vld [vmem:[%s3672_s3 + $0x20] sm:$0xff]   ;;  %2535 = vmatpush3.bf16.msra.mxu0 %v3036_v57 }
  0x29   : > { %v2993_v14 = vsel %vm2934_vm3, 0, %v565_v4  ;;  %v815_v24 = vor.u32 %v814_v7, %v810_v62  ;;  %v3002_v25 = vsel %vm2934_vm3, 0, %v586_v12  ;;  %v1031_v27 = vrot.slane %v746_v50, 1  ;;  %v2760_v12 = vld [vmem:[%s3672_s3 + $0x58] sm:$0xff]   ;;  %2536 = vmatprep.subr.bf16.mxu0 %v3050_v6 }
  0x2a   : > { %v1018_v19 = vrot.slane %v2993_v14, 1  ;;  %v762_v20 = vshrl.u32 %v2993_v14, 16  ;;  %v764_v21 = vshll.u32 %v2993_v14, 16  ;;  %v771_v23 = vrot.slane %v769_v10, 1 }
  0x2b   : > { %v800_v30 = vshll.u32 %v3002_v25, 16  ;;  %v805_v31 = vshll.u32 %v745_v15, 16  ;;  %v1027_v32 = vrot.slane %v3002_v25, 1  ;;  %v1028_v34 = vrot.slane %v745_v15, 1 }
  0x2c   : > { %v1020_v28 = vsel %vm1017_vm5, %v1018_v19, %v1019_v9  ;;  %v766_v29 = vrot.slane %v764_v21, 1  ;;  %v607_v35 = vor.u32 %v605_v18, %v604_v17  ;;  %v3010_v36 = vsel %vm2934_vm3, %v604_v17, 0  ;;  %2537 = vmatpush3.bf16.msra.mxu0 %v3050_v6 }
  0x2d   : > { %1066 = vrot.lane.b32.xlu1 %v1020_v28, %s2810_s20  ;;  %v798_v39 = vshrl.u32 %v3002_v25, 16  ;;  %v802_v40 = vrot.slane %v800_v30, 1  ;;  %v595_v41 = vshrl.u32 %v2739_v13, 16  ;;  %v820_v43 = vsel %vm760_vm2, %v815_v24, %v819_v22  ;;  %v3076_v22 = vld [vmem:[%s3672_s3 + $0x28] sm:$0xff]  }
  0x2e   : > { %v767_v38 = vor.u32 %v766_v29, %v762_v20  ;;  %v1032_v44 = vsel %vm1017_vm5, %v1030_v2, %v1031_v27  ;;  %v3019_v45 = vsel %vm2934_vm3, 0, %v607_v35  ;;  %v598_v47 = vshll.u32 %v2739_v13, 16  ;;  %2538 = vmatprep.subr.bf16.mxu0 %v3076_v22 }
  0x2f   : > { %v834_v49 = vshrl.u32 %v3019_v45, 16  ;;  %v836_v50 = vshll.u32 %v3019_v45, 16  ;;  %v841_v51 = vshll.u32 %v3010_v36, 16  ;;  %v807_v53 = vrot.slane %v805_v31, 1 }
  0x30   : > { %v772_v48 = vsel %vm760_vm2, %v767_v38, %v771_v23  ;;  %v3031_v54 = vsel %vm1017_vm5, %v1027_v32, %v1028_v34  ;;  %v597_v55 = vrot.slane %v595_v41, 7  ;;  %v616_v56 = vshrl.u32 %v2740_v37, 16  ;;  %v2742_v38 = vld [vmem:[%s2915_s30 + $0x48] sm:$0xff]   ;;  %2539 = vmatpush3.bf16.msra.mxu0 %v3076_v22 }
  0x31   : > { %953 = vrot.lane.b32.xlu0 %v772_v48, %s2809_s19  ;;  %1070 = vrot.lane.b32.xlu1 %v1026_v60, %s2810_s20  ;;  %v803_v58 = vor.u32 %v802_v40, %v798_v39  ;;  %v838_v59 = vrot.slane %v836_v50, 1  ;;  %v619_v61 = vshll.u32 %v2740_v37, 16  ;;  %v609_v62 = vshrl.u32 %v2741_v42, 16  ;;  %v2758_v60 = vld [vmem:[%s3672_s3 + $0x50] sm:$0xff]   ;;  %v2743_v39 = vld [vmem:[%s2915_s30 + $0x40] sm:$0xff]  }
  0x32   : > { %v600_v63 = vor.u32 %v598_v47, %v597_v55  ;;  %v3043_v0 = vsel %vm2934_vm3, %v597_v55, 0  ;;  %v1037_v2 = vrot.slane %v3010_v36, 1  ;;  %v618_v4 = vrot.slane %v616_v56, 7  ;;  %2492 = vmatprep.subr.bf16.mxu1 %v2758_v60  ;;  %v3104_v47 = vld [vmem:[%s2915_s30 + $0x58] sm:$0xff]  }
  0x33   : > { %v839_v7 = vor.u32 %v838_v59, %v834_v49  ;;  %v843_v8 = vrot.slane %v841_v51, 1  ;;  %v829_v9 = vshll.u32 %v3043_v0, 16  ;;  %v611_v10 = vrot.slane %v609_v62, 7  ;;  %2493 = vmatpush3.bf16.msra.mxu1 %v2758_v60  ;;  %v2745_v51 = vld [vmem:[%s2915_s30 + $0x50] sm:$0xff]  }
  0x34   : > { %v3062_v13 = vsel %vm2934_vm3, 0, %v600_v63  ;;  %v621_v15 = vor.u32 %v619_v61, %v618_v4  ;;  %v3066_v17 = vsel %vm2934_vm3, %v618_v4, 0  ;;  %v612_v18 = vshll.u32 %v2741_v42, 16  ;;  %2494 = vmatprep.subr.bf16.mxu1 %v2760_v12 }
  0x35   : > { %1068 = vrot.lane.b32.xlu0 %v2988_v11, %s2810_s20  ;;  %961 = vrot.lane.b32.xlu1 %v820_v43, %s2809_s19  ;;  %v808_v19 = vsel %vm760_vm2, %v803_v58, %v807_v53  ;;  %v822_v20 = vshrl.u32 %v3062_v13, 16  ;;  %v824_v21 = vshll.u32 %v3062_v13, 16  ;;  %v1036_v11 = vrot.slane %v3019_v45, 1 }
  0x36   : > { %v1034_v23 = vrot.slane %v3043_v0, 1  ;;  %v3081_v24 = vsel %vm2934_vm3, 0, %v621_v15  ;;  %v865_v27 = vshll.u32 %v3066_v17, 16  ;;  %v614_v28 = vor.u32 %v612_v18, %v611_v10 }
  0x37   : > { %v826_v29 = vrot.slane %v824_v21, 1  ;;  %v858_v30 = vshrl.u32 %v3081_v24, 16  ;;  %v860_v31 = vshll.u32 %v3081_v24, 16  ;;  %v3088_v32 = vsel %vm2934_vm3, %v611_v10, 0  ;;  %2495 = vmatpush3.bf16.msra.mxu1 %v2760_v12 }
  0x38   : > { %v844_v34 = vsel %vm760_vm2, %v839_v7, %v843_v8  ;;  %v831_v35 = vrot.slane %v829_v9, 1  ;;  %v3096_v36 = vsel %vm2934_vm3, 0, %v614_v28  ;;  %v853_v37 = vshll.u32 %v3088_v32, 16  ;;  %2616 = vmatprep.subr.bf16.mxu1 %v2889_v1 }
  0x39   : > { %959 = vrot.lane.b32.xlu0 %v808_v19, %s2809_s19  ;;  %1074 = vrot.lane.b32.xlu1 %v1032_v44, %s2810_s20  ;;  %v827_v40 = vor.u32 %v826_v29, %v822_v20  ;;  %v1033_v41 = vrot.slane %v3062_v13, 1  ;;  %v862_v42 = vrot.slane %v860_v31, 1  ;;  %v848_v43 = vshll.u32 %v3096_v36, 16  ;;  %v3111_v44 = vld [vmem:[%s3672_s3 + $0x60] sm:$0xff]  }
  0x3a   : > { %v867_v48 = vrot.slane %v865_v27, 1  ;;  %v846_v49 = vshrl.u32 %v3096_v36, 16  ;;  %v1042_v50 = vrot.slane %v3081_v24, 1  ;;  %v1038_v52 = vsel %vm1017_vm5, %v1036_v11, %v1037_v2  ;;  %2572 = vmatprep.subr.bf16.mxu0 %v3111_v44 }
  0x3b   : > { %v863_v53 = vor.u32 %v862_v42, %v858_v30  ;;  %v850_v55 = vrot.slane %v848_v43, 1  ;;  %v1043_v56 = vrot.slane %v3066_v17, 1  ;;  %v855_v58 = vrot.slane %v853_v37, 1  ;;  %v3132_v17 = vld [vmem:[%s2915_s30 + $0x68] sm:$0xff]  }
  0x3c   : > { %v630_v59 = vshrl.u32 %v2742_v38, 16  ;;  %v633_v61 = vshll.u32 %v2742_v38, 16  ;;  %v623_v62 = vshrl.u32 %v2743_v39, 16  ;;  %v832_v60 = vsel %vm760_vm2, %v827_v40, %v831_v35 }
  0x3d   : > { %1072 = vrot.lane.b32.xlu0 %v3031_v54, %s2810_s20  ;;  %965 = vrot.lane.b32.xlu1 %v844_v34, %s2809_s19  ;;  %v1035_v63 = vsel %vm1017_vm5, %v1033_v41, %v1034_v23  ;;  %v1039_v0 = vrot.slane %v3096_v36, 1  ;;  %v626_v2 = vshll.u32 %v2743_v39, 16  ;;  %v1040_v4 = vrot.slane %v3088_v32, 1 }
  0x3e   : > { %v632_v54 = vrot.slane %v630_v59, 7  ;;  %v625_v7 = vrot.slane %v623_v62, 7  ;;  %v644_v8 = vshrl.u32 %v3104_v47, 16  ;;  %v868_v9 = vsel %vm760_vm2, %v863_v53, %v867_v48 }
  0x3f   : > { %v851_v10 = vor.u32 %v850_v55, %v846_v49  ;;  %v1044_v12 = vsel %vm1017_vm5, %v1042_v50, %v1043_v56  ;;  %v637_v15 = vshrl.u32 %v2745_v51, 16  ;;  %v647_v27 = vshll.u32 %v3104_v47, 16 }
  0x40   : > { %v635_v18 = vor.u32 %v633_v61, %v632_v54  ;;  %v752_v19 = vsel %vm2934_vm3, %v632_v54, 0  ;;  %v628_v20 = vor.u32 %v626_v2, %v625_v7  ;;  %v751_v21 = vsel %vm2934_vm3, %v625_v7, 0  ;;  %v2747_v7 = vld [vmem:[%s2915_s30 + $0x60] sm:$0xff]  }
  0x41   : > { %963 = vrot.lane.b32.xlu0 %v832_v60, %s2809_s19  ;;  %1078 = vrot.lane.b32.xlu1 %v1038_v52, %s2810_s20  ;;  %v889_v11 = vshll.u32 %v752_v19, 16  ;;  %v877_v23 = vshll.u32 %v751_v21, 16  ;;  %v640_v28 = vshll.u32 %v2745_v51, 16  ;;  %v646_v31 = vrot.slane %v644_v8, 7 }
  0x42   : > { %v3149_v29 = vsel %vm2934_vm3, 0, %v635_v18  ;;  %v3153_v30 = vsel %vm2934_vm3, 0, %v628_v20  ;;  %v639_v32 = vrot.slane %v637_v15, 7  ;;  %v856_v34 = vsel %vm760_vm2, %v851_v10, %v855_v58 }
  0x43   : > { %v1041_v35 = vsel %vm1017_vm5, %v1039_v0, %v1040_v4  ;;  %v882_v37 = vshrl.u32 %v3149_v29, 16  ;;  %v884_v38 = vshll.u32 %v3149_v29, 16  ;;  %v891_v39 = vrot.slane %v889_v11, 1 }
  0x44   : > { %v870_v40 = vshrl.u32 %v3153_v30, 16  ;;  %v872_v41 = vshll.u32 %v3153_v30, 16  ;;  %v658_v42 = vshrl.u32 %v3132_v17, 16  ;;  %v649_v47 = vor.u32 %v647_v27, %v646_v31 }
  0x45   : > { %1076 = vrot.lane.b32.xlu0 %v1035_v63, %s2810_s20  ;;  %969 = vrot.lane.b32.xlu1 %v868_v9, %s2809_s19  ;;  %v886_v43 = vrot.slane %v884_v38, 1  ;;  %v3172_v48 = vsel %vm2934_vm3, %v646_v31, 0  ;;  %v642_v49 = vor.u32 %v640_v28, %v639_v32  ;;  %v879_v51 = vrot.slane %v877_v23, 1  ;;  %v2748_v9 = vld [vmem:[%s2915_s30 + $0x70] sm:$0xff]  }
  0x46   : > { %v874_v50 = vrot.slane %v872_v41, 1  ;;  %v1049_v52 = vrot.slane %v752_v19, 1  ;;  %v1046_v53 = vrot.slane %v751_v21, 1  ;;  %v1048_v56 = vrot.slane %v3149_v29, 1 }
  0x47   : > { %v887_v55 = vor.u32 %v886_v43, %v882_v37  ;;  %v3177_v58 = vsel %vm2934_vm3, 0, %v649_v47  ;;  %v3181_v59 = vsel %vm2934_vm3, 0, %v642_v49  ;;  %v1045_v61 = vrot.slane %v3153_v30, 1  ;;  %v2749_v49 = vld [vmem:[%s2915_s30 + $0x78] sm:$0xff]   ;;  %s432_s30 = scalar_select %p431_p11, 1, 0 }
  0x48   : > { %v908_v62 = vshll.u32 %v3177_v58, 16  ;;  %v913_v60 = vshll.u32 %v3172_v48, 16  ;;  %v3190_v63 = vsel %vm2934_vm3, %v639_v32, 0  ;;  %v875_v2 = vor.u32 %v874_v50, %v870_v40 }
  0x49   : > { %967 = vrot.lane.b32.xlu0 %v856_v34, %s2809_s19  ;;  %1082 = vrot.lane.b32.xlu1 %v1044_v12, %s2810_s20  ;;  %v892_v0 = vsel %vm760_vm2, %v887_v55, %v891_v39  ;;  %v906_v4 = vshrl.u32 %v3177_v58, 16  ;;  %v896_v54 = vshll.u32 %v3181_v59, 16  ;;  %v1050_v10 = vsel %vm1017_vm5, %v1048_v56, %v1049_v52 }
  0x4a   : > { %v910_v8 = vrot.slane %v908_v62, 1  ;;  %v894_v12 = vshrl.u32 %v3181_v59, 16  ;;  %v901_v18 = vshll.u32 %v3190_v63, 16  ;;  %v1047_v19 = vsel %vm1017_vm5, %v1045_v61, %v1046_v53 }
  0x4b   : > { %v898_v15 = vrot.slane %v896_v54, 1  ;;  %v915_v20 = vrot.slane %v913_v60, 1  ;;  %v660_v21 = vrot.slane %v658_v42, 7  ;;  %v661_v11 = vshll.u32 %v3132_v17, 16 }
  0x4c   : > { %v880_v23 = vsel %vm760_vm2, %v875_v2, %v879_v51  ;;  %v911_v27 = vor.u32 %v910_v8, %v906_v4  ;;  %v651_v28 = vshrl.u32 %v2747_v7, 16  ;;  %v654_v31 = vshll.u32 %v2747_v7, 16 }
  0x4d   : > { %1080 = vrot.lane.b32.xlu0 %v1041_v35, %s2810_s20  ;;  %973 = vrot.lane.b32.xlu1 %v892_v0, %s2809_s19  ;;  %v1054_v32 = vrot.slane %v3177_v58, 1  ;;  %v663_v34 = vor.u32 %v661_v11, %v660_v21  ;;  %v3213_v35 = vsel %vm2934_vm3, %v660_v21, 0  ;;  %v665_v37 = vshrl.u32 %v2748_v9, 16 }
  0x4e   : > { %v899_v38 = vor.u32 %v898_v15, %v894_v12  ;;  %v903_v17 = vrot.slane %v901_v18, 1  ;;  %v1055_v39 = vrot.slane %v3172_v48, 1  ;;  %v653_v40 = vrot.slane %v651_v28, 7 }
  0x4f   : > { %v3220_v41 = vsel %vm2934_vm3, 0, %v663_v34  ;;  %v937_v42 = vshll.u32 %v3213_v35, 16  ;;  %v667_v43 = vrot.slane %v665_v37, 7  ;;  %v668_v47 = vshll.u32 %v2748_v9, 16  ;;  %v424_v34 = vld [vmem:[%s404_s14 + $0x4] sm:$0xf] }
  0x50   : > { %v916_v50 = vsel %vm760_vm2, %v911_v27, %v915_v20  ;;  %v930_v51 = vshrl.u32 %v3220_v41, 16  ;;  %v932_v48 = vshll.u32 %v3220_v41, 16  ;;  %v656_v52 = vor.u32 %v654_v31, %v653_v40 }
  0x51   : > { %971 = vrot.lane.b32.xlu0 %v880_v23, %s2809_s19  ;;  %1086 = vrot.lane.b32.xlu1 %v1050_v10, %s2810_s20  ;;  %v1051_v53 = vrot.slane %v3181_v59, 1  ;;  %v755_v55 = vsel %vm2934_vm3, %v653_v40, 0  ;;  %v670_v56 = vor.u32 %v668_v47, %v667_v43  ;;  %v1056_v61 = vsel %vm1017_vm5, %v1054_v32, %v1055_v39  ;;  %v423_v32 = vld [vmem:[%s404_s14] sm:$0xf] }
  0x52   : > { %v1052_v62 = vrot.slane %v3190_v63, 1  ;;  %v934_v60 = vrot.slane %v932_v48, 1  ;;  %v3237_v0 = vsel %vm2934_vm3, 0, %v656_v52  ;;  %v904_v2 = vsel %vm760_vm2, %v899_v38, %v903_v17 }
  0x53   : > { %v939_v4 = vrot.slane %v937_v42, 1  ;;  %v920_v54 = vshll.u32 %v3237_v0, 16  ;;  %v672_v7 = vshrl.u32 %v2749_v49, 16  ;;  %v918_v9 = vshrl.u32 %v3237_v0, 16 }
  0x54   : > { %v935_v8 = vor.u32 %v934_v60, %v930_v51  ;;  %v925_v63 = vshll.u32 %v755_v55, 16  ;;  %v3246_v10 = vsel %vm2934_vm3, 0, %v670_v56  ;;  %v1053_v15 = vsel %vm1017_vm5, %v1051_v53, %v1052_v62 }
  0x55   : > { %1084 = vrot.lane.b32.xlu0 %v1047_v19, %s2810_s20  ;;  %977 = vrot.lane.b32.xlu1 %v916_v50, %s2809_s19  ;;  %v922_v12 = vrot.slane %v920_v54, 1  ;;  %v1061_v18 = vrot.slane %v3213_v35, 1  ;;  %v757_v19 = vsel %vm2934_vm3, %v667_v43, 0  ;;  %v1060_v20 = vrot.slane %v3220_v41, 1 }
  0x56   : > { %v944_v21 = vshll.u32 %v3246_v10, 16  ;;  %v674_v11 = vrot.slane %v672_v7, 7  ;;  %v675_v23 = vshll.u32 %v2749_v49, 16  ;;  %v940_v27 = vsel %vm760_vm2, %v935_v8, %v939_v4 }
  0x57   : > { %v923_v28 = vor.u32 %v922_v12, %v918_v9  ;;  %v927_v31 = vrot.slane %v925_v63, 1  ;;  %v433_v35 = vstv %s432_s30  ;;  %v1057_v37 = vrot.slane %v3237_v0, 1 }
  0x58   : > { %v1058_v38 = vrot.slane %v755_v55, 1  ;;  %v949_v17 = vshll.u32 %v757_v19, 16  ;;  %v677_v39 = vor.u32 %v675_v23, %v674_v11  ;;  %v942_v40 = vshrl.u32 %v3246_v10, 16 }
  0x59   : > { %975 = vrot.lane.b32.xlu0 %v904_v2, %s2809_s19  ;;  %1090 = vrot.lane.b32.xlu1 %v1056_v61, %s2810_s20  ;;  %v1063_v42 = vrot.slane %v3246_v10, 1  ;;  %v1064_v43 = vrot.slane %v757_v19, 1  ;;  %vm434_vm6 = vcmp.eq.s32.totalorder %v433_v35, 1  ;;  %v946_v47 = vrot.slane %v944_v21, 1 }
  0x5a   : > { %v3269_v49 = vsel %vm2934_vm3, 0, %v677_v39  ;;  %v435_v50 = vsel %vm434_vm6, 0, %v423_v32  ;;  %v436_v51 = vsel %vm434_vm6, 0, %v424_v34  ;;  %v928_v48 = vsel %vm760_vm2, %v923_v28, %v927_v31 }
  0x5b   : > { %v1062_v52 = vsel %vm1017_vm5, %v1060_v20, %v1061_v18  ;;  %v758_v53 = vsel %vm2934_vm3, %v674_v11, 0  ;;  %v1179_v55 = vshll.u32 %v3269_v49, 16  ;;  %v2314_v56 = vcombine.low %v435_v50, %v436_v51 }
  0x5c   : > { %v1059_v61 = vsel %vm1017_vm5, %v1057_v37, %v1058_v38  ;;  %v951_v62 = vrot.slane %v949_v17, 1  ;;  %v1065_v60 = vsel %vm1017_vm5, %v1063_v42, %v1064_v43  ;;  %v947_v2 = vor.u32 %v946_v47, %v942_v40 }
  0x5d   : > { %1088 = vrot.lane.b32.xlu0 %v1053_v15, %s2810_s20  ;;  %981 = vrot.lane.b32.xlu1 %v940_v27, %s2809_s19  ;;  %v1184_v4 = vshll.u32 %v758_v53, 16  ;;  %v679_v54 = vshrl.u32 %v2314_v56, 16  ;;  %v682_v7 = vshll.u32 %v2314_v56, 16  ;;  %v1177_v8 = vshrl.u32 %v3269_v49, 16 }
  0x5e   : > { %v1181_v9 = vrot.slane %v1179_v55, 1  ;;  %v1192_v63 = vrot.slane %v3269_v49, 1  ;;  %v1193_v12 = vrot.slane %v758_v53, 1  ;;  %v952_v18 = vsel %vm760_vm2, %v947_v2, %v951_v62  ;;  %v2764_v2 = vld [vmem:[%s3672_s3 + $0x70] sm:$0xff]  }
  0x5f   : > { %v681_v15 = vrot.slane %v679_v54, 7  ;;  %v1186_v19 = vrot.slane %v1184_v4, 1 }
  0x60   : > { %v1182_v11 = vor.u32 %v1181_v9, %v1177_v8  ;;  %v1194_v23 = vsel %vm1017_vm5, %v1192_v63, %v1193_v12  ;;  %v2765_v8 = vld [vmem:[%s3672_s3 + $0x78] sm:$0xff]   ;;  %v2766_v63 = vld [vmem:[%s3672_s3 + $0x80] sm:$0xff]  }
  0x61   : > { %979 = vrot.lane.b32.xlu0 %v928_v48, %s2809_s19  ;;  %1094 = vrot.lane.b32.xlu1 %v1062_v52, %s2810_s20  ;;  %v684_v20 = vor.u32 %v682_v7, %v681_v15  ;;  %v759_v21 = vsel %vm2934_vm3, %v681_v15, 0 }
  0x62   : > { %v1651_v27 = vshll.u32 %v759_v21, 16  ;;  %v1660_v28 = vrot.slane %v759_v21, 1  ;;  %v1187_v37 = vsel %vm760_vm2, %v1182_v11, %v1186_v19 }
  0x63   : > { %v3290_v31 = vsel %vm2934_vm3, 0, %v684_v20  ;;  %v2767_v20 = vld [vmem:[%s3672_s3 + $0x88] sm:$0xff]  }
  0x64   : > { %v1644_v32 = vshrl.u32 %v3290_v31, 16  ;;  %v1646_v34 = vshll.u32 %v3290_v31, 16  ;;  %v1659_v35 = vrot.slane %v3290_v31, 1  ;;  %v1653_v17 = vrot.slane %v1651_v27, 1 }
  0x65   : > { %1092 = vrot.lane.b32.xlu0 %v1059_v61, %s2810_s20  ;;  %1096 = vrot.lane.b32.xlu1 %v1065_v60, %s2810_s20  ;;  %v2763_v60 = vld [vmem:[%s3672_s3 + $0x68] sm:$0xff]  }
  0x66   : > { %v1648_v38 = vrot.slane %v1646_v34, 1  ;;  %v1661_v39 = vsel %vm1017_vm5, %v1659_v35, %v1660_v28 }
  0x68   : > { %v1649_v40 = vor.u32 %v1648_v38, %v1644_v32 }
  0x69   : > { %983 = vrot.lane.b32.xlu0 %v952_v18, %s2809_s19  ;;  %1195 = vrot.lane.b32.xlu1 %v1194_v23, %s2810_s20 }
  0x6a   : > { %v1654_v16 = vsel %vm760_vm2, %v1649_v40, %v1653_v17 }
  0x6d   : > { %1188 = vrot.lane.b32.xlu0 %v1187_v37, %s2809_s19  ;;  %1662 = vrot.lane.b32.xlu1 %v1661_v39, %s2810_s20 }
  0x71   : > { %1655 = vrot.lane.b32.xlu0 %v1654_v16, %s2809_s19  ;;  %s3475_s19 = scalar_lea.vmem %s3675_s6, %s2296_s13 }
  0x98   : > { %v958_v42 = vpop.permute.xlu1 %957  ;;  %v956_v43 = vpop.permute.xlu0 %955 }
  0x99   : > { %v1102_v53 = vsel %vm1098_vm8, %v2959_v33, %v956_v43  ;;  %v1104_v61 = vsel %vm1098_vm8, %v2953_v26, %v958_v42 }
  0x9f   : > { %v1067_v47 = vpop.permute.xlu1 %1066 }
  0xa3   : > { %v954_v50 = vpop.permute.xlu0 %953  ;;  %v1071_v51 = vpop.permute.xlu1 %1070 }
  0xa4   : > { %v1100_v48 = vsel %vm1098_vm8, %v2993_v14, %v954_v50  ;;  %v3316_v14 = vsel %vm1131_vm7, %v1104_v61, %v1071_v51 }
  0xa5   : > { %v1133_v52 = vsel %vm1131_vm7, %v1100_v48, %v1067_v47 }
  0xa6   : > { %2540 = vmatprep.mubr.msk.bf16.mxu0 %vm1250_vm9, %v1133_v52 }
  0xa7   : > { %v1069_v55 = vpop.permute.xlu0 %1068  ;;  %v962_v56 = vpop.permute.xlu1 %961 }
  0xa8   : > { %v1135_v62 = vsel %vm1131_vm7, %v1102_v53, %v1069_v55  ;;  %v1108_v4 = vsel %vm1098_vm8, %v2971_v46, %v962_v56 }
  0xa9   : > { %2496 = vmatprep.mubr.msk.bf16.mxu1 %vm1250_vm9, %v1135_v62  ;;  %2541 = vmatmul.mubr.msk.bf16.vlgmr.msra.gmra.mrb[0].mxu0 %vm1250_vm9, %v1135_v62 }
  0xaa   : > { %2497 = vmatmul.mubr.msk.bf16.vlgmr.msra.gmra.mrb[0].mxu1 %vm1250_vm9, %v3316_v14  ;;  %2544 = vmatprep.mubr.msk.bf16.mxu0 %vm1250_vm9, %v3316_v14 }
  0xab   : > { %2622 = vmatpush3.bf16.msra.mxu1 %v2889_v1  ;;  %2573 = vmatpush3.bf16.msra.mxu0 %v3111_v44  ;;  %v960_v26 = vpop.permute.xlu0 %959  ;;  %v1075_v33 = vpop.permute.xlu1 %1074  ;;  %v2768_v44 = vld [vmem:[%s3672_s3 + $0x8] sm:$0xff]  }
  0xac   : > { %2574 = vmatprep.subr.bf16.mxu0 %v2763_v60  ;;  %2617 = vmatprep.subr.bf16.mxu1 %v2900_v3  ;;  %v1106_v54 = vsel %vm1098_vm8, %v3002_v25, %v960_v26  ;;  %v1141_v46 = vsel %vm1131_vm7, %v1108_v4, %v1075_v33 }
  0xaf   : > { %v1073_v7 = vpop.permute.xlu0 %1072  ;;  %2575 = vmatpush3.bf16.msra.mxu0 %v2763_v60  ;;  %v966_v1 = vpop.permute.xlu1 %965  ;;  %2623 = vmatpush3.bf16.msra.mxu1 %v2768_v44 }
  0xb0   : > { %v1139_v3 = vsel %vm1131_vm7, %v1106_v54, %v1073_v7  ;;  %2576 = vmatprep.subr.bf16.mxu0 %v2764_v2  ;;  %2618 = vmatprep.subr.bf16.mxu1 %v2921_v5  ;;  %v1112_v12 = vsel %vm1098_vm8, %v3019_v45, %v966_v1 }
  0xb1   : > { %2500 = vmatprep.mubr.msk.bf16.mxu1 %vm1250_vm9, %v1139_v3  ;;  %2545 = vmatmul.mubr.msk.bf16.gmra.mrb[4].mxu0 %vm1250_vm9, %v1139_v3 }
  0xb2   : > { %2501 = vmatmul.mubr.msk.bf16.gmra.mrb[4].mxu1 %vm1250_vm9, %v1141_v46  ;;  %2548 = vmatprep.mubr.msk.bf16.mxu0 %vm1250_vm9, %v1141_v46 }
  0xb3   : > { %v964_v25 = vpop.permute.xlu0 %963  ;;  %2577 = vmatpush3.bf16.msra.mxu0 %v2764_v2  ;;  %v1079_v9 = vpop.permute.xlu1 %1078  ;;  %2624 = vmatpush3.bf16.msra.mxu1 %v2921_v5 }
  0xb4   : > { %2578 = vmatprep.subr.bf16.mxu0 %v2765_v8  ;;  %2619 = vmatprep.subr.bf16.mxu1 %v3036_v57  ;;  %v1110_v15 = vsel %vm1098_vm8, %v3062_v13, %v964_v25  ;;  %v1145_v21 = vsel %vm1131_vm7, %v1112_v12, %v1079_v9 }
  0xb7   : > { %v1077_v18 = vpop.permute.xlu0 %1076  ;;  %2579 = vmatpush3.bf16.msra.mxu0 %v2765_v8  ;;  %v970_v19 = vpop.permute.xlu1 %969  ;;  %2625 = vmatpush3.bf16.msra.mxu1 %v3036_v57 }
  0xb8   : > { %v1143_v5 = vsel %vm1131_vm7, %v1110_v15, %v1077_v18  ;;  %2580 = vmatprep.subr.bf16.mxu0 %v2766_v63  ;;  %2620 = vmatprep.subr.bf16.mxu1 %v3050_v6  ;;  %v1116_v13 = vsel %vm1098_vm8, %v3081_v24, %v970_v19  ;;  %v3456_v18 = vstv %s2879_s28 }
  0xb9   : > { %2504 = vmatprep.mubr.msk.bf16.mxu1 %vm1250_vm9, %v1143_v5  ;;  %2549 = vmatmul.mubr.msk.bf16.gmra.mrb[8].mxu0 %vm1250_vm9, %v1143_v5  ;;  %vm2007_vm12 = vcmp.lt.s32.totalorder %v3456_v18, 20 }
  0xba   : > { %2505 = vmatmul.mubr.msk.bf16.gmra.mrb[8].mxu1 %vm1250_vm9, %v1145_v21  ;;  %2552 = vmatprep.mubr.msk.bf16.mxu0 %vm1250_vm9, %v1145_v21 }
  0xbb   : > { %v968_v45 = vpop.permute.xlu0 %967  ;;  %v1083_v57 = vpop.permute.xlu1 %1082  ;;  %2581 = vmatpush3.bf16.msra.mxu0 %v2766_v63  ;;  %2626 = vmatpush3.bf16.msra.mxu1 %v3050_v6 }
  0xbc   : > { %2582 = vmatprep.subr.bf16.mxu0 %v2767_v20  ;;  %2621 = vmatprep.subr.bf16.mxu1 %v3076_v22  ;;  %v1114_v11 = vsel %vm1098_vm8, %v3096_v36, %v968_v45  ;;  %v1149_v32 = vsel %vm1131_vm7, %v1116_v13, %v1083_v57  ;;  %v3468_v57 = vld [vmem:[%s3674_s5] ss:$0 sm:$0xff] }
  0xbf   : > { %v1081_v23 = vpop.permute.xlu0 %1080  ;;  %v974_v27 = vpop.permute.xlu1 %973  ;;  %2583 = vmatpush3.bf16.msra.mxu0 %v2767_v20  ;;  %2627 = vmatpush3.bf16.msra.mxu1 %v3076_v22  ;;  %v1992_v20 = vadd.s32 1, %v3456_v18 }
  0xc0   : > { %v1147_v28 = vsel %vm1131_vm7, %v1114_v11, %v1081_v23  ;;  %v1120_v36 = vsel %vm1098_vm8, %v3149_v29, %v974_v27 }
  0xc1   : > { %2508 = vmatprep.mubr.msk.bf16.mxu1 %vm1250_vm9, %v1147_v28  ;;  %2553 = vmatmul.mubr.msk.bf16.gmra.mrb[12].mxu0 %vm1250_vm9, %v1147_v28  ;;  %vm2008_vm10 = vcmp.lt.s32.totalorder %v1992_v20, 20 }
  0xc2   : > { %2509 = vmatmul.mubr.msk.bf16.gmra.mrb[12].mxu1 %vm1250_vm9, %v1149_v32  ;;  %2584 = vmatprep.mubr.msk.bf16.mxu0 %vm1250_vm9, %v3316_v14 }
  0xc3   : > { %v972_v6 = vpop.permute.xlu0 %971  ;;  %v1087_v24 = vpop.permute.xlu1 %1086 }
  0xc4   : > { %v1118_v22 = vsel %vm1098_vm8, %v3153_v30, %v972_v6  ;;  %v1153_v38 = vsel %vm1131_vm7, %v1120_v36, %v1087_v24 }
  0xc7   : > { %v1085_v34 = vpop.permute.xlu0 %1084  ;;  %v978_v35 = vpop.permute.xlu1 %977 }
  0xc8   : > { %v1151_v37 = vsel %vm1131_vm7, %v1118_v22, %v1085_v34  ;;  %v1124_v29 = vsel %vm1098_vm8, %v3177_v58, %v978_v35 }
  0xc9   : > { %2512 = vmatprep.mubr.msk.bf16.mxu1 %vm1250_vm9, %v1151_v37  ;;  %2585 = vmatmul.mubr.msk.bf16.vlgmr.msra.gmra.mrb[0].mxu0 %vm1250_vm9, %v1139_v3 }
  0xca   : > { %2513 = vmatmul.mubr.msk.bf16.gmra.mrb[16].mxu1 %vm1250_vm9, %v1153_v38  ;;  %2588 = vmatprep.mubr.msk.bf16.mxu0 %vm1250_vm9, %v1141_v46 }
  0xcb   : > { %v976_v17 = vpop.permute.xlu0 %975  ;;  %v1091_v39 = vpop.permute.xlu1 %1090 }
  0xcc   : > { %v1122_v30 = vsel %vm1098_vm8, %v3181_v59, %v976_v17  ;;  %v1157_v43 = vsel %vm1131_vm7, %v1124_v29, %v1091_v39  ;;  %v1994_v29 = vadd.s32 3, %v3456_v18 }
  0xce   : > { %vm2010_vm13 = vcmp.lt.s32.totalorder %v1994_v29, 20 }
  0xcf   : > { %v1089_v40 = vpop.permute.xlu0 %1088  ;;  %v982_v16 = vpop.permute.xlu1 %981 }
  0xd0   : > { %v1155_v42 = vsel %vm1131_vm7, %v1122_v30, %v1089_v40  ;;  %v1128_v58 = vsel %vm1098_vm8, %v3220_v41, %v982_v16 }
  0xd1   : > { %2516 = vmatprep.mubr.msk.bf16.mxu1 %vm1250_vm9, %v1155_v42  ;;  %2589 = vmatmul.mubr.msk.bf16.gmra.mrb[4].mxu0 %vm1250_vm9, %v1143_v5  ;;  %v3461_v5 = vld [vmem:[%s3673_s4] ss:$0 sm:$0xff] }
  0xd2   : > { %2517 = vmatmul.mubr.msk.bf16.gmra.mrb[20].mxu1 %vm1250_vm9, %v1157_v43  ;;  %2592 = vmatprep.mubr.msk.bf16.mxu0 %vm1250_vm9, %v1145_v21 }
  0xd3   : > { %v980_v47 = vpop.permute.xlu0 %979  ;;  %v1095_v50 = vpop.permute.xlu1 %1094 }
  0xd4   : > { %v1126_v59 = vsel %vm1098_vm8, %v3237_v0, %v980_v47  ;;  %v1161_v53 = vsel %vm1131_vm7, %v1128_v58, %v1095_v50 }
  0xd7   : > { %v1093_v51 = vpop.permute.xlu0 %1092  ;;  %v1097_v52 = vpop.permute.xlu1 %1096 }
  0xd8   : > { %v1159_v48 = vsel %vm1131_vm7, %v1126_v59, %v1093_v51 }
  0xd9   : > { %2520 = vmatprep.mubr.msk.bf16.mxu1 %vm1250_vm9, %v1159_v48  ;;  %2593 = vmatmul.mubr.msk.bf16.gmra.mrb[8].mxu0 %vm1250_vm9, %v1147_v28 }
  0xda   : > { %2521 = vmatmul.mubr.msk.bf16.gmra.mrb[24].mxu1 %vm1250_vm9, %v1161_v53  ;;  %2596 = vmatprep.mubr.msk.bf16.mxu0 %vm1250_vm9, %v1149_v32 }
  0xdb   : > { %v984_v55 = vpop.permute.xlu0 %983  ;;  %v1196_v56 = vpop.permute.xlu1 %1195 }
  0xdc   : > { %v1130_v41 = vsel %vm1098_vm8, %v3246_v10, %v984_v55 }
  0xdd   : > { %v1163_v0 = vsel %vm1131_vm7, %v1130_v41, %v1097_v52 }
  0xde   : > { %2524 = vmatprep.mubr.msk.bf16.mxu1 %vm1250_vm9, %v1163_v0 }
  0xdf   : > { %v1189_v61 = vpop.permute.xlu0 %1188  ;;  %v1663_v14 = vpop.permute.xlu1 %1662 }
  0xe0   : > { %v1198_v62 = vsel %vm1098_vm8, %v3269_v49, %v1189_v61 }
  0xe1   : > { %v1200_v60 = vsel %vm1131_vm7, %v1198_v62, %v1196_v56  ;;  %2597 = vmatmul.mubr.msk.bf16.gmra.mrb[12].mxu0 %vm1250_vm9, %v1151_v37 }
  0xe2   : > { %2525 = vmatmul.mubr.msk.bf16.gmra.mrb[28].mxu1 %vm1250_vm9, %v1200_v60  ;;  %2600 = vmatprep.mubr.msk.bf16.mxu0 %vm1250_vm9, %v1153_v38 }
  0xe3   : > { %2556 = vmatprep.mubr.msk.bf16.mxu1 %vm1250_vm9, %v1149_v32  ;;  %v1656_v10 = vpop.permute.xlu0 %1655 }
  0xe4   : > { %v1665_v49 = vsel %vm1098_vm8, %v3290_v31, %v1656_v10 }
  0xe5   : > { %v1667_v26 = vsel %vm1131_vm7, %v1665_v49, %v1663_v14  ;;  %v1996_v49 = vadd.s32 5, %v3456_v18 }
  0xe7   : > { %vm2012_vm15 = vcmp.lt.s32.totalorder %v1996_v49, 20 }
  0xe9   : > { %2601 = vmatmul.mubr.msk.bf16.gmra.mrb[16].mxu0 %vm1250_vm9, %v1155_v42 }
  0xea   : > { %2557 = vmatmul.mubr.msk.bf16.vlgmr.msra.gmra.mrb[16].mxu1 %vm1250_vm9, %v1151_v37  ;;  %2604 = vmatprep.mubr.msk.bf16.mxu0 %vm1250_vm9, %v1157_v43 }
  0xeb   : > { %2560 = vmatprep.mubr.msk.bf16.mxu1 %vm1250_vm9, %v1153_v38 }
  0xf1   : > { %2605 = vmatmul.mubr.msk.bf16.gmra.mrb[20].mxu0 %vm1250_vm9, %v1159_v48 }
  0xf2   : > { %2561 = vmatmul.mubr.msk.bf16.gmra.mrb[20].mxu1 %vm1250_vm9, %v1155_v42  ;;  %2608 = vmatprep.mubr.msk.bf16.mxu0 %vm1250_vm9, %v1161_v53  ;;  %v1993_v42 = vadd.s32 2, %v3456_v18 }
  0xf3   : > { %2564 = vmatprep.mubr.msk.bf16.mxu1 %vm1250_vm9, %v1157_v43 }
  0xf4   : > { %vm2009_vm14 = vcmp.lt.s32.totalorder %v1993_v42, 20 }
  0xf9   : > { %2609 = vmatmul.mubr.msk.bf16.gmra.mrb[24].mxu0 %vm1250_vm9, %v1163_v0 }
  0xfa   : > { %2565 = vmatmul.mubr.msk.bf16.gmra.mrb[24].mxu1 %vm1250_vm9, %v1159_v48  ;;  %2612 = vmatprep.mubr.msk.bf16.mxu0 %vm1250_vm9, %v1200_v60 }
  0xfb   : > { %2568 = vmatprep.mubr.msk.bf16.mxu1 %vm1250_vm9, %v1161_v53 }
 0x101   : > { %2613 = vmatmul.mubr.msk.bf16.gmra.mrb[28].mxu0 %vm1250_vm9, %v1667_v26 }
 0x102   : > { %2569 = vmatmul.mubr.msk.bf16.gmra.mrb[28].mxu1 %vm1250_vm9, %v1163_v0 }
 0x17d   : > { %v2498_v33 = vpop.f32.mrb[0].mxu1 }
 0x17e   : > { %v1317_v2 = vpop.f32.mrb[1].mxu1 }
 0x17f   : > { %v2499_v4 = vpop.f32.mrb[2].mxu1 }
 0x180   : > { %v1320_v54 = vpop.f32.mrb[3].mxu1 }
 0x185   : > { %v2502_v7 = vpop.f32.mrb[4].mxu1 }
 0x186   : > { %v1333_v1 = vpop.f32.mrb[5].mxu1 }
 0x187   : > { %v2503_v44 = vpop.f32.mrb[6].mxu1 }
 0x188   : > { %v1336_v3 = vpop.f32.mrb[7].mxu1 }
 0x18d   : > { %v3439_v8 = vpop.f32.mrb[8].mxu1 }
 0x18e   : > { %v3441_v31 = vpop.f32.mrb[9].mxu1 }
 0x18f   : > { %v3443_v46 = vpop.f32.mrb[10].mxu1 }
 0x190   : > { %v3445_v25 = vpop.f32.mrb[11].mxu1 }
 0x195   : > { %v3447_v9 = vpop.f32.mrb[12].mxu1 }
 0x196   : > { %v3449_v63 = vpop.f32.mrb[13].mxu1 }
 0x197   : > { %v3451_v12 = vpop.f32.mrb[14].mxu1 }
 0x198   : > { %v3453_v15 = vpop.f32.mrb[15].mxu1 }
 0x19c   : > { %v2586_v19 = vpop.f32.mrb[0].mxu0 }
 0x19d   : > { %v2628_v21 = vadd.f32 %v2586_v19, %v2498_v33  ;;  %v1753_v45 = vpop.f32.mrb[1].mxu0 }
 0x19e   : > { %v2629_v13 = vadd.f32 %v1753_v45, %v1317_v2  ;;  %v2587_v11 = vpop.f32.mrb[2].mxu0  ;;  %v1995_v2 = vadd.s32 4, %v3456_v18 }
 0x19f   : > { %v1921_v23 = vmul.f32 %v2628_v21, %v3461_v5  ;;  %v2630_v27 = vadd.f32 %v2587_v11, %v2499_v4  ;;  %v1756_v28 = vpop.f32.mrb[3].mxu0 }
 0x1a0   : > { %v1919_v32 = vmul.f32 %v2629_v13, %v3461_v5  ;;  %v2631_v6 = vadd.f32 %v1756_v28, %v1320_v54  ;;  %vm2011_vm0 = vcmp.lt.s32.totalorder %v1995_v2, 20 }
 0x1a1   : > { %v1960_v24 = vadd.f32 %v3468_v57, %v1921_v23  ;;  %v1922_v36 = vmul.f32 %v2630_v27, %v3461_v5  ;;  %v1998_v27 = vadd.s32 7, %v3456_v18 }
 0x1a2   : > { %v1958_v22 = vadd.f32 %v3468_v57, %v1919_v32  ;;  %v1920_v34 = vmul.f32 %v2631_v6, %v3461_v5 }
 0x1a3   : > { %v2057_v35 = vsel %vm2008_vm10, %v1960_v24, 0.0  ;;  %v1961_v37 = vadd.f32 %v3468_v57, %v1922_v36  ;;  %v1997_v24 = vadd.s32 6, %v3456_v18  ;;  %vm2014_vm1 = vcmp.lt.s32.totalorder %v1998_v27, 20 }
 0x1a4   : > { %2090 = vst.msk [vmem:[%s3475_s19 + $0x10] sm:$0xff] %vm2087_vm11, %v2057_v35  ;;  %v2055_v38 = vsel %vm2007_vm12, %v1958_v22, 0.0  ;;  %v1959_v17 = vadd.f32 %v3468_v57, %v1920_v34  ;;  %v2590_v39 = vpop.f32.mrb[4].mxu0 }
 0x1a5   : > { %2088 = vst.msk [vmem:[%s3475_s19] sm:$0xff] %vm2087_vm11, %v2055_v38  ;;  %v2058_v30 = vsel %vm2008_vm10, %v1961_v37, 0.0  ;;  %v2632_v40 = vadd.f32 %v2590_v39, %v2502_v7  ;;  %v1769_v16 = vpop.f32.mrb[5].mxu0  ;;  %vm2013_vm2 = vcmp.lt.s32.totalorder %v1997_v24, 20 }
 0x1a6   : > { %2091 = vst.msk [vmem:[%s3475_s19 + $0x18] sm:$0xff] %vm2087_vm11, %v2058_v30  ;;  %v2056_v43 = vsel %vm2007_vm12, %v1959_v17, 0.0  ;;  %v2633_v47 = vadd.f32 %v1769_v16, %v1333_v1  ;;  %v2591_v50 = vpop.f32.mrb[6].mxu0 }
 0x1a7   : > { %2089 = vst.msk [vmem:[%s3475_s19 + $0x8] sm:$0xff] %vm2087_vm11, %v2056_v43  ;;  %v1925_v58 = vmul.f32 %v2632_v40, %v3461_v5  ;;  %v2634_v59 = vadd.f32 %v2591_v50, %v2503_v44  ;;  %v1772_v51 = vpop.f32.mrb[7].mxu0  ;;  %v2000_v50 = vadd.s32 9, %v3456_v18 }
 0x1a8   : > { %v1923_v48 = vmul.f32 %v2633_v47, %v3461_v5  ;;  %v2635_v52 = vadd.f32 %v1772_v51, %v1336_v3 }
 0x1a9   : > { %v1964_v53 = vadd.f32 %v3468_v57, %v1925_v58  ;;  %v1926_v55 = vmul.f32 %v2634_v59, %v3461_v5  ;;  %vm2016_vm3 = vcmp.lt.s32.totalorder %v2000_v50, 20 }
 0x1aa   : > { %v1962_v41 = vadd.f32 %v3468_v57, %v1923_v48  ;;  %v1924_v0 = vmul.f32 %v2635_v52, %v3461_v5  ;;  %v1999_v52 = vadd.s32 8, %v3456_v18 }
 0x1ab   : > { %v2061_v56 = vsel %vm2010_vm13, %v1964_v53, 0.0  ;;  %v1965_v61 = vadd.f32 %v3468_v57, %v1926_v55 }
 0x1ac   : > { %2094 = vst.msk [vmem:[%s3475_s19 + $0x30] sm:$0xff] %vm2087_vm11, %v2061_v56  ;;  %v2059_v62 = vsel %vm2009_vm14, %v1962_v41, 0.0  ;;  %v1963_v60 = vadd.f32 %v3468_v57, %v1924_v0  ;;  %v2594_v10 = vpop.f32.mrb[8].mxu0  ;;  %vm2015_vm4 = vcmp.lt.s32.totalorder %v1999_v52, 20 }
 0x1ad   : > { %2092 = vst.msk [vmem:[%s3475_s19 + $0x20] sm:$0xff] %vm2087_vm11, %v2059_v62  ;;  %v2062_v14 = vsel %vm2010_vm13, %v1965_v61, 0.0  ;;  %v2636_v26 = vadd.f32 %v2594_v10, %v3439_v8  ;;  %v1785_v33 = vpop.f32.mrb[9].mxu0 }
 0x1ae   : > { %2095 = vst.msk [vmem:[%s3475_s19 + $0x38] sm:$0xff] %vm2087_vm11, %v2062_v14  ;;  %v2060_v4 = vsel %vm2009_vm14, %v1963_v60, 0.0  ;;  %v2637_v54 = vadd.f32 %v1785_v33, %v3441_v31  ;;  %v2595_v7 = vpop.f32.mrb[10].mxu0 }
 0x1af   : > { %2093 = vst.msk [vmem:[%s3475_s19 + $0x28] sm:$0xff] %vm2087_vm11, %v2060_v4  ;;  %v1929_v1 = vmul.f32 %v2636_v26, %v3461_v5  ;;  %v2638_v44 = vadd.f32 %v2595_v7, %v3443_v46  ;;  %v1788_v3 = vpop.f32.mrb[11].mxu0 }
 0x1b0   : > { %v1927_v8 = vmul.f32 %v2637_v54, %v3461_v5  ;;  %v2639_v19 = vadd.f32 %v1788_v3, %v3445_v25  ;;  %v2002_v3 = vadd.s32 11, %v3456_v18 }
 0x1b1   : > { %v1968_v20 = vadd.f32 %v3468_v57, %v1929_v1  ;;  %v1930_v31 = vmul.f32 %v2638_v44, %v3461_v5 }
 0x1b2   : > { %v1966_v21 = vadd.f32 %v3468_v57, %v1927_v8  ;;  %v1928_v45 = vmul.f32 %v2639_v19, %v3461_v5  ;;  %vm2018_vm5 = vcmp.lt.s32.totalorder %v2002_v3, 20 }
 0x1b3   : > { %v2065_v13 = vsel %vm2012_vm15, %v1968_v20, 0.0  ;;  %v1969_v46 = vadd.f32 %v3468_v57, %v1930_v31 }
 0x1b4   : > { %2098 = vst.msk [vmem:[%s3475_s19 + $0x50] sm:$0xff] %vm2087_vm11, %v2065_v13  ;;  %v2063_v11 = vsel %vm2011_vm0, %v1966_v21, 0.0  ;;  %v1967_v25 = vadd.f32 %v3468_v57, %v1928_v45  ;;  %v2598_v23 = vpop.f32.mrb[12].mxu0  ;;  %v2001_v21 = vadd.s32 10, %v3456_v18 }
 0x1b5   : > { %2096 = vst.msk [vmem:[%s3475_s19 + $0x40] sm:$0xff] %vm2087_vm11, %v2063_v11  ;;  %v2066_v28 = vsel %vm2012_vm15, %v1969_v46, 0.0  ;;  %v2640_v32 = vadd.f32 %v2598_v23, %v3447_v9  ;;  %v1801_v6 = vpop.f32.mrb[13].mxu0 }
 0x1b6   : > { %2099 = vst.msk [vmem:[%s3475_s19 + $0x58] sm:$0xff] %vm2087_vm11, %v2066_v28  ;;  %v2064_v36 = vsel %vm2011_vm0, %v1967_v25, 0.0  ;;  %v2641_v22 = vadd.f32 %v1801_v6, %v3449_v63  ;;  %v2599_v34 = vpop.f32.mrb[14].mxu0  ;;  %vm2017_vm6 = vcmp.lt.s32.totalorder %v2001_v21, 20 }
 0x1b7   : > { %2097 = vst.msk [vmem:[%s3475_s19 + $0x48] sm:$0xff] %vm2087_vm11, %v2064_v36  ;;  %v1933_v35 = vmul.f32 %v2640_v32, %v3461_v5  ;;  %v2642_v37 = vadd.f32 %v2599_v34, %v3451_v12  ;;  %v1804_v38 = vpop.f32.mrb[15].mxu0 }
 0x1b8   : > { %v1931_v9 = vmul.f32 %v2641_v22, %v3461_v5  ;;  %v2643_v17 = vadd.f32 %v1804_v38, %v3453_v15 }
 0x1b9   : > { %v1972_v39 = vadd.f32 %v3468_v57, %v1933_v35  ;;  %v1934_v63 = vmul.f32 %v2642_v37, %v3461_v5 }
 0x1ba   : > { %v1970_v29 = vadd.f32 %v3468_v57, %v1931_v9  ;;  %v1932_v30 = vmul.f32 %v2643_v17, %v3461_v5 }
 0x1bb   : > { %v2069_v40 = vsel %vm2014_vm1, %v1972_v39, 0.0  ;;  %v1973_v12 = vadd.f32 %v3468_v57, %v1934_v63  ;;  %v2004_v63 = vadd.s32 13, %v3456_v18 }
 0x1bc   : > { %2102 = vst.msk [vmem:[%s3475_s19 + $0x70] sm:$0xff] %vm2087_vm11, %v2069_v40  ;;  %v2067_v16 = vsel %vm2013_vm2, %v1970_v29, 0.0  ;;  %v1971_v15 = vadd.f32 %v3468_v57, %v1932_v30  ;;  %v2602_v42 = vpop.f32.mrb[16].mxu0 }
 0x1bd   : > { %2100 = vst.msk [vmem:[%s3475_s19 + $0x60] sm:$0xff] %vm2087_vm11, %v2067_v16  ;;  %v2070_v43 = vsel %vm2014_vm1, %v1973_v12, 0.0  ;;  %v2558_v47 = vpop.f32.mrb[16].mxu1  ;;  %v1817_v58 = vpop.f32.mrb[17].mxu0  ;;  %v2003_v16 = vadd.s32 12, %v3456_v18  ;;  %vm2020_vm7 = vcmp.lt.s32.totalorder %v2004_v63, 20 }
 0x1be   : > { %2103 = vst.msk [vmem:[%s3475_s19 + $0x78] sm:$0xff] %vm2087_vm11, %v2070_v43  ;;  %v2068_v59 = vsel %vm2013_vm2, %v1971_v15, 0.0  ;;  %v2644_v51 = vadd.f32 %v2602_v42, %v2558_v47  ;;  %v1580_v48 = vpop.f32.mrb[17].mxu1  ;;  %v2603_v53 = vpop.f32.mrb[18].mxu0 }
 0x1bf   : > { %2101 = vst.msk [vmem:[%s3475_s19 + $0x68] sm:$0xff] %vm2087_vm11, %v2068_v59  ;;  %v2645_v55 = vadd.f32 %v1817_v58, %v1580_v48  ;;  %v2559_v41 = vpop.f32.mrb[18].mxu1  ;;  %v1820_v0 = vpop.f32.mrb[19].mxu0  ;;  %vm2019_vm8 = vcmp.lt.s32.totalorder %v2003_v16, 20 }
 0x1c0   : > { %v1937_v56 = vmul.f32 %v2644_v51, %v3461_v5  ;;  %v2646_v61 = vadd.f32 %v2603_v53, %v2559_v41  ;;  %v1583_v62 = vpop.f32.mrb[19].mxu1 }
 0x1c1   : > { %v1935_v60 = vmul.f32 %v2645_v55, %v3461_v5  ;;  %v2647_v10 = vadd.f32 %v1820_v0, %v1583_v62 }
 0x1c2   : > { %v1976_v49 = vadd.f32 %v3468_v57, %v1937_v56  ;;  %v1938_v14 = vmul.f32 %v2646_v61, %v3461_v5 }
 0x1c3   : > { %v1974_v26 = vadd.f32 %v3468_v57, %v1935_v60  ;;  %v1936_v33 = vmul.f32 %v2647_v10, %v3461_v5 }
 0x1c4   : > { %v2073_v2 = vsel %vm2016_vm3, %v1976_v49, 0.0  ;;  %v1977_v4 = vadd.f32 %v3468_v57, %v1938_v14  ;;  %v2606_v54 = vpop.f32.mrb[20].mxu0  ;;  %v2006_v14 = vadd.s32 15, %v3456_v18 }
 0x1c5   : > { %2106 = vst.msk [vmem:[%s3475_s19 + $0x90] sm:$0xff] %vm2087_vm11, %v2073_v2  ;;  %v2071_v7 = vsel %vm2015_vm4, %v1974_v26, 0.0  ;;  %v1975_v1 = vadd.f32 %v3468_v57, %v1936_v33  ;;  %v2562_v44 = vpop.f32.mrb[20].mxu1  ;;  %v1833_v8 = vpop.f32.mrb[21].mxu0 }
 0x1c6   : > { %2104 = vst.msk [vmem:[%s3475_s19 + $0x80] sm:$0xff] %vm2087_vm11, %v2071_v7  ;;  %v2074_v19 = vsel %vm2016_vm3, %v1977_v4, 0.0  ;;  %v2648_v20 = vadd.f32 %v2606_v54, %v2562_v44  ;;  %v1596_v31 = vpop.f32.mrb[21].mxu1  ;;  %v2607_v45 = vpop.f32.mrb[22].mxu0  ;;  %v2005_v54 = vadd.s32 14, %v3456_v18  ;;  %vm2022_vm9 = vcmp.lt.s32.totalorder %v2006_v14, 20 }
 0x1c7   : > { %2107 = vst.msk [vmem:[%s3475_s19 + $0x98] sm:$0xff] %vm2087_vm11, %v2074_v19  ;;  %v2072_v13 = vsel %vm2015_vm4, %v1975_v1, 0.0  ;;  %v2649_v46 = vadd.f32 %v1833_v8, %v1596_v31  ;;  %v2563_v11 = vpop.f32.mrb[22].mxu1  ;;  %v1836_v25 = vpop.f32.mrb[23].mxu0 }
 0x1c8   : > { %2105 = vst.msk [vmem:[%s3475_s19 + $0x88] sm:$0xff] %vm2087_vm11, %v2072_v13  ;;  %v1941_v23 = vmul.f32 %v2648_v20, %v3461_v5  ;;  %v2650_v27 = vadd.f32 %v2607_v45, %v2563_v11  ;;  %v1599_v28 = vpop.f32.mrb[23].mxu1  ;;  %vm2021_vm10 = vcmp.lt.s32.totalorder %v2005_v54, 20 }
 0x1c9   : > { %v1939_v32 = vmul.f32 %v2649_v46, %v3461_v5  ;;  %v2651_v6 = vadd.f32 %v1836_v25, %v1599_v28 }
 0x1ca   : > { %v1980_v24 = vadd.f32 %v3468_v57, %v1941_v23  ;;  %v1942_v36 = vmul.f32 %v2650_v27, %v3461_v5 }
 0x1cb   : > { %v1978_v22 = vadd.f32 %v3468_v57, %v1939_v32  ;;  %v1940_v34 = vmul.f32 %v2651_v6, %v3461_v5 }
 0x1cc   : > { %v2077_v35 = vsel %vm2018_vm5, %v1980_v24, 0.0  ;;  %v1981_v37 = vadd.f32 %v3468_v57, %v1942_v36  ;;  %v2610_v38 = vpop.f32.mrb[24].mxu0 }
 0x1cd   : > { %2110 = vst.msk [vmem:[%s3475_s19 + $0xb0] sm:$0xff] %vm2087_vm11, %v2077_v35  ;;  %v2075_v9 = vsel %vm2017_vm6, %v1978_v22, 0.0  ;;  %v1979_v17 = vadd.f32 %v3468_v57, %v1940_v34  ;;  %v2566_v39 = vpop.f32.mrb[24].mxu1  ;;  %v1849_v29 = vpop.f32.mrb[25].mxu0 }
 0x1ce   : > { %2108 = vst.msk [vmem:[%s3475_s19 + $0xa0] sm:$0xff] %vm2087_vm11, %v2075_v9  ;;  %v2078_v30 = vsel %vm2018_vm5, %v1981_v37, 0.0  ;;  %v2652_v40 = vadd.f32 %v2610_v38, %v2566_v39  ;;  %v1612_v12 = vpop.f32.mrb[25].mxu1  ;;  %v2611_v15 = vpop.f32.mrb[26].mxu0 }
 0x1cf   : > { %2111 = vst.msk [vmem:[%s3475_s19 + $0xb8] sm:$0xff] %vm2087_vm11, %v2078_v30  ;;  %v2076_v42 = vsel %vm2017_vm6, %v1979_v17, 0.0  ;;  %v2653_v43 = vadd.f32 %v1849_v29, %v1612_v12  ;;  %v2567_v47 = vpop.f32.mrb[26].mxu1  ;;  %v1852_v50 = vpop.f32.mrb[27].mxu0 }
 0x1d0   : > { %2109 = vst.msk [vmem:[%s3475_s19 + $0xa8] sm:$0xff] %vm2087_vm11, %v2076_v42  ;;  %v1945_v58 = vmul.f32 %v2652_v40, %v3461_v5  ;;  %v2654_v59 = vadd.f32 %v2611_v15, %v2567_v47  ;;  %v1615_v51 = vpop.f32.mrb[27].mxu1 }
 0x1d1   : > { %v1943_v48 = vmul.f32 %v2653_v43, %v3461_v5  ;;  %v2655_v52 = vadd.f32 %v1852_v50, %v1615_v51 }
 0x1d2   : > { %v1984_v53 = vadd.f32 %v3468_v57, %v1945_v58  ;;  %v1946_v55 = vmul.f32 %v2654_v59, %v3461_v5 }
 0x1d3   : > { %v1982_v41 = vadd.f32 %v3468_v57, %v1943_v48  ;;  %v1944_v0 = vmul.f32 %v2655_v52, %v3461_v5 }
 0x1d4   : > { %v2081_v56 = vsel %vm2020_vm7, %v1984_v53, 0.0  ;;  %v1985_v61 = vadd.f32 %v3468_v57, %v1946_v55  ;;  %v2614_v62 = vpop.f32.mrb[28].mxu0 }
 0x1d5   : > { %2114 = vst.msk [vmem:[%s3475_s19 + $0xd0] sm:$0xff] %vm2087_vm11, %v2081_v56  ;;  %v2079_v60 = vsel %vm2019_vm8, %v1982_v41, 0.0  ;;  %v1983_v10 = vadd.f32 %v3468_v57, %v1944_v0  ;;  %v2570_v49 = vpop.f32.mrb[28].mxu1  ;;  %v1865_v26 = vpop.f32.mrb[29].mxu0 }
 0x1d6   : > { %2112 = vst.msk [vmem:[%s3475_s19 + $0xc0] sm:$0xff] %vm2087_vm11, %v2079_v60  ;;  %v2082_v33 = vsel %vm2020_vm7, %v1985_v61, 0.0  ;;  %v2656_v2 = vadd.f32 %v2614_v62, %v2570_v49  ;;  %v1628_v4 = vpop.f32.mrb[29].mxu1  ;;  %v2615_v7 = vpop.f32.mrb[30].mxu0 }
 0x1d7   : > { %2115 = vst.msk [vmem:[%s3475_s19 + $0xd8] sm:$0xff] %vm2087_vm11, %v2082_v33  ;;  %v2080_v1 = vsel %vm2019_vm8, %v1983_v10, 0.0  ;;  %v2657_v44 = vadd.f32 %v1865_v26, %v1628_v4  ;;  %v2571_v3 = vpop.f32.mrb[30].mxu1  ;;  %v1868_v8 = vpop.f32.mrb[31].mxu0 }
 0x1d8   : > { %2113 = vst.msk [vmem:[%s3475_s19 + $0xc8] sm:$0xff] %vm2087_vm11, %v2080_v1  ;;  %v1949_v19 = vmul.f32 %v2656_v2, %v3461_v5  ;;  %v2658_v20 = vadd.f32 %v2615_v7, %v2571_v3  ;;  %v1631_v31 = vpop.f32.mrb[31].mxu1 }
 0x1d9   : > { %v1947_v18 = vmul.f32 %v2657_v44, %v3461_v5  ;;  %v2659_v21 = vadd.f32 %v1868_v8, %v1631_v31 }
 0x1da   : > { %v1988_v45 = vadd.f32 %v3468_v57, %v1949_v19  ;;  %v1950_v13 = vmul.f32 %v2658_v20, %v3461_v5 }
 0x1db   : > { %v1986_v46 = vadd.f32 %v3468_v57, %v1947_v18  ;;  %v1948_v11 = vmul.f32 %v2659_v21, %v3461_v5 }
 0x1dc   : > { %v2085_v25 = vsel %vm2022_vm9, %v1988_v45, 0.0  ;;  %v1989_v23 = vadd.f32 %v3468_v57, %v1950_v13 }
 0x1dd   : > { %2118 = vst.msk [vmem:[%s3475_s19 + $0xf0] sm:$0xff] %vm2087_vm11, %v2085_v25  ;;  %v2083_v27 = vsel %vm2021_vm10, %v1986_v46, 0.0  ;;  %v1987_v28 = vadd.f32 %v3468_v57, %v1948_v11 }
 0x1de   : > { %2116 = vst.msk [vmem:[%s3475_s19 + $0xe0] sm:$0xff] %vm2087_vm11, %v2083_v27  ;;  %v2086_v32 = vsel %vm2022_vm9, %v1989_v23, 0.0 }
 0x1df   : > { %2119 = vst.msk [vmem:[%s3475_s19 + $0xf8] sm:$0xff] %vm2087_vm11, %v2086_v32  ;;  %v2084_v6 = vsel %vm2021_vm10, %v1987_v28, 0.0 }
 0x1e0   : > { %2117 = vst.msk [vmem:[%s3475_s19 + $0xe8] sm:$0xff] %vm2087_vm11, %v2084_v6 }
 0x1e1 PF: > { %s16_s25 = sadd.s32 1, %s2807_s25   ;;  %s3681_s21 = smov %s2799_s23 }
 0x1e2   : > { %p13_p12 = scmp.ge.s32.totalorder %s16_s25, 6   ;;  %s3682_s22 = smov %s2803_s24 }
 0x1e3   : > { %s3683_s23 = smov %s3686_s26  ;;  %s3684_s24 = smov %s3690_s27 }
 0x1e4   :  { %15 = sbr.rel (!%p13_p12) target bundleno = 3 (0x3), region = 82 }

// kernel: _lambda_.5
= control target key start
LH: loop header
LB: loop body
LE: loop exit
PB: predicated region body
PF: predicated region fallthrough
CT: control target
= control target key end

     0   :  { %s5338_s30 = smov 0   ;;  %s5340_s10 = smov 0   ;;  %s7156_s0 = inlined_call_operand.vmem [shape: bf16[2,32,16,32], index: 0, kind: input, shape index: {}, may-alias: {0,1,2}]   ;;  %s7157_s1 = inlined_call_operand.vmem [shape: bf16[2,32,16,32], index: 1, kind: input, shape index: {}, may-alias: {0,1,2}]   ;;  %s7158_s2 = inlined_call_operand.vmem [shape: bf16[2,32,16,32], index: 2, kind: input, shape index: {}, may-alias: {0,1,2}]   ;;  %s7159_s3 = inlined_call_operand.vmem [shape: bf16[3,96,32], index: 3, kind: input, shape index: {}]   ;;  %s7160_s4 = inlined_call_operand.vmem [shape: f32[1,32], index: 4, kind: input, shape index: {}, may-alias: {4,7}]   ;;  %s7161_s5 = inlined_call_operand.vmem [shape: f32[1,32], index: 5, kind: input, shape index: {}, may-alias: {5,8}]   ;;  %s7162_s6 = inlined_call_operand.vmem [shape: bf16[3,96,32], index: 6, kind: input, shape index: {}]   ;;  %s7163_s7 = inlined_call_operand.vmem [shape: f32[1,32], index: 7, kind: input, shape index: {}, may-alias: {4,7}]   ;;  %s7164_s8 = inlined_call_operand.vmem [shape: f32[1,32], index: 8, kind: input, shape index: {}, may-alias: {5,8}]   ;;  %s7165_s9 = inlined_call_operand.vmem [shape: bf16[2,32,16,32], index: 9, kind: output, shape index: {}]  }
   0x1   :  { %s5342_s11 = smov 0   ;;  %s5344_s12 = smov 0  }
   0x2   :  { %s5346_s13 = smov 0  }
   0x3 LB: > { %s28_s14 = sadd.s32 1, %s5276_s11  ;;  %s31_s15 = sadd.s32 1, %s5280_s12  ;;  %s5284_s13 = sphi %s5346_s13, %s19_s13   ;;  %s5280_s12 = sphi %s5344_s12, %s7213_s12   ;;  %s5276_s11 = sphi %s5342_s11, %s7212_s11   ;;  %s5272_s10 = sphi %s5340_s10, %s7211_s10   ;;  %s5268_s30 = sphi %s5338_s30, %s7210_s30  }
   0x4   : > { %p29_p0 = scmp.ge.s32.totalorder %s28_s14, 2  ;;  %p4298_p1 = scmp.ge.s32.totalorder %s5284_s13, 1 }
   0x5   : > { %p377_p2 = scmp.lt.s32.totalorder %s5284_s13, 5 }
   0x6   : > { %s7215_s14 = smov (%p29_p0, %s28_s14), 0  ;;  %s7217_s15 = smov (!%p29_p0, %s31_s15), %s5280_s12 }
   0x7   : > { %p378_p3 = pnand %p4298_p1, %p377_p2  ;;  %p33_p4 = scmp.ge.s32.totalorder %s7217_s15, 2 }
   0x8   : > { %s7166_s16 = sshll.u32 (!%p378_p3), %s5268_s30, 3  ;;  %p456_p5 = scmp.lt.s32.totalorder (!%p378_p3), %s5272_s10, 1  ;;  %v5210_v0 = vld [vmem:[%s7159_s3 + $0x30] sm:$0xff] (!%p378_p3)   ;;  %v5211_v1 = vld [vmem:[%s7159_s3 + $0x38] sm:$0xff] (!%p378_p3)   ;;  %v5212_v2 = vld [vmem:[%s7159_s3 + $0x40] sm:$0xff] (!%p378_p3)   ;;  %vm848_vm1 = vcmask (!%p378_p3), 1040384  }
   0x9   : > { %s7219_s15 = smov (%p33_p4, %s7217_s15), 0  ;;  %381 = sbr.rel (%p378_p3) target bundleno = 1122 (0x462), region = 56 }
   0xa   : > { %s4300_s17 = sadd.s32 (!%p378_p3), 4294967295, %s7166_s16  ;;  %s5374_s18 = sshll.u32 (!%p378_p3), %s5268_s30, 4  ;;  %4740 = vmatprep.subr.bf16.mxu0 (!%p378_p3), %v5210_v0  ;;  %vm849_vm0 = vsmask.f32 (!%p378_p3), 256  ;;  %v5213_v3 = vld [vmem:[%s7159_s3 + $0x48] sm:$0xff] (!%p378_p3)   ;;  %v5214_v4 = vld [vmem:[%s7159_s3 + $0x50] sm:$0xff] (!%p378_p3)  }
   0xb   : > { %p453_p6 = scmp.gt.s32.totalorder (!%p378_p3), %s4300_s17, 0  ;;  %p473_p7 = scmp.lt.s32.totalorder (!%p378_p3), %s5374_s18, 31  ;;  %4741 = vmatpush3.bf16.msra.mxu0 (!%p378_p3), %v5210_v0  ;;  %vm5430_vm3 = vmand (!%p378_p3), %vm848_vm1, %vm849_vm0  ;;  %vm1180_vm4 = vcmask (!%p378_p3), 1046528   ;;  %vm891_vm5 = vsmask.f32 (!%p378_p3), 7424  ;;  %vm1271_vm7 = vcmask (!%p378_p3), 261120  }
   0xc   : > { %4742 = vmatprep.subr.bf16.mxu0 (!%p378_p3), %v5211_v1  ;;  %p520_p9 = scmp.eq.s32.totalorder (!%p378_p3), %s5268_s30, 0  ;;  %s5287_s25 = smov (!%p378_p3), 32   ;;  %vm1308_vm8 = vcmask (!%p378_p3), 523264   ;;  %vm1431_vm9 = vcmask (!%p378_p3), 785408  }
   0xd   : > { %p528_p12 = scmp.eq.s32.totalorder (!%p378_p3), %s5268_s30, 1 }
   0xf   : > { %4743 = vmatpush3.bf16.msra.mxu0 (!%p378_p3), %v5211_v1 }
  0x10   : > { %s7221_s10 = smov (!%p456_p5, %s5272_s10), 1  ;;  %s7223_s17 = smov (!%p453_p6, %s4300_s17), 0  ;;  %4744 = vmatprep.subr.bf16.mxu0 %v5212_v2 }
  0x11   : > { %s4301_s23 = sshll.u32 %s7223_s17, 1  ;;  %s5386_s26 = sshll.u32 %s7221_s10, 6 }
  0x12   : > { %p458_p8 = scmp.lt.s32.totalorder %s4301_s23, 31 }
  0x13   : > { %s474_s27 = scalar_select %p473_p7, %s5374_s18, 31  ;;  %4745 = vmatpush3.bf16.msra.mxu0 %v5212_v2 }
  0x14   : > { %s7225_s23 = smov (!%p458_p8, %s4301_s23), 31  ;;  %4746 = vmatprep.subr.bf16.mxu0 %v5213_v3 }
  0x15   : > { %s4306_s19 = sshll.u32 %s474_s27, 1  ;;  %s4302_s17 = sshll.u32 %s7225_s23, 1 }
  0x16   : > { %s5394_s20 = sadd.s32 %s4306_s19, %s5386_s26  ;;  %s462_s10 = sadd.s32 %s5386_s26, %s4302_s17 }
  0x17   : > { %s4308_s21 = sshll.u32 %s5394_s20, 2  ;;  %s4304_s22 = sshll.u32 %s462_s10, 2  ;;  %4747 = vmatpush3.bf16.msra.mxu0 %v5213_v3 }
  0x18   : > { %s5403_s16 = scalar_lea.vmem %s7157_s1, %s4308_s21  ;;  %s5411_s19 = scalar_lea.vmem %s7156_s0, %s4304_s22  ;;  %4748 = vmatprep.subr.bf16.mxu0 %v5214_v4 }
  0x19   : > { %v5194_v5 = vld [vmem:[%s5403_s16] sm:$0xff]   ;;  %v514_v6 = vld [vmem:[%s5411_s19 + $0x8] sm:$0xf]  ;;  %v515_v7 = vld [vmem:[%s5411_s19 + $0xc] sm:$0xf]  ;;  %s5286_s10 = smov 64  }
  0x1a   : > { %s521_s17 = scalar_select %p520_p9, 1, 0  ;;  %v683_v8 = vshrl.u32 %v5194_v5, 16  ;;  %v686_v9 = vshll.u32 %v5194_v5, 16  ;;  %v5195_v11 = vld [vmem:[%s5403_s16 + $0x10] sm:$0xff]   ;;  %v5196_v14 = vld [vmem:[%s5403_s16 + $0x8] sm:$0xff]  }
  0x1b   : > { %v697_v18 = vshrl.u32 %v5195_v11, 16  ;;  %v700_v19 = vshll.u32 %v5195_v11, 16  ;;  %v690_v23 = vshrl.u32 %v5196_v14, 16  ;;  %v693_v26 = vshll.u32 %v5196_v14, 16  ;;  %4749 = vmatpush3.bf16.msra.mxu0 %v5214_v4  ;;  %v5197_v50 = vld [vmem:[%s5403_s16 + $0x20] sm:$0xff]   ;;  %v5198_v55 = vld [vmem:[%s5403_s16 + $0x18] sm:$0xff]  }
  0x1c   : > { %v522_v10 = vstv %s521_s17  ;;  %v685_v13 = vrot.slane %v683_v8, 7  ;;  %v5199_v8 = vld [vmem:[%s5403_s16 + $0x30] sm:$0xff]   ;;  %s7171_s22 = sshll.u32 %s5268_s30, 3 }
  0x1d   : > { %vm5419_vm2 = vcmp.eq.s32.totalorder %v522_v10, 1  ;;  %v699_v25 = vrot.slane %v697_v18, 7  ;;  %v692_v30 = vrot.slane %v690_v23, 7  ;;  %s5481_s24 = sadd.s32 8, %s7171_s22 }
  0x1e   : > { %v526_v15 = vsel %vm5419_vm2, 0, %v514_v6  ;;  %v527_v16 = vsel %vm5419_vm2, 0, %v515_v7  ;;  %v688_v21 = vor.u32 %v686_v9, %v685_v13  ;;  %v873_v22 = vsel %vm5430_vm3, %v685_v13, 0  ;;  %p483_p10 = scmp.lt.s32.totalorder %s5481_s24, 15 }
  0x1f   : > { %v4319_v20 = vcombine.low %v526_v15, %v527_v16  ;;  %v924_v24 = vshll.u32 %v873_v22, 16  ;;  %v1188_v31 = vrot.slane %v873_v22, 1  ;;  %v702_v35 = vor.u32 %v700_v19, %v699_v25  ;;  %v5200_v22 = vld [vmem:[%s5403_s16 + $0x28] sm:$0xff]  }
  0x20   : > { %v5438_v29 = vsel %vm5430_vm3, 0, %v688_v21  ;;  %v875_v36 = vsel %vm5430_vm3, %v699_v25, 0  ;;  %v695_v37 = vor.u32 %v693_v26, %v692_v30  ;;  %v874_v45 = vsel %vm5430_vm3, %v692_v30, 0  ;;  %s7227_s24 = smov (!%p483_p10, %s5481_s24), 15 }
  0x21   : > { %v676_v27 = vshrl.u32 %v4319_v20, 16  ;;  %v679_v28 = vshll.u32 %v4319_v20, 16  ;;  %v917_v32 = vshrl.u32 %v5438_v29, 16  ;;  %v919_v33 = vshll.u32 %v5438_v29, 16  ;;  %s4310_s23 = sshll.u32 %s7227_s24, 1 }
  0x22   : > { %v1187_v38 = vrot.slane %v5438_v29, 1  ;;  %v926_v40 = vrot.slane %v924_v24, 1  ;;  %v948_v41 = vshll.u32 %v875_v36, 16  ;;  %v5449_v44 = vsel %vm5430_vm3, 0, %v702_v35  ;;  %p488_p11 = scmp.lt.s32.totalorder %s4310_s23, 31 }
  0x23   : > { %v678_v34 = vrot.slane %v676_v27, 7  ;;  %v921_v39 = vrot.slane %v919_v33, 1  ;;  %v5455_v49 = vsel %vm5430_vm3, 0, %v695_v37  ;;  %v941_v52 = vshrl.u32 %v5449_v44, 16 }
  0x24   : > { %v943_v53 = vshll.u32 %v5449_v44, 16  ;;  %v950_v54 = vrot.slane %v948_v41, 1  ;;  %v929_v59 = vshrl.u32 %v5455_v49, 16  ;;  %v931_v62 = vshll.u32 %v5455_v49, 16  ;;  %s7229_s23 = smov (!%p488_p11, %s4310_s23), 31 }
  0x25   : > { %v681_v42 = vor.u32 %v679_v28, %v678_v34  ;;  %v872_v43 = vsel %vm5430_vm3, %v678_v34, 0  ;;  %v922_v48 = vor.u32 %v921_v39, %v917_v32  ;;  %v936_v63 = vshll.u32 %v874_v45, 16  ;;  %s4311_s22 = sshll.u32 %s7229_s23, 1 }
  0x26   : > { %v1185_v46 = vrot.slane %v872_v43, 1  ;;  %v912_v47 = vshll.u32 %v872_v43, 16  ;;  %v945_v61 = vrot.slane %v943_v53, 1  ;;  %v1193_v2 = vrot.slane %v5449_v44, 1  ;;  %s5557_s24 = sadd.s32 %s4311_s22, %s5386_s26 }
  0x27   : > { %v5460_v51 = vsel %vm5430_vm3, 0, %v681_v42  ;;  %v1194_v3 = vrot.slane %v875_v36, 1  ;;  %v933_v5 = vrot.slane %v931_v62, 1  ;;  %v938_v6 = vrot.slane %v936_v63, 1  ;;  %s5626_s26 = scalar_select %p528_p12, 1, 0 }
  0x28   : > { %v1184_v56 = vrot.slane %v5460_v51, 1  ;;  %v905_v57 = vshrl.u32 %v5460_v51, 16  ;;  %v907_v58 = vshll.u32 %v5460_v51, 16  ;;  %v914_v60 = vrot.slane %v912_v47, 1  ;;  %s4313_s30 = sshll.u32 %s5557_s24, 2 }
  0x29   : > { %v946_v4 = vor.u32 %v945_v61, %v941_v52  ;;  %v1190_v7 = vrot.slane %v5455_v49, 1  ;;  %v1189_v10 = vsel %vm1180_vm4, %v1187_v38, %v1188_v31  ;;  %v1191_v11 = vrot.slane %v874_v45, 1  ;;  %s5664_s23 = scalar_lea.vmem %s7158_s2, %s4313_s30 }
  0x2a   : > { %v1186_v0 = vsel %vm1180_vm4, %v1184_v56, %v1185_v46  ;;  %v909_v1 = vrot.slane %v907_v58, 1  ;;  %v711_v13 = vshrl.u32 %v5197_v50, 16  ;;  %v934_v14 = vor.u32 %v933_v5, %v929_v59 }
  0x2b   : > { %1237 = vrot.lane.b32.xlu1 %v1186_v0, %s5286_s10  ;;  %v714_v15 = vshll.u32 %v5197_v50, 16  ;;  %v704_v16 = vshrl.u32 %v5198_v55, 16  ;;  %v927_v19 = vsel %vm891_vm5, %v922_v48, %v926_v40  ;;  %v707_v21 = vshll.u32 %v5198_v55, 16  ;;  %v5215_v50 = vld [vmem:[%s7159_s3 + $0x58] sm:$0xff]   ;;  %v5201_v0 = vld [vmem:[%s5403_s16 + $0x40] sm:$0xff]  }
  0x2c   : > { %v910_v9 = vor.u32 %v909_v1, %v905_v57  ;;  %v713_v20 = vrot.slane %v711_v13, 7  ;;  %v951_v23 = vsel %vm891_vm5, %v946_v4, %v950_v54  ;;  %v1195_v24 = vsel %vm1180_vm4, %v1193_v2, %v1194_v3  ;;  %4750 = vmatprep.subr.bf16.mxu0 %v5215_v50  ;;  %v5531_v1 = vld [vmem:[%s7159_s3] sm:$0xff]  }
  0x2d   : > { %v706_v25 = vrot.slane %v704_v16, 7  ;;  %v725_v26 = vshrl.u32 %v5199_v8, 16  ;;  %v939_v27 = vsel %vm891_vm5, %v934_v14, %v938_v6  ;;  %v1192_v28 = vsel %vm1180_vm4, %v1190_v7, %v1191_v11  ;;  %v5202_v6 = vld [vmem:[%s5403_s16 + $0x38] sm:$0xff]   ;;  %4751 = vmatpush3.bf16.msra.mxu0 %v5215_v50  ;;  %v5203_v11 = vld [vmem:[%s5403_s16 + $0x50] sm:$0xff]  }
  0x2e   : > { %v915_v18 = vsel %vm891_vm5, %v910_v9, %v914_v60  ;;  %v716_v30 = vor.u32 %v714_v15, %v713_v20  ;;  %v877_v31 = vsel %vm5430_vm3, %v713_v20, 0  ;;  %v728_v35 = vshll.u32 %v5199_v8, 16  ;;  %4788 = vmatprep.subr.bf16.mxu0 %v5531_v1 }
  0x2f   : > { %1110 = vrot.lane.b32.xlu0 %v915_v18, %s5287_s25  ;;  %1239 = vrot.lane.b32.xlu1 %v1189_v10, %s5286_s10  ;;  %v972_v32 = vshll.u32 %v877_v31, 16  ;;  %v709_v33 = vor.u32 %v707_v21, %v706_v25  ;;  %v876_v34 = vsel %vm5430_vm3, %v706_v25, 0  ;;  %v727_v37 = vrot.slane %v725_v26, 7 }
  0x30   : > { %v5496_v36 = vsel %vm5430_vm3, 0, %v716_v30  ;;  %v718_v38 = vshrl.u32 %v5200_v22, 16  ;;  %v721_v39 = vshll.u32 %v5200_v22, 16  ;;  %v960_v43 = vshll.u32 %v876_v34, 16 }
  0x31   : > { %v965_v40 = vshrl.u32 %v5496_v36, 16  ;;  %v967_v41 = vshll.u32 %v5496_v36, 16  ;;  %v5504_v42 = vsel %vm5430_vm3, 0, %v709_v33  ;;  %v1199_v47 = vrot.slane %v5496_v36, 1 }
  0x32   : > { %v953_v45 = vshrl.u32 %v5504_v42, 16  ;;  %v955_v46 = vshll.u32 %v5504_v42, 16  ;;  %v1200_v48 = vrot.slane %v877_v31, 1  ;;  %v974_v53 = vrot.slane %v972_v32, 1 }
  0x33   : > { %1112 = vrot.lane.b32.xlu0 %v927_v19, %s5287_s25  ;;  %1116 = vrot.lane.b32.xlu1 %v951_v23, %s5287_s25  ;;  %v969_v52 = vrot.slane %v967_v41, 1  ;;  %v730_v54 = vor.u32 %v728_v35, %v727_v37  ;;  %v879_v55 = vsel %vm5430_vm3, %v727_v37, 0  ;;  %v1197_v57 = vrot.slane %v876_v34, 1  ;;  %v5204_v35 = vld [vmem:[%s5403_s16 + $0x48] sm:$0xff]  }
  0x34   : > { %v957_v56 = vrot.slane %v955_v46, 1  ;;  %v996_v58 = vshll.u32 %v879_v55, 16  ;;  %v720_v59 = vrot.slane %v718_v38, 7  ;;  %v962_v61 = vrot.slane %v960_v43, 1 }
  0x35   : > { %v970_v60 = vor.u32 %v969_v52, %v965_v40  ;;  %v1196_v62 = vrot.slane %v5504_v42, 1  ;;  %v5525_v63 = vsel %vm5430_vm3, 0, %v730_v54  ;;  %v1201_v3 = vsel %vm1180_vm4, %v1199_v47, %v1200_v48 }
  0x36   : > { %v958_v2 = vor.u32 %v957_v56, %v953_v45  ;;  %v989_v4 = vshrl.u32 %v5525_v63, 16  ;;  %v991_v5 = vshll.u32 %v5525_v63, 16  ;;  %v723_v8 = vor.u32 %v721_v39, %v720_v59 }
  0x37   : > { %1114 = vrot.lane.b32.xlu0 %v939_v27, %s5287_s25  ;;  %1243 = vrot.lane.b32.xlu1 %v1195_v24, %s5286_s10  ;;  %v975_v7 = vsel %vm891_vm5, %v970_v60, %v974_v53  ;;  %v5540_v9 = vsel %vm5430_vm3, %v720_v59, 0  ;;  %v1206_v10 = vrot.slane %v879_v55, 1  ;;  %v998_v14 = vrot.slane %v996_v58, 1 }
  0x38   : > { %v993_v13 = vrot.slane %v991_v5, 1  ;;  %v984_v15 = vshll.u32 %v5540_v9, 16  ;;  %v1205_v16 = vrot.slane %v5525_v63, 1  ;;  %v1198_v18 = vsel %vm1180_vm4, %v1196_v62, %v1197_v57 }
  0x39   : > { %v5551_v19 = vsel %vm5430_vm3, 0, %v723_v8  ;;  %v739_v20 = vshrl.u32 %v5201_v0, 16  ;;  %v742_v21 = vshll.u32 %v5201_v0, 16  ;;  %v963_v22 = vsel %vm891_vm5, %v958_v2, %v962_v61 }
  0x3a   : > { %v994_v23 = vor.u32 %v993_v13, %v989_v4  ;;  %v977_v24 = vshrl.u32 %v5551_v19, 16  ;;  %v979_v25 = vshll.u32 %v5551_v19, 16  ;;  %v1203_v26 = vrot.slane %v5540_v9, 1 }
  0x3b   : > { %1241 = vrot.lane.b32.xlu0 %v1192_v28, %s5286_s10  ;;  %1120 = vrot.lane.b32.xlu1 %v975_v7, %s5287_s25  ;;  %v741_v27 = vrot.slane %v739_v20, 7  ;;  %v732_v28 = vshrl.u32 %v5202_v6, 16  ;;  %v735_v30 = vshll.u32 %v5202_v6, 16  ;;  %v986_v32 = vrot.slane %v984_v15, 1  ;;  %v5205_v6 = vld [vmem:[%s5403_s16 + $0x60] sm:$0xff]  }
  0x3c   : > { %v981_v31 = vrot.slane %v979_v25, 1  ;;  %v1207_v33 = vsel %vm1180_vm4, %v1205_v16, %v1206_v10  ;;  %v753_v34 = vshrl.u32 %v5203_v11, 16  ;;  %v1202_v37 = vrot.slane %v5551_v19, 1 }
  0x3d   : > { %v744_v38 = vor.u32 %v742_v21, %v741_v27  ;;  %v881_v39 = vsel %vm5430_vm3, %v741_v27, 0  ;;  %v734_v40 = vrot.slane %v732_v28, 7  ;;  %v999_v41 = vsel %vm891_vm5, %v994_v23, %v998_v14  ;;  %v5207_v27 = vld [vmem:[%s5403_s16 + $0x70] sm:$0xff]  }
  0x3e   : > { %v982_v43 = vor.u32 %v981_v31, %v977_v24  ;;  %v1020_v45 = vshll.u32 %v881_v39, 16  ;;  %v756_v46 = vshll.u32 %v5203_v11, 16  ;;  %v755_v52 = vrot.slane %v753_v34, 7 }
  0x3f   : > { %1118 = vrot.lane.b32.xlu0 %v963_v22, %s5287_s25  ;;  %1247 = vrot.lane.b32.xlu1 %v1201_v3, %s5286_s10  ;;  %v5570_v47 = vsel %vm5430_vm3, 0, %v744_v38  ;;  %v737_v48 = vor.u32 %v735_v30, %v734_v40  ;;  %v880_v50 = vsel %vm5430_vm3, %v734_v40, 0  ;;  %v1212_v55 = vrot.slane %v881_v39, 1 }
  0x40   : > { %v1013_v53 = vshrl.u32 %v5570_v47, 16  ;;  %v1015_v54 = vshll.u32 %v5570_v47, 16  ;;  %v746_v56 = vshrl.u32 %v5204_v35, 16  ;;  %v987_v57 = vsel %vm891_vm5, %v982_v43, %v986_v32 }
  0x41   : > { %v1022_v58 = vrot.slane %v1020_v45, 1  ;;  %v5581_v59 = vsel %vm5430_vm3, 0, %v737_v48  ;;  %v1008_v60 = vshll.u32 %v880_v50, 16  ;;  %v1211_v2 = vrot.slane %v5570_v47, 1 }
  0x42   : > { %v1017_v61 = vrot.slane %v1015_v54, 1  ;;  %v1001_v62 = vshrl.u32 %v5581_v59, 16  ;;  %v1003_v0 = vshll.u32 %v5581_v59, 16  ;;  %v1209_v3 = vrot.slane %v880_v50, 1  ;;  %v5208_v50 = vld [vmem:[%s5403_s16 + $0x68] sm:$0xff]  }
  0x43   : > { %1245 = vrot.lane.b32.xlu0 %v1198_v18, %s5286_s10  ;;  %1124 = vrot.lane.b32.xlu1 %v999_v41, %s5287_s25  ;;  %v758_v4 = vor.u32 %v756_v46, %v755_v52  ;;  %v883_v5 = vsel %vm5430_vm3, %v755_v52, 0  ;;  %v1204_v7 = vsel %vm1180_vm4, %v1202_v37, %v1203_v26  ;;  %v1010_v11 = vrot.slane %v1008_v60, 1  ;;  %v5206_v26 = vld [vmem:[%s5403_s16 + $0x58] sm:$0xff]  }
  0x44   : > { %v1018_v8 = vor.u32 %v1017_v61, %v1013_v53  ;;  %v1005_v9 = vrot.slane %v1003_v0, 1  ;;  %v1044_v10 = vshll.u32 %v883_v5, 16  ;;  %v748_v14 = vrot.slane %v746_v56, 7 }
  0x45   : > { %v5594_v13 = vsel %vm5430_vm3, 0, %v758_v4  ;;  %v749_v15 = vshll.u32 %v5204_v35, 16  ;;  %v1213_v22 = vsel %vm1180_vm4, %v1211_v2, %v1212_v55  ;;  %v1208_v23 = vrot.slane %v5581_v59, 1 }
  0x46   : > { %v1023_v16 = vsel %vm891_vm5, %v1018_v8, %v1022_v58  ;;  %v1006_v18 = vor.u32 %v1005_v9, %v1001_v62  ;;  %v1037_v20 = vshrl.u32 %v5594_v13, 16  ;;  %v1039_v21 = vshll.u32 %v5594_v13, 16 }
  0x47   : > { %1122 = vrot.lane.b32.xlu0 %v987_v57, %s5287_s25  ;;  %1251 = vrot.lane.b32.xlu1 %v1207_v33, %s5286_s10  ;;  %v751_v24 = vor.u32 %v749_v15, %v748_v14  ;;  %v882_v25 = vsel %vm5430_vm3, %v748_v14, 0  ;;  %v1046_v30 = vrot.slane %v1044_v10, 1  ;;  %v1218_v32 = vrot.slane %v883_v5, 1 }
  0x48   : > { %v1041_v28 = vrot.slane %v1039_v21, 1  ;;  %v1032_v31 = vshll.u32 %v882_v25, 16  ;;  %v1217_v34 = vrot.slane %v5594_v13, 1  ;;  %v767_v35 = vshrl.u32 %v5205_v6, 16 }
  0x49   : > { %v5609_v33 = vsel %vm5430_vm3, 0, %v751_v24  ;;  %v770_v37 = vshll.u32 %v5205_v6, 16  ;;  %v1011_v38 = vsel %vm891_vm5, %v1006_v18, %v1010_v11  ;;  %v1210_v43 = vsel %vm1180_vm4, %v1208_v23, %v1209_v3 }
  0x4a   : > { %v1042_v39 = vor.u32 %v1041_v28, %v1037_v20  ;;  %v1025_v40 = vshrl.u32 %v5609_v33, 16  ;;  %v1027_v41 = vshll.u32 %v5609_v33, 16  ;;  %v769_v45 = vrot.slane %v767_v35, 7 }
  0x4b   : > { %1249 = vrot.lane.b32.xlu0 %v1204_v7, %s5286_s10  ;;  %1128 = vrot.lane.b32.xlu1 %v1023_v16, %s5287_s25  ;;  %v760_v46 = vshrl.u32 %v5206_v26, 16  ;;  %v763_v48 = vshll.u32 %v5206_v26, 16  ;;  %v1034_v53 = vrot.slane %v1032_v31, 1  ;;  %v1215_v54 = vrot.slane %v882_v25, 1 }
  0x4c   : > { %v1029_v52 = vrot.slane %v1027_v41, 1  ;;  %v781_v55 = vshrl.u32 %v5207_v27, 16  ;;  %v1219_v56 = vsel %vm1180_vm4, %v1217_v34, %v1218_v32  ;;  %v772_v57 = vor.u32 %v770_v37, %v769_v45  ;;  %v5209_v37 = vld [vmem:[%s5403_s16 + $0x78] sm:$0xff]   ;;  %s4437_s16 = sadd.s32 4294967295, %s5374_s18 }
  0x4d   : > { %v885_v58 = vsel %vm5430_vm3, %v769_v45, 0  ;;  %v762_v60 = vrot.slane %v760_v46, 7  ;;  %v1047_v61 = vsel %vm891_vm5, %v1042_v39, %v1046_v30  ;;  %v784_v2 = vshll.u32 %v5207_v27, 16 }
  0x4e   : > { %v1030_v62 = vor.u32 %v1029_v52, %v1025_v40  ;;  %v1068_v0 = vshll.u32 %v885_v58, 16  ;;  %v5630_v3 = vsel %vm5430_vm3, 0, %v772_v57  ;;  %v783_v6 = vrot.slane %v781_v55, 7  ;;  %v513_v52 = vld [vmem:[%s5411_s19 + $0x4] sm:$0xf] }
  0x4f   : > { %1126 = vrot.lane.b32.xlu0 %v1011_v38, %s5287_s25  ;;  %1255 = vrot.lane.b32.xlu1 %v1213_v22, %s5286_s10  ;;  %v765_v4 = vor.u32 %v763_v48, %v762_v60  ;;  %v5634_v5 = vsel %vm5430_vm3, %v762_v60, 0  ;;  %v1214_v7 = vrot.slane %v5609_v33, 1  ;;  %v1061_v8 = vshrl.u32 %v5630_v3, 16  ;;  %v516_v57 = vld [vmem:[%s5664_s23] sm:$0xf] }
  0x50   : > { %v1063_v9 = vshll.u32 %v5630_v3, 16  ;;  %v1224_v10 = vrot.slane %v885_v58, 1  ;;  %v1035_v11 = vsel %vm891_vm5, %v1030_v62, %v1034_v53  ;;  %v1056_v15 = vshll.u32 %v5634_v5, 16 }
  0x51   : > { %v5644_v14 = vsel %vm5430_vm3, 0, %v765_v4  ;;  %v774_v16 = vshrl.u32 %v5208_v50, 16  ;;  %v1070_v20 = vrot.slane %v1068_v0, 1  ;;  %v1223_v23 = vrot.slane %v5630_v3, 1  ;;  %v517_v0 = vld [vmem:[%s5664_s23 + $0x4] sm:$0xf] }
  0x52   : > { %v1065_v18 = vrot.slane %v1063_v9, 1  ;;  %v1049_v21 = vshrl.u32 %v5644_v14, 16  ;;  %v1051_v22 = vshll.u32 %v5644_v14, 16  ;;  %v786_v24 = vor.u32 %v784_v2, %v783_v6 }
  0x53   : > { %1253 = vrot.lane.b32.xlu0 %v1210_v43, %s5286_s10  ;;  %1132 = vrot.lane.b32.xlu1 %v1047_v61, %s5287_s25  ;;  %v887_v25 = vsel %vm5430_vm3, %v783_v6, 0  ;;  %v1216_v26 = vsel %vm1180_vm4, %v1214_v7, %v1215_v54  ;;  %v1058_v31 = vrot.slane %v1056_v15, 1  ;;  %v776_v34 = vrot.slane %v774_v16, 7  ;;  %v512_v43 = vld [vmem:[%s5411_s19] sm:$0xf] }
  0x54   : > { %v1066_v27 = vor.u32 %v1065_v18, %v1061_v8  ;;  %v1053_v28 = vrot.slane %v1051_v22, 1  ;;  %v1092_v30 = vshll.u32 %v887_v25, 16  ;;  %v5658_v32 = vsel %vm5430_vm3, 0, %v786_v24 }
  0x55   : > { %v777_v35 = vshll.u32 %v5208_v50, 16  ;;  %v1085_v40 = vshrl.u32 %v5658_v32, 16  ;;  %v1087_v41 = vshll.u32 %v5658_v32, 16  ;;  %v1220_v45 = vrot.slane %v5644_v14, 1 }
  0x56   : > { %v1071_v38 = vsel %vm891_vm5, %v1066_v27, %v1070_v20  ;;  %v1054_v39 = vor.u32 %v1053_v28, %v1049_v21  ;;  %v1221_v46 = vrot.slane %v5634_v5, 1  ;;  %v886_v50 = vsel %vm5430_vm3, %v776_v34, 0 }
  0x57   : > { %1130 = vrot.lane.b32.xlu0 %v1035_v11, %s5287_s25  ;;  %1259 = vrot.lane.b32.xlu1 %v1219_v56, %s5286_s10  ;;  %v779_v48 = vor.u32 %v777_v35, %v776_v34  ;;  %v1225_v53 = vsel %vm1180_vm4, %v1223_v23, %v1224_v10  ;;  %v1089_v54 = vrot.slane %v1087_v41, 1  ;;  %v1094_v55 = vrot.slane %v1092_v30, 1 }
  0x58   : > { %v1230_v56 = vrot.slane %v887_v25, 1  ;;  %v1059_v58 = vsel %vm891_vm5, %v1054_v39, %v1058_v31  ;;  %v788_v61 = vshrl.u32 %v5209_v37, 16  ;;  %v791_v62 = vshll.u32 %v5209_v37, 16 }
  0x59   : > { %v5682_v60 = vsel %vm5430_vm3, 0, %v779_v48  ;;  %v1090_v2 = vor.u32 %v1089_v54, %v1085_v40  ;;  %v1080_v6 = vshll.u32 %v886_v50, 16  ;;  %v1229_v7 = vrot.slane %v5658_v32, 1 }
  0x5a   : > { %v1073_v4 = vshrl.u32 %v5682_v60, 16  ;;  %v1075_v5 = vshll.u32 %v5682_v60, 16  ;;  %v790_v8 = vrot.slane %v788_v61, 7  ;;  %v530_v9 = vstv %s5626_s26 }
  0x5b   : > { %1257 = vrot.lane.b32.xlu0 %v1216_v26, %s5286_s10  ;;  %1136 = vrot.lane.b32.xlu1 %v1071_v38, %s5287_s25  ;;  %v524_v10 = vsel %vm5419_vm2, 0, %v512_v43  ;;  %v1227_v15 = vrot.slane %v886_v50, 1  ;;  %vm5691_vm6 = vcmp.eq.s32.totalorder %v530_v9, 1  ;;  %v525_v18 = vsel %vm5419_vm2, 0, %v513_v52 }
  0x5c   : > { %v1077_v11 = vrot.slane %v1075_v5, 1  ;;  %v1222_v20 = vsel %vm1180_vm4, %v1220_v45, %v1221_v46  ;;  %v793_v21 = vor.u32 %v791_v62, %v790_v8  ;;  %v888_v22 = vsel %vm5430_vm3, %v790_v8, 0 }
  0x5d   : > { %v532_v23 = vsel %vm5691_vm6, 0, %v516_v57  ;;  %v1095_v24 = vsel %vm891_vm5, %v1090_v2, %v1094_v55  ;;  %v1082_v26 = vrot.slane %v1080_v6, 1  ;;  %v533_v12 = vsel %vm5691_vm6, 0, %v517_v0 }
  0x5e   : > { %v1078_v25 = vor.u32 %v1077_v11, %v1073_v4  ;;  %v1231_v27 = vsel %vm1180_vm4, %v1229_v7, %v1230_v56  ;;  %v5710_v28 = vsel %vm5430_vm3, 0, %v793_v21  ;;  %v4336_v30 = vcombine.low %v532_v23, %v533_v12 }
  0x5f   : > { %1134 = vrot.lane.b32.xlu0 %v1059_v58, %s5287_s25  ;;  %1263 = vrot.lane.b32.xlu1 %v1225_v53, %s5286_s10  ;;  %v4318_v31 = vcombine.low %v524_v10, %v525_v18  ;;  %v1226_v34 = vrot.slane %v5682_v60, 1  ;;  %v1097_v35 = vshrl.u32 %v5710_v28, 16  ;;  %v1099_v37 = vshll.u32 %v5710_v28, 16 }
  0x60   : > { %v1104_v38 = vshll.u32 %v888_v22, 16  ;;  %v1233_v39 = vrot.slane %v888_v22, 1  ;;  %v795_v40 = vshrl.u32 %v4336_v30, 16  ;;  %v798_v41 = vshll.u32 %v4336_v30, 16 }
  0x61   : > { %v669_v43 = vshrl.u32 %v4318_v31, 16  ;;  %v1083_v45 = vsel %vm891_vm5, %v1078_v25, %v1082_v26  ;;  %v1101_v46 = vrot.slane %v1099_v37, 1  ;;  %v1232_v48 = vrot.slane %v5710_v28, 1 }
  0x62   : > { %v672_v50 = vshll.u32 %v4318_v31, 16  ;;  %v797_v52 = vrot.slane %v795_v40, 7  ;;  %v1106_v55 = vrot.slane %v1104_v38, 1  ;;  %v1228_v56 = vsel %vm1180_vm4, %v1226_v34, %v1227_v15  ;;  %v518_v34 = vld [vmem:[%s5664_s23 + $0x8] sm:$0xf] }
  0x63   : > { %1261 = vrot.lane.b32.xlu0 %v1222_v20, %s5286_s10  ;;  %1140 = vrot.lane.b32.xlu1 %v1095_v24, %s5287_s25  ;;  %v671_v53 = vrot.slane %v669_v43, 7  ;;  %v1102_v54 = vor.u32 %v1101_v46, %v1097_v35  ;;  %v1234_v62 = vsel %vm1180_vm4, %v1232_v48, %v1233_v39  ;;  %v519_v35 = vld [vmem:[%s5664_s23 + $0xc] sm:$0xf]  ;;  %v534_v37 = vsel %vm5691_vm6, 0, %v518_v34 }
  0x64   : > { %v800_v57 = vor.u32 %v798_v41, %v797_v52  ;;  %v889_v58 = vsel %vm5430_vm3, %v797_v52, 0  ;;  %v535_v38 = vsel %vm5691_vm6, 0, %v519_v35 }
  0x65   : > { %v674_v61 = vor.u32 %v672_v50, %v671_v53  ;;  %v1365_v0 = vshll.u32 %v889_v58, 16  ;;  %v1374_v2 = vrot.slane %v889_v58, 1  ;;  %v871_v4 = vsel %vm5430_vm3, %v671_v53, 0 }
  0x66   : > { %v5729_v5 = vsel %vm5430_vm3, 0, %v800_v57  ;;  %v1107_v7 = vsel %vm891_vm5, %v1102_v54, %v1106_v55  ;;  %v900_v18 = vshll.u32 %v871_v4, 16  ;;  %v1182_v20 = vrot.slane %v871_v4, 1 }
  0x67   : > { %1138 = vrot.lane.b32.xlu0 %v1083_v45, %s5287_s25  ;;  %1267 = vrot.lane.b32.xlu1 %v1231_v27, %s5286_s10  ;;  %v5733_v6 = vsel %vm5430_vm3, 0, %v674_v61  ;;  %v1358_v8 = vshrl.u32 %v5729_v5, 16  ;;  %v1360_v9 = vshll.u32 %v5729_v5, 16  ;;  %v1373_v10 = vrot.slane %v5729_v5, 1 }
  0x68   : > { %v1367_v11 = vrot.slane %v1365_v0, 1  ;;  %v895_v15 = vshll.u32 %v5733_v6, 16  ;;  %v893_v23 = vshrl.u32 %v5733_v6, 16  ;;  %v1181_v24 = vrot.slane %v5733_v6, 1 }
  0x69   : > { %v1362_v21 = vrot.slane %v1360_v9, 1  ;;  %v1375_v22 = vsel %vm1180_vm4, %v1373_v10, %v1374_v2  ;;  %v902_v30 = vrot.slane %v900_v18, 1  ;;  %v4337_v39 = vcombine.low %v534_v37, %v535_v38  ;;  %v5221_v37 = vld [vmem:[%s7159_s3 + $0x28] sm:$0xff]  }
  0x6a   : > { %v897_v25 = vrot.slane %v895_v15, 1  ;;  %v1183_v31 = vsel %vm1180_vm4, %v1181_v24, %v1182_v20  ;;  %v5217_v15 = vld [vmem:[%s7159_s3 + $0x8] sm:$0xff]  }
  0x6b   : > { %1265 = vrot.lane.b32.xlu0 %v1228_v56, %s5286_s10  ;;  %1269 = vrot.lane.b32.xlu1 %v1234_v62, %s5286_s10  ;;  %v1363_v26 = vor.u32 %v1362_v21, %v1358_v8  ;;  %v802_v41 = vshrl.u32 %v4337_v39, 16  ;;  %v805_v45 = vshll.u32 %v4337_v39, 16  ;;  %v5218_v21 = vld [vmem:[%s7159_s3 + $0x10] sm:$0xff]   ;;  %v5833_v39 = vld [vmem:[%s7159_s3 + $0x60] sm:$0xff]  }
  0x6c   : > { %v898_v27 = vor.u32 %v897_v25, %v893_v23 }
  0x6d   : > { %v1368_v12 = vsel %vm891_vm5, %v1363_v26, %v1367_v11  ;;  %v804_v43 = vrot.slane %v802_v41, 7 }
  0x6e   : > { %v903_v40 = vsel %vm891_vm5, %v898_v27, %v902_v30 }
  0x6f   : > { %1142 = vrot.lane.b32.xlu0 %v1107_v7, %s5287_s25  ;;  %1376 = vrot.lane.b32.xlu1 %v1375_v22, %s5286_s10  ;;  %v807_v46 = vor.u32 %v805_v45, %v804_v43  ;;  %v890_v50 = vsel %vm5430_vm3, %v804_v43, 0 }
  0x70   : > { %v1868_v54 = vshll.u32 %v890_v50, 16  ;;  %v1877_v58 = vrot.slane %v890_v50, 1 }
  0x71   : > { %v5761_v48 = vsel %vm5430_vm3, 0, %v807_v46 }
  0x72   : > { %v1863_v16 = vshll.u32 %v5761_v48, 16  ;;  %v1861_v52 = vshrl.u32 %v5761_v48, 16  ;;  %v1870_v56 = vrot.slane %v1868_v54, 1  ;;  %v1876_v57 = vrot.slane %v5761_v48, 1 }
  0x73   : > { %1369 = vrot.lane.b32.xlu0 %v1368_v12, %s5287_s25  ;;  %1235 = vrot.lane.b32.xlu1 %v1183_v31, %s5286_s10  ;;  %v5220_v12 = vld [vmem:[%s7159_s3 + $0x20] sm:$0xff]  }
  0x74   : > { %v1865_v53 = vrot.slane %v1863_v16, 1  ;;  %v1878_v62 = vsel %vm1180_vm4, %v1876_v57, %v1877_v58 }
  0x76   : > { %v1866_v55 = vor.u32 %v1865_v53, %v1861_v52 }
  0x77   : > { %1108 = vrot.lane.b32.xlu0 %v903_v40, %s5287_s25  ;;  %1879 = vrot.lane.b32.xlu1 %v1878_v62, %s5286_s10 }
  0x78   : > { %v1871_v61 = vsel %vm891_vm5, %v1866_v55, %v1870_v56 }
  0x7b   : > { %1872 = vrot.lane.b32.xlu0 %v1871_v61, %s5287_s25 }
  0x9d   : > { %v1238_v0 = vpop.permute.xlu1 %1237 }
  0xa1   : > { %v1111_v2 = vpop.permute.xlu0 %1110  ;;  %v1240_v4 = vpop.permute.xlu1 %1239 }
  0xa2   : > { %v1275_v7 = vsel %vm1271_vm7, %v5460_v51, %v1111_v2 }
  0xa3   : > { %v5775_v8 = vsel %vm1308_vm8, %v1275_v7, %v1238_v0 }
  0xa4   : > { %4752 = vmatprep.mubr.msk.bf16.mxu0 %vm1431_vm9, %v5775_v8 }
  0xa5   : > { %v1113_v9 = vpop.permute.xlu0 %1112  ;;  %v1117_v10 = vpop.permute.xlu1 %1116 }
  0xa6   : > { %v1277_v11 = vsel %vm1271_vm7, %v5438_v29, %v1113_v9  ;;  %v1281_v29 = vsel %vm1271_vm7, %v5449_v44, %v1117_v10 }
  0xa7   : > { %v5785_v18 = vsel %vm1308_vm8, %v1277_v11, %v1240_v4 }
  0xa8   : > { %4753 = vmatmul.mubr.msk.bf16.vlgmr.msra.gmra.mrb[0].mxu0 %vm1431_vm9, %v5785_v18 }
  0xa9   : > { %4789 = vmatpush3.bf16.msra.mxu0 %v5531_v1  ;;  %v1115_v51 = vpop.permute.xlu0 %1114  ;;  %v1244_v20 = vpop.permute.xlu1 %1243  ;;  %v5219_v1 = vld [vmem:[%s7159_s3 + $0x18] sm:$0xff]  }
  0xaa   : > { %4790 = vmatprep.subr.bf16.mxu0 %v5217_v15  ;;  %v1279_v22 = vsel %vm1271_vm7, %v5455_v49, %v1115_v51  ;;  %v5804_v26 = vsel %vm1308_vm8, %v1281_v29, %v1244_v20 }
  0xad   : > { %v1242_v23 = vpop.permute.xlu0 %1241  ;;  %v1121_v24 = vpop.permute.xlu1 %1120  ;;  %4791 = vmatpush3.bf16.msra.mxu0 %v5217_v15 }
  0xae   : > { %v5798_v25 = vsel %vm1308_vm8, %v1279_v22, %v1242_v23  ;;  %4792 = vmatprep.subr.bf16.mxu0 %v5218_v21  ;;  %v1285_v27 = vsel %vm1271_vm7, %v5496_v36, %v1121_v24 }
  0xaf   : > { %4756 = vmatprep.mubr.msk.bf16.mxu0 %vm1431_vm9, %v5798_v25 }
  0xb0   : > { %4757 = vmatmul.mubr.msk.bf16.gmra.mrb[4].mxu0 %vm1431_vm9, %v5804_v26 }
  0xb1   : > { %v1119_v44 = vpop.permute.xlu0 %1118  ;;  %v1248_v49 = vpop.permute.xlu1 %1247  ;;  %4793 = vmatpush3.bf16.msra.mxu0 %v5218_v21 }
  0xb2   : > { %4794 = vmatprep.subr.bf16.mxu0 %v5219_v1  ;;  %v1283_v30 = vsel %vm1271_vm7, %v5504_v42, %v1119_v44  ;;  %v5824_v38 = vsel %vm1308_vm8, %v1285_v27, %v1248_v49 }
  0xb5   : > { %v1246_v31 = vpop.permute.xlu0 %1245  ;;  %v1125_v34 = vpop.permute.xlu1 %1124  ;;  %4795 = vmatpush3.bf16.msra.mxu0 %v5219_v1 }
  0xb6   : > { %v5818_v35 = vsel %vm1308_vm8, %v1283_v30, %v1246_v31  ;;  %4796 = vmatprep.subr.bf16.mxu0 %v5220_v12  ;;  %v1289_v40 = vsel %vm1271_vm7, %v5525_v63, %v1125_v34  ;;  %v5223_v34 = vld [vmem:[%s7159_s3 + $0x68] sm:$0xff]  }
  0xb7   : > { %4760 = vmatprep.mubr.msk.bf16.mxu0 %vm1431_vm9, %v5818_v35 }
  0xb8   : > { %4761 = vmatmul.mubr.msk.bf16.gmra.mrb[8].mxu0 %vm1431_vm9, %v5824_v38 }
  0xb9   : > { %v1123_v36 = vpop.permute.xlu0 %1122  ;;  %v1252_v42 = vpop.permute.xlu1 %1251  ;;  %4797 = vmatpush3.bf16.msra.mxu0 %v5220_v12 }
  0xba   : > { %4798 = vmatprep.subr.bf16.mxu0 %v5221_v37  ;;  %v1287_v41 = vsel %vm1271_vm7, %v5551_v19, %v1123_v36  ;;  %v5844_v16 = vsel %vm1308_vm8, %v1289_v40, %v1252_v42  ;;  %v6009_v36 = vld [vmem:[%s7160_s4] ss:$0 sm:$0xff] }
  0xbd   : > { %v1250_v43 = vpop.permute.xlu0 %1249  ;;  %v1129_v45 = vpop.permute.xlu1 %1128  ;;  %4799 = vmatpush3.bf16.msra.mxu0 %v5221_v37  ;;  %v5227_v37 = vld [vmem:[%s7159_s3 + $0x88] sm:$0xff]  }
  0xbe   : > { %v5840_v46 = vsel %vm1308_vm8, %v1287_v41, %v1250_v43  ;;  %4836 = vmatprep.subr.bf16.mxu0 %v5833_v39  ;;  %v1293_v19 = vsel %vm1271_vm7, %v5570_v47, %v1129_v45 }
  0xbf   : > { %4764 = vmatprep.mubr.msk.bf16.mxu0 %vm1431_vm9, %v5840_v46 }
  0xc0   : > { %4765 = vmatmul.mubr.msk.bf16.gmra.mrb[12].mxu0 %vm1431_vm9, %v5844_v16 }
  0xc1   : > { %v1127_v63 = vpop.permute.xlu0 %1126  ;;  %v1256_v50 = vpop.permute.xlu1 %1255 }
  0xc2   : > { %v1291_v52 = vsel %vm1271_vm7, %v5581_v59, %v1127_v63  ;;  %v5858_v56 = vsel %vm1308_vm8, %v1293_v19, %v1256_v50 }
  0xc5   : > { %v1254_v53 = vpop.permute.xlu0 %1253  ;;  %v1133_v54 = vpop.permute.xlu1 %1132 }
  0xc6   : > { %v5855_v55 = vsel %vm1308_vm8, %v1291_v52, %v1254_v53  ;;  %v1297_v47 = vsel %vm1271_vm7, %v5594_v13, %v1133_v54 }
  0xc7   : > { %4768 = vmatprep.mubr.msk.bf16.mxu0 %vm1431_vm9, %v5855_v55 }
  0xc8   : > { %4769 = vmatmul.mubr.msk.bf16.gmra.mrb[16].mxu0 %vm1431_vm9, %v5858_v56 }
  0xc9   : > { %v1131_v57 = vpop.permute.xlu0 %1130  ;;  %v1260_v58 = vpop.permute.xlu1 %1259 }
  0xca   : > { %v1295_v59 = vsel %vm1271_vm7, %v5609_v33, %v1131_v57  ;;  %v5872_v2 = vsel %vm1308_vm8, %v1297_v47, %v1260_v58 }
  0xcd   : > { %v1258_v61 = vpop.permute.xlu0 %1257  ;;  %v1137_v62 = vpop.permute.xlu1 %1136 }
  0xce   : > { %v5869_v0 = vsel %vm1308_vm8, %v1295_v59, %v1258_v61  ;;  %v1301_v13 = vsel %vm1271_vm7, %v5630_v3, %v1137_v62  ;;  %v5228_v62 = vld [vmem:[%s7162_s6 + $0x30] sm:$0xff]  }
  0xcf   : > { %4772 = vmatprep.mubr.msk.bf16.mxu0 %vm1431_vm9, %v5869_v0  ;;  %4884 = vmatprep.subr.bf16.mxu1 %v5228_v62 }
  0xd0   : > { %4773 = vmatmul.mubr.msk.bf16.gmra.mrb[20].mxu0 %vm1431_vm9, %v5872_v2  ;;  %4885 = vmatpush3.bf16.msra.mxu1 %v5228_v62 }
  0xd1   : > { %v1135_v4 = vpop.permute.xlu0 %1134  ;;  %v1264_v7 = vpop.permute.xlu1 %1263 }
  0xd2   : > { %v1299_v33 = vsel %vm1271_vm7, %v5644_v14, %v1135_v4  ;;  %v5886_v15 = vsel %vm1308_vm8, %v1301_v13, %v1264_v7 }
  0xd5   : > { %v1262_v9 = vpop.permute.xlu0 %1261  ;;  %v1141_v10 = vpop.permute.xlu1 %1140 }
  0xd6   : > { %v5883_v11 = vsel %vm1308_vm8, %v1299_v33, %v1262_v9  ;;  %v1305_v3 = vsel %vm1271_vm7, %v5658_v32, %v1141_v10 }
  0xd7   : > { %4776 = vmatprep.mubr.msk.bf16.mxu0 %vm1431_vm9, %v5883_v11 }
  0xd8   : > { %4777 = vmatmul.mubr.msk.bf16.gmra.mrb[24].mxu0 %vm1431_vm9, %v5886_v15 }
  0xd9   : > { %v1139_v51 = vpop.permute.xlu0 %1138  ;;  %v1268_v20 = vpop.permute.xlu1 %1267 }
  0xda   : > { %v1303_v14 = vsel %vm1271_vm7, %v5682_v60, %v1139_v51  ;;  %v5900_v23 = vsel %vm1308_vm8, %v1305_v3, %v1268_v20 }
  0xdd   : > { %v1266_v21 = vpop.permute.xlu0 %1265  ;;  %v1270_v22 = vpop.permute.xlu1 %1269 }
  0xde   : > { %v5897_v29 = vsel %vm1308_vm8, %v1303_v14, %v1266_v21 }
  0xdf   : > { %4780 = vmatprep.mubr.msk.bf16.mxu0 %vm1431_vm9, %v5897_v29 }
  0xe0   : > { %4781 = vmatmul.mubr.msk.bf16.gmra.mrb[28].mxu0 %vm1431_vm9, %v5900_v23 }
  0xe1   : > { %v1143_v24 = vpop.permute.xlu0 %1142  ;;  %v1377_v1 = vpop.permute.xlu1 %1376 }
  0xe2   : > { %v1307_v32 = vsel %vm1271_vm7, %v5710_v28, %v1143_v24 }
  0xe3   : > { %v1344_v60 = vsel %vm1308_vm8, %v1307_v32, %v1270_v22 }
  0xe4   : > { %4784 = vmatprep.mubr.msk.bf16.mxu0 %vm1431_vm9, %v1344_v60 }
  0xe5   : > { %v1370_v44 = vpop.permute.xlu0 %1369  ;;  %v1236_v27 = vpop.permute.xlu1 %1235 }
  0xe6   : > { %v1379_v49 = vsel %vm1271_vm7, %v5729_v5, %v1370_v44  ;;  %v5224_v5 = vld [vmem:[%s7159_s3 + $0x70] sm:$0xff]  }
  0xe7   : > { %v1381_v12 = vsel %vm1308_vm8, %v1379_v49, %v1377_v1 }
  0xe8   : > { %4785 = vmatmul.mubr.msk.bf16.gmra.mrb[32].mxu0 %vm1431_vm9, %v1381_v12 }
  0xe9   : > { %v1109_v30 = vpop.permute.xlu0 %1108 }
  0xea   : > { %v1273_v31 = vsel %vm1271_vm7, %v5733_v6, %v1109_v30  ;;  %v5225_v6 = vld [vmem:[%s7159_s3 + $0x78] sm:$0xff]  }
  0xeb   : > { %v1310_v28 = vsel %vm1308_vm8, %v1273_v31, %v1236_v27 }
  0xec   : > { %4800 = vmatprep.mubr.msk.bf16.mxu0 %vm1431_vm9, %v1310_v28 }
  0xf0   : > { %4801 = vmatmul.mubr.msk.bf16.vlgmr.msra.gmra.mrb[0].mxu0 %vm1431_vm9, %v5775_v8  ;;  %v5226_v8 = vld [vmem:[%s7159_s3 + $0x80] sm:$0xff]  }
  0xf1   : > { %4837 = vmatpush3.bf16.msra.mxu0 %v5833_v39  ;;  %4804 = vmatprep.mubr.msk.bf16.mxu0 %vm1431_vm9, %v5785_v18 }
  0xf2   : > { %4838 = vmatprep.subr.bf16.mxu0 %v5223_v34 }
  0xf5   : > { %4839 = vmatpush3.bf16.msra.mxu0 %v5223_v34 }
  0xf6   : > { %4840 = vmatprep.subr.bf16.mxu0 %v5224_v5 }
  0xf8   : > { %4805 = vmatmul.mubr.msk.bf16.gmra.mrb[4].mxu0 %vm1431_vm9, %v5798_v25 }
  0xf9   : > { %4808 = vmatprep.mubr.msk.bf16.mxu0 %vm1431_vm9, %v5804_v26  ;;  %4841 = vmatpush3.bf16.msra.mxu0 %v5224_v5 }
  0xfa   : > { %4842 = vmatprep.subr.bf16.mxu0 %v5225_v6 }
  0xfd   : > { %4843 = vmatpush3.bf16.msra.mxu0 %v5225_v6 }
  0xfe   : > { %4844 = vmatprep.subr.bf16.mxu0 %v5226_v8 }
 0x100   : > { %4809 = vmatmul.mubr.msk.bf16.gmra.mrb[8].mxu0 %vm1431_vm9, %v5818_v35 }
 0x101   : > { %4812 = vmatprep.mubr.msk.bf16.mxu0 %vm1431_vm9, %v5824_v38  ;;  %4845 = vmatpush3.bf16.msra.mxu0 %v5226_v8 }
 0x102   : > { %4846 = vmatprep.subr.bf16.mxu0 %v5227_v37 }
 0x105   : > { %4847 = vmatpush3.bf16.msra.mxu0 %v5227_v37 }
 0x108   : > { %4813 = vmatmul.mubr.msk.bf16.gmra.mrb[12].mxu0 %vm1431_vm9, %v5840_v46 }
 0x109   : > { %4816 = vmatprep.mubr.msk.bf16.mxu0 %vm1431_vm9, %v5844_v16 }
 0x110   : > { %4817 = vmatmul.mubr.msk.bf16.gmra.mrb[16].mxu0 %vm1431_vm9, %v5855_v55 }
 0x111   : > { %4820 = vmatprep.mubr.msk.bf16.mxu0 %vm1431_vm9, %v5858_v56 }
 0x118   : > { %4821 = vmatmul.mubr.msk.bf16.gmra.mrb[20].mxu0 %vm1431_vm9, %v5869_v0 }
 0x119   : > { %4824 = vmatprep.mubr.msk.bf16.mxu0 %vm1431_vm9, %v5872_v2 }
 0x120   : > { %4825 = vmatmul.mubr.msk.bf16.gmra.mrb[24].mxu0 %vm1431_vm9, %v5883_v11 }
 0x121   : > { %4828 = vmatprep.mubr.msk.bf16.mxu0 %vm1431_vm9, %v5886_v15 }
 0x128   : > { %4829 = vmatmul.mubr.msk.bf16.gmra.mrb[28].mxu0 %vm1431_vm9, %v5897_v29 }
 0x129   : > { %4832 = vmatprep.mubr.msk.bf16.mxu0 %vm1431_vm9, %v5900_v23 }
 0x130   : > { %4833 = vmatmul.mubr.msk.bf16.gmra.mrb[32].mxu0 %vm1431_vm9, %v1344_v60 }
 0x131   : > { %4848 = vmatprep.mubr.msk.bf16.mxu0 %vm1431_vm9, %v5785_v18  ;;  %v1873_v18 = vpop.permute.xlu0 %1872 }
 0x138   : > { %4849 = vmatmul.mubr.msk.bf16.vlgmr.msra.gmra.mrb[0].mxu0 %vm1431_vm9, %v5798_v25  ;;  %v1882_v25 = vsel %vm1271_vm7, %v5761_v48, %v1873_v18  ;;  %v6015_v48 = vld [vmem:[%s7161_s5] ss:$0 sm:$0xff] }
 0x139   : > { %4852 = vmatprep.mubr.msk.bf16.mxu0 %vm1431_vm9, %v5804_v26  ;;  %v1880_v26 = vpop.permute.xlu1 %1879 }
 0x140   : > { %4853 = vmatmul.mubr.msk.bf16.gmra.mrb[4].mxu0 %vm1431_vm9, %v5818_v35  ;;  %v1884_v35 = vsel %vm1308_vm8, %v1882_v25, %v1880_v26 }
 0x141   : > { %4856 = vmatprep.mubr.msk.bf16.mxu0 %vm1431_vm9, %v5824_v38  ;;  %v6004_v38 = vstv %s4437_s16 }
 0x142   : > { %v2274_v42 = vadd.s32 1, %v6004_v38  ;;  %v2276_v50 = vadd.s32 3, %v6004_v38  ;;  %v2275_v19 = vadd.s32 2, %v6004_v38  ;;  %vm2291_vm12 = vcmp.ge.s32.totalorder %v6004_v38, 0 }
 0x143   : > { %vm2309_vm13 = vcmp.lt.s32.totalorder %v6004_v38, 20  ;;  %v6035_v47 = vadd.s32 5, %v6004_v38  ;;  %v6048_v7 = vadd.s32 4, %v6004_v38  ;;  %v6051_v13 = vadd.s32 7, %v6004_v38 }
 0x144   : > { %vm2292_vm10 = vcmp.ge.s32.totalorder %v2274_v42, 0  ;;  %vm2310_vm11 = vcmp.lt.s32.totalorder %v2274_v42, 20  ;;  %vm6037_vm15 = vmand %vm2291_vm12, %vm2309_vm13  ;;  %vm2294_vm0 = vcmp.ge.s32.totalorder %v2276_v50, 0  ;;  %vm2312_vm1 = vcmp.lt.s32.totalorder %v2276_v50, 20 }
 0x145   : > { %vm6029_vm14 = vmand %vm2292_vm10, %vm2310_vm11  ;;  %vm2293_vm2 = vcmp.ge.s32.totalorder %v2275_v19, 0  ;;  %vm2311_vm6 = vcmp.lt.s32.totalorder %v2275_v19, 20  ;;  %vm2296_vm10 = vcmp.ge.s32.totalorder %v6035_v47, 0  ;;  %vm2314_vm11 = vcmp.lt.s32.totalorder %v6035_v47, 20 }
 0x146   : > { %v6073_v32 = vadd.s32 9, %v6004_v38  ;;  %vm2295_vm12 = vcmp.ge.s32.totalorder %v6048_v7, 0  ;;  %vm2313_vm13 = vcmp.lt.s32.totalorder %v6048_v7, 20  ;;  %v6087_v31 = vadd.s32 11, %v6004_v38 }
 0x147   : > { %v6090_v28 = vadd.s32 10, %v6004_v38  ;;  %v6106_v26 = vadd.s32 13, %v6004_v38  ;;  %v6112_v42 = vadd.s32 15, %v6004_v38  ;;  %v6126_v19 = vadd.s32 16, %v6004_v38 }
 0x148   : > { %4857 = vmatmul.mubr.msk.bf16.gmra.mrb[8].mxu0 %vm1431_vm9, %v5840_v46 }
 0x149   : > { %4860 = vmatprep.mubr.msk.bf16.mxu0 %vm1431_vm9, %v5844_v16 }
 0x150   : > { %4861 = vmatmul.mubr.msk.bf16.gmra.mrb[12].mxu0 %vm1431_vm9, %v5855_v55 }
 0x151   : > { %4864 = vmatprep.mubr.msk.bf16.mxu0 %vm1431_vm9, %v5858_v56 }
 0x158   : > { %4865 = vmatmul.mubr.msk.bf16.gmra.mrb[16].mxu0 %vm1431_vm9, %v5869_v0  ;;  %v5229_v0 = vld [vmem:[%s7162_s6 + $0x38] sm:$0xff]  }
 0x159   : > { %4868 = vmatprep.mubr.msk.bf16.mxu0 %vm1431_vm9, %v5872_v2  ;;  %4886 = vmatprep.subr.bf16.mxu1 %v5229_v0 }
 0x15a   : > { %4887 = vmatpush3.bf16.msra.mxu1 %v5229_v0 }
 0x160   : > { %4869 = vmatmul.mubr.msk.bf16.gmra.mrb[20].mxu0 %vm1431_vm9, %v5883_v11 }
 0x161   : > { %4872 = vmatprep.mubr.msk.bf16.mxu0 %vm1431_vm9, %v5886_v15  ;;  %v6059_v15 = vadd.s32 6, %v6004_v38 }
 0x168   : > { %4873 = vmatmul.mubr.msk.bf16.gmra.mrb[24].mxu0 %vm1431_vm9, %v5897_v29 }
 0x169   : > { %4876 = vmatprep.mubr.msk.bf16.mxu0 %vm1431_vm9, %v5900_v23 }
 0x170   : > { %4877 = vmatmul.mubr.msk.bf16.gmra.mrb[28].mxu0 %vm1431_vm9, %v1344_v60  ;;  %v5230_v60 = vld [vmem:[%s7162_s6 + $0x40] sm:$0xff]  }
 0x171   : > { %4880 = vmatprep.mubr.msk.bf16.mxu0 %vm1431_vm9, %v1381_v12  ;;  %v6083_v12 = vadd.s32 8, %v6004_v38  ;;  %4888 = vmatprep.subr.bf16.mxu1 %v5230_v60 }
 0x172   : > { %4889 = vmatpush3.bf16.msra.mxu1 %v5230_v60 }
 0x178   : > { %4881 = vmatmul.mubr.msk.bf16.gmra.mrb[32].mxu0 %vm1431_vm9, %v1884_v35  ;;  %v6109_v35 = vadd.s32 12, %v6004_v38 }
 0x20b   : > { %v4850_v39 = vpop.f32.mrb[0].mxu0 }
 0x20c   : > { %v2158_v40 = vmul.f32 %v4850_v39, %v6009_v36  ;;  %v1970_v41 = vpop.f32.mrb[1].mxu0 }
 0x20d   : > { %v2156_v43 = vmul.f32 %v6009_v36, %v1970_v41  ;;  %v4851_v45 = vpop.f32.mrb[2].mxu0 }
 0x20e   : > { %v2201_v46 = vadd.f32 %v6015_v48, %v2158_v40  ;;  %v2159_v16 = vmul.f32 %v4851_v45, %v6009_v36  ;;  %v1973_v63 = vpop.f32.mrb[3].mxu0  ;;  %v6118_v45 = vadd.s32 17, %v6004_v38 }
 0x20f   : > { %v2199_v52 = vadd.f32 %v6015_v48, %v2156_v43  ;;  %v2157_v53 = vmul.f32 %v6009_v36, %v1973_v63  ;;  %v6115_v43 = vadd.s32 14, %v6004_v38 }
 0x210   : > { %v2237_v54 = vmax.f32 %v2201_v46, 0.0  ;;  %v2202_v55 = vadd.f32 %v6015_v48, %v2159_v16 }
 0x211   : > { %v2235_v57 = vmax.f32 %v2199_v52, 0.0  ;;  %v2200_v58 = vadd.f32 %v6015_v48, %v2157_v53  ;;  %v5231_v52 = vld [vmem:[%s7162_s6 + $0x48] sm:$0xff]  }
 0x212   : > { %v2238_v61 = vmax.f32 %v2202_v55, 0.0  ;;  %v2383_v33 = vsel %vm6029_vm14, %v2237_v54, 0.0  ;;  %4890 = vmatprep.subr.bf16.mxu1 %v5231_v52 }
 0x213   : > { %v2236_v2 = vmax.f32 %v2200_v58, 0.0  ;;  %v4854_v4 = vpop.f32.mrb[4].mxu0  ;;  %v2381_v51 = vsel %vm6037_vm15, %v2235_v57, 0.0  ;;  %4891 = vmatpush3.bf16.msra.mxu1 %v5231_v52 }
 0x214   : > { %v2384_v9 = vsel %vm6029_vm14, %v2238_v61, 0.0  ;;  %v2162_v10 = vmul.f32 %v4854_v4, %v6009_v36  ;;  %v1986_v11 = vpop.f32.mrb[5].mxu0  ;;  %vm6094_vm14 = vmand %vm2294_vm0, %vm2312_vm1  ;;  %vm2298_vm0 = vcmp.ge.s32.totalorder %v6051_v13, 0  ;;  %vm2316_vm1 = vcmp.lt.s32.totalorder %v6051_v13, 20 }
 0x215   : > { %v2418_v20 = vpack.c.bf16 %v2384_v9, %v2383_v33  ;;  %v2382_v3 = vsel %vm6037_vm15, %v2236_v2, 0.0  ;;  %v2160_v14 = vmul.f32 %v6009_v36, %v1986_v11  ;;  %v4855_v21 = vpop.f32.mrb[6].mxu0  ;;  %vm6101_vm15 = vmand %vm2293_vm2, %vm2311_vm6  ;;  %v5232_v9 = vld [vmem:[%s7162_s6 + $0x50] sm:$0xff]   ;;  %vm2297_vm6 = vcmp.ge.s32.totalorder %v6059_v15, 0 }
 0x216   : > { %v6068_v29 = vpack.c.bf16 %v2382_v3, %v2381_v51  ;;  %v2205_v22 = vadd.f32 %v6015_v48, %v2162_v10  ;;  %v2163_v23 = vmul.f32 %v4855_v21, %v6009_v36  ;;  %v1989_v24 = vpop.f32.mrb[7].mxu0  ;;  %vm6158_vm2 = vmand %vm2296_vm10, %vm2314_vm11  ;;  %4892 = vmatprep.subr.bf16.mxu1 %v5232_v9 }
 0x217   : > { %v2443_v1 = vshrl.u32 %v2418_v20, 16  ;;  %v2203_v44 = vadd.f32 %v6015_v48, %v2160_v14  ;;  %v2161_v49 = vmul.f32 %v6009_v36, %v1989_v24  ;;  %v2446_v5 = vshll.u32 %v2418_v20, 16  ;;  %vm6173_vm10 = vmand %vm2295_vm12, %vm2313_vm13  ;;  %4893 = vmatpush3.bf16.msra.mxu1 %v5232_v9 }
 0x218   : > { %v2241_v27 = vmax.f32 %v2205_v22, 0.0  ;;  %v2206_v30 = vadd.f32 %v6015_v48, %v2163_v23  ;;  %v2436_v10 = vshrl.u32 %v6068_v29, 16  ;;  %vm6208_vm11 = vmand %vm2298_vm0, %vm2316_vm1  ;;  %vm2300_vm12 = vcmp.ge.s32.totalorder %v6073_v32, 0 }
 0x219   : > { %v2445_v34 = vrot.slane %v2443_v1, 7  ;;  %v2239_v8 = vmax.f32 %v2203_v44, 0.0  ;;  %v2204_v37 = vadd.f32 %v6015_v48, %v2161_v49  ;;  %vm2318_vm13 = vcmp.lt.s32.totalorder %v6073_v32, 20 }
 0x21a   : > { %v2242_v25 = vmax.f32 %v2206_v30, 0.0  ;;  %v2387_v46 = vsel %vm6094_vm14, %v2241_v27, 0.0  ;;  %vm2299_vm0 = vcmp.ge.s32.totalorder %v6083_v12, 0  ;;  %vm2317_vm1 = vcmp.lt.s32.totalorder %v6083_v12, 20 }
 0x21b   : > { %v2448_v39 = vor.u32 %v2446_v5, %v2445_v34  ;;  %v2240_v40 = vmax.f32 %v2204_v37, 0.0  ;;  %v4858_v41 = vpop.f32.mrb[8].mxu0  ;;  %v2385_v53 = vsel %vm6101_vm15, %v2239_v8, 0.0  ;;  %v6142_v62 = vsel %vm5430_vm3, %v2445_v34, 0 }
 0x21c   : > { %v2388_v16 = vsel %vm6094_vm14, %v2242_v25, 0.0  ;;  %v2166_v63 = vmul.f32 %v4858_v41, %v6009_v36  ;;  %v2002_v50 = vpop.f32.mrb[9].mxu0  ;;  %vm2315_vm14 = vcmp.lt.s32.totalorder %v6059_v15, 20  ;;  %v2653_v23 = vshll.u32 %v6142_v62, 16 }
 0x21d   : > { %v2420_v54 = vpack.c.bf16 %v2388_v16, %v2387_v46  ;;  %v2386_v55 = vsel %vm6101_vm15, %v2240_v40, 0.0  ;;  %v2164_v56 = vmul.f32 %v6009_v36, %v2002_v50  ;;  %v4859_v57 = vpop.f32.mrb[10].mxu0  ;;  %v6146_v0 = vsel %vm5430_vm3, 0, %v2448_v39  ;;  %vm6228_vm15 = vmand %vm2297_vm6, %vm2315_vm14 }
 0x21e   : > { %v2419_v58 = vpack.c.bf16 %v2386_v55, %v2385_v53  ;;  %v2209_v59 = vadd.f32 %v6015_v48, %v2166_v63  ;;  %v2167_v38 = vmul.f32 %v4859_v57, %v6009_v36  ;;  %v2005_v61 = vpop.f32.mrb[11].mxu0  ;;  %v2648_v44 = vshll.u32 %v6146_v0, 16 }
 0x21f   : > { %v2457_v2 = vshrl.u32 %v2420_v54, 16  ;;  %v2207_v4 = vadd.f32 %v6015_v48, %v2164_v56  ;;  %v2165_v33 = vmul.f32 %v6009_v36, %v2005_v61  ;;  %v2460_v24 = vshll.u32 %v2420_v54, 16 }
 0x220   : > { %v2450_v11 = vshrl.u32 %v2419_v58, 16  ;;  %v2245_v51 = vmax.f32 %v2209_v59, 0.0  ;;  %v2210_v3 = vadd.f32 %v6015_v48, %v2167_v38  ;;  %v2453_v47 = vshll.u32 %v2419_v58, 16 }
 0x221   : > { %v6163_v14 = vrot.slane %v2457_v2, 7  ;;  %v2243_v21 = vmax.f32 %v2207_v4, 0.0  ;;  %v2208_v22 = vadd.f32 %v6015_v48, %v2165_v33  ;;  %v2646_v5 = vshrl.u32 %v6146_v0, 16  ;;  %v6279_v33 = vld [vmem:[%s7162_s6] sm:$0xff]  }
 0x222   : > { %v2246_v1 = vmax.f32 %v2210_v3, 0.0  ;;  %v6178_v49 = vrot.slane %v2450_v11, 7  ;;  %v2391_v27 = vsel %vm6158_vm2, %v2245_v51, 0.0  ;;  %v2650_v18 = vrot.slane %v2648_v44, 1 }
 0x223   : > { %v2244_v30 = vmax.f32 %v2208_v22, 0.0  ;;  %v4862_v34 = vpop.f32.mrb[12].mxu0  ;;  %v2462_v6 = vor.u32 %v2460_v24, %v6163_v14  ;;  %v2389_v25 = vsel %vm6173_vm10, %v2243_v21, 0.0  ;;  %v2655_v52 = vrot.slane %v2653_v23, 1 }
 0x224   : > { %v2392_v7 = vsel %vm6158_vm2, %v2246_v1, 0.0  ;;  %v2170_v8 = vmul.f32 %v4862_v34, %v6009_v36  ;;  %v2018_v37 = vpop.f32.mrb[13].mxu0  ;;  %v2651_v50 = vor.u32 %v2650_v18, %v2646_v5  ;;  %v2439_v54 = vshll.u32 %v6068_v29, 16  ;;  %vm6293_vm2 = vmand %vm2300_vm12, %vm2318_vm13 }
 0x225   : > { %v2422_v39 = vpack.c.bf16 %v2392_v7, %v2391_v27  ;;  %v2390_v40 = vsel %vm6173_vm10, %v2244_v30, 0.0  ;;  %v2168_v41 = vmul.f32 %v6009_v36, %v2018_v37  ;;  %v4863_v46 = vpop.f32.mrb[14].mxu0  ;;  %v2455_v58 = vor.u32 %v2453_v47, %v6178_v49  ;;  %vm6314_vm12 = vmand %vm2299_vm0, %vm2317_vm1 }
 0x226   : > { %v2421_v16 = vpack.c.bf16 %v2390_v40, %v2389_v25  ;;  %v2213_v63 = vadd.f32 %v6015_v48, %v2170_v8  ;;  %v2021_v53 = vpop.f32.mrb[15].mxu0  ;;  %v2171_v57 = vmul.f32 %v4863_v46, %v6009_v36  ;;  %v2656_v61 = vsel %vm891_vm5, %v2651_v50, %v2655_v52 }
 0x227   : > { %v2471_v55 = vshrl.u32 %v2422_v39, 16  ;;  %v2211_v56 = vadd.f32 %v6015_v48, %v2168_v41  ;;  %v6200_v2 = vsel %vm5430_vm3, 0, %v2462_v6  ;;  %2827 = vrot.lane.b32.xlu0 %v2656_v61, %s5287_s25  ;;  %v2169_v11 = vmul.f32 %v6009_v36, %v2021_v53 }
 0x228   : > { %v2464_v59 = vshrl.u32 %v2421_v16, 16  ;;  %v2249_v38 = vmax.f32 %v2213_v63, 0.0  ;;  %v2214_v9 = vadd.f32 %v6015_v48, %v2171_v57  ;;  %v2474_v51 = vshll.u32 %v2422_v39, 16  ;;  %v5233_v39 = vld [vmem:[%s7162_s6 + $0x58] sm:$0xff]  }
 0x229   : > { %v6202_v4 = vrot.slane %v2471_v55, 7  ;;  %v2892_v3 = vrot.slane %v6146_v0, 1  ;;  %v2893_v13 = vrot.slane %v6142_v62, 1  ;;  %v2467_v21 = vshll.u32 %v2421_v16, 16  ;;  %4894 = vmatprep.subr.bf16.mxu1 %v5233_v39 }
 0x22a   : > { %v6217_v20 = vrot.slane %v2464_v59, 7  ;;  %v2247_v22 = vmax.f32 %v2211_v56, 0.0  ;;  %v2250_v23 = vmax.f32 %v2214_v9, 0.0  ;;  %v2212_v24 = vadd.f32 %v6015_v48, %v2169_v11  ;;  %4895 = vmatpush3.bf16.msra.mxu1 %v5233_v39 }
 0x22b   : > { %v4866_v47 = vpop.f32.mrb[16].mxu0  ;;  %v2395_v60 = vsel %vm6208_vm11, %v2249_v38, 0.0  ;;  %v2894_v44 = vsel %vm1180_vm4, %v2892_v3, %v2893_v13  ;;  %v6239_v30 = vsel %vm5430_vm3, %v6163_v14, 0  ;;  %v2476_v15 = vor.u32 %v2474_v51, %v6202_v4  ;;  %4928 = vmatprep.subr.bf16.mxu1 %v6279_v33 }
 0x22c   : > { %v2174_v62 = vmul.f32 %v4866_v47, %v6009_v36  ;;  %v2034_v27 = vpop.f32.mrb[17].mxu0  ;;  %v2396_v34 = vsel %vm6208_vm11, %v2250_v23, 0.0  ;;  %v2248_v5 = vmax.f32 %v2212_v24, 0.0  ;;  %2939 = vrot.lane.b32.xlu0 %v2894_v44, %s5286_s10  ;;  %v6248_v8 = vrot.slane %v2436_v10, 7 }
 0x22d   : > { %v2172_v6 = vmul.f32 %v6009_v36, %v2034_v27  ;;  %v4867_v7 = vpop.f32.mrb[18].mxu0  ;;  %v2469_v37 = vor.u32 %v2467_v21, %v6217_v20  ;;  %v2424_v18 = vpack.c.bf16 %v2396_v34, %v2395_v60  ;;  %v2393_v40 = vsel %vm6228_vm15, %v2247_v22, 0.0 }
 0x22e   : > { %v2217_v14 = vadd.f32 %v6015_v48, %v2174_v62  ;;  %v2037_v25 = vpop.f32.mrb[19].mxu0  ;;  %v2394_v41 = vsel %vm6228_vm15, %v2248_v5, 0.0  ;;  %v2672_v46 = vshll.u32 %v6200_v2, 16  ;;  %v2677_v10 = vshll.u32 %v6239_v30, 16 }
 0x22f   : > { %v6263_v16 = vsel %vm5430_vm3, 0, %v2455_v58  ;;  %v2485_v63 = vshrl.u32 %v2424_v18, 16  ;;  %v2423_v50 = vpack.c.bf16 %v2394_v41, %v2393_v40  ;;  %v2215_v52 = vadd.f32 %v6015_v48, %v2172_v6 }
 0x230   : > { %v6268_v53 = vsel %vm5430_vm3, 0, %v2476_v15  ;;  %v2670_v55 = vshrl.u32 %v6200_v2, 16  ;;  %v2674_v56 = vrot.slane %v2672_v46, 1  ;;  %v2175_v57 = vmul.f32 %v4867_v7, %v6009_v36 }
 0x231   : > { %v6274_v59 = vsel %vm5430_vm3, 0, %v2469_v37  ;;  %v2488_v58 = vshll.u32 %v2424_v18, 16  ;;  %v2478_v38 = vshrl.u32 %v2423_v50, 16  ;;  %v2253_v61 = vmax.f32 %v2217_v14, 0.0 }
 0x232   : > { %v2675_v9 = vor.u32 %v2674_v56, %v2670_v55  ;;  %v2679_v11 = vrot.slane %v2677_v10, 1  ;;  %v2218_v51 = vadd.f32 %v6015_v48, %v2175_v57  ;;  %v2617_v3 = vsel %vm5430_vm3, %v6178_v49, 0 }
 0x233   : > { %v4870_v13 = vpop.f32.mrb[20].mxu0  ;;  %v6285_v21 = vrot.slane %v2485_v63, 7  ;;  %v6287_v22 = vrot.slane %v2478_v38, 7  ;;  %v2251_v24 = vmax.f32 %v2215_v52, 0.0  ;;  %v2660_v47 = vshll.u32 %v6263_v16, 16 }
 0x234   : > { %vm2302_vm6 = vcmp.ge.s32.totalorder %v6087_v31, 0  ;;  %vm2320_vm14 = vcmp.lt.s32.totalorder %v6087_v31, 20  ;;  %v2050_v49 = vpop.f32.mrb[21].mxu0  ;;  %v2680_v60 = vsel %vm891_vm5, %v2675_v9, %v2679_v11  ;;  %v2254_v1 = vmax.f32 %v2218_v51, 0.0 }
 0x235   : > { %v2665_v44 = vshll.u32 %v2617_v3, 16  ;;  %v2173_v32 = vmul.f32 %v6009_v36, %v2037_v25  ;;  %v4871_v62 = vpop.f32.mrb[22].mxu0  ;;  %v2481_v27 = vshll.u32 %v2423_v50, 16  ;;  %2831 = vrot.lane.b32.xlu0 %v2680_v60, %s5287_s25  ;;  %v2658_v15 = vshrl.u32 %v6263_v16, 16  ;;  %vm6365_vm13 = vmand %vm2302_vm6, %vm2320_vm14 }
 0x236   : > { %v2662_v34 = vrot.slane %v2660_v47, 1  ;;  %v2898_v5 = vrot.slane %v6200_v2, 1  ;;  %vm2301_vm10 = vcmp.ge.s32.totalorder %v6090_v28, 0  ;;  %vm2319_vm11 = vcmp.lt.s32.totalorder %v6090_v28, 20  ;;  %v2053_v6 = vpop.f32.mrb[23].mxu0 }
 0x237   : > { %v2399_v7 = vsel %vm6293_vm2, %v2253_v61, 0.0  ;;  %v2400_v18 = vsel %vm6293_vm2, %v2254_v1, 0.0  ;;  %v2216_v14 = vadd.f32 %v6015_v48, %v2173_v32  ;;  %v2899_v25 = vrot.slane %v6239_v30, 1  ;;  %vm6380_vm15 = vmand %vm2301_vm10, %vm2319_vm11 }
 0x238   : > { %v2490_v39 = vor.u32 %v2488_v58, %v6285_v21  ;;  %v2426_v40 = vpack.c.bf16 %v2400_v18, %v2399_v7  ;;  %v2663_v41 = vor.u32 %v2662_v34, %v2658_v15  ;;  %v2667_v46 = vrot.slane %v2665_v44, 1 }
 0x239   : > { %v2483_v10 = vor.u32 %v2481_v27, %v6287_v22  ;;  %v2252_v63 = vmax.f32 %v2216_v14, 0.0  ;;  %v2900_v12 = vsel %vm1180_vm4, %v2898_v5, %v2899_v25  ;;  %v2178_v50 = vmul.f32 %v4870_v13, %v6009_v36 }
 0x23a   : > { %v2397_v52 = vsel %vm6314_vm12, %v2251_v24, 0.0  ;;  %v2668_v55 = vsel %vm891_vm5, %v2663_v41, %v2667_v46  ;;  %2943 = vrot.lane.b32.xlu0 %v2900_v12, %s5286_s10  ;;  %v2895_v30 = vrot.slane %v6263_v16, 1  ;;  %v2176_v56 = vmul.f32 %v6009_v36, %v2050_v49 }
 0x23b   : > { %v2499_v57 = vshrl.u32 %v2426_v40, 16  ;;  %2829 = vrot.lane.b32.xlu1 %v2668_v55, %s5287_s25  ;;  %v2398_v58 = vsel %vm6314_vm12, %v2252_v63, 0.0  ;;  %v2221_v38 = vadd.f32 %v6015_v48, %v2178_v50  ;;  %v6339_v61 = vsel %vm5430_vm3, %v6202_v4, 0  ;;  %v4874_v9 = vpop.f32.mrb[24].mxu0 }
 0x23c   : > { %v6343_v11 = vsel %vm5430_vm3, 0, %v2490_v39  ;;  %v2425_v51 = vpack.c.bf16 %v2398_v58, %v2397_v52  ;;  %v2896_v13 = vrot.slane %v2617_v3, 1  ;;  %v2219_v23 = vadd.f32 %v6015_v48, %v2176_v56  ;;  %v2066_v24 = vpop.f32.mrb[25].mxu0 }
 0x23d   : > { %v6348_v47 = vsel %vm5430_vm3, 0, %v2483_v10  ;;  %v2696_v49 = vshll.u32 %v6268_v53, 16  ;;  %v2701_v60 = vshll.u32 %v6339_v61, 16  ;;  %v2179_v4 = vmul.f32 %v4871_v62, %v6009_v36  ;;  %v6353_v1 = vpop.f32.mrb[26].mxu0 }
 0x23e   : > { %v2502_v44 = vshll.u32 %v2426_v40, 16  ;;  %v2492_v32 = vshrl.u32 %v2425_v51, 16  ;;  %v2897_v27 = vsel %vm1180_vm4, %v2895_v30, %v2896_v13  ;;  %v2257_v3 = vmax.f32 %v2221_v38, 0.0  ;;  %v6356_v15 = vpop.f32.mrb[27].mxu0 }
 0x23f   : > { %v6358_v34 = vrot.slane %v2499_v57, 7  ;;  %2941 = vrot.lane.b32.xlu1 %v2897_v27, %s5286_s10  ;;  %v2694_v62 = vshrl.u32 %v6268_v53, 16  ;;  %v2698_v7 = vrot.slane %v2696_v49, 1  ;;  %v2222_v37 = vadd.f32 %v6015_v48, %v2179_v4 }
 0x240   : > { %v2495_v18 = vshll.u32 %v2425_v51, 16  ;;  %v2255_v14 = vmax.f32 %v2219_v23, 0.0  ;;  %v2703_v25 = vrot.slane %v2701_v60, 1  ;;  %v2619_v39 = vsel %vm5430_vm3, %v6217_v20, 0 }
 0x241   : > { %v6374_v40 = vrot.slane %v2492_v32, 7  ;;  %v2699_v41 = vor.u32 %v2698_v7, %v2694_v62  ;;  %v2258_v46 = vmax.f32 %v2222_v37, 0.0  ;;  %v2684_v10 = vshll.u32 %v6274_v59, 16 }
 0x242   : > { %vm2304_vm0 = vcmp.ge.s32.totalorder %v6106_v26, 0  ;;  %vm2322_vm1 = vcmp.lt.s32.totalorder %v6106_v26, 20  ;;  %v2403_v20 = vsel %vm6365_vm13, %v2257_v3, 0.0  ;;  %v2682_v63 = vshrl.u32 %v6274_v59, 16 }
 0x243   : > { %v2689_v12 = vshll.u32 %v2619_v39, 16  ;;  %v2177_v28 = vmul.f32 %v6009_v36, %v2053_v6  ;;  %v2704_v50 = vsel %vm891_vm5, %v2699_v41, %v2703_v25  ;;  %v2404_v52 = vsel %vm6365_vm13, %v2258_v46, 0.0  ;;  %v6397_v56 = vpop.f32.mrb[28].mxu0  ;;  %vm6454_vm14 = vmand %vm2304_vm0, %vm2322_vm1 }
 0x244   : > { %v2686_v55 = vrot.slane %v2684_v10, 1  ;;  %v2904_v30 = vrot.slane %v6268_v53, 1  ;;  %vm2303_vm2 = vcmp.ge.s32.totalorder %v6109_v35, 0  ;;  %vm2321_vm6 = vcmp.lt.s32.totalorder %v6109_v35, 20  ;;  %2835 = vrot.lane.b32.xlu0 %v2704_v50, %s5287_s25  ;;  %v6404_v51 = vpop.f32.mrb[29].mxu0 }
 0x245   : > { %v2504_v57 = vor.u32 %v2502_v44, %v6358_v34  ;;  %v2401_v58 = vsel %vm6380_vm15, %v2255_v14, 0.0  ;;  %v2428_v6 = vpack.c.bf16 %v2404_v52, %v2403_v20  ;;  %v2220_v38 = vadd.f32 %v6015_v48, %v2177_v28  ;;  %v6408_v4 = vpop.f32.mrb[30].mxu0  ;;  %vm6471_vm12 = vmand %vm2303_vm2, %vm2321_vm6 }
 0x246   : > { %v2497_v13 = vor.u32 %v2495_v18, %v6374_v40  ;;  %v2687_v23 = vor.u32 %v2686_v55, %v2682_v63  ;;  %v2691_v49 = vrot.slane %v2689_v12, 1  ;;  %v2905_v60 = vrot.slane %v6339_v61, 1  ;;  %v6412_v5 = vpop.f32.mrb[31].mxu0 }
 0x247   : > { %v2513_v32 = vshrl.u32 %v2428_v6, 16  ;;  %v2256_v44 = vmax.f32 %v2220_v38, 0.0  ;;  %v2901_v27 = vrot.slane %v6274_v59, 1  ;;  %v2182_v3 = vmul.f32 %v4874_v9, %v6009_v36 }
 0x248   : > { %v2692_v62 = vsel %vm891_vm5, %v2687_v23, %v2691_v49  ;;  %v2906_v7 = vsel %vm1180_vm4, %v2904_v30, %v2905_v60  ;;  %v2180_v37 = vmul.f32 %v6009_v36, %v2066_v24  ;;  %v2622_v61 = vsel %vm5430_vm3, %v6285_v21, 0 }
 0x249   : > { %v6420_v18 = vrot.slane %v2513_v32, 7  ;;  %2833 = vrot.lane.b32.xlu1 %v2692_v62, %s5287_s25  ;;  %v2402_v14 = vsel %vm6380_vm15, %v2256_v44, 0.0  ;;  %2947 = vrot.lane.b32.xlu0 %v2906_v7, %s5286_s10  ;;  %v2902_v9 = vrot.slane %v2619_v39, 1  ;;  %v2225_v25 = vadd.f32 %v6015_v48, %v2182_v3 }
 0x24a   : > { %v2427_v41 = vpack.c.bf16 %v2402_v14, %v2401_v58  ;;  %v2223_v46 = vadd.f32 %v6015_v48, %v2180_v37  ;;  %v2720_v24 = vshll.u32 %v6343_v11, 16  ;;  %v2725_v10 = vshll.u32 %v2622_v61, 16 }
 0x24b   : > { %v2516_v20 = vshll.u32 %v2428_v6, 16  ;;  %v2903_v21 = vsel %vm1180_vm4, %v2901_v27, %v2902_v9  ;;  %v2718_v63 = vshrl.u32 %v6343_v11, 16  ;;  %v2183_v31 = vmul.f32 %v6353_v1, %v6009_v36  ;;  %v6438_v52 = vpop.f32.mrb[32].mxu0 }
 0x24c   : > { %v2506_v12 = vshrl.u32 %v2427_v41, 16  ;;  %v2261_v28 = vmax.f32 %v2225_v25, 0.0  ;;  %v2722_v50 = vrot.slane %v2720_v24, 1  ;;  %v6436_v39 = vsel %vm5430_vm3, %v6287_v22, 0 }
 0x24d   : > { %v6442_v55 = vsel %vm5430_vm3, 0, %v2504_v57  ;;  %v6446_v30 = vsel %vm5430_vm3, 0, %v2497_v13  ;;  %v2518_v1 = vor.u32 %v2516_v20, %v6420_v18  ;;  %2945 = vrot.lane.b32.xlu1 %v2903_v21, %s5286_s10  ;;  %v2226_v58 = vadd.f32 %v6015_v48, %v2183_v31  ;;  %v6459_v57 = vpop.f32.mrb[33].mxu0 }
 0x24e   : > { %v6461_v6 = vrot.slane %v2506_v12, 7  ;;  %v2259_v38 = vmax.f32 %v2223_v46, 0.0  ;;  %v2723_v13 = vor.u32 %v2722_v50, %v2718_v63  ;;  %v2727_v23 = vrot.slane %v2725_v10, 1  ;;  %v6465_v49 = vpop.f32.mrb[34].mxu0 }
 0x24f   : > { %vm2306_vm10 = vcmp.ge.s32.totalorder %v6112_v42, 0  ;;  %vm2324_vm11 = vcmp.lt.s32.totalorder %v6112_v42, 20  ;;  %v2262_v60 = vmax.f32 %v2226_v58, 0.0  ;;  %v2708_v32 = vshll.u32 %v6348_v47, 16  ;;  %v6479_v3 = vpop.f32.mrb[35].mxu0 }
 0x250   : > { %v2713_v44 = vshll.u32 %v6436_v39, 16  ;;  %v2181_v27 = vmul.f32 %v6009_v36, %v6356_v15  ;;  %v2509_v62 = vshll.u32 %v2427_v41, 16  ;;  %v2407_v7 = vsel %vm6454_vm14, %v2261_v28, 0.0  ;;  %vm6530_vm0 = vmand %vm2306_vm10, %vm2324_vm11 }
 0x251   : > { %v2728_v35 = vsel %vm891_vm5, %v2723_v13, %v2727_v23  ;;  %v2910_v37 = vrot.slane %v6343_v11, 1  ;;  %vm2305_vm13 = vcmp.ge.s32.totalorder %v6115_v43, 0  ;;  %vm2323_vm15 = vcmp.lt.s32.totalorder %v6115_v43, 20 }
 0x252   : > { %2839 = vrot.lane.b32.xlu0 %v2728_v35, %s5287_s25  ;;  %v2408_v14 = vsel %vm6454_vm14, %v2262_v60, 0.0  ;;  %v2706_v15 = vshrl.u32 %v6348_v47, 16  ;;  %v2710_v9 = vrot.slane %v2708_v32, 1  ;;  %v2224_v25 = vadd.f32 %v6015_v48, %v2181_v27  ;;  %vm6546_vm1 = vmand %vm2305_vm13, %vm2323_vm15 }
 0x253   : > { %v2511_v41 = vor.u32 %v2509_v62, %v6461_v6  ;;  %v2405_v46 = vsel %vm6471_vm12, %v2259_v38, 0.0  ;;  %v2430_v24 = vpack.c.bf16 %v2408_v14, %v2407_v7  ;;  %v2911_v10 = vrot.slane %v2622_v61, 1 }
 0x254   : > { %v2711_v20 = vor.u32 %v2710_v9, %v2706_v15  ;;  %v2715_v21 = vrot.slane %v2713_v44, 1  ;;  %v2260_v63 = vmax.f32 %v2224_v25, 0.0  ;;  %v2186_v31 = vmul.f32 %v6397_v56, %v6009_v36 }
 0x255   : > { %v2912_v12 = vsel %vm1180_vm4, %v2910_v37, %v2911_v10  ;;  %v2907_v28 = vrot.slane %v6348_v47, 1  ;;  %v2184_v50 = vmul.f32 %v6009_v36, %v6404_v51  ;;  %v2624_v22 = vsel %vm5430_vm3, %v6358_v34, 0 }
 0x256   : > { %v2527_v58 = vshrl.u32 %v2430_v24, 16  ;;  %v2716_v61 = vsel %vm891_vm5, %v2711_v20, %v2715_v21  ;;  %v2406_v38 = vsel %vm6471_vm12, %v2260_v63, 0.0  ;;  %2951 = vrot.lane.b32.xlu0 %v2912_v12, %s5286_s10  ;;  %v2229_v56 = vadd.f32 %v6015_v48, %v2186_v31 }
 0x257   : > { %v6511_v13 = vsel %vm5430_vm3, 0, %v2518_v1  ;;  %2837 = vrot.lane.b32.xlu1 %v2716_v61, %s5287_s25  ;;  %v2429_v51 = vpack.c.bf16 %v2406_v38, %v2405_v46  ;;  %v2908_v23 = vrot.slane %v6436_v39, 1  ;;  %v2227_v34 = vadd.f32 %v6015_v48, %v2184_v50 }
 0x258   : > { %v6518_v60 = vsel %vm5430_vm3, 0, %v2511_v41  ;;  %v2744_v26 = vshll.u32 %v6442_v55, 16  ;;  %v2749_v32 = vshll.u32 %v2624_v22, 16  ;;  %v2187_v44 = vmul.f32 %v6408_v4, %v6009_v36 }
 0x259   : > { %v2530_v27 = vshll.u32 %v2430_v24, 16  ;;  %v2520_v1 = vshrl.u32 %v2429_v51, 16  ;;  %v2909_v62 = vsel %vm1180_vm4, %v2907_v28, %v2908_v23  ;;  %v2265_v7 = vmax.f32 %v2229_v56, 0.0 }
 0x25a   : > { %v6524_v35 = vrot.slane %v2527_v58, 7  ;;  %v2742_v37 = vshrl.u32 %v6442_v55, 16  ;;  %v2746_v14 = vrot.slane %v2744_v26, 1  ;;  %v2230_v4 = vadd.f32 %v6015_v48, %v2187_v44 }
 0x25b   : > { %v2523_v15 = vshll.u32 %v2429_v51, 16  ;;  %2949 = vrot.lane.b32.xlu1 %v2909_v62, %s5286_s10  ;;  %v2263_v9 = vmax.f32 %v2227_v34, 0.0  ;;  %v2751_v25 = vrot.slane %v2749_v32, 1  ;;  %v2623_v41 = vsel %vm5430_vm3, %v6374_v40, 0 }
 0x25c   : > { %v6540_v46 = vrot.slane %v2520_v1, 7  ;;  %v2747_v24 = vor.u32 %v2746_v14, %v2742_v37  ;;  %v2266_v10 = vmax.f32 %v2230_v4, 0.0  ;;  %v2732_v20 = vshll.u32 %v6446_v30, 16 }
 0x25d   : > { %vm2308_vm2 = vcmp.ge.s32.totalorder %v6118_v45, 0  ;;  %vm2326_vm6 = vcmp.lt.s32.totalorder %v6118_v45, 20  ;;  %v2411_v40 = vsel %vm6530_vm0, %v2265_v7, 0.0  ;;  %v2730_v21 = vshrl.u32 %v6446_v30, 16 }
 0x25e   : > { %v2737_v63 = vshll.u32 %v2623_v41, 16  ;;  %v2185_v43 = vmul.f32 %v6009_v36, %v6412_v5  ;;  %v2752_v31 = vsel %vm891_vm5, %v2747_v24, %v2751_v25  ;;  %v2412_v12 = vsel %vm6530_vm0, %v2266_v10, 0.0  ;;  %vm6614_vm11 = vmand %vm2308_vm2, %vm2326_vm6 }
 0x25f   : > { %v2734_v28 = vrot.slane %v2732_v20, 1  ;;  %v2916_v50 = vrot.slane %v6442_v55, 1  ;;  %vm2307_vm14 = vcmp.ge.s32.totalorder %v6126_v19, 0  ;;  %vm2325_vm10 = vcmp.lt.s32.totalorder %v6126_v19, 20  ;;  %2843 = vrot.lane.b32.xlu0 %v2752_v31, %s5287_s25 }
 0x260   : > { %v2532_v58 = vor.u32 %v2530_v27, %v6524_v35  ;;  %v2409_v61 = vsel %vm6546_vm1, %v2263_v9, 0.0  ;;  %v2432_v5 = vpack.c.bf16 %v2412_v12, %v2411_v40  ;;  %v2228_v38 = vadd.f32 %v6015_v48, %v2185_v43  ;;  %vm6624_vm12 = vmand %vm2307_vm14, %vm2325_vm10 }
 0x261   : > { %v2525_v56 = vor.u32 %v2523_v15, %v6540_v46  ;;  %v2735_v51 = vor.u32 %v2734_v28, %v2730_v21  ;;  %v2739_v23 = vrot.slane %v2737_v63, 1  ;;  %v2917_v34 = vrot.slane %v2624_v22, 1 }
 0x262   : > { %v2541_v26 = vshrl.u32 %v2432_v5, 16  ;;  %v2264_v32 = vmax.f32 %v2228_v38, 0.0  ;;  %v2913_v44 = vrot.slane %v6446_v30, 1  ;;  %v2190_v27 = vmul.f32 %v6438_v52, %v6009_v36 }
 0x263   : > { %v2740_v1 = vsel %vm891_vm5, %v2735_v51, %v2739_v23  ;;  %v2918_v62 = vsel %vm1180_vm4, %v2916_v50, %v2917_v34  ;;  %v2188_v7 = vmul.f32 %v6009_v36, %v6459_v57  ;;  %v2626_v39 = vsel %vm5430_vm3, %v6420_v18, 0 }
 0x264   : > { %v6580_v37 = vrot.slane %v2541_v26, 7  ;;  %2841 = vrot.lane.b32.xlu1 %v2740_v1, %s5287_s25  ;;  %v2410_v22 = vsel %vm6546_vm1, %v2264_v32, 0.0  ;;  %2955 = vrot.lane.b32.xlu0 %v2918_v62, %s5286_s10  ;;  %v2914_v52 = vrot.slane %v2623_v41, 1  ;;  %v2233_v14 = vadd.f32 %v6015_v48, %v2190_v27 }
 0x265   : > { %v2431_v4 = vpack.c.bf16 %v2410_v22, %v2409_v61  ;;  %v2231_v15 = vadd.f32 %v6015_v48, %v2188_v7  ;;  %v2768_v57 = vshll.u32 %v6511_v13, 16  ;;  %v2773_v9 = vshll.u32 %v2626_v39, 16 }
 0x266   : > { %v2544_v25 = vshll.u32 %v2432_v5, 16  ;;  %v2915_v18 = vsel %vm1180_vm4, %v2913_v44, %v2914_v52  ;;  %v2766_v24 = vshrl.u32 %v6511_v13, 16  ;;  %v2191_v42 = vmul.f32 %v6465_v49, %v6009_v36 }
 0x267   : > { %v2534_v10 = vshrl.u32 %v2431_v4, 16  ;;  %v2269_v20 = vmax.f32 %v2233_v14, 0.0  ;;  %v2770_v40 = vrot.slane %v2768_v57, 1  ;;  %v2625_v41 = vsel %vm5430_vm3, %v6461_v6, 0 }
 0x268   : > { %v6599_v21 = vor.u32 %v2439_v54, %v6248_v8  ;;  %v6603_v63 = vsel %vm5430_vm3, 0, %v2532_v58  ;;  %v6607_v43 = vsel %vm5430_vm3, 0, %v2525_v56  ;;  %2953 = vrot.lane.b32.xlu1 %v2915_v18, %s5286_s10  ;;  %v2234_v29 = vadd.f32 %v6015_v48, %v2191_v42 }
 0x269   : > { %v2546_v54 = vor.u32 %v2544_v25, %v6580_v37  ;;  %v2267_v49 = vmax.f32 %v2231_v15, 0.0  ;;  %v2771_v31 = vor.u32 %v2770_v40, %v2766_v24  ;;  %v2775_v12 = vrot.slane %v2773_v9, 1 }
 0x26a   : > { %v2270_v45 = vmax.f32 %v2234_v29, 0.0  ;;  %v2756_v50 = vshll.u32 %v6518_v60, 16  ;;  %v2761_v58 = vshll.u32 %v2625_v41, 16  ;;  %v2189_v61 = vmul.f32 %v6009_v36, %v6479_v3 }
 0x26b   : > { %v2536_v5 = vrot.slane %v2534_v10, 7  ;;  %v2415_v38 = vsel %vm6614_vm11, %v2269_v20, 0.0  ;;  %v2776_v56 = vsel %vm891_vm5, %v2771_v31, %v2775_v12  ;;  %v2922_v51 = vrot.slane %v6511_v13, 1 }
 0x26c   : > { %2847 = vrot.lane.b32.xlu0 %v2776_v56, %s5287_s25  ;;  %v2416_v19 = vsel %vm6614_vm11, %v2270_v45, 0.0  ;;  %v2754_v23 = vshrl.u32 %v6518_v60, 16  ;;  %v2758_v34 = vrot.slane %v2756_v50, 1  ;;  %v2232_v26 = vadd.f32 %v6015_v48, %v2189_v61 }
 0x26d   : > { %v2537_v32 = vshll.u32 %v2431_v4, 16  ;;  %v2413_v36 = vsel %vm6624_vm12, %v2267_v49, 0.0  ;;  %v2434_v3 = vpack.c.bf16 %v2416_v19, %v2415_v38  ;;  %v2923_v44 = vrot.slane %v2626_v39, 1 }
 0x26e   : > { %v2759_v27 = vor.u32 %v2758_v34, %v2754_v23  ;;  %v2763_v1 = vrot.slane %v2761_v58, 1  ;;  %v2268_v62 = vmax.f32 %v2232_v26, 0.0  ;;  %v2628_v7 = vsel %vm5430_vm3, %v6524_v35, 0 }
 0x26f   : > { %v2539_v22 = vor.u32 %v2537_v32, %v2536_v5  ;;  %v2924_v52 = vsel %vm1180_vm4, %v2922_v51, %v2923_v44  ;;  %v2919_v14 = vrot.slane %v6518_v60, 1  ;;  %v2792_v48 = vshll.u32 %v6603_v63, 16 }
 0x270   : > { %v2555_v4 = vshrl.u32 %v2434_v3, 16  ;;  %v2764_v15 = vsel %vm891_vm5, %v2759_v27, %v2763_v1  ;;  %v2414_v39 = vsel %vm6624_vm12, %v2268_v62, 0.0  ;;  %2959 = vrot.lane.b32.xlu0 %v2924_v52, %s5286_s10  ;;  %v2797_v57 = vshll.u32 %v2628_v7, 16 }
 0x271   : > { %2845 = vrot.lane.b32.xlu1 %v2764_v15, %s5287_s25  ;;  %v2433_v9 = vpack.c.bf16 %v2414_v39, %v2413_v36  ;;  %v2790_v35 = vshrl.u32 %v6603_v63, 16  ;;  %v2794_v25 = vrot.slane %v2792_v48, 1  ;;  %v2627_v18 = vsel %vm5430_vm3, %v6540_v46, 0 }
 0x272   : > { %v6659_v24 = vsel %vm5430_vm3, 0, %v2546_v54  ;;  %v2920_v42 = vrot.slane %v2625_v41, 1  ;;  %v2780_v10 = vshll.u32 %v6607_v43, 16  ;;  %v2785_v20 = vshll.u32 %v2627_v18, 16 }
 0x273   : > { %v6664_v40 = vsel %vm5430_vm3, 0, %v2539_v22  ;;  %v2548_v6 = vshrl.u32 %v2433_v9, 16  ;;  %v2795_v29 = vor.u32 %v2794_v25, %v2790_v35  ;;  %v2799_v49 = vrot.slane %v2797_v57, 1 }
 0x274   : > { %v2921_v31 = vsel %vm1180_vm4, %v2919_v14, %v2920_v42  ;;  %v2778_v12 = vshrl.u32 %v6607_v43, 16  ;;  %v2782_v46 = vrot.slane %v2780_v10, 1  ;;  %v2928_v28 = vrot.slane %v6603_v63, 1 }
 0x275   : > { %v2557_v54 = vrot.slane %v2555_v4, 7  ;;  %v2550_v45 = vrot.slane %v2548_v6, 7  ;;  %v2551_v41 = vshll.u32 %v2433_v9, 16  ;;  %2957 = vrot.lane.b32.xlu1 %v2921_v31, %s5286_s10  ;;  %v2800_v50 = vsel %vm891_vm5, %v2795_v29, %v2799_v49 }
 0x276   : > { %2851 = vrot.lane.b32.xlu0 %v2800_v50, %s5287_s25  ;;  %v2783_v58 = vor.u32 %v2782_v46, %v2778_v12  ;;  %v2787_v61 = vrot.slane %v2785_v20, 1  ;;  %v2929_v38 = vrot.slane %v2628_v7, 1  ;;  %v6675_v56 = vsel %vm5430_vm3, %v6580_v37, 0 }
 0x277   : > { %v2558_v51 = vshll.u32 %v2434_v3, 16  ;;  %v2553_v19 = vor.u32 %v2551_v41, %v2550_v45  ;;  %v2816_v23 = vshll.u32 %v6659_v24, 16  ;;  %v2821_v34 = vshll.u32 %v6675_v56, 16 }
 0x278   : > { %v2788_v26 = vsel %vm891_vm5, %v2783_v58, %v2787_v61  ;;  %v2930_v32 = vsel %vm1180_vm4, %v2928_v28, %v2929_v38  ;;  %v2925_v36 = vrot.slane %v6607_v43, 1  ;;  %v2629_v44 = vsel %vm5430_vm3, %v2536_v5, 0 }
 0x279   : > { %v6686_v27 = vsel %vm5430_vm3, 0, %v2553_v19  ;;  %2849 = vrot.lane.b32.xlu1 %v2788_v26, %s5287_s25  ;;  %v2814_v37 = vshrl.u32 %v6659_v24, 16  ;;  %v2818_v3 = vrot.slane %v2816_v23, 1  ;;  %v2804_v1 = vshll.u32 %v6664_v40, 16 }
 0x27a   : > { %v2560_v62 = vor.u32 %v2558_v51, %v2557_v54  ;;  %2963 = vrot.lane.b32.xlu0 %v2930_v32, %s5286_s10  ;;  %v2926_v7 = vrot.slane %v2627_v18, 1  ;;  %v2802_v22 = vshrl.u32 %v6664_v40, 16  ;;  %v2809_v52 = vshll.u32 %v2629_v44, 16 }
 0x27b   : > { %v2819_v14 = vor.u32 %v2818_v3, %v2814_v37  ;;  %v2823_v5 = vrot.slane %v2821_v34, 1  ;;  %v2806_v48 = vrot.slane %v2804_v1, 1  ;;  %v2631_v4 = vsel %vm5430_vm3, %v2550_v45, 0 }
 0x27c   : > { %v6698_v15 = vsel %vm5430_vm3, 0, %v6599_v21  ;;  %v2927_v39 = vsel %vm1180_vm4, %v2925_v36, %v2926_v7  ;;  %v3048_v57 = vshll.u32 %v6686_v27, 16  ;;  %v2811_v25 = vrot.slane %v2809_v52, 1 }
 0x27d   : > { %2961 = vrot.lane.b32.xlu1 %v2927_v39, %s5286_s10  ;;  %v2824_v9 = vsel %vm891_vm5, %v2819_v14, %v2823_v5  ;;  %v2807_v35 = vor.u32 %v2806_v48, %v2802_v22  ;;  %v3053_v18 = vshll.u32 %v2631_v4, 16  ;;  %v3046_v42 = vshrl.u32 %v6686_v27, 16 }
 0x27e   : > { %2855 = vrot.lane.b32.xlu0 %v2824_v9, %s5287_s25  ;;  %v3050_v10 = vrot.slane %v3048_v57, 1  ;;  %v2615_v21 = vsel %vm5430_vm3, %v6248_v8, 0  ;;  %v6711_v20 = vsel %vm5430_vm3, 0, %v2560_v62  ;;  %v2931_v29 = vrot.slane %v6664_v40, 1 }
 0x27f   : > { %v2812_v6 = vsel %vm891_vm5, %v2807_v35, %v2811_v25  ;;  %v2636_v49 = vshll.u32 %v6698_v15, 16  ;;  %v3055_v12 = vrot.slane %v3053_v18, 1  ;;  %v2641_v46 = vshll.u32 %v2615_v21, 16 }
 0x280   : > { %v3051_v31 = vor.u32 %v3050_v10, %v3046_v42  ;;  %v2932_v28 = vrot.slane %v2629_v44, 1  ;;  %v2634_v45 = vshrl.u32 %v6698_v15, 16  ;;  %v2632_v8 = vsel %vm5430_vm3, %v2557_v54, 0  ;;  %v5235_v10 = vld [vmem:[%s7162_s6 + $0x8] sm:$0xff]  }
 0x281   : > { %2853 = vrot.lane.b32.xlu1 %v2812_v6, %s5287_s25  ;;  %v2638_v41 = vrot.slane %v2636_v49, 1  ;;  %v3514_v58 = vshll.u32 %v6711_v20, 16  ;;  %v2934_v38 = vrot.slane %v6659_v24, 1  ;;  %v2643_v19 = vrot.slane %v2641_v46, 1  ;;  %v5238_v46 = vld [vmem:[%s7162_s6 + $0x20] sm:$0xff]  }
 0x282   : > { %v3056_v50 = vsel %vm891_vm5, %v3051_v31, %v3055_v12  ;;  %v2933_v61 = vsel %vm1180_vm4, %v2931_v29, %v2932_v28  ;;  %v3512_v23 = vshrl.u32 %v6711_v20, 16  ;;  %v3519_v26 = vshll.u32 %v2632_v8, 16  ;;  %v5237_v29 = vld [vmem:[%s7162_s6 + $0x18] sm:$0xff]  }
 0x283   : > { %3057 = vrot.lane.b32.xlu0 %v3056_v50, %s5287_s25  ;;  %v2639_v51 = vor.u32 %v2638_v41, %v2634_v45  ;;  %v3516_v34 = vrot.slane %v3514_v58, 1  ;;  %v2935_v17 = vrot.slane %v6675_v56, 1  ;;  %v3061_v44 = vrot.slane %v6686_v27, 1 }
 0x284   : > { %v3521_v37 = vrot.slane %v3519_v26, 1  ;;  %v3062_v3 = vrot.slane %v2631_v4, 1  ;;  %v2889_v56 = vrot.slane %v6698_v15, 1  ;;  %v2890_v7 = vrot.slane %v2615_v21, 1 }
 0x285   : > { %2965 = vrot.lane.b32.xlu1 %v2933_v61, %s5286_s10  ;;  %v2644_v54 = vsel %vm891_vm5, %v2639_v51, %v2643_v19  ;;  %v3517_v32 = vor.u32 %v3516_v34, %v3512_v23  ;;  %v2936_v36 = vsel %vm1180_vm4, %v2934_v38, %v2935_v17  ;;  %v3527_v52 = vrot.slane %v6711_v20, 1 }
 0x286   : > { %v3063_v62 = vsel %vm1180_vm4, %v3061_v44, %v3062_v3  ;;  %v2891_v22 = vsel %vm1180_vm4, %v2889_v56, %v2890_v7  ;;  %v3528_v14 = vrot.slane %v2632_v8, 1 }
 0x287   : > { %2825 = vrot.lane.b32.xlu0 %v2644_v54, %s5287_s25  ;;  %v3522_v1 = vsel %vm891_vm5, %v3517_v32, %v3521_v37  ;;  %vm4114_vm5 = vcmask 257024  }
 0x288   : > { %v3529_v5 = vsel %vm1180_vm4, %v3527_v52, %v3528_v14 }
 0x289   : > { %2967 = vrot.lane.b32.xlu1 %v2936_v36, %s5286_s10 }
 0x28b   : > { %3523 = vrot.lane.b32.xlu0 %v3522_v1, %s5287_s25 }
 0x28d   : > { %3064 = vrot.lane.b32.xlu1 %v3063_v62, %s5286_s10 }
 0x291   : > { %2937 = vrot.lane.b32.xlu1 %v2891_v22, %s5286_s10 }
 0x295   : > { %3530 = vrot.lane.b32.xlu1 %v3529_v5, %s5286_s10  ;;  %s6975_s10 = scalar_lea.vmem %s7165_s9, %s4308_s21 }
 0x299   : > { %v2828_v48 = vpop.permute.xlu0 %2827 }
 0x29a   : > { %v2972_v4 = vsel %vm1271_vm7, %v6146_v0, %v2828_v48 }
 0x29e   : > { %v2940_v39 = vpop.permute.xlu0 %2939 }
 0x29f   : > { %v6746_v57 = vsel %vm1308_vm8, %v2972_v4, %v2940_v39 }
 0x2a0   : > { %4896 = vmatprep.mubr.msk.bf16.mxu1 %vm1431_vm9, %v6746_v57 }
 0x2a7   : > { %v2832_v9 = vpop.permute.xlu0 %2831 }
 0x2a8   : > { %v2976_v0 = vsel %vm1271_vm7, %v6200_v2, %v2832_v9 }
 0x2ac   : > { %v2944_v25 = vpop.permute.xlu0 %2943 }
 0x2ad   : > { %v2830_v35 = vpop.permute.xlu1 %2829  ;;  %v6761_v6 = vsel %vm1308_vm8, %v2976_v0, %v2944_v25 }
 0x2ae   : > { %v2974_v18 = vsel %vm1271_vm7, %v6263_v16, %v2830_v35  ;;  %v5236_v16 = vld [vmem:[%s7162_s6 + $0x10] sm:$0xff]  }
 0x2b1   : > { %v2942_v42 = vpop.permute.xlu1 %2941 }
 0x2b2   : > { %v6758_v21 = vsel %vm1308_vm8, %v2974_v18, %v2942_v42 }
 0x2b3   : > { %4897 = vmatmul.mubr.msk.bf16.vlgmr.msra.gmra.mrb[0].mxu1 %vm1431_vm9, %v6758_v21 }
 0x2b4   : > { %4929 = vmatpush3.bf16.msra.mxu1 %v6279_v33  ;;  %4900 = vmatprep.mubr.msk.bf16.mxu1 %vm1431_vm9, %v6761_v6 }
 0x2b5   : > { %4930 = vmatprep.subr.bf16.mxu1 %v5235_v10 }
 0x2b6   : > { %v2836_v2 = vpop.permute.xlu0 %2835 }
 0x2b7   : > { %v2980_v28 = vsel %vm1271_vm7, %v6268_v53, %v2836_v2  ;;  %v6797_v53 = vld [vmem:[%s7162_s6 + $0x60] sm:$0xff]  }
 0x2b8   : > { %4931 = vmatpush3.bf16.msra.mxu1 %v5235_v10 }
 0x2b9   : > { %4932 = vmatprep.subr.bf16.mxu1 %v5236_v16 }
 0x2bb   : > { %v2834_v49 = vpop.permute.xlu1 %2833  ;;  %v2948_v31 = vpop.permute.xlu0 %2947 }
 0x2bc   : > { %4933 = vmatpush3.bf16.msra.mxu1 %v5236_v16  ;;  %v2978_v33 = vsel %vm1271_vm7, %v6274_v59, %v2834_v49  ;;  %v6785_v41 = vsel %vm1308_vm8, %v2980_v28, %v2948_v31  ;;  %v5239_v59 = vld [vmem:[%s7162_s6 + $0x28] sm:$0xff]   ;;  %v6953_v28 = vld [vmem:[%s7163_s7] ss:$0 sm:$0xff] }
 0x2bd   : > { %4934 = vmatprep.subr.bf16.mxu1 %v5237_v29  ;;  %v5241_v49 = vld [vmem:[%s7162_s6 + $0x68] sm:$0xff]  }
 0x2be   : > { %v5245_v31 = vld [vmem:[%s7162_s6 + $0x88] sm:$0xff]  }
 0x2bf   : > { %v2946_v12 = vpop.permute.xlu1 %2945 }
 0x2c0   : > { %v6782_v45 = vsel %vm1308_vm8, %v2978_v33, %v2946_v12  ;;  %4935 = vmatpush3.bf16.msra.mxu1 %v5237_v29 }
 0x2c1   : > { %4901 = vmatmul.mubr.msk.bf16.gmra.mrb[4].mxu1 %vm1431_vm9, %v6782_v45  ;;  %4936 = vmatprep.subr.bf16.mxu1 %v5238_v46 }
 0x2c2   : > { %4904 = vmatprep.mubr.msk.bf16.mxu1 %vm1431_vm9, %v6785_v41 }
 0x2c4   : > { %v2840_v8 = vpop.permute.xlu0 %2839  ;;  %4937 = vmatpush3.bf16.msra.mxu1 %v5238_v46  ;;  %v6948_v46 = vstv %s5374_s18 }
 0x2c5   : > { %4938 = vmatprep.subr.bf16.mxu1 %v5239_v59  ;;  %v2984_v51 = vsel %vm1271_vm7, %v6343_v11, %v2840_v8  ;;  %vm3906_vm4 = vcmp.lt.s32.totalorder %v6948_v46, 20 }
 0x2c8   : > { %v2952_v58 = vpop.permute.xlu0 %2951  ;;  %4939 = vmatpush3.bf16.msra.mxu1 %v5239_v59  ;;  %v3891_v59 = vadd.s32 1, %v6948_v46 }
 0x2c9   : > { %v2838_v50 = vpop.permute.xlu1 %2837  ;;  %4972 = vmatprep.subr.bf16.mxu1 %v6797_v53  ;;  %v6808_v23 = vsel %vm1308_vm8, %v2984_v51, %v2952_v58 }
 0x2ca   : > { %v2982_v61 = vsel %vm1271_vm7, %v6348_v47, %v2838_v50  ;;  %vm3907_vm3 = vcmp.lt.s32.totalorder %v3891_v59, 20 }
 0x2cd   : > { %v2950_v38 = vpop.permute.xlu1 %2949 }
 0x2ce   : > { %v6805_v19 = vsel %vm1308_vm8, %v2982_v61, %v2950_v38 }
 0x2cf   : > { %4905 = vmatmul.mubr.msk.bf16.gmra.mrb[8].mxu1 %vm1431_vm9, %v6805_v19 }
 0x2d0   : > { %4908 = vmatprep.mubr.msk.bf16.mxu1 %vm1431_vm9, %v6808_v23 }
 0x2d1   : > { %v2844_v34 = vpop.permute.xlu0 %2843 }
 0x2d2   : > { %v2988_v11 = vsel %vm1271_vm7, %v6442_v55, %v2844_v34 }
 0x2d6   : > { %v2842_v26 = vpop.permute.xlu1 %2841  ;;  %v2956_v17 = vpop.permute.xlu0 %2955 }
 0x2d7   : > { %v2986_v47 = vsel %vm1271_vm7, %v6446_v30, %v2842_v26  ;;  %v6822_v36 = vsel %vm1308_vm8, %v2988_v11, %v2956_v17 }
 0x2da   : > { %v2954_v54 = vpop.permute.xlu1 %2953 }
 0x2db   : > { %v6819_v32 = vsel %vm1308_vm8, %v2986_v47, %v2954_v54 }
 0x2dc   : > { %4909 = vmatmul.mubr.msk.bf16.gmra.mrb[12].mxu1 %vm1431_vm9, %v6819_v32 }
 0x2dd   : > { %4912 = vmatprep.mubr.msk.bf16.mxu1 %vm1431_vm9, %v6822_v36 }
 0x2de   : > { %v2848_v44 = vpop.permute.xlu0 %2847 }
 0x2df   : > { %v2992_v55 = vsel %vm1271_vm7, %v6511_v13, %v2848_v44 }
 0x2e2   : > { %v2960_v37 = vpop.permute.xlu0 %2959 }
 0x2e3   : > { %v2846_v3 = vpop.permute.xlu1 %2845  ;;  %v6836_v7 = vsel %vm1308_vm8, %v2992_v55, %v2960_v37  ;;  %v3893_v37 = vadd.s32 3, %v6948_v46 }
 0x2e4   : > { %v2990_v30 = vsel %vm1271_vm7, %v6518_v60, %v2846_v3 }
 0x2e7   : > { %v2958_v1 = vpop.permute.xlu1 %2957 }
 0x2e8   : > { %v6833_v62 = vsel %vm1308_vm8, %v2990_v30, %v2958_v1  ;;  %v2852_v56 = vpop.permute.xlu0 %2851 }
 0x2e9   : > { %4913 = vmatmul.mubr.msk.bf16.gmra.mrb[16].mxu1 %vm1431_vm9, %v6833_v62  ;;  %v2996_v13 = vsel %vm1271_vm7, %v6603_v63, %v2852_v56 }
 0x2ea   : > { %4916 = vmatprep.mubr.msk.bf16.mxu1 %vm1431_vm9, %v6836_v7 }
 0x2eb   : > { %v2850_v22 = vpop.permute.xlu1 %2849 }
 0x2ec   : > { %v2964_v52 = vpop.permute.xlu0 %2963  ;;  %v2994_v60 = vsel %vm1271_vm7, %v6607_v43, %v2850_v22 }
 0x2ed   : > { %v6850_v48 = vsel %vm1308_vm8, %v2996_v13, %v2964_v52 }
 0x2ef   : > { %v2962_v14 = vpop.permute.xlu1 %2961 }
 0x2f0   : > { %v6847_v5 = vsel %vm1308_vm8, %v2994_v60, %v2962_v14  ;;  %v2856_v39 = vpop.permute.xlu0 %2855 }
 0x2f1   : > { %4917 = vmatmul.mubr.msk.bf16.gmra.mrb[20].mxu1 %vm1431_vm9, %v6847_v5  ;;  %v3000_v25 = vsel %vm1271_vm7, %v6659_v24, %v2856_v39 }
 0x2f2   : > { %4920 = vmatprep.mubr.msk.bf16.mxu1 %vm1431_vm9, %v6850_v48 }
 0x2f3   : > { %v2854_v4 = vpop.permute.xlu1 %2853 }
 0x2f4   : > { %v2998_v43 = vsel %vm1271_vm7, %v6664_v40, %v2854_v4 }
 0x2f5   : > { %v3058_v35 = vpop.permute.xlu0 %3057 }
 0x2f6   : > { %v3067_v10 = vsel %vm1271_vm7, %v6686_v27, %v3058_v35  ;;  %v5242_v27 = vld [vmem:[%s7162_s6 + $0x70] sm:$0xff]  }
 0x2f7   : > { %v2966_v9 = vpop.permute.xlu1 %2965 }
 0x2f8   : > { %v3030_v63 = vsel %vm1308_vm8, %v2998_v43, %v2966_v9 }
 0x2f9   : > { %4921 = vmatmul.mubr.msk.bf16.gmra.mrb[24].mxu1 %vm1431_vm9, %v3030_v63  ;;  %v2826_v16 = vpop.permute.xlu0 %2825 }
 0x2fa   : > { %v2970_v2 = vsel %vm1271_vm7, %v6698_v15, %v2826_v16  ;;  %v5243_v15 = vld [vmem:[%s7162_s6 + $0x78] sm:$0xff]  }
 0x2fb   : > { %v2968_v18 = vpop.permute.xlu1 %2967 }
 0x2fc   : > { %v3032_v42 = vsel %vm1308_vm8, %v3000_v25, %v2968_v18 }
 0x2fd   : > { %4924 = vmatprep.mubr.msk.bf16.mxu1 %vm1431_vm9, %v3032_v42 }
 0x2ff   : > { %v3065_v0 = vpop.permute.xlu1 %3064 }
 0x300   : > { %v3069_v40 = vsel %vm1308_vm8, %v3067_v10, %v3065_v0 }
 0x301   : > { %4925 = vmatmul.mubr.msk.bf16.gmra.mrb[28].mxu1 %vm1431_vm9, %v3069_v40 }
 0x303   : > { %v2938_v29 = vpop.permute.xlu1 %2937 }
 0x304   : > { %v3002_v24 = vsel %vm1308_vm8, %v2970_v2, %v2938_v29 }
 0x305   : > { %4940 = vmatprep.mubr.msk.bf16.mxu1 %vm1431_vm9, %v3002_v24 }
 0x309   : > { %4941 = vmatmul.mubr.msk.bf16.vlgmr.msra.gmra.mrb[0].mxu1 %vm1431_vm9, %v6746_v57  ;;  %v5244_v57 = vld [vmem:[%s7162_s6 + $0x80] sm:$0xff]  }
 0x30a   : > { %4973 = vmatpush3.bf16.msra.mxu1 %v6797_v53  ;;  %4944 = vmatprep.mubr.msk.bf16.mxu1 %vm1431_vm9, %v6758_v21 }
 0x30b   : > { %4974 = vmatprep.subr.bf16.mxu1 %v5241_v49 }
 0x30e   : > { %4975 = vmatpush3.bf16.msra.mxu1 %v5241_v49  ;;  %v3894_v49 = vadd.s32 4, %v6948_v46 }
 0x30f   : > { %4976 = vmatprep.subr.bf16.mxu1 %v5242_v27 }
 0x310   : > { %vm3910_vm13 = vcmp.lt.s32.totalorder %v3894_v49, 20 }
 0x311   : > { %4945 = vmatmul.mubr.msk.bf16.gmra.mrb[4].mxu1 %vm1431_vm9, %v6761_v6 }
 0x312   : > { %4948 = vmatprep.mubr.msk.bf16.mxu1 %vm1431_vm9, %v6782_v45  ;;  %4977 = vmatpush3.bf16.msra.mxu1 %v5242_v27 }
 0x313   : > { %4978 = vmatprep.subr.bf16.mxu1 %v5243_v15 }
 0x316   : > { %4979 = vmatpush3.bf16.msra.mxu1 %v5243_v15 }
 0x317   : > { %4980 = vmatprep.subr.bf16.mxu1 %v5244_v57 }
 0x319   : > { %4949 = vmatmul.mubr.msk.bf16.gmra.mrb[8].mxu1 %vm1431_vm9, %v6785_v41 }
 0x31a   : > { %4952 = vmatprep.mubr.msk.bf16.mxu1 %vm1431_vm9, %v6805_v19  ;;  %4981 = vmatpush3.bf16.msra.mxu1 %v5244_v57 }
 0x31b   : > { %4982 = vmatprep.subr.bf16.mxu1 %v5245_v31 }
 0x31e   : > { %4983 = vmatpush3.bf16.msra.mxu1 %v5245_v31 }
 0x321   : > { %4953 = vmatmul.mubr.msk.bf16.gmra.mrb[12].mxu1 %vm1431_vm9, %v6808_v23 }
 0x322   : > { %4956 = vmatprep.mubr.msk.bf16.mxu1 %vm1431_vm9, %v6819_v32 }
 0x329   : > { %4957 = vmatmul.mubr.msk.bf16.gmra.mrb[16].mxu1 %vm1431_vm9, %v6822_v36 }
 0x32a   : > { %4960 = vmatprep.mubr.msk.bf16.mxu1 %vm1431_vm9, %v6833_v62 }
 0x331   : > { %4961 = vmatmul.mubr.msk.bf16.gmra.mrb[20].mxu1 %vm1431_vm9, %v6836_v7 }
 0x332   : > { %4964 = vmatprep.mubr.msk.bf16.mxu1 %vm1431_vm9, %v6847_v5 }
 0x339   : > { %4965 = vmatmul.mubr.msk.bf16.gmra.mrb[24].mxu1 %vm1431_vm9, %v6850_v48 }
 0x33a   : > { %4968 = vmatprep.mubr.msk.bf16.mxu1 %vm1431_vm9, %v3030_v63 }
 0x341   : > { %4969 = vmatmul.mubr.msk.bf16.gmra.mrb[28].mxu1 %vm1431_vm9, %v3032_v42 }
 0x342   : > { %4984 = vmatprep.mubr.msk.bf16.mxu1 %vm1431_vm9, %v6758_v21  ;;  %v3524_v21 = vpop.permute.xlu0 %3523 }
 0x343   : > { %v3533_v33 = vsel %vm1271_vm7, %v6711_v20, %v3524_v21  ;;  %vm3909_vm7 = vcmp.lt.s32.totalorder %v3893_v37, 20 }
 0x349   : > { %4985 = vmatmul.mubr.msk.bf16.vlgmr.msra.gmra.mrb[0].mxu1 %vm1431_vm9, %v6761_v6  ;;  %v3531_v6 = vpop.permute.xlu1 %3530 }
 0x34a   : > { %4988 = vmatprep.mubr.msk.bf16.mxu1 %vm1431_vm9, %v6782_v45  ;;  %v3535_v12 = vsel %vm1308_vm8, %v3533_v33, %v3531_v6 }
 0x351   : > { %4989 = vmatmul.mubr.msk.bf16.gmra.mrb[4].mxu1 %vm1431_vm9, %v6785_v41  ;;  %v6958_v41 = vld [vmem:[%s7164_s8] ss:$0 sm:$0xff] }
 0x352   : > { %4992 = vmatprep.mubr.msk.bf16.mxu1 %vm1431_vm9, %v6805_v19 }
 0x359   : > { %4993 = vmatmul.mubr.msk.bf16.gmra.mrb[8].mxu1 %vm1431_vm9, %v6808_v23 }
 0x35a   : > { %4996 = vmatprep.mubr.msk.bf16.mxu1 %vm1431_vm9, %v6819_v32 }
 0x361   : > { %4997 = vmatmul.mubr.msk.bf16.gmra.mrb[12].mxu1 %vm1431_vm9, %v6822_v36 }
 0x362   : > { %5000 = vmatprep.mubr.msk.bf16.mxu1 %vm1431_vm9, %v6833_v62  ;;  %v3892_v62 = vadd.s32 2, %v6948_v46 }
 0x364   : > { %vm3908_vm8 = vcmp.lt.s32.totalorder %v3892_v62, 20 }
 0x369   : > { %5001 = vmatmul.mubr.msk.bf16.gmra.mrb[16].mxu1 %vm1431_vm9, %v6836_v7 }
 0x36a   : > { %5004 = vmatprep.mubr.msk.bf16.mxu1 %vm1431_vm9, %v6847_v5 }
 0x371   : > { %5005 = vmatmul.mubr.msk.bf16.gmra.mrb[20].mxu1 %vm1431_vm9, %v6850_v48 }
 0x372   : > { %5008 = vmatprep.mubr.msk.bf16.mxu1 %vm1431_vm9, %v3030_v63 }
 0x379   : > { %5009 = vmatmul.mubr.msk.bf16.gmra.mrb[24].mxu1 %vm1431_vm9, %v3032_v42 }
 0x37a   : > { %5012 = vmatprep.mubr.msk.bf16.mxu1 %vm1431_vm9, %v3069_v40  ;;  %v3895_v40 = vadd.s32 5, %v6948_v46 }
 0x381   : > { %5013 = vmatmul.mubr.msk.bf16.gmra.mrb[28].mxu1 %vm1431_vm9, %v3535_v12  ;;  %vm3911_vm9 = vcmp.lt.s32.totalorder %v3895_v40, 20 }
 0x41c   : > { %v4986_v45 = vpop.f32.mrb[0].mxu1 }
 0x41d   : > { %v3789_v20 = vmul.f32 %v4986_v45, %v6953_v28  ;;  %v3621_v8 = vpop.f32.mrb[1].mxu1 }
 0x41e   : > { %v3787_v53 = vmul.f32 %v6953_v28, %v3621_v8  ;;  %v4987_v50 = vpop.f32.mrb[2].mxu1 }
 0x41f   : > { %v3828_v58 = vadd.f32 %v6958_v41, %v3789_v20  ;;  %v3790_v61 = vmul.f32 %v4987_v50, %v6953_v28  ;;  %v3624_v38 = vpop.f32.mrb[3].mxu1 }
 0x420   : > { %v3826_v51 = vadd.f32 %v6958_v41, %v3787_v53  ;;  %v3788_v19 = vmul.f32 %v6953_v28, %v3624_v38 }
 0x421   : > { %v3860_v23 = vmax.f32 %v3828_v58, 0.0  ;;  %v3829_v34 = vadd.f32 %v6958_v41, %v3790_v61 }
 0x422   : > { %v3858_v26 = vmax.f32 %v3826_v51, 0.0  ;;  %v3827_v17 = vadd.f32 %v6958_v41, %v3788_v19 }
 0x423   : > { %v3956_v47 = vsel %vm3907_vm3, %v3860_v23, 0.0  ;;  %v3861_v54 = vmax.f32 %v3829_v34, 0.0  ;;  %v3897_v34 = vadd.s32 7, %v6948_v46 }
 0x424   : > { %v4572_v11 = vpack.c.bf16 %v3956_v47, %v3956_v47  ;;  %v3954_v32 = vsel %vm3906_vm4, %v3858_v26, 0.0  ;;  %v3859_v36 = vmax.f32 %v3827_v17, 0.0  ;;  %v4990_v44 = vpop.f32.mrb[4].mxu1 }
 0x425   : > { %v4570_v3 = vpack.c.bf16 %v3954_v32, %v3954_v32  ;;  %v3957_v30 = vsel %vm3907_vm3, %v3861_v54, 0.0  ;;  %v3793_v1 = vmul.f32 %v4990_v44, %v6953_v28  ;;  %v3637_v55 = vpop.f32.mrb[5].mxu1  ;;  %vm3913_vm15 = vcmp.lt.s32.totalorder %v3897_v34, 20 }
 0x426   : > { %4117 = vst.msk [vmem:[%s6975_s10 + $0x8] sm:$0xf] %vm4114_vm5, %v4572_v11  ;;  %v4573_v56 = vpack.c.bf16 %v3957_v30, %v3957_v30  ;;  %v3955_v7 = vsel %vm3906_vm4, %v3859_v36, 0.0  ;;  %v3791_v22 = vmul.f32 %v6953_v28, %v3637_v55  ;;  %v4991_v52 = vpop.f32.mrb[6].mxu1  ;;  %v3896_v11 = vadd.s32 6, %v6948_v46 }
 0x427   : > { %4115 = vst.msk [vmem:[%s6975_s10] sm:$0xf] %vm4114_vm5, %v4570_v3  ;;  %v4571_v60 = vpack.c.bf16 %v3955_v7, %v3955_v7  ;;  %v3832_v14 = vadd.f32 %v6958_v41, %v3793_v1  ;;  %v3794_v13 = vmul.f32 %v4991_v52, %v6953_v28  ;;  %v3640_v5 = vpop.f32.mrb[7].mxu1 }
 0x428   : > { %4118 = vst.msk [vmem:[%s6975_s10 + $0xc] sm:$0xf] %vm4114_vm5, %v4573_v56  ;;  %v3830_v48 = vadd.f32 %v6958_v41, %v3791_v22  ;;  %v3792_v4 = vmul.f32 %v6953_v28, %v3640_v5  ;;  %vm3912_vm0 = vcmp.lt.s32.totalorder %v3896_v11, 20 }
 0x429   : > { %4116 = vst.msk [vmem:[%s6975_s10 + $0x4] sm:$0xf] %vm4114_vm5, %v4571_v60  ;;  %v3864_v39 = vmax.f32 %v3832_v14, 0.0  ;;  %v3833_v43 = vadd.f32 %v6958_v41, %v3794_v13 }
 0x42a   : > { %v3862_v9 = vmax.f32 %v3830_v48, 0.0  ;;  %v3831_v63 = vadd.f32 %v6958_v41, %v3792_v4 }
 0x42b   : > { %v3960_v35 = vsel %vm3909_vm7, %v3864_v39, 0.0  ;;  %v3865_v25 = vmax.f32 %v3833_v43, 0.0  ;;  %v3899_v43 = vadd.s32 9, %v6948_v46 }
 0x42c   : > { %v4576_v18 = vpack.c.bf16 %v3960_v35, %v3960_v35  ;;  %v3958_v42 = vsel %vm3908_vm8, %v3862_v9, 0.0  ;;  %v3863_v10 = vmax.f32 %v3831_v63, 0.0  ;;  %v4994_v0 = vpop.f32.mrb[8].mxu1 }
 0x42d   : > { %v4574_v16 = vpack.c.bf16 %v3958_v42, %v3958_v42  ;;  %v3961_v2 = vsel %vm3909_vm7, %v3865_v25, 0.0  ;;  %v3797_v29 = vmul.f32 %v4994_v0, %v6953_v28  ;;  %v3653_v24 = vpop.f32.mrb[9].mxu1  ;;  %vm3915_vm1 = vcmp.lt.s32.totalorder %v3899_v43, 20 }
 0x42e   : > { %4121 = vst.msk [vmem:[%s6975_s10 + $0x18] sm:$0xf] %vm4114_vm5, %v4576_v18  ;;  %v4577_v27 = vpack.c.bf16 %v3961_v2, %v3961_v2  ;;  %v3959_v15 = vsel %vm3908_vm8, %v3863_v10, 0.0  ;;  %v3795_v57 = vmul.f32 %v6953_v28, %v3653_v24  ;;  %v4995_v31 = vpop.f32.mrb[10].mxu1  ;;  %v3898_v18 = vadd.s32 8, %v6948_v46 }
 0x42f   : > { %4119 = vst.msk [vmem:[%s6975_s10 + $0x10] sm:$0xf] %vm4114_vm5, %v4574_v16  ;;  %v4575_v21 = vpack.c.bf16 %v3959_v15, %v3959_v15  ;;  %v3836_v6 = vadd.f32 %v6958_v41, %v3797_v29  ;;  %v3798_v33 = vmul.f32 %v4995_v31, %v6953_v28  ;;  %v3656_v12 = vpop.f32.mrb[11].mxu1 }
 0x430   : > { %4122 = vst.msk [vmem:[%s6975_s10 + $0x1c] sm:$0xf] %vm4114_vm5, %v4577_v27  ;;  %v3834_v45 = vadd.f32 %v6958_v41, %v3795_v57  ;;  %v3796_v59 = vmul.f32 %v6953_v28, %v3656_v12  ;;  %vm3914_vm2 = vcmp.lt.s32.totalorder %v3898_v18, 20 }
 0x431   : > { %4120 = vst.msk [vmem:[%s6975_s10 + $0x14] sm:$0xf] %vm4114_vm5, %v4575_v21  ;;  %v3868_v20 = vmax.f32 %v3836_v6, 0.0  ;;  %v3837_v8 = vadd.f32 %v6958_v41, %v3798_v33 }
 0x432   : > { %v3866_v53 = vmax.f32 %v3834_v45, 0.0  ;;  %v3835_v50 = vadd.f32 %v6958_v41, %v3796_v59 }
 0x433   : > { %v3964_v58 = vsel %vm3911_vm9, %v3868_v20, 0.0  ;;  %v3869_v61 = vmax.f32 %v3837_v8, 0.0  ;;  %v3901_v8 = vadd.s32 11, %v6948_v46 }
 0x434   : > { %v4580_v38 = vpack.c.bf16 %v3964_v58, %v3964_v58  ;;  %v3962_v51 = vsel %vm3910_vm13, %v3866_v53, 0.0  ;;  %v3867_v19 = vmax.f32 %v3835_v50, 0.0  ;;  %v4998_v23 = vpop.f32.mrb[12].mxu1 }
 0x435   : > { %v4578_v26 = vpack.c.bf16 %v3962_v51, %v3962_v51  ;;  %v3965_v17 = vsel %vm3911_vm9, %v3869_v61, 0.0  ;;  %v3801_v47 = vmul.f32 %v4998_v23, %v6953_v28  ;;  %v3669_v54 = vpop.f32.mrb[13].mxu1  ;;  %vm3917_vm6 = vcmp.lt.s32.totalorder %v3901_v8, 20 }
 0x436   : > { %4125 = vst.msk [vmem:[%s6975_s10 + $0x28] sm:$0xf] %vm4114_vm5, %v4580_v38  ;;  %v4581_v32 = vpack.c.bf16 %v3965_v17, %v3965_v17  ;;  %v3963_v36 = vsel %vm3910_vm13, %v3867_v19, 0.0  ;;  %v3799_v44 = vmul.f32 %v6953_v28, %v3669_v54  ;;  %v4999_v37 = vpop.f32.mrb[14].mxu1  ;;  %v3900_v38 = vadd.s32 10, %v6948_v46 }
 0x437   : > { %4123 = vst.msk [vmem:[%s6975_s10 + $0x20] sm:$0xf] %vm4114_vm5, %v4578_v26  ;;  %v4579_v3 = vpack.c.bf16 %v3963_v36, %v3963_v36  ;;  %v3840_v30 = vadd.f32 %v6958_v41, %v3801_v47  ;;  %v3802_v1 = vmul.f32 %v4999_v37, %v6953_v28  ;;  %v3672_v55 = vpop.f32.mrb[15].mxu1 }
 0x438   : > { %4126 = vst.msk [vmem:[%s6975_s10 + $0x2c] sm:$0xf] %vm4114_vm5, %v4581_v32  ;;  %v3838_v62 = vadd.f32 %v6958_v41, %v3799_v44  ;;  %v3800_v56 = vmul.f32 %v6953_v28, %v3672_v55  ;;  %vm3916_vm14 = vcmp.lt.s32.totalorder %v3900_v38, 20 }
 0x439   : > { %4124 = vst.msk [vmem:[%s6975_s10 + $0x24] sm:$0xf] %vm4114_vm5, %v4579_v3  ;;  %v3872_v7 = vmax.f32 %v3840_v30, 0.0  ;;  %v3841_v22 = vadd.f32 %v6958_v41, %v3802_v1 }
 0x43a   : > { %v3870_v52 = vmax.f32 %v3838_v62, 0.0  ;;  %v3839_v60 = vadd.f32 %v6958_v41, %v3800_v56 }
 0x43b   : > { %v3968_v14 = vsel %vm3913_vm15, %v3872_v7, 0.0  ;;  %v3873_v13 = vmax.f32 %v3841_v22, 0.0  ;;  %v3903_v22 = vadd.s32 13, %v6948_v46 }
 0x43c   : > { %v4584_v5 = vpack.c.bf16 %v3968_v14, %v3968_v14  ;;  %v3966_v48 = vsel %vm3912_vm0, %v3870_v52, 0.0  ;;  %v3871_v4 = vmax.f32 %v3839_v60, 0.0  ;;  %v5002_v39 = vpop.f32.mrb[16].mxu1 }
 0x43d   : > { %v4582_v9 = vpack.c.bf16 %v3966_v48, %v3966_v48  ;;  %v3969_v63 = vsel %vm3913_vm15, %v3873_v13, 0.0  ;;  %v3805_v35 = vmul.f32 %v5002_v39, %v6953_v28  ;;  %v3685_v25 = vpop.f32.mrb[17].mxu1  ;;  %vm3919_vm10 = vcmp.lt.s32.totalorder %v3903_v22, 20 }
 0x43e   : > { %4129 = vst.msk [vmem:[%s6975_s10 + $0x38] sm:$0xf] %vm4114_vm5, %v4584_v5  ;;  %v4585_v42 = vpack.c.bf16 %v3969_v63, %v3969_v63  ;;  %v3967_v10 = vsel %vm3912_vm0, %v3871_v4, 0.0  ;;  %v3803_v0 = vmul.f32 %v6953_v28, %v3685_v25  ;;  %v5003_v40 = vpop.f32.mrb[18].mxu1  ;;  %v3902_v5 = vadd.s32 12, %v6948_v46 }
 0x43f   : > { %4127 = vst.msk [vmem:[%s6975_s10 + $0x30] sm:$0xf] %vm4114_vm5, %v4582_v9  ;;  %v4583_v16 = vpack.c.bf16 %v3967_v10, %v3967_v10  ;;  %v3844_v2 = vadd.f32 %v6958_v41, %v3805_v35  ;;  %v3806_v29 = vmul.f32 %v5003_v40, %v6953_v28  ;;  %v3688_v24 = vpop.f32.mrb[19].mxu1 }
 0x440   : > { %4130 = vst.msk [vmem:[%s6975_s10 + $0x3c] sm:$0xf] %vm4114_vm5, %v4585_v42  ;;  %v3842_v49 = vadd.f32 %v6958_v41, %v3803_v0  ;;  %v3804_v27 = vmul.f32 %v6953_v28, %v3688_v24  ;;  %vm3918_vm11 = vcmp.lt.s32.totalorder %v3902_v5, 20 }
 0x441   : > { %4128 = vst.msk [vmem:[%s6975_s10 + $0x34] sm:$0xf] %vm4114_vm5, %v4583_v16  ;;  %v3876_v15 = vmax.f32 %v3844_v2, 0.0  ;;  %v3845_v57 = vadd.f32 %v6958_v41, %v3806_v29 }
 0x442   : > { %v3874_v31 = vmax.f32 %v3842_v49, 0.0  ;;  %v3843_v21 = vadd.f32 %v6958_v41, %v3804_v27 }
 0x443   : > { %v3972_v6 = vsel %vm3915_vm1, %v3876_v15, 0.0  ;;  %v3877_v33 = vmax.f32 %v3845_v57, 0.0  ;;  %v3905_v57 = vadd.s32 15, %v6948_v46 }
 0x444   : > { %v4588_v12 = vpack.c.bf16 %v3972_v6, %v3972_v6  ;;  %v3970_v45 = vsel %vm3914_vm2, %v3874_v31, 0.0  ;;  %v3875_v59 = vmax.f32 %v3843_v21, 0.0  ;;  %v5006_v20 = vpop.f32.mrb[20].mxu1 }
 0x445   : > { %v4586_v53 = vpack.c.bf16 %v3970_v45, %v3970_v45  ;;  %v3973_v50 = vsel %vm3915_vm1, %v3877_v33, 0.0  ;;  %v3809_v58 = vmul.f32 %v5006_v20, %v6953_v28  ;;  %v3701_v61 = vpop.f32.mrb[21].mxu1  ;;  %vm3921_vm12 = vcmp.lt.s32.totalorder %v3905_v57, 20 }
 0x446   : > { %4133 = vst.msk [vmem:[%s6975_s10 + $0x48] sm:$0xf] %vm4114_vm5, %v4588_v12  ;;  %v4589_v51 = vpack.c.bf16 %v3973_v50, %v3973_v50  ;;  %v3971_v19 = vsel %vm3914_vm2, %v3875_v59, 0.0  ;;  %v3807_v23 = vmul.f32 %v6953_v28, %v3701_v61  ;;  %v5007_v34 = vpop.f32.mrb[22].mxu1  ;;  %v3904_v12 = vadd.s32 14, %v6948_v46 }
 0x447   : > { %4131 = vst.msk [vmem:[%s6975_s10 + $0x40] sm:$0xf] %vm4114_vm5, %v4586_v53  ;;  %v4587_v26 = vpack.c.bf16 %v3971_v19, %v3971_v19  ;;  %v3848_v17 = vadd.f32 %v6958_v41, %v3809_v58  ;;  %v3810_v47 = vmul.f32 %v5007_v34, %v6953_v28  ;;  %v3704_v54 = vpop.f32.mrb[23].mxu1 }
 0x448   : > { %4134 = vst.msk [vmem:[%s6975_s10 + $0x4c] sm:$0xf] %vm4114_vm5, %v4589_v51  ;;  %v3846_v11 = vadd.f32 %v6958_v41, %v3807_v23  ;;  %v3808_v32 = vmul.f32 %v6953_v28, %v3704_v54  ;;  %vm3920_vm3 = vcmp.lt.s32.totalorder %v3904_v12, 20 }
 0x449   : > { %4132 = vst.msk [vmem:[%s6975_s10 + $0x44] sm:$0xf] %vm4114_vm5, %v4587_v26  ;;  %v3880_v36 = vmax.f32 %v3848_v17, 0.0  ;;  %v3849_v44 = vadd.f32 %v6958_v41, %v3810_v47 }
 0x44a   : > { %v3878_v37 = vmax.f32 %v3846_v11, 0.0  ;;  %v3847_v3 = vadd.f32 %v6958_v41, %v3808_v32 }
 0x44b   : > { %v3976_v30 = vsel %vm3917_vm6, %v3880_v36, 0.0  ;;  %v3881_v1 = vmax.f32 %v3849_v44, 0.0 }
 0x44c   : > { %v4592_v55 = vpack.c.bf16 %v3976_v30, %v3976_v30  ;;  %v3974_v62 = vsel %vm3916_vm14, %v3878_v37, 0.0  ;;  %v3879_v56 = vmax.f32 %v3847_v3, 0.0  ;;  %v5010_v7 = vpop.f32.mrb[24].mxu1 }
 0x44d   : > { %v4590_v52 = vpack.c.bf16 %v3974_v62, %v3974_v62  ;;  %v3977_v60 = vsel %vm3917_vm6, %v3881_v1, 0.0  ;;  %v3813_v14 = vmul.f32 %v5010_v7, %v6953_v28  ;;  %v3717_v13 = vpop.f32.mrb[25].mxu1 }
 0x44e   : > { %4137 = vst.msk [vmem:[%s6975_s10 + $0x58] sm:$0xf] %vm4114_vm5, %v4592_v55  ;;  %v4593_v48 = vpack.c.bf16 %v3977_v60, %v3977_v60  ;;  %v3975_v4 = vsel %vm3916_vm14, %v3879_v56, 0.0  ;;  %v3811_v39 = vmul.f32 %v6953_v28, %v3717_v13  ;;  %v5011_v43 = vpop.f32.mrb[26].mxu1 }
 0x44f   : > { %4135 = vst.msk [vmem:[%s6975_s10 + $0x50] sm:$0xf] %vm4114_vm5, %v4590_v52  ;;  %v4591_v9 = vpack.c.bf16 %v3975_v4, %v3975_v4  ;;  %v3852_v63 = vadd.f32 %v6958_v41, %v3813_v14  ;;  %v3814_v35 = vmul.f32 %v5011_v43, %v6953_v28  ;;  %v3720_v25 = vpop.f32.mrb[27].mxu1 }
 0x450   : > { %4138 = vst.msk [vmem:[%s6975_s10 + $0x5c] sm:$0xf] %vm4114_vm5, %v4593_v48  ;;  %v3850_v18 = vadd.f32 %v6958_v41, %v3811_v39  ;;  %v3812_v42 = vmul.f32 %v6953_v28, %v3720_v25 }
 0x451   : > { %4136 = vst.msk [vmem:[%s6975_s10 + $0x54] sm:$0xf] %vm4114_vm5, %v4591_v9  ;;  %v3884_v10 = vmax.f32 %v3852_v63, 0.0  ;;  %v3853_v0 = vadd.f32 %v6958_v41, %v3814_v35 }
 0x452   : > { %v3882_v40 = vmax.f32 %v3850_v18, 0.0  ;;  %v3851_v16 = vadd.f32 %v6958_v41, %v3812_v42 }
 0x453   : > { %v3980_v2 = vsel %vm3919_vm10, %v3884_v10, 0.0  ;;  %v3885_v29 = vmax.f32 %v3853_v0, 0.0 }
 0x454   : > { %v4596_v24 = vpack.c.bf16 %v3980_v2, %v3980_v2  ;;  %v3978_v49 = vsel %vm3918_vm11, %v3882_v40, 0.0  ;;  %v3883_v27 = vmax.f32 %v3851_v16, 0.0  ;;  %v5014_v15 = vpop.f32.mrb[28].mxu1 }
 0x455   : > { %v4594_v31 = vpack.c.bf16 %v3978_v49, %v3978_v49  ;;  %v3981_v21 = vsel %vm3919_vm10, %v3885_v29, 0.0  ;;  %v3817_v6 = vmul.f32 %v5014_v15, %v6953_v28  ;;  %v3733_v33 = vpop.f32.mrb[29].mxu1 }
 0x456   : > { %4141 = vst.msk [vmem:[%s6975_s10 + $0x68] sm:$0xf] %vm4114_vm5, %v4596_v24  ;;  %v4597_v45 = vpack.c.bf16 %v3981_v21, %v3981_v21  ;;  %v3979_v59 = vsel %vm3918_vm11, %v3883_v27, 0.0  ;;  %v3815_v20 = vmul.f32 %v6953_v28, %v3733_v33  ;;  %v5015_v8 = vpop.f32.mrb[30].mxu1 }
 0x457   : > { %4139 = vst.msk [vmem:[%s6975_s10 + $0x60] sm:$0xf] %vm4114_vm5, %v4594_v31  ;;  %v4595_v53 = vpack.c.bf16 %v3979_v59, %v3979_v59  ;;  %v3856_v50 = vadd.f32 %v6958_v41, %v3817_v6  ;;  %v3818_v58 = vmul.f32 %v5015_v8, %v6953_v28  ;;  %v3736_v61 = vpop.f32.mrb[31].mxu1 }
 0x458   : > { %4142 = vst.msk [vmem:[%s6975_s10 + $0x6c] sm:$0xf] %vm4114_vm5, %v4597_v45  ;;  %v3854_v46 = vadd.f32 %v6958_v41, %v3815_v20  ;;  %v3816_v38 = vmul.f32 %v6953_v28, %v3736_v61 }
 0x459   : > { %4140 = vst.msk [vmem:[%s6975_s10 + $0x64] sm:$0xf] %vm4114_vm5, %v4595_v53  ;;  %v3888_v51 = vmax.f32 %v3856_v50, 0.0  ;;  %v3857_v19 = vadd.f32 %v6958_v41, %v3818_v58 }
 0x45a   : > { %v3886_v23 = vmax.f32 %v3854_v46, 0.0  ;;  %v3855_v34 = vadd.f32 %v6958_v41, %v3816_v38 }
 0x45b   : > { %v3984_v26 = vsel %vm3921_vm12, %v3888_v51, 0.0  ;;  %v3889_v17 = vmax.f32 %v3857_v19, 0.0 }
 0x45c   : > { %v4600_v47 = vpack.c.bf16 %v3984_v26, %v3984_v26  ;;  %v3982_v54 = vsel %vm3920_vm3, %v3886_v23, 0.0  ;;  %v3887_v11 = vmax.f32 %v3855_v34, 0.0 }
 0x45d   : > { %v4598_v32 = vpack.c.bf16 %v3982_v54, %v3982_v54  ;;  %v3985_v36 = vsel %vm3921_vm12, %v3889_v17, 0.0 }
 0x45e   : > { %4145 = vst.msk [vmem:[%s6975_s10 + $0x78] sm:$0xf] %vm4114_vm5, %v4600_v47  ;;  %v4601_v28 = vpack.c.bf16 %v3985_v36, %v3985_v36  ;;  %v3983_v44 = vsel %vm3920_vm3, %v3887_v11, 0.0 }
 0x45f   : > { %4143 = vst.msk [vmem:[%s6975_s10 + $0x70] sm:$0xf] %vm4114_vm5, %v4598_v32  ;;  %v4599_v37 = vpack.c.bf16 %v3983_v44, %v3983_v44 }
 0x460   : > { %4146 = vst.msk [vmem:[%s6975_s10 + $0x7c] sm:$0xf] %vm4114_vm5, %v4601_v28 }
 0x461   : > { %4144 = vst.msk [vmem:[%s6975_s10 + $0x74] sm:$0xf] %vm4114_vm5, %v4599_v37 }
 0x462 PF: > { %s19_s13 = sadd.s32 1, %s5284_s13   ;;  %s7210_s30 = smov %s5276_s11 }
 0x463   : > { %p16_p13 = scmp.ge.s32.totalorder %s19_s13, 6   ;;  %s7211_s10 = smov %s5280_s12 }
 0x464   : > { %s7212_s11 = smov %s7215_s14  ;;  %s7213_s12 = smov %s7219_s15 }
 0x465   :  { %18 = sbr.rel (!%p16_p13) target bundleno = 3 (0x3), region = 96 }

// kernel: _lambda_.4
= control target key start
LH: loop header
LB: loop body
LE: loop exit
PB: predicated region body
PF: predicated region fallthrough
CT: control target
= control target key end

     0   :  { %s5172_s30 = smov 0   ;;  %s5174_s10 = smov 0   ;;  %s6935_s0 = inlined_call_operand.vmem [shape: bf16[2,32,16,8], index: 0, kind: input, shape index: {}, may-alias: {0,1,2}]   ;;  %s6936_s1 = inlined_call_operand.vmem [shape: bf16[2,32,16,8], index: 1, kind: input, shape index: {}, may-alias: {0,1,2}]   ;;  %s6937_s2 = inlined_call_operand.vmem [shape: bf16[2,32,16,8], index: 2, kind: input, shape index: {}, may-alias: {0,1,2}]   ;;  %s6938_s3 = inlined_call_operand.vmem [shape: bf16[3,24,32], index: 3, kind: input, shape index: {}]   ;;  %s6939_s4 = inlined_call_operand.vmem [shape: f32[1,32], index: 4, kind: input, shape index: {}]   ;;  %s6940_s5 = inlined_call_operand.vmem [shape: f32[1,32], index: 5, kind: input, shape index: {}, may-alias: {5,8}]   ;;  %s6941_s6 = inlined_call_operand.vmem [shape: bf16[3,96,32], index: 6, kind: input, shape index: {}]   ;;  %s6942_s7 = inlined_call_operand.vmem [shape: f32[1,32], index: 7, kind: input, shape index: {}]   ;;  %s6943_s8 = inlined_call_operand.vmem [shape: f32[1,32], index: 8, kind: input, shape index: {}, may-alias: {5,8}]   ;;  %s6944_s9 = inlined_call_operand.vmem [shape: bf16[2,32,16,32], index: 9, kind: output, shape index: {}]  }
   0x1   :  { %s5176_s11 = smov 0   ;;  %s5178_s12 = smov 0  }
   0x2   :  { %s5180_s13 = smov 0  }
   0x3 LB: > { %s28_s14 = sadd.s32 1, %s5108_s11  ;;  %s31_s15 = sadd.s32 1, %s5112_s12  ;;  %s5116_s13 = sphi %s5180_s13, %s19_s13   ;;  %s5112_s12 = sphi %s5178_s12, %s6992_s12   ;;  %s5108_s11 = sphi %s5176_s11, %s6991_s11   ;;  %s5104_s10 = sphi %s5174_s10, %s6990_s10   ;;  %s5100_s30 = sphi %s5172_s30, %s6989_s30  }
   0x4   : > { %p29_p0 = scmp.ge.s32.totalorder %s28_s14, 2  ;;  %p4203_p1 = scmp.ge.s32.totalorder %s5116_s13, 1 }
   0x5   : > { %p377_p2 = scmp.lt.s32.totalorder %s5116_s13, 5 }
   0x6   : > { %s6994_s14 = smov (%p29_p0, %s28_s14), 0  ;;  %s6996_s15 = smov (!%p29_p0, %s31_s15), %s5112_s12 }
   0x7   : > { %p378_p3 = pnand %p4203_p1, %p377_p2  ;;  %p33_p4 = scmp.ge.s32.totalorder %s6996_s15, 2 }
   0x8   : > { %s6945_s16 = sshll.u32 (!%p378_p3), %s5100_s30, 3  ;;  %p456_p5 = scmp.lt.s32.totalorder (!%p378_p3), %s5104_s10, 1  ;;  %v5054_v0 = vld [vmem:[%s6938_s3 + $0xc] sm:$0xff] (!%p378_p3)   ;;  %vm849_vm0 = vsmask.f32 (!%p378_p3), 256  ;;  %vm848_vm1 = vcmask (!%p378_p3), 1040384  }
   0x9   : > { %s6998_s15 = smov (%p33_p4, %s6996_s15), 0  ;;  %381 = sbr.rel (%p378_p3) target bundleno = 1121 (0x461), region = 56 }
   0xa   : > { %s4205_s17 = sadd.s32 (!%p378_p3), 4294967295, %s6945_s16  ;;  %s5208_s18 = sshll.u32 (!%p378_p3), %s5100_s30, 4  ;;  %4603 = vmatprep.subr.bf16.mxu0 (!%p378_p3), %v5054_v0  ;;  %vm5249_vm3 = vmand (!%p378_p3), %vm848_vm1, %vm849_vm0  ;;  %vm1180_vm4 = vcmask (!%p378_p3), 1046528   ;;  %vm891_vm5 = vsmask.f32 (!%p378_p3), 7424  ;;  %vm1423_vm7 = vcmask (!%p378_p3), 1043456  }
   0xb   : > { %p453_p6 = scmp.gt.s32.totalorder (!%p378_p3), %s4205_s17, 0  ;;  %p473_p7 = scmp.lt.s32.totalorder (!%p378_p3), %s5208_s18, 31  ;;  %4604 = vmatpush3.bf16.msra.mxu0 (!%p378_p3), %v5054_v0  ;;  %vm1271_vm8 = vcmask (!%p378_p3), 64512   ;;  %vm1308_vm9 = vcmask (!%p378_p3), 130048   ;;  %vm1386_vm10 = vcmask (!%p378_p3), 195584  }
   0xc   : > { %p520_p9 = scmp.eq.s32.totalorder (!%p378_p3), %s5100_s30, 0  ;;  %s5118_s16 = smov (!%p378_p3), 16  }
   0xd   : > { %p528_p12 = scmp.eq.s32.totalorder (!%p378_p3), %s5100_s30, 1 }
  0x10   : > { %s7000_s10 = smov (!%p456_p5, %s5104_s10), 1  ;;  %s7002_s17 = smov (!%p453_p6, %s4205_s17), 0 }
  0x11   : > { %s4206_s21 = sshll.u32 %s7002_s17, 1  ;;  %s5214_s22 = sshll.u32 %s7000_s10, 6 }
  0x12   : > { %p458_p8 = scmp.lt.s32.totalorder %s4206_s21, 31 }
  0x13   : > { %s474_s23 = scalar_select %p473_p7, %s5208_s18, 31 }
  0x14   : > { %s7004_s21 = smov (!%p458_p8, %s4206_s21), 31 }
  0x15   : > { %s4211_s24 = sshll.u32 %s474_s23, 1  ;;  %s4207_s25 = sshll.u32 %s7004_s21, 1 }
  0x16   : > { %s5219_s26 = sadd.s32 %s4211_s24, %s5214_s22  ;;  %s462_s27 = sadd.s32 %s5214_s22, %s4207_s25 }
  0x17   : > { %s4213_s28 = sshll.u32 %s5219_s26, 2  ;;  %s4209_s29 = sshll.u32 %s462_s27, 2 }
  0x18   : > { %s5228_s10 = scalar_lea.vmem %s6936_s1, %s4213_s28  ;;  %s5233_s21 = scalar_lea.vmem %s6935_s0, %s4209_s29 }
  0x19   : > { %v5038_v1 = vld [vmem:[%s5228_s10] sm:$0xff]   ;;  %v514_v2 = vld [vmem:[%s5233_s21 + $0x8] sm:$0xf]  ;;  %v515_v3 = vld [vmem:[%s5233_s21 + $0xc] sm:$0xf]  ;;  %s6950_s24 = sshll.u32 %s5100_s30, 3 }
  0x1a   : > { %s521_s23 = scalar_select %p520_p9, 1, 0  ;;  %v683_v4 = vshrl.u32 %v5038_v1, 16  ;;  %v686_v5 = vshll.u32 %v5038_v1, 16  ;;  %v5039_v7 = vld [vmem:[%s5228_s10 + $0x10] sm:$0xff]   ;;  %v5040_v10 = vld [vmem:[%s5228_s10 + $0x8] sm:$0xff]  }
  0x1b   : > { %v697_v14 = vshrl.u32 %v5039_v7, 16  ;;  %v700_v15 = vshll.u32 %v5039_v7, 16  ;;  %v690_v19 = vshrl.u32 %v5040_v10, 16  ;;  %v693_v22 = vshll.u32 %v5040_v10, 16  ;;  %v5041_v46 = vld [vmem:[%s5228_s10 + $0x20] sm:$0xff]   ;;  %v5042_v51 = vld [vmem:[%s5228_s10 + $0x18] sm:$0xff]  }
  0x1c   : > { %v522_v6 = vstv %s521_s23  ;;  %v685_v9 = vrot.slane %v683_v4, 7  ;;  %v5043_v0 = vld [vmem:[%s5228_s10 + $0x30] sm:$0xff]   ;;  %v711_v10 = vshrl.u32 %v5041_v46, 16  ;;  %s5303_s25 = sadd.s32 8, %s6950_s24  ;;  %s5119_s27 = smov 8  }
  0x1d   : > { %vm5239_vm2 = vcmp.eq.s32.totalorder %v522_v6, 1  ;;  %v699_v21 = vrot.slane %v697_v14, 7  ;;  %v692_v26 = vrot.slane %v690_v19, 7  ;;  %v714_v14 = vshll.u32 %v5041_v46, 16  ;;  %p483_p10 = scmp.lt.s32.totalorder %s5303_s25, 15  ;;  %s5121_s30 = smov 64  }
  0x1e   : > { %v526_v11 = vsel %vm5239_vm2, 0, %v514_v2  ;;  %v527_v12 = vsel %vm5239_vm2, 0, %v515_v3  ;;  %v688_v17 = vor.u32 %v686_v5, %v685_v9  ;;  %v873_v18 = vsel %vm5249_vm3, %v685_v9, 0  ;;  %v5295_v5 = vld [vmem:[%s5228_s10 + $0x28] sm:$0xff]   ;;  %s529_s20 = scalar_select %p528_p12, 1, 0 }
  0x1f   : > { %v4224_v16 = vcombine.low %v526_v11, %v527_v12  ;;  %v924_v20 = vshll.u32 %v873_v18, 16  ;;  %v1188_v27 = vrot.slane %v873_v18, 1  ;;  %v702_v31 = vor.u32 %v700_v15, %v699_v21  ;;  %s7006_s25 = smov (!%p483_p10, %s5303_s25), 15 }
  0x20   : > { %v5257_v25 = vsel %vm5249_vm3, 0, %v688_v17  ;;  %v875_v32 = vsel %vm5249_vm3, %v699_v21, 0  ;;  %v695_v33 = vor.u32 %v693_v22, %v692_v26  ;;  %v874_v41 = vsel %vm5249_vm3, %v692_v26, 0  ;;  %s4215_s29 = sshll.u32 %s7006_s25, 1 }
  0x21   : > { %v676_v23 = vshrl.u32 %v4224_v16, 16  ;;  %v679_v24 = vshll.u32 %v4224_v16, 16  ;;  %v917_v28 = vshrl.u32 %v5257_v25, 16  ;;  %v919_v29 = vshll.u32 %v5257_v25, 16  ;;  %p488_p11 = scmp.lt.s32.totalorder %s4215_s29, 31 }
  0x22   : > { %v1187_v34 = vrot.slane %v5257_v25, 1  ;;  %v926_v36 = vrot.slane %v924_v20, 1  ;;  %v948_v37 = vshll.u32 %v875_v32, 16  ;;  %v5268_v40 = vsel %vm5249_vm3, 0, %v702_v31 }
  0x23   : > { %v678_v30 = vrot.slane %v676_v23, 7  ;;  %v921_v35 = vrot.slane %v919_v29, 1  ;;  %v5274_v45 = vsel %vm5249_vm3, 0, %v695_v33  ;;  %v941_v48 = vshrl.u32 %v5268_v40, 16  ;;  %s7008_s29 = smov (!%p488_p11, %s4215_s29), 31 }
  0x24   : > { %v943_v49 = vshll.u32 %v5268_v40, 16  ;;  %v950_v50 = vrot.slane %v948_v37, 1  ;;  %v929_v55 = vshrl.u32 %v5274_v45, 16  ;;  %v931_v58 = vshll.u32 %v5274_v45, 16  ;;  %s4216_s17 = sshll.u32 %s7008_s29, 1 }
  0x25   : > { %v681_v38 = vor.u32 %v679_v24, %v678_v30  ;;  %v872_v39 = vsel %vm5249_vm3, %v678_v30, 0  ;;  %v922_v44 = vor.u32 %v921_v35, %v917_v28  ;;  %v936_v59 = vshll.u32 %v874_v41, 16  ;;  %s5369_s19 = sadd.s32 %s4216_s17, %s5214_s22  ;;  %s6754_s17 = scalar_lea.vmem %s6944_s9, %s4213_s28 }
  0x26   : > { %v1185_v42 = vrot.slane %v872_v39, 1  ;;  %v912_v43 = vshll.u32 %v872_v39, 16  ;;  %v945_v57 = vrot.slane %v943_v49, 1  ;;  %v1193_v62 = vrot.slane %v5268_v40, 1  ;;  %s4218_s22 = sshll.u32 %s5369_s19, 2 }
  0x27   : > { %v5279_v47 = vsel %vm5249_vm3, 0, %v681_v38  ;;  %v1194_v63 = vrot.slane %v875_v32, 1  ;;  %v933_v2 = vrot.slane %v931_v58, 1  ;;  %v938_v3 = vrot.slane %v936_v59, 1  ;;  %s5479_s24 = scalar_lea.vmem %s6937_s2, %s4218_s22 }
  0x28   : > { %v1184_v52 = vrot.slane %v5279_v47, 1  ;;  %v905_v53 = vshrl.u32 %v5279_v47, 16  ;;  %v907_v54 = vshll.u32 %v5279_v47, 16  ;;  %v914_v56 = vrot.slane %v912_v43, 1 }
  0x29   : > { %v946_v1 = vor.u32 %v945_v57, %v941_v48  ;;  %v1190_v4 = vrot.slane %v5274_v45, 1  ;;  %v1189_v7 = vsel %vm1180_vm4, %v1187_v34, %v1188_v27  ;;  %v1191_v9 = vrot.slane %v874_v41, 1 }
  0x2a   : > { %v1186_v60 = vsel %vm1180_vm4, %v1184_v52, %v1185_v42  ;;  %v909_v61 = vrot.slane %v907_v54, 1  ;;  %v927_v11 = vsel %vm891_vm5, %v922_v44, %v926_v36  ;;  %v934_v12 = vor.u32 %v933_v2, %v929_v55 }
  0x2b   : > { %1237 = vrot.lane.b32.xlu1 %v1186_v60, %s5118_s16  ;;  %v704_v15 = vshrl.u32 %v5042_v51, 16  ;;  %v1195_v17 = vsel %vm1180_vm4, %v1193_v62, %v1194_v63  ;;  %v713_v18 = vrot.slane %v711_v10, 7  ;;  %v707_v19 = vshll.u32 %v5042_v51, 16  ;;  %v5045_v60 = vld [vmem:[%s5228_s10 + $0x40] sm:$0xff]  }
  0x2c   : > { %v910_v6 = vor.u32 %v909_v61, %v905_v53  ;;  %v951_v20 = vsel %vm891_vm5, %v946_v1, %v950_v50  ;;  %v1192_v21 = vsel %vm1180_vm4, %v1190_v4, %v1191_v9  ;;  %v725_v23 = vshrl.u32 %v5043_v0, 16 }
  0x2d   : > { %v706_v22 = vrot.slane %v704_v15, 7  ;;  %v939_v24 = vsel %vm891_vm5, %v934_v12, %v938_v3  ;;  %v716_v26 = vor.u32 %v714_v14, %v713_v18  ;;  %v877_v27 = vsel %vm5249_vm3, %v713_v18, 0 }
  0x2e   : > { %v915_v16 = vsel %vm891_vm5, %v910_v6, %v914_v56  ;;  %v728_v28 = vshll.u32 %v5043_v0, 16  ;;  %v972_v29 = vshll.u32 %v877_v27, 16  ;;  %v718_v32 = vshrl.u32 %v5295_v5, 16 }
  0x2f   : > { %1110 = vrot.lane.b32.xlu0 %v915_v16, %s5119_s27  ;;  %1239 = vrot.lane.b32.xlu1 %v1189_v7, %s5118_s16  ;;  %v709_v30 = vor.u32 %v707_v19, %v706_v22  ;;  %v876_v31 = vsel %vm5249_vm3, %v706_v22, 0  ;;  %v5318_v33 = vsel %vm5249_vm3, 0, %v716_v26  ;;  %v1200_v34 = vrot.slane %v877_v27, 1  ;;  %v5048_v26 = vld [vmem:[%s5228_s10 + $0x48] sm:$0xff]  }
  0x30   : > { %v727_v35 = vrot.slane %v725_v23, 7  ;;  %v721_v36 = vshll.u32 %v5295_v5, 16  ;;  %v965_v37 = vshrl.u32 %v5318_v33, 16  ;;  %v967_v38 = vshll.u32 %v5318_v33, 16  ;;  %v5046_v5 = vld [vmem:[%s5228_s10 + $0x38] sm:$0xff]  }
  0x31   : > { %v5327_v39 = vsel %vm5249_vm3, 0, %v709_v30  ;;  %v960_v41 = vshll.u32 %v876_v31, 16  ;;  %v1199_v44 = vrot.slane %v5318_v33, 1  ;;  %v1197_v46 = vrot.slane %v876_v31, 1 }
  0x32   : > { %v953_v42 = vshrl.u32 %v5327_v39, 16  ;;  %v955_v43 = vshll.u32 %v5327_v39, 16  ;;  %v969_v48 = vrot.slane %v967_v38, 1  ;;  %v974_v49 = vrot.slane %v972_v29, 1 }
  0x33   : > { %1112 = vrot.lane.b32.xlu0 %v927_v11, %s5119_s27  ;;  %1116 = vrot.lane.b32.xlu1 %v951_v20, %s5119_s27  ;;  %v730_v50 = vor.u32 %v728_v28, %v727_v35  ;;  %v879_v51 = vsel %vm5249_vm3, %v727_v35, 0  ;;  %v1196_v53 = vrot.slane %v5327_v39, 1  ;;  %v720_v55 = vrot.slane %v718_v32, 7  ;;  %v5047_v11 = vld [vmem:[%s5228_s10 + $0x50] sm:$0xff]  }
  0x34   : > { %v957_v52 = vrot.slane %v955_v43, 1  ;;  %v996_v54 = vshll.u32 %v879_v51, 16  ;;  %v970_v56 = vor.u32 %v969_v48, %v965_v37  ;;  %v962_v57 = vrot.slane %v960_v41, 1 }
  0x35   : > { %v1201_v58 = vsel %vm1180_vm4, %v1199_v44, %v1200_v34  ;;  %v5343_v59 = vsel %vm5249_vm3, 0, %v730_v50  ;;  %v1206_v0 = vrot.slane %v879_v51, 1  ;;  %v723_v2 = vor.u32 %v721_v36, %v720_v55 }
  0x36   : > { %v958_v61 = vor.u32 %v957_v52, %v953_v42  ;;  %v989_v62 = vshrl.u32 %v5343_v59, 16  ;;  %v991_v63 = vshll.u32 %v5343_v59, 16  ;;  %v975_v1 = vsel %vm891_vm5, %v970_v56, %v974_v49 }
  0x37   : > { %1114 = vrot.lane.b32.xlu0 %v939_v24, %s5119_s27  ;;  %1243 = vrot.lane.b32.xlu1 %v1195_v17, %s5118_s16  ;;  %v5351_v3 = vsel %vm5249_vm3, %v720_v55, 0  ;;  %v1205_v4 = vrot.slane %v5343_v59, 1  ;;  %v1198_v6 = vsel %vm1180_vm4, %v1196_v53, %v1197_v46  ;;  %v998_v9 = vrot.slane %v996_v54, 1 }
  0x38   : > { %v993_v7 = vrot.slane %v991_v63, 1  ;;  %v984_v10 = vshll.u32 %v5351_v3, 16  ;;  %v963_v12 = vsel %vm891_vm5, %v958_v61, %v962_v57  ;;  %v5363_v14 = vsel %vm5249_vm3, 0, %v723_v2 }
  0x39   : > { %v739_v15 = vshrl.u32 %v5045_v60, 16  ;;  %v742_v16 = vshll.u32 %v5045_v60, 16  ;;  %v977_v18 = vshrl.u32 %v5363_v14, 16  ;;  %v979_v19 = vshll.u32 %v5363_v14, 16 }
  0x3a   : > { %v994_v17 = vor.u32 %v993_v7, %v989_v62  ;;  %v1203_v20 = vrot.slane %v5351_v3, 1  ;;  %v732_v23 = vshrl.u32 %v5046_v5, 16  ;;  %v735_v24 = vshll.u32 %v5046_v5, 16 }
  0x3b   : > { %1241 = vrot.lane.b32.xlu0 %v1192_v21, %s5118_s16  ;;  %1120 = vrot.lane.b32.xlu1 %v975_v1, %s5119_s27  ;;  %v1207_v21 = vsel %vm1180_vm4, %v1205_v4, %v1206_v0  ;;  %v741_v22 = vrot.slane %v739_v15, 7  ;;  %v981_v27 = vrot.slane %v979_v19, 1  ;;  %v986_v28 = vrot.slane %v984_v10, 1  ;;  %v5049_v0 = vld [vmem:[%s5228_s10 + $0x60] sm:$0xff]   ;;  %v5050_v19 = vld [vmem:[%s5228_s10 + $0x58] sm:$0xff]  }
  0x3c   : > { %v1202_v29 = vrot.slane %v5363_v14, 1  ;;  %v753_v30 = vshrl.u32 %v5047_v11, 16  ;;  %v999_v31 = vsel %vm891_vm5, %v994_v17, %v998_v9  ;;  %v734_v35 = vrot.slane %v732_v23, 7 }
  0x3d   : > { %v744_v32 = vor.u32 %v742_v16, %v741_v22  ;;  %v881_v34 = vsel %vm5249_vm3, %v741_v22, 0  ;;  %v982_v36 = vor.u32 %v981_v27, %v977_v18  ;;  %v756_v41 = vshll.u32 %v5047_v11, 16 }
  0x3e   : > { %v1020_v37 = vshll.u32 %v881_v34, 16  ;;  %v1212_v38 = vrot.slane %v881_v34, 1  ;;  %v737_v43 = vor.u32 %v735_v24, %v734_v35  ;;  %v880_v44 = vsel %vm5249_vm3, %v734_v35, 0  ;;  %v5051_v24 = vld [vmem:[%s5228_s10 + $0x70] sm:$0xff]  }
  0x3f   : > { %1118 = vrot.lane.b32.xlu0 %v963_v12, %s5119_s27  ;;  %1247 = vrot.lane.b32.xlu1 %v1201_v58, %s5118_s16  ;;  %v5381_v42 = vsel %vm5249_vm3, 0, %v744_v32  ;;  %v755_v46 = vrot.slane %v753_v30, 7  ;;  %v987_v48 = vsel %vm891_vm5, %v982_v36, %v986_v28  ;;  %v746_v51 = vshrl.u32 %v5048_v26, 16 }
  0x40   : > { %v1013_v49 = vshrl.u32 %v5381_v42, 16  ;;  %v1015_v50 = vshll.u32 %v5381_v42, 16  ;;  %v1022_v52 = vrot.slane %v1020_v37, 1  ;;  %v5392_v53 = vsel %vm5249_vm3, 0, %v737_v43 }
  0x41   : > { %v1008_v54 = vshll.u32 %v880_v44, 16  ;;  %v1211_v55 = vrot.slane %v5381_v42, 1  ;;  %v1001_v57 = vshrl.u32 %v5392_v53, 16  ;;  %v1003_v58 = vshll.u32 %v5392_v53, 16 }
  0x42   : > { %v1017_v56 = vrot.slane %v1015_v50, 1  ;;  %v1209_v60 = vrot.slane %v880_v44, 1  ;;  %v1208_v61 = vrot.slane %v5392_v53, 1  ;;  %v758_v62 = vor.u32 %v756_v41, %v755_v46 }
  0x43   : > { %1245 = vrot.lane.b32.xlu0 %v1198_v6, %s5118_s16  ;;  %1124 = vrot.lane.b32.xlu1 %v999_v31, %s5119_s27  ;;  %v883_v63 = vsel %vm5249_vm3, %v755_v46, 0  ;;  %v1204_v1 = vsel %vm1180_vm4, %v1202_v29, %v1203_v20  ;;  %v1005_v3 = vrot.slane %v1003_v58, 1  ;;  %v1010_v5 = vrot.slane %v1008_v54, 1 }
  0x44   : > { %v1018_v2 = vor.u32 %v1017_v56, %v1013_v49  ;;  %v1044_v4 = vshll.u32 %v883_v63, 16  ;;  %v5406_v6 = vsel %vm5249_vm3, 0, %v758_v62  ;;  %v748_v7 = vrot.slane %v746_v51, 7 }
  0x45   : > { %v749_v9 = vshll.u32 %v5048_v26, 16  ;;  %v1006_v11 = vor.u32 %v1005_v3, %v1001_v57  ;;  %v1037_v12 = vshrl.u32 %v5406_v6, 16  ;;  %v1039_v15 = vshll.u32 %v5406_v6, 16 }
  0x46   : > { %v1023_v10 = vsel %vm891_vm5, %v1018_v2, %v1022_v52  ;;  %v1213_v16 = vsel %vm1180_vm4, %v1211_v55, %v1212_v38  ;;  %v882_v18 = vsel %vm5249_vm3, %v748_v7, 0  ;;  %v1210_v20 = vsel %vm1180_vm4, %v1208_v61, %v1209_v60  ;;  %v5052_v52 = vld [vmem:[%s5228_s10 + $0x68] sm:$0xff]  }
  0x47   : > { %1122 = vrot.lane.b32.xlu0 %v987_v48, %s5119_s27  ;;  %1251 = vrot.lane.b32.xlu1 %v1207_v21, %s5118_s16  ;;  %v751_v17 = vor.u32 %v749_v9, %v748_v7  ;;  %v1041_v21 = vrot.slane %v1039_v15, 1  ;;  %v1046_v22 = vrot.slane %v1044_v4, 1  ;;  %v1218_v23 = vrot.slane %v883_v63, 1 }
  0x48   : > { %v1032_v27 = vshll.u32 %v882_v18, 16  ;;  %v767_v28 = vshrl.u32 %v5049_v0, 16  ;;  %v770_v29 = vshll.u32 %v5049_v0, 16  ;;  %v1011_v30 = vsel %vm891_vm5, %v1006_v11, %v1010_v5 }
  0x49   : > { %v5421_v26 = vsel %vm5249_vm3, 0, %v751_v17  ;;  %v1042_v31 = vor.u32 %v1041_v21, %v1037_v12  ;;  %v1217_v35 = vrot.slane %v5406_v6, 1  ;;  %v760_v37 = vshrl.u32 %v5050_v19, 16 }
  0x4a   : > { %v1025_v32 = vshrl.u32 %v5421_v26, 16  ;;  %v1027_v34 = vshll.u32 %v5421_v26, 16  ;;  %v769_v36 = vrot.slane %v767_v28, 7  ;;  %v763_v38 = vshll.u32 %v5050_v19, 16 }
  0x4b   : > { %1249 = vrot.lane.b32.xlu0 %v1204_v1, %s5118_s16  ;;  %1128 = vrot.lane.b32.xlu1 %v1023_v10, %s5119_s27  ;;  %v1214_v43 = vrot.slane %v5421_v26, 1  ;;  %v1215_v44 = vrot.slane %v882_v18, 1  ;;  %v781_v46 = vshrl.u32 %v5051_v24, 16  ;;  %v1034_v48 = vrot.slane %v1032_v27, 1 }
  0x4c   : > { %v1029_v41 = vrot.slane %v1027_v34, 1  ;;  %v772_v49 = vor.u32 %v770_v29, %v769_v36  ;;  %v885_v50 = vsel %vm5249_vm3, %v769_v36, 0  ;;  %v762_v51 = vrot.slane %v760_v37, 7  ;;  %v5053_v29 = vld [vmem:[%s5228_s10 + $0x78] sm:$0xff]   ;;  %s4312_s10 = sadd.s32 4294967295, %s5208_s18 }
  0x4d   : > { %v1047_v54 = vsel %vm891_vm5, %v1042_v31, %v1046_v22  ;;  %v1068_v56 = vshll.u32 %v885_v50, 16  ;;  %v784_v57 = vshll.u32 %v5051_v24, 16  ;;  %v783_v62 = vrot.slane %v781_v46, 7 }
  0x4e   : > { %v1030_v55 = vor.u32 %v1029_v41, %v1025_v32  ;;  %v5436_v58 = vsel %vm5249_vm3, 0, %v772_v49  ;;  %v765_v60 = vor.u32 %v763_v38, %v762_v51  ;;  %v884_v61 = vsel %vm5249_vm3, %v762_v51, 0 }
  0x4f   : > { %1126 = vrot.lane.b32.xlu0 %v1011_v30, %s5119_s27  ;;  %1255 = vrot.lane.b32.xlu1 %v1213_v16, %s5118_s16  ;;  %v1219_v63 = vsel %vm1180_vm4, %v1217_v35, %v1218_v23  ;;  %v1216_v0 = vsel %vm1180_vm4, %v1214_v43, %v1215_v44  ;;  %v1061_v1 = vshrl.u32 %v5436_v58, 16  ;;  %v1063_v2 = vshll.u32 %v5436_v58, 16 }
  0x50   : > { %v1035_v3 = vsel %vm891_vm5, %v1030_v55, %v1034_v48  ;;  %v5449_v4 = vsel %vm5249_vm3, 0, %v765_v60  ;;  %v1056_v5 = vshll.u32 %v884_v61, 16  ;;  %v774_v7 = vshrl.u32 %v5052_v52, 16  ;;  %v512_v48 = vld [vmem:[%s5233_s21] sm:$0xf] }
  0x51   : > { %v1065_v9 = vrot.slane %v1063_v2, 1  ;;  %v1070_v10 = vrot.slane %v1068_v56, 1  ;;  %v1049_v11 = vshrl.u32 %v5449_v4, 16  ;;  %v1051_v12 = vshll.u32 %v5449_v4, 16 }
  0x52   : > { %v1223_v15 = vrot.slane %v5436_v58, 1  ;;  %v1224_v16 = vrot.slane %v885_v50, 1  ;;  %v786_v17 = vor.u32 %v784_v57, %v783_v62  ;;  %v887_v18 = vsel %vm5249_vm3, %v783_v62, 0 }
  0x53   : > { %1253 = vrot.lane.b32.xlu0 %v1210_v20, %s5118_s16  ;;  %1132 = vrot.lane.b32.xlu1 %v1047_v54, %s5119_s27  ;;  %v1066_v19 = vor.u32 %v1065_v9, %v1061_v1  ;;  %v1053_v20 = vrot.slane %v1051_v12, 1  ;;  %v1221_v21 = vrot.slane %v884_v61, 1  ;;  %v1092_v22 = vshll.u32 %v887_v18, 16  ;;  %v513_v54 = vld [vmem:[%s5233_s21 + $0x4] sm:$0xf] }
  0x54   : > { %v1058_v23 = vrot.slane %v1056_v5, 1  ;;  %v5462_v24 = vsel %vm5249_vm3, 0, %v786_v17  ;;  %v776_v27 = vrot.slane %v774_v7, 7  ;;  %v777_v28 = vshll.u32 %v5052_v52, 16  ;;  %v516_v61 = vld [vmem:[%s5479_s24] sm:$0xf] }
  0x55   : > { %v1071_v30 = vsel %vm891_vm5, %v1066_v19, %v1070_v10  ;;  %v1054_v31 = vor.u32 %v1053_v20, %v1049_v11  ;;  %v1085_v32 = vshrl.u32 %v5462_v24, 16  ;;  %v1087_v34 = vshll.u32 %v5462_v24, 16 }
  0x56   : > { %v1225_v35 = vsel %vm1180_vm4, %v1223_v15, %v1224_v16  ;;  %v1220_v36 = vrot.slane %v5449_v4, 1  ;;  %v779_v37 = vor.u32 %v777_v28, %v776_v27  ;;  %v5474_v38 = vsel %vm5249_vm3, %v776_v27, 0 }
  0x57   : > { %1130 = vrot.lane.b32.xlu0 %v1035_v3, %s5119_s27  ;;  %1259 = vrot.lane.b32.xlu1 %v1219_v63, %s5118_s16  ;;  %v1089_v41 = vrot.slane %v1087_v34, 1  ;;  %v1094_v43 = vrot.slane %v1092_v22, 1  ;;  %v1229_v44 = vrot.slane %v5462_v24, 1  ;;  %v1230_v46 = vrot.slane %v887_v18, 1 }
  0x58   : > { %v5487_v49 = vsel %vm5249_vm3, 0, %v779_v37  ;;  %v1080_v50 = vshll.u32 %v5474_v38, 16  ;;  %v788_v51 = vshrl.u32 %v5053_v29, 16  ;;  %v791_v52 = vshll.u32 %v5053_v29, 16 }
  0x59   : > { %v1059_v55 = vsel %vm891_vm5, %v1054_v31, %v1058_v23  ;;  %v1090_v56 = vor.u32 %v1089_v41, %v1085_v32  ;;  %v1073_v57 = vshrl.u32 %v5487_v49, 16  ;;  %v1075_v60 = vshll.u32 %v5487_v49, 16  ;;  %v5055_v23 = vld [vmem:[%s6938_s3 + $0x14] ss:$0 sps:$4 sm:$0xff]   ;;  %v5533_v41 = vld [vmem:[%s6938_s3] sm:$0xff]  }
  0x5a   : > { %v1222_v62 = vsel %vm1180_vm4, %v1220_v36, %v1221_v21  ;;  %v790_v63 = vrot.slane %v788_v51, 7  ;;  %v530_v1 = vstv %s529_s20  ;;  %v524_v2 = vsel %vm5239_vm2, 0, %v512_v48  ;;  %4991 = vmatprep.subr.msk.bf16.mxu0 %vm1423_vm7, %v5055_v23 }
  0x5b   : > { %1257 = vrot.lane.b32.xlu0 %v1216_v0, %s5118_s16  ;;  %1136 = vrot.lane.b32.xlu1 %v1071_v30, %s5119_s27  ;;  %v517_v0 = vld [vmem:[%s5479_s24 + $0x4] sm:$0xf]  ;;  %v1077_v3 = vrot.slane %v1075_v60, 1  ;;  %v1227_v5 = vrot.slane %v5474_v38, 1  ;;  %vm5500_vm6 = vcmp.eq.s32.totalorder %v530_v1, 1  ;;  %v525_v9 = vsel %vm5239_vm2, 0, %v513_v54 }
  0x5c   : > { %v1082_v10 = vrot.slane %v1080_v50, 1  ;;  %v793_v11 = vor.u32 %v791_v52, %v790_v63  ;;  %v888_v12 = vsel %vm5249_vm3, %v790_v63, 0  ;;  %v532_v15 = vsel %vm5500_vm6, 0, %v516_v61 }
  0x5d   : > { %v1095_v16 = vsel %vm891_vm5, %v1090_v56, %v1094_v43  ;;  %v1078_v17 = vor.u32 %v1077_v3, %v1073_v57  ;;  %v1231_v18 = vsel %vm1180_vm4, %v1229_v44, %v1230_v46  ;;  %v533_v8 = vsel %vm5500_vm6, 0, %v517_v0 }
  0x5e   : > { %v1226_v19 = vrot.slane %v5487_v49, 1  ;;  %v5519_v20 = vsel %vm5249_vm3, 0, %v793_v11  ;;  %v4241_v21 = vcombine.low %v532_v15, %v533_v8  ;;  %v4223_v22 = vcombine.low %v524_v2, %v525_v9 }
  0x5f   : > { %1134 = vrot.lane.b32.xlu0 %v1059_v55, %s5119_s27  ;;  %1263 = vrot.lane.b32.xlu1 %v1225_v35, %s5118_s16  ;;  %v1097_v27 = vshrl.u32 %v5519_v20, 16  ;;  %v1099_v28 = vshll.u32 %v5519_v20, 16  ;;  %v1104_v29 = vshll.u32 %v888_v12, 16  ;;  %v1233_v30 = vrot.slane %v888_v12, 1 }
  0x60   : > { %v1083_v31 = vsel %vm891_vm5, %v1078_v17, %v1082_v10  ;;  %v795_v32 = vshrl.u32 %v4241_v21, 16  ;;  %v798_v34 = vshll.u32 %v4241_v21, 16  ;;  %v669_v35 = vshrl.u32 %v4223_v22, 16 }
  0x61   : > { %v1101_v36 = vrot.slane %v1099_v28, 1  ;;  %v1232_v37 = vrot.slane %v5519_v20, 1  ;;  %v672_v38 = vshll.u32 %v4223_v22, 16  ;;  %v1425_v46 = vsel %vm1423_vm7, %v5055_v23, 0  ;;  %v519_v28 = vld [vmem:[%s5479_s24 + $0xc] sm:$0xf] }
  0x62   : > { %v797_v43 = vrot.slane %v795_v32, 7  ;;  %v671_v44 = vrot.slane %v669_v35, 7  ;;  %v1106_v50 = vrot.slane %v1104_v29, 1  ;;  %4606 = vmatpush3.bf16.msra.mxu0 %v1425_v46  ;;  %v1228_v51 = vsel %vm1180_vm4, %v1226_v19, %v1227_v5 }
  0x63   : > { %1261 = vrot.lane.b32.xlu0 %v1222_v62, %s5118_s16  ;;  %1140 = vrot.lane.b32.xlu1 %v1095_v16, %s5119_s27  ;;  %v1102_v48 = vor.u32 %v1101_v36, %v1097_v27  ;;  %v1234_v56 = vsel %vm1180_vm4, %v1232_v37, %v1233_v30  ;;  %v518_v27 = vld [vmem:[%s5479_s24 + $0x8] sm:$0xf]  ;;  %v535_v30 = vsel %vm5500_vm6, 0, %v519_v28  ;;  %s5120_s24 = smov 32  }
  0x64   : > { %v800_v52 = vor.u32 %v798_v34, %v797_v43  ;;  %v889_v54 = vsel %vm5249_vm3, %v797_v43, 0  ;;  %v674_v55 = vor.u32 %v672_v38, %v671_v44  ;;  %v871_v61 = vsel %vm5249_vm3, %v671_v44, 0  ;;  %4643 = vmatprep.subr.bf16.mxu0 %v5533_v41 }
  0x65   : > { %v1356_v57 = vshll.u32 %v889_v54, 16  ;;  %v1365_v60 = vrot.slane %v889_v54, 1  ;;  %v1107_v0 = vsel %vm891_vm5, %v1102_v48, %v1106_v50  ;;  %v900_v10 = vshll.u32 %v871_v61, 16 }
  0x66   : > { %v5548_v62 = vsel %vm5249_vm3, 0, %v800_v52  ;;  %v5552_v63 = vsel %vm5249_vm3, 0, %v674_v55  ;;  %v1182_v11 = vrot.slane %v871_v61, 1  ;;  %v534_v29 = vsel %vm5500_vm6, 0, %v518_v27 }
  0x67   : > { %1138 = vrot.lane.b32.xlu0 %v1083_v31, %s5119_s27  ;;  %1267 = vrot.lane.b32.xlu1 %v1231_v18, %s5118_s16  ;;  %v1349_v1 = vshrl.u32 %v5548_v62, 16  ;;  %v1351_v2 = vshll.u32 %v5548_v62, 16  ;;  %v1364_v3 = vrot.slane %v5548_v62, 1  ;;  %v1358_v5 = vrot.slane %v1356_v57, 1 }
  0x68   : > { %v895_v9 = vshll.u32 %v5552_v63, 16  ;;  %v893_v16 = vshrl.u32 %v5552_v63, 16  ;;  %v1181_v17 = vrot.slane %v5552_v63, 1  ;;  %v902_v22 = vrot.slane %v900_v10, 1 }
  0x69   : > { %v1353_v12 = vrot.slane %v1351_v2, 1  ;;  %v1366_v15 = vsel %vm1180_vm4, %v1364_v3, %v1365_v60  ;;  %v4242_v31 = vcombine.low %v534_v29, %v535_v30 }
  0x6a   : > { %v897_v18 = vrot.slane %v895_v9, 1  ;;  %v1183_v23 = vsel %vm1180_vm4, %v1181_v17, %v1182_v11  ;;  %v5057_v9 = vld [vmem:[%s6938_s3 + $0x8] ss:$0 sps:$4 sm:$0xff]  }
  0x6b   : > { %1265 = vrot.lane.b32.xlu0 %v1228_v51, %s5118_s16  ;;  %1269 = vrot.lane.b32.xlu1 %v1234_v56, %s5118_s16  ;;  %v1354_v8 = vor.u32 %v1353_v12, %v1349_v1  ;;  %v802_v34 = vshrl.u32 %v4242_v31, 16  ;;  %v805_v36 = vshll.u32 %v4242_v31, 16  ;;  %v1616_v12 = vsel %vm1423_vm7, %v5057_v9, 0 }
  0x6c   : > { %v898_v21 = vor.u32 %v897_v18, %v893_v16 }
  0x6d   : > { %v1359_v19 = vsel %vm891_vm5, %v1354_v8, %v1358_v5  ;;  %v804_v35 = vrot.slane %v802_v34, 7 }
  0x6e   : > { %v903_v32 = vsel %vm891_vm5, %v898_v21, %v902_v22 }
  0x6f   : > { %1142 = vrot.lane.b32.xlu0 %v1107_v0, %s5119_s27  ;;  %1367 = vrot.lane.b32.xlu1 %v1366_v15, %s5118_s16  ;;  %v807_v37 = vor.u32 %v805_v36, %v804_v35  ;;  %v890_v43 = vsel %vm5249_vm3, %v804_v35, 0 }
  0x70   : > { %v1803_v48 = vshll.u32 %v890_v43, 16  ;;  %v1812_v54 = vrot.slane %v890_v43, 1 }
  0x71   : > { %v5580_v38 = vsel %vm5249_vm3, 0, %v807_v37 }
  0x72   : > { %v1798_v7 = vshll.u32 %v5580_v38, 16  ;;  %v1796_v44 = vshrl.u32 %v5580_v38, 16  ;;  %v1805_v51 = vrot.slane %v1803_v48, 1  ;;  %v1811_v52 = vrot.slane %v5580_v38, 1 }
  0x73   : > { %1360 = vrot.lane.b32.xlu0 %v1359_v19, %s5119_s27  ;;  %1235 = vrot.lane.b32.xlu1 %v1183_v23, %s5118_s16 }
  0x74   : > { %v1800_v46 = vrot.slane %v1798_v7, 1  ;;  %v1813_v56 = vsel %vm1180_vm4, %v1811_v52, %v1812_v54 }
  0x76   : > { %v1801_v50 = vor.u32 %v1800_v46, %v1796_v44 }
  0x77   : > { %1108 = vrot.lane.b32.xlu0 %v903_v32, %s5119_s27  ;;  %1814 = vrot.lane.b32.xlu1 %v1813_v56, %s5118_s16 }
  0x78   : > { %v1806_v55 = vsel %vm891_vm5, %v1801_v50, %v1805_v51 }
  0x7b   : > { %1807 = vrot.lane.b32.xlu0 %v1806_v55, %s5119_s27 }
  0x9d   : > { %v1238_v57 = vpop.permute.xlu1 %1237 }
  0xa1   : > { %v1111_v60 = vpop.permute.xlu0 %1110  ;;  %v1240_v61 = vpop.permute.xlu1 %1239 }
  0xa2   : > { %v1275_v0 = vsel %vm1271_vm8, %v5279_v47, %v1111_v60 }
  0xa3   : > { %v5594_v1 = vsel %vm1308_vm9, %v1275_v0, %v1238_v57 }
  0xa4   : > { %4607 = vmatprep.mubr.msk.bf16.mxu0 %vm1386_vm10, %v5594_v1 }
  0xa5   : > { %v1113_v2 = vpop.permute.xlu0 %1112  ;;  %v1117_v3 = vpop.permute.xlu1 %1116 }
  0xa6   : > { %v1277_v5 = vsel %vm1271_vm8, %v5257_v25, %v1113_v2  ;;  %v5614_v25 = vld [vmem:[%s6938_s3 + $0x18] sm:$0xff]   ;;  %v1281_v15 = vsel %vm1271_vm8, %v5268_v40, %v1117_v3 }
  0xa7   : > { %v5604_v10 = vsel %vm1308_vm9, %v1277_v5, %v1240_v61 }
  0xa8   : > { %4608 = vmatmul.mubr.msk.bf16.vlgmr.msra.gmra.mrb[0].mxu0 %vm1386_vm10, %v5604_v10 }
  0xa9   : > { %4644 = vmatpush3.bf16.msra.mxu0 %v5533_v41  ;;  %v1115_v47 = vpop.permute.xlu0 %1114  ;;  %v1244_v11 = vpop.permute.xlu1 %1243 }
  0xaa   : > { %4992 = vmatprep.subr.msk.bf16.mxu0 %vm1423_vm7, %v5057_v9  ;;  %v1279_v16 = vsel %vm1271_vm8, %v5274_v45, %v1115_v47  ;;  %v5625_v8 = vsel %vm1308_vm9, %v1281_v15, %v1244_v11 }
  0xad   : > { %v1242_v17 = vpop.permute.xlu0 %1241  ;;  %v1121_v18 = vpop.permute.xlu1 %1120  ;;  %4646 = vmatpush3.bf16.msra.mxu0 %v1616_v12 }
  0xae   : > { %v5621_v41 = vsel %vm1308_vm9, %v1279_v16, %v1242_v17  ;;  %4683 = vmatprep.subr.bf16.mxu0 %v5614_v25  ;;  %v1285_v45 = vsel %vm1271_vm8, %v5318_v33, %v1121_v18 }
  0xaf   : > { %4611 = vmatprep.mubr.msk.bf16.mxu0 %vm1386_vm10, %v5621_v41 }
  0xb0   : > { %4612 = vmatmul.mubr.msk.bf16.gmra.mrb[4].mxu0 %vm1386_vm10, %v5625_v8 }
  0xb1   : > { %v1119_v40 = vpop.permute.xlu0 %1118  ;;  %v1248_v19 = vpop.permute.xlu1 %1247 }
  0xb2   : > { %v1283_v21 = vsel %vm1271_vm8, %v5327_v39, %v1119_v40  ;;  %v5639_v28 = vsel %vm1308_vm9, %v1285_v45, %v1248_v19 }
  0xb5   : > { %v1246_v22 = vpop.permute.xlu0 %1245  ;;  %v1125_v23 = vpop.permute.xlu1 %1124 }
  0xb6   : > { %v5636_v27 = vsel %vm1308_vm9, %v1283_v21, %v1246_v22  ;;  %v1289_v33 = vsel %vm1271_vm8, %v5343_v59, %v1125_v23  ;;  %v5059_v22 = vld [vmem:[%s6938_s3 + $0x20] ss:$0 sps:$4 sm:$0xff]  }
  0xb7   : > { %4615 = vmatprep.mubr.msk.bf16.mxu0 %vm1386_vm10, %v5636_v27 }
  0xb8   : > { %4616 = vmatmul.mubr.msk.bf16.gmra.mrb[8].mxu0 %vm1386_vm10, %v5639_v28 }
  0xb9   : > { %v1123_v29 = vpop.permute.xlu0 %1122  ;;  %v1252_v30 = vpop.permute.xlu1 %1251 }
  0xba   : > { %v1287_v39 = vsel %vm1271_vm8, %v5363_v14, %v1123_v29  ;;  %v5653_v35 = vsel %vm1308_vm9, %v1289_v33, %v1252_v30 }
  0xbd   : > { %v1250_v31 = vpop.permute.xlu0 %1249  ;;  %v1129_v32 = vpop.permute.xlu1 %1128 }
  0xbe   : > { %v5650_v34 = vsel %vm1308_vm9, %v1287_v39, %v1250_v31  ;;  %v1293_v59 = vsel %vm1271_vm8, %v5381_v42, %v1129_v32 }
  0xbf   : > { %4619 = vmatprep.mubr.msk.bf16.mxu0 %vm1386_vm10, %v5650_v34 }
  0xc0   : > { %4620 = vmatmul.mubr.msk.bf16.gmra.mrb[12].mxu0 %vm1386_vm10, %v5653_v35 }
  0xc1   : > { %v1127_v36 = vpop.permute.xlu0 %1126  ;;  %v1256_v37 = vpop.permute.xlu1 %1255 }
  0xc2   : > { %v1291_v14 = vsel %vm1271_vm8, %v5392_v53, %v1127_v36  ;;  %v5667_v46 = vsel %vm1308_vm9, %v1293_v59, %v1256_v37 }
  0xc5   : > { %v1254_v7 = vpop.permute.xlu0 %1253  ;;  %v1133_v43 = vpop.permute.xlu1 %1132 }
  0xc6   : > { %v5664_v44 = vsel %vm1308_vm9, %v1291_v14, %v1254_v7  ;;  %v1297_v42 = vsel %vm1271_vm8, %v5406_v6, %v1133_v43 }
  0xc7   : > { %4623 = vmatprep.mubr.msk.bf16.mxu0 %vm1386_vm10, %v5664_v44 }
  0xc8   : > { %4624 = vmatmul.mubr.msk.bf16.gmra.mrb[16].mxu0 %vm1386_vm10, %v5667_v46 }
  0xc9   : > { %v1131_v48 = vpop.permute.xlu0 %1130  ;;  %v1260_v50 = vpop.permute.xlu1 %1259 }
  0xca   : > { %v1295_v53 = vsel %vm1271_vm8, %v5421_v26, %v1131_v48  ;;  %v5681_v55 = vsel %vm1308_vm9, %v1297_v42, %v1260_v50  ;;  %v5060_v42 = vld [vmem:[%s6941_s6 + $0x30] sm:$0xff]  }
  0xcb   : > { %4723 = vmatprep.subr.bf16.mxu1 %v5060_v42 }
  0xcc   : > { %4724 = vmatpush3.bf16.msra.mxu1 %v5060_v42 }
  0xcd   : > { %v1258_v51 = vpop.permute.xlu0 %1257  ;;  %v1137_v52 = vpop.permute.xlu1 %1136 }
  0xce   : > { %v5678_v54 = vsel %vm1308_vm9, %v1295_v53, %v1258_v51  ;;  %v1301_v6 = vsel %vm1271_vm8, %v5436_v58, %v1137_v52  ;;  %v5061_v53 = vld [vmem:[%s6941_s6 + $0x38] sm:$0xff]  }
  0xcf   : > { %4627 = vmatprep.mubr.msk.bf16.mxu0 %vm1386_vm10, %v5678_v54  ;;  %4725 = vmatprep.subr.bf16.mxu1 %v5061_v53 }
  0xd0   : > { %4628 = vmatmul.mubr.msk.bf16.gmra.mrb[20].mxu0 %vm1386_vm10, %v5681_v55  ;;  %4726 = vmatpush3.bf16.msra.mxu1 %v5061_v53 }
  0xd1   : > { %v1135_v56 = vpop.permute.xlu0 %1134  ;;  %v1264_v57 = vpop.permute.xlu1 %1263 }
  0xd2   : > { %v1299_v26 = vsel %vm1271_vm8, %v5449_v4, %v1135_v56  ;;  %v1338_v2 = vsel %vm1308_vm9, %v1301_v6, %v1264_v57 }
  0xd5   : > { %v1262_v60 = vpop.permute.xlu0 %1261  ;;  %v1141_v61 = vpop.permute.xlu1 %1140 }
  0xd6   : > { %v1336_v0 = vsel %vm1308_vm9, %v1299_v26, %v1262_v60  ;;  %v1305_v9 = vsel %vm1271_vm8, %v5462_v24, %v1141_v61 }
  0xd7   : > { %4631 = vmatprep.mubr.msk.bf16.mxu0 %vm1386_vm10, %v1336_v0 }
  0xd8   : > { %4632 = vmatmul.mubr.msk.bf16.gmra.mrb[24].mxu0 %vm1386_vm10, %v1338_v2 }
  0xd9   : > { %v1139_v3 = vpop.permute.xlu0 %1138  ;;  %v1268_v5 = vpop.permute.xlu1 %1267 }
  0xda   : > { %v1303_v58 = vsel %vm1271_vm8, %v5487_v49, %v1139_v3  ;;  %v1342_v12 = vsel %vm1308_vm9, %v1305_v9, %v1268_v5 }
  0xdd   : > { %v1266_v47 = vpop.permute.xlu0 %1265  ;;  %v1270_v11 = vpop.permute.xlu1 %1269 }
  0xde   : > { %v1340_v4 = vsel %vm1308_vm9, %v1303_v58, %v1266_v47 }
  0xdf   : > { %4635 = vmatprep.mubr.msk.bf16.mxu0 %vm1386_vm10, %v1340_v4 }
  0xe0   : > { %4636 = vmatmul.mubr.msk.bf16.gmra.mrb[28].mxu0 %vm1386_vm10, %v1342_v12 }
  0xe1   : > { %v1143_v15 = vpop.permute.xlu0 %1142  ;;  %v1368_v24 = vpop.permute.xlu1 %1367 }
  0xe2   : > { %v1307_v16 = vsel %vm1271_vm8, %v5519_v20, %v1143_v15 }
  0xe3   : > { %v1344_v17 = vsel %vm1308_vm9, %v1307_v16, %v1270_v11 }
  0xe4   : > { %4639 = vmatprep.mubr.msk.bf16.mxu0 %vm1386_vm10, %v1344_v17 }
  0xe5   : > { %v1361_v49 = vpop.permute.xlu0 %1360  ;;  %v1236_v19 = vpop.permute.xlu1 %1235 }
  0xe6   : > { %v1370_v18 = vsel %vm1271_vm8, %v5548_v62, %v1361_v49  ;;  %v1836_v62 = vsel %vm1423_vm7, %v5059_v22, 0 }
  0xe7   : > { %v1372_v40 = vsel %vm1308_vm9, %v1370_v18, %v1368_v24 }
  0xe8   : > { %4640 = vmatmul.mubr.msk.bf16.gmra.mrb[32].mxu0 %vm1386_vm10, %v1372_v40 }
  0xe9   : > { %v1109_v45 = vpop.permute.xlu0 %1108 }
  0xea   : > { %v1273_v21 = vsel %vm1271_vm8, %v5552_v63, %v1109_v45 }
  0xeb   : > { %v1310_v20 = vsel %vm1308_vm9, %v1273_v21, %v1236_v19 }
  0xec   : > { %4647 = vmatprep.mubr.msk.bf16.mxu0 %vm1386_vm10, %v1310_v20 }
  0xed   : > { %v1808_v63 = vpop.permute.xlu0 %1807 }
  0xf0   : > { %4648 = vmatmul.mubr.msk.bf16.vlgmr.msra.gmra.mrb[0].mxu0 %vm1386_vm10, %v5594_v1  ;;  %v1817_v1 = vsel %vm1271_vm8, %v5580_v38, %v1808_v63  ;;  %v5794_v38 = vld [vmem:[%s6940_s5] ss:$0 sm:$0xff] }
  0xf1   : > { %4684 = vmatpush3.bf16.msra.mxu0 %v5614_v25  ;;  %4651 = vmatprep.mubr.msk.bf16.mxu0 %vm1386_vm10, %v5604_v10 }
  0xf2   : > { %4993 = vmatprep.subr.msk.bf16.mxu0 %vm1423_vm7, %v5059_v22 }
  0xf5   : > { %4686 = vmatpush3.bf16.msra.mxu0 %v1836_v62 }
  0xf8   : > { %4652 = vmatmul.mubr.msk.bf16.gmra.mrb[4].mxu0 %vm1386_vm10, %v5621_v41 }
  0xf9   : > { %4655 = vmatprep.mubr.msk.bf16.mxu0 %vm1386_vm10, %v5625_v8 }
 0x100   : > { %4656 = vmatmul.mubr.msk.bf16.gmra.mrb[8].mxu0 %vm1386_vm10, %v5636_v27 }
 0x101   : > { %4659 = vmatprep.mubr.msk.bf16.mxu0 %vm1386_vm10, %v5639_v28 }
 0x108   : > { %4660 = vmatmul.mubr.msk.bf16.gmra.mrb[12].mxu0 %vm1386_vm10, %v5650_v34 }
 0x109   : > { %4663 = vmatprep.mubr.msk.bf16.mxu0 %vm1386_vm10, %v5653_v35 }
 0x110   : > { %4664 = vmatmul.mubr.msk.bf16.gmra.mrb[16].mxu0 %vm1386_vm10, %v5664_v44 }
 0x111   : > { %4667 = vmatprep.mubr.msk.bf16.mxu0 %vm1386_vm10, %v5667_v46 }
 0x118   : > { %4668 = vmatmul.mubr.msk.bf16.gmra.mrb[20].mxu0 %vm1386_vm10, %v5678_v54 }
 0x119   : > { %4671 = vmatprep.mubr.msk.bf16.mxu0 %vm1386_vm10, %v5681_v55 }
 0x120   : > { %4672 = vmatmul.mubr.msk.bf16.gmra.mrb[24].mxu0 %vm1386_vm10, %v1336_v0 }
 0x121   : > { %4675 = vmatprep.mubr.msk.bf16.mxu0 %vm1386_vm10, %v1338_v2 }
 0x128   : > { %4676 = vmatmul.mubr.msk.bf16.gmra.mrb[28].mxu0 %vm1386_vm10, %v1340_v4 }
 0x129   : > { %4679 = vmatprep.mubr.msk.bf16.mxu0 %vm1386_vm10, %v1342_v12 }
 0x130   : > { %4680 = vmatmul.mubr.msk.bf16.gmra.mrb[32].mxu0 %vm1386_vm10, %v1344_v17 }
 0x131   : > { %4687 = vmatprep.mubr.msk.bf16.mxu0 %vm1386_vm10, %v5604_v10  ;;  %v1815_v10 = vpop.permute.xlu1 %1814 }
 0x132   : > { %v1819_v25 = vsel %vm1308_vm9, %v1817_v1, %v1815_v10 }
 0x138   : > { %4688 = vmatmul.mubr.msk.bf16.vlgmr.msra.gmra.mrb[0].mxu0 %vm1386_vm10, %v5621_v41  ;;  %v5783_v41 = vstv %s4312_s10 }
 0x139   : > { %4691 = vmatprep.mubr.msk.bf16.mxu0 %vm1386_vm10, %v5625_v8  ;;  %v5788_v8 = vld [vmem:[%s6939_s4] ss:$0 sm:$0xff]  ;;  %v2176_v23 = vadd.s32 1, %v5783_v41  ;;  %vm2193_vm13 = vcmp.ge.s32.totalorder %v5783_v41, 0  ;;  %vm2211_vm14 = vcmp.lt.s32.totalorder %v5783_v41, 20  ;;  %v5838_v60 = vadd.s32 6, %v5783_v41 }
 0x13a   : > { %vm5816_vm0 = vmand %vm2193_vm13, %vm2211_vm14  ;;  %v5852_v11 = vadd.s32 9, %v5783_v41  ;;  %v5862_v24 = vadd.s32 8, %v5783_v41  ;;  %v5869_v19 = vadd.s32 10, %v5783_v41  ;;  %v5885_v10 = vadd.s32 13, %v5783_v41 }
 0x13b   : > { %vm2194_vm11 = vcmp.ge.s32.totalorder %v2176_v23, 0  ;;  %vm2212_vm12 = vcmp.lt.s32.totalorder %v2176_v23, 20  ;;  %v5891_v23 = vadd.s32 15, %v5783_v41 }
 0x13c   : > { %vm5808_vm15 = vmand %vm2194_vm11, %vm2212_vm12 }
 0x140   : > { %4692 = vmatmul.mubr.msk.bf16.gmra.mrb[4].mxu0 %vm1386_vm10, %v5636_v27 }
 0x141   : > { %4695 = vmatprep.mubr.msk.bf16.mxu0 %vm1386_vm10, %v5639_v28 }
 0x148   : > { %4696 = vmatmul.mubr.msk.bf16.gmra.mrb[8].mxu0 %vm1386_vm10, %v5650_v34  ;;  %v2178_v34 = vadd.s32 3, %v5783_v41 }
 0x149   : > { %4699 = vmatprep.mubr.msk.bf16.mxu0 %vm1386_vm10, %v5653_v35  ;;  %v2177_v35 = vadd.s32 2, %v5783_v41 }
 0x14a   : > { %vm2196_vm1 = vcmp.ge.s32.totalorder %v2178_v34, 0  ;;  %vm2214_vm2 = vcmp.lt.s32.totalorder %v2178_v34, 20 }
 0x14b   : > { %vm2195_vm6 = vcmp.ge.s32.totalorder %v2177_v35, 0  ;;  %vm2213_vm7 = vcmp.lt.s32.totalorder %v2177_v35, 20  ;;  %vm5873_vm12 = vmand %vm2196_vm1, %vm2214_vm2  ;;  %v5905_v35 = vadd.s32 16, %v5783_v41  ;;  %vm2199_vm1 = vcmp.ge.s32.totalorder %v5838_v60, 0 }
 0x14c   : > { %vm5880_vm13 = vmand %vm2195_vm6, %vm2213_vm7  ;;  %vm2217_vm2 = vcmp.lt.s32.totalorder %v5838_v60, 20 }
 0x150   : > { %4700 = vmatmul.mubr.msk.bf16.gmra.mrb[12].mxu0 %vm1386_vm10, %v5664_v44 }
 0x151   : > { %4703 = vmatprep.mubr.msk.bf16.mxu0 %vm1386_vm10, %v5667_v46  ;;  %v5814_v46 = vadd.s32 5, %v5783_v41 }
 0x153   : > { %vm2198_vm8 = vcmp.ge.s32.totalorder %v5814_v46, 0  ;;  %vm2216_vm9 = vcmp.lt.s32.totalorder %v5814_v46, 20 }
 0x158   : > { %4704 = vmatmul.mubr.msk.bf16.gmra.mrb[16].mxu0 %vm1386_vm10, %v5678_v54  ;;  %v5827_v54 = vadd.s32 4, %v5783_v41 }
 0x159   : > { %4707 = vmatprep.mubr.msk.bf16.mxu0 %vm1386_vm10, %v5681_v55  ;;  %v5830_v55 = vadd.s32 7, %v5783_v41 }
 0x15a   : > { %vm2215_vm11 = vcmp.lt.s32.totalorder %v5827_v54, 20 }
 0x15b   : > { %vm2200_vm14 = vcmp.ge.s32.totalorder %v5830_v55, 0 }
 0x160   : > { %4708 = vmatmul.mubr.msk.bf16.gmra.mrb[20].mxu0 %vm1386_vm10, %v1336_v0 }
 0x161   : > { %4711 = vmatprep.mubr.msk.bf16.mxu0 %vm1386_vm10, %v1338_v2 }
 0x168   : > { %4712 = vmatmul.mubr.msk.bf16.gmra.mrb[24].mxu0 %vm1386_vm10, %v1340_v4 }
 0x169   : > { %4715 = vmatprep.mubr.msk.bf16.mxu0 %vm1386_vm10, %v1342_v12  ;;  %v5062_v12 = vld [vmem:[%s6941_s6 + $0x40] sm:$0xff]  }
 0x16a   : > { %4727 = vmatprep.subr.bf16.mxu1 %v5062_v12 }
 0x16b   : > { %4728 = vmatpush3.bf16.msra.mxu1 %v5062_v12 }
 0x170   : > { %4716 = vmatmul.mubr.msk.bf16.gmra.mrb[28].mxu0 %vm1386_vm10, %v1344_v17 }
 0x171   : > { %4719 = vmatprep.mubr.msk.bf16.mxu0 %vm1386_vm10, %v1372_v40  ;;  %v5866_v40 = vadd.s32 11, %v5783_v41 }
 0x178   : > { %4720 = vmatmul.mubr.msk.bf16.gmra.mrb[32].mxu0 %vm1386_vm10, %v1819_v25  ;;  %vm2197_vm10 = vcmp.ge.s32.totalorder %v5827_v54, 0  ;;  %v5888_v25 = vadd.s32 12, %v5783_v41 }
 0x179   : > { %vm5952_vm6 = vmand %vm2197_vm10, %vm2215_vm11  ;;  %vm2201_vm11 = vcmp.ge.s32.totalorder %v5862_v24, 0 }
 0x17a   : > { %vm6007_vm10 = vmand %vm2199_vm1, %vm2217_vm2  ;;  %vm2221_vm1 = vcmp.lt.s32.totalorder %v5869_v19, 20 }
 0x20b   : > { %v4689_v27 = vpop.f32.mrb[0].mxu0 }
 0x20c   : > { %v2060_v28 = vmul.f32 %v4689_v27, %v5788_v8  ;;  %v1872_v29 = vpop.f32.mrb[1].mxu0 }
 0x20d   : > { %v2058_v30 = vmul.f32 %v5788_v8, %v1872_v29  ;;  %v4690_v33 = vpop.f32.mrb[2].mxu0 }
 0x20e   : > { %v2103_v39 = vadd.f32 %v5794_v38, %v2060_v28  ;;  %v2061_v31 = vmul.f32 %v4690_v33, %v5788_v8  ;;  %v1875_v32 = vpop.f32.mrb[3].mxu0  ;;  %v5897_v33 = vadd.s32 17, %v5783_v41 }
 0x20f   : > { %v2101_v36 = vadd.f32 %v5794_v38, %v2058_v30  ;;  %v2059_v37 = vmul.f32 %v5788_v8, %v1875_v32  ;;  %v5894_v30 = vadd.s32 14, %v5783_v41 }
 0x210   : > { %v2139_v59 = vmax.f32 %v2103_v39, 0.0  ;;  %v2104_v14 = vadd.f32 %v5794_v38, %v2061_v31 }
 0x211   : > { %v2137_v43 = vmax.f32 %v2101_v36, 0.0  ;;  %v2102_v44 = vadd.f32 %v5794_v38, %v2059_v37  ;;  %v5063_v36 = vld [vmem:[%s6941_s6 + $0x48] sm:$0xff]  }
 0x212   : > { %v2140_v50 = vmax.f32 %v2104_v14, 0.0  ;;  %v2285_v56 = vsel %vm5808_vm15, %v2139_v59, 0.0  ;;  %4729 = vmatprep.subr.bf16.mxu1 %v5063_v36 }
 0x213   : > { %v2138_v51 = vmax.f32 %v2102_v44, 0.0  ;;  %v4693_v52 = vpop.f32.mrb[4].mxu0  ;;  %v2283_v61 = vsel %vm5816_vm0, %v2137_v43, 0.0  ;;  %4730 = vmatpush3.bf16.msra.mxu1 %v5063_v36 }
 0x214   : > { %v2286_v57 = vsel %vm5808_vm15, %v2140_v50, 0.0  ;;  %v2064_v6 = vmul.f32 %v4693_v52, %v5788_v8  ;;  %v1888_v26 = vpop.f32.mrb[5].mxu0  ;;  %vm2218_vm15 = vcmp.lt.s32.totalorder %v5830_v55, 20 }
 0x215   : > { %v2320_v0 = vpack.c.bf16 %v2286_v57, %v2285_v56  ;;  %v2284_v2 = vsel %vm5816_vm0, %v2138_v51, 0.0  ;;  %v2062_v3 = vmul.f32 %v5788_v8, %v1888_v26  ;;  %v4694_v5 = vpop.f32.mrb[6].mxu0  ;;  %v5064_v57 = vld [vmem:[%s6941_s6 + $0x50] sm:$0xff]   ;;  %vm5937_vm0 = vmand %vm2198_vm8, %vm2216_vm9  ;;  %vm2202_vm8 = vcmp.ge.s32.totalorder %v5852_v11, 0 }
 0x216   : > { %v5847_v9 = vpack.c.bf16 %v2284_v2, %v2283_v61  ;;  %v2107_v58 = vadd.f32 %v5794_v38, %v2064_v6  ;;  %v2065_v47 = vmul.f32 %v4694_v5, %v5788_v8  ;;  %v1891_v4 = vpop.f32.mrb[7].mxu0  ;;  %4731 = vmatprep.subr.bf16.mxu1 %v5064_v57  ;;  %vm5987_vm7 = vmand %vm2200_vm14, %vm2218_vm15  ;;  %vm2220_vm9 = vcmp.lt.s32.totalorder %v5852_v11, 20 }
 0x217   : > { %v2345_v15 = vshrl.u32 %v2320_v0, 16  ;;  %v2105_v16 = vadd.f32 %v5794_v38, %v2062_v3  ;;  %v2063_v17 = vmul.f32 %v5788_v8, %v1891_v4  ;;  %v2348_v21 = vshll.u32 %v2320_v0, 16  ;;  %4732 = vmatpush3.bf16.msra.mxu1 %v5064_v57 }
 0x218   : > { %v2143_v49 = vmax.f32 %v2107_v58, 0.0  ;;  %v2108_v18 = vadd.f32 %v5794_v38, %v2065_v47  ;;  %v2338_v6 = vshrl.u32 %v5847_v9, 16  ;;  %vm2204_vm14 = vcmp.ge.s32.totalorder %v5866_v40, 0 }
 0x219   : > { %v2347_v45 = vrot.slane %v2345_v15, 7  ;;  %v2141_v22 = vmax.f32 %v2105_v16, 0.0  ;;  %v2106_v62 = vadd.f32 %v5794_v38, %v2063_v17  ;;  %vm2222_vm15 = vcmp.lt.s32.totalorder %v5866_v40, 20 }
 0x21a   : > { %v2144_v1 = vmax.f32 %v2108_v18, 0.0  ;;  %v2289_v39 = vsel %vm5873_vm12, %v2143_v49, 0.0 }
 0x21b   : > { %v2350_v27 = vor.u32 %v2348_v21, %v2347_v45  ;;  %v2142_v28 = vmax.f32 %v2106_v62, 0.0  ;;  %v4697_v29 = vpop.f32.mrb[8].mxu0  ;;  %v2287_v37 = vsel %vm5880_vm13, %v2141_v22, 0.0  ;;  %v5921_v42 = vsel %vm5249_vm3, %v2347_v45, 0 }
 0x21c   : > { %v2290_v31 = vsel %vm5873_vm12, %v2144_v1, 0.0  ;;  %v2068_v32 = vmul.f32 %v4697_v29, %v5788_v8  ;;  %v1904_v34 = vpop.f32.mrb[9].mxu0  ;;  %v2555_v47 = vshll.u32 %v5921_v42, 16  ;;  %vm2219_vm12 = vcmp.lt.s32.totalorder %v5862_v24, 20 }
 0x21d   : > { %v2322_v59 = vpack.c.bf16 %v2290_v31, %v2289_v39  ;;  %v2288_v14 = vsel %vm5880_vm13, %v2142_v28, 0.0  ;;  %v2066_v7 = vmul.f32 %v5788_v8, %v1904_v34  ;;  %v4698_v43 = vpop.f32.mrb[10].mxu0  ;;  %v5925_v53 = vsel %vm5249_vm3, 0, %v2350_v27  ;;  %vm6072_vm13 = vmand %vm2202_vm8, %vm2220_vm9 }
 0x21e   : > { %v2321_v44 = vpack.c.bf16 %v2288_v14, %v2287_v37  ;;  %v2111_v48 = vadd.f32 %v5794_v38, %v2068_v32  ;;  %v2069_v41 = vmul.f32 %v4698_v43, %v5788_v8  ;;  %v1907_v50 = vpop.f32.mrb[11].mxu0  ;;  %v2550_v16 = vshll.u32 %v5925_v53, 16  ;;  %vm6093_vm2 = vmand %vm2201_vm11, %vm2219_vm12 }
 0x21f   : > { %v2359_v51 = vshrl.u32 %v2322_v59, 16  ;;  %v2109_v52 = vadd.f32 %v5794_v38, %v2066_v7  ;;  %v2067_v56 = vmul.f32 %v5788_v8, %v1907_v50  ;;  %v2362_v4 = vshll.u32 %v2322_v59, 16 }
 0x220   : > { %v2352_v26 = vshrl.u32 %v2321_v44, 16  ;;  %v2147_v61 = vmax.f32 %v2111_v48, 0.0  ;;  %v2112_v2 = vadd.f32 %v5794_v38, %v2069_v41  ;;  %v2355_v46 = vshll.u32 %v2321_v44, 16 }
 0x221   : > { %v5942_v3 = vrot.slane %v2359_v51, 7  ;;  %v2145_v5 = vmax.f32 %v2109_v52, 0.0  ;;  %v2110_v58 = vadd.f32 %v5794_v38, %v2067_v56  ;;  %v2548_v21 = vshrl.u32 %v5925_v53, 16  ;;  %v6058_v56 = vld [vmem:[%s6941_s6] sm:$0xff]  }
 0x222   : > { %v2148_v15 = vmax.f32 %v2112_v2, 0.0  ;;  %v5957_v17 = vrot.slane %v2352_v26, 7  ;;  %v2293_v49 = vsel %vm5937_vm0, %v2147_v61, 0.0  ;;  %v2552_v63 = vrot.slane %v2550_v16, 1 }
 0x223   : > { %v2146_v18 = vmax.f32 %v2110_v58, 0.0  ;;  %v4701_v45 = vpop.f32.mrb[12].mxu0  ;;  %v2364_v20 = vor.u32 %v2362_v4, %v5942_v3  ;;  %v2291_v1 = vsel %vm5952_vm6, %v2145_v5, 0.0  ;;  %v2557_v36 = vrot.slane %v2555_v47, 1 }
 0x224   : > { %v2294_v54 = vsel %vm5937_vm0, %v2148_v15, 0.0  ;;  %v2072_v22 = vmul.f32 %v4701_v45, %v5788_v8  ;;  %v1920_v62 = vpop.f32.mrb[13].mxu0  ;;  %v2553_v34 = vor.u32 %v2552_v63, %v2548_v21  ;;  %v2341_v59 = vshll.u32 %v5847_v9, 16 }
 0x225   : > { %v2324_v27 = vpack.c.bf16 %v2294_v54, %v2293_v49  ;;  %v2292_v28 = vsel %vm5952_vm6, %v2146_v18, 0.0  ;;  %v2070_v29 = vmul.f32 %v5788_v8, %v1920_v62  ;;  %v4702_v39 = vpop.f32.mrb[14].mxu0  ;;  %v2357_v44 = vor.u32 %v2355_v46, %v5957_v17  ;;  %vm6144_vm6 = vmand %vm2204_vm14, %vm2222_vm15 }
 0x226   : > { %v2323_v31 = vpack.c.bf16 %v2292_v28, %v2291_v1  ;;  %v2115_v32 = vadd.f32 %v5794_v38, %v2072_v22  ;;  %v1923_v37 = vpop.f32.mrb[15].mxu0  ;;  %v2073_v43 = vmul.f32 %v4702_v39, %v5788_v8  ;;  %v2558_v50 = vsel %vm891_vm5, %v2553_v34, %v2557_v36 }
 0x227   : > { %v2373_v14 = vshrl.u32 %v2324_v27, 16  ;;  %v2113_v7 = vadd.f32 %v5794_v38, %v2070_v29  ;;  %v5979_v51 = vsel %vm5249_vm3, 0, %v2364_v20  ;;  %2729 = vrot.lane.b32.xlu0 %v2558_v50, %s5120_s24  ;;  %v2071_v26 = vmul.f32 %v5788_v8, %v1923_v37 }
 0x228   : > { %v2366_v48 = vshrl.u32 %v2323_v31, 16  ;;  %v2151_v41 = vmax.f32 %v2115_v32, 0.0  ;;  %v2116_v57 = vadd.f32 %v5794_v38, %v2073_v43  ;;  %v2376_v61 = vshll.u32 %v2324_v27, 16  ;;  %v5065_v27 = vld [vmem:[%s6941_s6 + $0x58] sm:$0xff]  }
 0x229   : > { %v5981_v52 = vrot.slane %v2373_v14, 7  ;;  %v2794_v55 = vrot.slane %v5925_v53, 1  ;;  %v2795_v2 = vrot.slane %v5921_v42, 1  ;;  %v2369_v5 = vshll.u32 %v2323_v31, 16  ;;  %4733 = vmatprep.subr.bf16.mxu1 %v5065_v27 }
 0x22a   : > { %v5996_v0 = vrot.slane %v2366_v48, 7  ;;  %v2149_v58 = vmax.f32 %v2113_v7, 0.0  ;;  %v2152_v47 = vmax.f32 %v2116_v57, 0.0  ;;  %v2114_v4 = vadd.f32 %v5794_v38, %v2071_v26  ;;  %4734 = vmatpush3.bf16.msra.mxu1 %v5065_v27 }
 0x22b   : > { %v4705_v46 = vpop.f32.mrb[16].mxu0  ;;  %v2297_v12 = vsel %vm5987_vm7, %v2151_v41, 0.0  ;;  %v2796_v16 = vsel %vm1180_vm4, %v2794_v55, %v2795_v2  ;;  %v6018_v18 = vsel %vm5249_vm3, %v5942_v3, 0  ;;  %v2378_v60 = vor.u32 %v2376_v61, %v5981_v52  ;;  %4767 = vmatprep.subr.bf16.mxu1 %v6058_v56 }
 0x22c   : > { %v2076_v42 = vmul.f32 %v4705_v46, %v5788_v8  ;;  %v1936_v49 = vpop.f32.mrb[17].mxu0  ;;  %v2298_v45 = vsel %vm5987_vm7, %v2152_v47, 0.0  ;;  %v2150_v21 = vmax.f32 %v2114_v4, 0.0  ;;  %2841 = vrot.lane.b32.xlu0 %v2796_v16, %s5121_s30  ;;  %v6027_v22 = vrot.slane %v2338_v6, 7 }
 0x22d   : > { %v2074_v20 = vmul.f32 %v5788_v8, %v1936_v49  ;;  %v4706_v54 = vpop.f32.mrb[18].mxu0  ;;  %v2371_v62 = vor.u32 %v2369_v5, %v5996_v0  ;;  %v2326_v3 = vpack.c.bf16 %v2298_v45, %v2297_v12  ;;  %v2295_v28 = vsel %vm6007_vm10, %v2149_v58, 0.0 }
 0x22e   : > { %v2119_v63 = vadd.f32 %v5794_v38, %v2076_v42  ;;  %v1939_v1 = vpop.f32.mrb[19].mxu0  ;;  %v2296_v29 = vsel %vm6007_vm10, %v2150_v21, 0.0  ;;  %v2574_v39 = vshll.u32 %v5979_v51, 16  ;;  %v2579_v6 = vshll.u32 %v6018_v18, 16 }
 0x22f   : > { %v6042_v31 = vsel %vm5249_vm3, 0, %v2357_v44  ;;  %v2387_v32 = vshrl.u32 %v2326_v3, 16  ;;  %v2325_v34 = vpack.c.bf16 %v2296_v29, %v2295_v28  ;;  %v2117_v36 = vadd.f32 %v5794_v38, %v2074_v20 }
 0x230   : > { %v6047_v37 = vsel %vm5249_vm3, 0, %v2378_v60  ;;  %v2572_v14 = vshrl.u32 %v5979_v51, 16  ;;  %v2576_v7 = vrot.slane %v2574_v39, 1  ;;  %v2077_v43 = vmul.f32 %v4706_v54, %v5788_v8 }
 0x231   : > { %v6053_v48 = vsel %vm5249_vm3, 0, %v2371_v62  ;;  %v2390_v44 = vshll.u32 %v2326_v3, 16  ;;  %v2380_v41 = vshrl.u32 %v2325_v34, 16  ;;  %v2155_v50 = vmax.f32 %v2119_v63, 0.0 }
 0x232   : > { %v2577_v57 = vor.u32 %v2576_v7, %v2572_v14  ;;  %v2581_v26 = vrot.slane %v2579_v6, 1  ;;  %v2120_v61 = vadd.f32 %v5794_v38, %v2077_v43  ;;  %v2519_v55 = vsel %vm5249_vm3, %v5957_v17, 0 }
 0x233   : > { %v4709_v2 = vpop.f32.mrb[20].mxu0  ;;  %v6064_v5 = vrot.slane %v2387_v32, 7  ;;  %v6066_v58 = vrot.slane %v2380_v41, 7  ;;  %v2153_v4 = vmax.f32 %v2117_v36, 0.0  ;;  %v2562_v46 = vshll.u32 %v6042_v31, 16 }
 0x234   : > { %v1952_v17 = vpop.f32.mrb[21].mxu0  ;;  %v2582_v12 = vsel %vm891_vm5, %v2577_v57, %v2581_v26  ;;  %v2156_v15 = vmax.f32 %v2120_v61, 0.0  ;;  %v2567_v16 = vshll.u32 %v2519_v55, 16  ;;  %v2075_v11 = vmul.f32 %v5788_v8, %v1939_v1 }
 0x235   : > { %v4710_v42 = vpop.f32.mrb[22].mxu0  ;;  %v2383_v49 = vshll.u32 %v2325_v34, 16  ;;  %2733 = vrot.lane.b32.xlu0 %v2582_v12, %s5120_s24  ;;  %v2560_v60 = vshrl.u32 %v6042_v31, 16  ;;  %v2564_v45 = vrot.slane %v2562_v46, 1  ;;  %v2800_v21 = vrot.slane %v5979_v51, 1 }
 0x236   : > { %vm2203_vm0 = vcmp.ge.s32.totalorder %v5869_v19, 0  ;;  %v1955_v20 = vpop.f32.mrb[23].mxu0  ;;  %v2301_v54 = vsel %vm6072_vm13, %v2155_v50, 0.0  ;;  %v2302_v3 = vsel %vm6072_vm13, %v2156_v15, 0.0  ;;  %v2118_v63 = vadd.f32 %v5794_v38, %v2075_v11 }
 0x237   : > { %v2801_v1 = vrot.slane %v6018_v18, 1  ;;  %v2392_v27 = vor.u32 %v2390_v44, %v6064_v5  ;;  %v2328_v28 = vpack.c.bf16 %v2302_v3, %v2301_v54  ;;  %v2565_v29 = vor.u32 %v2564_v45, %v2560_v60  ;;  %vm6159_vm7 = vmand %vm2203_vm0, %vm2221_vm1 }
 0x238   : > { %v2569_v39 = vrot.slane %v2567_v16, 1  ;;  %v2385_v6 = vor.u32 %v2383_v49, %v6066_v58  ;;  %v2154_v32 = vmax.f32 %v2118_v63, 0.0  ;;  %v2080_v34 = vmul.f32 %v4709_v2, %v5788_v8 }
 0x239   : > { %v2802_v24 = vsel %vm1180_vm4, %v2800_v21, %v2801_v1  ;;  %v2299_v36 = vsel %vm6093_vm2, %v2153_v4, 0.0  ;;  %v2797_v18 = vrot.slane %v6042_v31, 1  ;;  %v2078_v7 = vmul.f32 %v5788_v8, %v1952_v17 }
 0x23a   : > { %v2570_v14 = vsel %vm891_vm5, %v2565_v29, %v2569_v39  ;;  %2845 = vrot.lane.b32.xlu0 %v2802_v24, %s5121_s30  ;;  %v2401_v43 = vshrl.u32 %v2328_v28, 16  ;;  %v2300_v44 = vsel %vm6093_vm2, %v2154_v32, 0.0  ;;  %v2123_v41 = vadd.f32 %v5794_v38, %v2080_v34 }
 0x23b   : > { %2731 = vrot.lane.b32.xlu1 %v2570_v14, %s5120_s24  ;;  %v6118_v50 = vsel %vm5249_vm3, %v5981_v52, 0  ;;  %v4713_v57 = vpop.f32.mrb[24].mxu0  ;;  %v6122_v26 = vsel %vm5249_vm3, 0, %v2392_v27  ;;  %v2327_v61 = vpack.c.bf16 %v2300_v44, %v2299_v36  ;;  %v2798_v2 = vrot.slane %v2519_v55, 1 }
 0x23c   : > { %v2121_v47 = vadd.f32 %v5794_v38, %v2078_v7  ;;  %v1968_v4 = vpop.f32.mrb[25].mxu0  ;;  %v6127_v46 = vsel %vm5249_vm3, 0, %v2385_v6  ;;  %v2598_v17 = vshll.u32 %v6047_v37, 16  ;;  %v2603_v12 = vshll.u32 %v6118_v50, 16 }
 0x23d   : > { %v2081_v52 = vmul.f32 %v4710_v42, %v5788_v8  ;;  %v6132_v15 = vpop.f32.mrb[26].mxu0  ;;  %v2404_v16 = vshll.u32 %v2328_v28, 16  ;;  %v2394_v11 = vshrl.u32 %v2327_v61, 16  ;;  %v2799_v49 = vsel %vm1180_vm4, %v2797_v18, %v2798_v2 }
 0x23e   : > { %v2159_v55 = vmax.f32 %v2123_v41, 0.0  ;;  %v6135_v60 = vpop.f32.mrb[27].mxu0  ;;  %v6137_v45 = vrot.slane %v2401_v43, 7  ;;  %v2596_v42 = vshrl.u32 %v6047_v37, 16  ;;  %v2600_v54 = vrot.slane %v2598_v17, 1 }
 0x23f   : > { %2843 = vrot.lane.b32.xlu1 %v2799_v49, %s5121_s30  ;;  %v2124_v62 = vadd.f32 %v5794_v38, %v2081_v52  ;;  %v2397_v3 = vshll.u32 %v2327_v61, 16  ;;  %v2157_v63 = vmax.f32 %v2121_v47, 0.0  ;;  %v2605_v1 = vrot.slane %v2603_v12, 1 }
 0x240   : > { %v2521_v27 = vsel %vm5249_vm3, %v5996_v0, 0  ;;  %v6153_v28 = vrot.slane %v2394_v11, 7  ;;  %v2601_v29 = vor.u32 %v2600_v54, %v2596_v42  ;;  %v2586_v6 = vshll.u32 %v6053_v48, 16 }
 0x241   : > { %v2160_v39 = vmax.f32 %v2124_v62, 0.0  ;;  %vm2206_vm8 = vcmp.ge.s32.totalorder %v5885_v10, 0  ;;  %vm2224_vm9 = vcmp.lt.s32.totalorder %v5885_v10, 20  ;;  %v2305_v0 = vsel %vm6144_vm6, %v2159_v55, 0.0 }
 0x242   : > { %v2584_v32 = vshrl.u32 %v6053_v48, 16  ;;  %v2591_v24 = vshll.u32 %v2521_v27, 16  ;;  %v2079_v19 = vmul.f32 %v5788_v8, %v1955_v20  ;;  %v2606_v34 = vsel %vm891_vm5, %v2601_v29, %v2605_v1  ;;  %vm6233_vm12 = vmand %vm2206_vm8, %vm2224_vm9 }
 0x243   : > { %v2306_v36 = vsel %vm6144_vm6, %v2160_v39, 0.0  ;;  %v2588_v14 = vrot.slane %v2586_v6, 1  ;;  %v2806_v18 = vrot.slane %v6047_v37, 1  ;;  %vm2205_vm10 = vcmp.ge.s32.totalorder %v5888_v25, 0  ;;  %v6176_v7 = vpop.f32.mrb[28].mxu0  ;;  %2737 = vrot.lane.b32.xlu0 %v2606_v34, %s5120_s24 }
 0x244   : > { %vm2223_vm11 = vcmp.lt.s32.totalorder %v5888_v25, 20  ;;  %v2406_v43 = vor.u32 %v2404_v16, %v6137_v45  ;;  %v2303_v44 = vsel %vm6159_vm7, %v2157_v63, 0.0  ;;  %v2330_v20 = vpack.c.bf16 %v2306_v36, %v2305_v0  ;;  %v6183_v61 = vpop.f32.mrb[29].mxu0 }
 0x245   : > { %v2122_v41 = vadd.f32 %v5794_v38, %v2079_v19  ;;  %v2399_v2 = vor.u32 %v2397_v3, %v6153_v28  ;;  %v2589_v47 = vor.u32 %v2588_v14, %v2584_v32  ;;  %v2593_v17 = vrot.slane %v2591_v24, 1  ;;  %v6187_v52 = vpop.f32.mrb[30].mxu0  ;;  %vm6250_vm15 = vmand %vm2205_vm10, %vm2223_vm11 }
 0x246   : > { %v2807_v12 = vrot.slane %v6118_v50, 1  ;;  %v2415_v11 = vshrl.u32 %v2330_v20, 16  ;;  %v2803_v49 = vrot.slane %v6053_v48, 1  ;;  %v2084_v55 = vmul.f32 %v4713_v57, %v5788_v8  ;;  %v6191_v21 = vpop.f32.mrb[31].mxu0 }
 0x247   : > { %v2158_v16 = vmax.f32 %v2122_v41, 0.0  ;;  %v2594_v42 = vsel %vm891_vm5, %v2589_v47, %v2593_v17  ;;  %v2082_v62 = vmul.f32 %v5788_v8, %v1968_v4  ;;  %v2524_v50 = vsel %vm5249_vm3, %v6064_v5, 0 }
 0x248   : > { %v2808_v54 = vsel %vm1180_vm4, %v2806_v18, %v2807_v12  ;;  %v6199_v3 = vrot.slane %v2415_v11, 7  ;;  %2735 = vrot.lane.b32.xlu1 %v2594_v42, %s5120_s24  ;;  %v2804_v57 = vrot.slane %v2521_v27, 1  ;;  %v2127_v1 = vadd.f32 %v5794_v38, %v2084_v55 }
 0x249   : > { %v2304_v63 = vsel %vm6159_vm7, %v2158_v16, 0.0  ;;  %2849 = vrot.lane.b32.xlu0 %v2808_v54, %s5121_s30  ;;  %v2125_v39 = vadd.f32 %v5794_v38, %v2082_v62  ;;  %v2622_v4 = vshll.u32 %v6122_v26, 16  ;;  %v2627_v6 = vshll.u32 %v2524_v50, 16 }
 0x24a   : > { %v2329_v29 = vpack.c.bf16 %v2304_v63, %v2303_v44  ;;  %v2418_v0 = vshll.u32 %v2330_v20, 16  ;;  %v2805_v5 = vsel %vm1180_vm4, %v2803_v49, %v2804_v57  ;;  %v2620_v32 = vshrl.u32 %v6122_v26, 16 }
 0x24b   : > { %v2085_v40 = vmul.f32 %v6132_v15, %v5788_v8  ;;  %v2163_v19 = vmax.f32 %v2127_v1, 0.0  ;;  %v2624_v34 = vrot.slane %v2622_v4, 1  ;;  %v6215_v27 = vsel %vm5249_vm3, %v6066_v58, 0  ;;  %v6217_v36 = vpop.f32.mrb[32].mxu0 }
 0x24c   : > { %v2408_v24 = vshrl.u32 %v2329_v29, 16  ;;  %v6221_v14 = vsel %vm5249_vm3, 0, %v2406_v43  ;;  %v6225_v18 = vsel %vm5249_vm3, 0, %v2399_v2  ;;  %v2420_v15 = vor.u32 %v2418_v0, %v6199_v3  ;;  %2847 = vrot.lane.b32.xlu1 %v2805_v5, %s5121_s30  ;;  %v6238_v43 = vpop.f32.mrb[33].mxu0 }
 0x24d   : > { %v2128_v44 = vadd.f32 %v5794_v38, %v2085_v40  ;;  %v2161_v41 = vmax.f32 %v2125_v39, 0.0  ;;  %v2625_v2 = vor.u32 %v2624_v34, %v2620_v32  ;;  %v2629_v47 = vrot.slane %v2627_v6, 1  ;;  %v6244_v17 = vpop.f32.mrb[34].mxu0 }
 0x24e   : > { %v6240_v20 = vrot.slane %v2408_v24, 7  ;;  %vm2208_vm13 = vcmp.ge.s32.totalorder %v5891_v23, 0  ;;  %vm2226_vm14 = vcmp.lt.s32.totalorder %v5891_v23, 20  ;;  %v2610_v11 = vshll.u32 %v6127_v46, 16  ;;  %v6258_v55 = vpop.f32.mrb[35].mxu0 }
 0x24f   : > { %v2164_v12 = vmax.f32 %v2128_v44, 0.0  ;;  %v2615_v16 = vshll.u32 %v6215_v27, 16  ;;  %v2083_v49 = vmul.f32 %v5788_v8, %v6135_v60  ;;  %v2411_v42 = vshll.u32 %v2329_v29, 16  ;;  %vm6309_vm2 = vmand %vm2208_vm13, %vm2226_vm14 }
 0x250   : > { %v2309_v54 = vsel %vm6233_vm12, %v2163_v19, 0.0  ;;  %v2630_v25 = vsel %vm891_vm5, %v2625_v2, %v2629_v47  ;;  %v2812_v62 = vrot.slane %v6122_v26, 1  ;;  %vm2207_vm0 = vcmp.ge.s32.totalorder %v5894_v30, 0 }
 0x251   : > { %vm2225_vm1 = vcmp.lt.s32.totalorder %v5894_v30, 20  ;;  %2741 = vrot.lane.b32.xlu0 %v2630_v25, %s5120_s24  ;;  %v2310_v63 = vsel %vm6233_vm12, %v2164_v12, 0.0  ;;  %v2608_v60 = vshrl.u32 %v6127_v46, 16  ;;  %v2612_v57 = vrot.slane %v2610_v11, 1 }
 0x252   : > { %v2126_v1 = vadd.f32 %v5794_v38, %v2083_v49  ;;  %v2413_v29 = vor.u32 %v2411_v42, %v6240_v20  ;;  %v2307_v39 = vsel %vm6250_vm15, %v2161_v41, 0.0  ;;  %v2332_v4 = vpack.c.bf16 %v2310_v63, %v2309_v54  ;;  %vm6325_vm6 = vmand %vm2207_vm0, %vm2225_vm1 }
 0x253   : > { %v2813_v6 = vrot.slane %v2524_v50, 1  ;;  %v2613_v0 = vor.u32 %v2612_v57, %v2608_v60  ;;  %v2617_v5 = vrot.slane %v2615_v16, 1  ;;  %v2088_v40 = vmul.f32 %v6176_v7, %v5788_v8 }
 0x254   : > { %v2162_v32 = vmax.f32 %v2126_v1, 0.0  ;;  %v2809_v19 = vrot.slane %v6127_v46, 1  ;;  %v2086_v34 = vmul.f32 %v5788_v8, %v6183_v61  ;;  %v2526_v58 = vsel %vm5249_vm3, %v6137_v45, 0 }
 0x255   : > { %v2814_v24 = vsel %vm1180_vm4, %v2812_v62, %v2813_v6  ;;  %v2429_v44 = vshrl.u32 %v2332_v4, 16  ;;  %v2618_v50 = vsel %vm891_vm5, %v2613_v0, %v2617_v5  ;;  %v2131_v7 = vadd.f32 %v5794_v38, %v2088_v40 }
 0x256   : > { %v2308_v41 = vsel %vm6250_vm15, %v2162_v32, 0.0  ;;  %2853 = vrot.lane.b32.xlu0 %v2814_v24, %s5121_s30  ;;  %v6290_v2 = vsel %vm5249_vm3, 0, %v2420_v15  ;;  %2739 = vrot.lane.b32.xlu1 %v2618_v50, %s5120_s24  ;;  %v2810_v47 = vrot.slane %v6215_v27, 1  ;;  %v2129_v45 = vadd.f32 %v5794_v38, %v2086_v34 }
 0x257   : > { %v2331_v61 = vpack.c.bf16 %v2308_v41, %v2307_v39  ;;  %v6297_v12 = vsel %vm5249_vm3, 0, %v2413_v29  ;;  %v2646_v10 = vshll.u32 %v6221_v14, 16  ;;  %v2651_v11 = vshll.u32 %v2526_v58, 16 }
 0x258   : > { %v2089_v16 = vmul.f32 %v6187_v52, %v5788_v8  ;;  %v2432_v49 = vshll.u32 %v2332_v4, 16  ;;  %v2811_v42 = vsel %vm1180_vm4, %v2809_v19, %v2810_v47  ;;  %v2167_v54 = vmax.f32 %v2131_v7, 0.0 }
 0x259   : > { %v2422_v15 = vshrl.u32 %v2331_v61, 16  ;;  %v6303_v25 = vrot.slane %v2429_v44, 7  ;;  %v2644_v62 = vshrl.u32 %v6221_v14, 16  ;;  %v2648_v63 = vrot.slane %v2646_v10, 1 }
 0x25a   : > { %v2132_v52 = vadd.f32 %v5794_v38, %v2089_v16  ;;  %v2425_v60 = vshll.u32 %v2331_v61, 16  ;;  %2851 = vrot.lane.b32.xlu1 %v2811_v42, %s5121_s30  ;;  %v2165_v57 = vmax.f32 %v2129_v45, 0.0  ;;  %v2653_v1 = vrot.slane %v2651_v11, 1 }
 0x25b   : > { %v2525_v29 = vsel %vm5249_vm3, %v6153_v28, 0  ;;  %v6319_v39 = vrot.slane %v2422_v15, 7  ;;  %v2649_v4 = vor.u32 %v2648_v63, %v2644_v62  ;;  %v2634_v0 = vshll.u32 %v6225_v18, 16 }
 0x25c   : > { %v2168_v6 = vmax.f32 %v2132_v52, 0.0  ;;  %vm2210_vm7 = vcmp.ge.s32.totalorder %v5897_v33, 0  ;;  %vm2228_vm8 = vcmp.lt.s32.totalorder %v5897_v33, 20  ;;  %v2313_v28 = vsel %vm6309_vm2, %v2167_v54, 0.0 }
 0x25d   : > { %v2632_v5 = vshrl.u32 %v6225_v18, 16  ;;  %v2639_v32 = vshll.u32 %v2525_v29, 16  ;;  %v2087_v30 = vmul.f32 %v5788_v8, %v6191_v21  ;;  %v2654_v40 = vsel %vm891_vm5, %v2649_v4, %v2653_v1  ;;  %vm6393_vm11 = vmand %vm2210_vm7, %vm2228_vm8 }
 0x25e   : > { %v2314_v24 = vsel %vm6309_vm2, %v2168_v6, 0.0  ;;  %v2636_v19 = vrot.slane %v2634_v0, 1  ;;  %v2818_v34 = vrot.slane %v6221_v14, 1  ;;  %vm2209_vm9 = vcmp.ge.s32.totalorder %v5905_v35, 0  ;;  %2745 = vrot.lane.b32.xlu0 %v2654_v40, %s5120_s24 }
 0x25f   : > { %vm2227_vm10 = vcmp.lt.s32.totalorder %v5905_v35, 20  ;;  %v2434_v44 = vor.u32 %v2432_v49, %v6303_v25  ;;  %v2311_v50 = vsel %vm6325_vm6, %v2165_v57, 0.0  ;;  %v2334_v21 = vpack.c.bf16 %v2314_v24, %v2313_v28 }
 0x260   : > { %v2130_v41 = vadd.f32 %v5794_v38, %v2087_v30  ;;  %v2427_v7 = vor.u32 %v2425_v60, %v6319_v39  ;;  %v2637_v61 = vor.u32 %v2636_v19, %v2632_v5  ;;  %v2641_v47 = vrot.slane %v2639_v32, 1  ;;  %vm6403_vm12 = vmand %vm2209_vm9, %vm2227_vm10 }
 0x261   : > { %v2819_v45 = vrot.slane %v2526_v58, 1  ;;  %v2443_v10 = vshrl.u32 %v2334_v21, 16  ;;  %v2815_v16 = vrot.slane %v6225_v18, 1  ;;  %v2092_v49 = vmul.f32 %v6217_v36, %v5788_v8 }
 0x262   : > { %v2166_v11 = vmax.f32 %v2130_v41, 0.0  ;;  %v2642_v15 = vsel %vm891_vm5, %v2637_v61, %v2641_v47  ;;  %v2090_v54 = vmul.f32 %v5788_v8, %v6238_v43  ;;  %v2528_v27 = vsel %vm5249_vm3, %v6199_v3, 0 }
 0x263   : > { %v2820_v42 = vsel %vm1180_vm4, %v2818_v34, %v2819_v45  ;;  %v6359_v62 = vrot.slane %v2443_v10, 7  ;;  %2743 = vrot.lane.b32.xlu1 %v2642_v15, %s5120_s24  ;;  %v2816_v36 = vrot.slane %v2525_v29, 1  ;;  %v2135_v63 = vadd.f32 %v5794_v38, %v2092_v49 }
 0x264   : > { %v2312_v58 = vsel %vm6325_vm6, %v2166_v11, 0.0  ;;  %2857 = vrot.lane.b32.xlu0 %v2820_v42, %s5121_s30  ;;  %v2133_v60 = vadd.f32 %v5794_v38, %v2090_v54  ;;  %v2670_v43 = vshll.u32 %v6290_v2, 16  ;;  %v2675_v57 = vshll.u32 %v2528_v27, 16 }
 0x265   : > { %v2333_v52 = vpack.c.bf16 %v2312_v58, %v2311_v50  ;;  %v2446_v1 = vshll.u32 %v2334_v21, 16  ;;  %v2817_v3 = vsel %vm1180_vm4, %v2815_v16, %v2816_v36  ;;  %v2668_v4 = vshrl.u32 %v6290_v2, 16 }
 0x266   : > { %v2093_v23 = vmul.f32 %v6244_v17, %v5788_v8  ;;  %v2171_v0 = vmax.f32 %v2135_v63, 0.0  ;;  %v2672_v28 = vrot.slane %v2670_v43, 1  ;;  %v2527_v29 = vsel %vm5249_vm3, %v6240_v20, 0 }
 0x267   : > { %v2436_v6 = vshrl.u32 %v2333_v52, 16  ;;  %v6378_v5 = vor.u32 %v2341_v59, %v6027_v22  ;;  %v6382_v32 = vsel %vm5249_vm3, 0, %v2434_v44  ;;  %v6386_v30 = vsel %vm5249_vm3, 0, %v2427_v7  ;;  %2855 = vrot.lane.b32.xlu1 %v2817_v3, %s5121_s30 }
 0x268   : > { %v2136_v9 = vadd.f32 %v5794_v38, %v2093_v23  ;;  %v2448_v59 = vor.u32 %v2446_v1, %v6359_v62  ;;  %v2169_v17 = vmax.f32 %v2133_v60, 0.0  ;;  %v2673_v40 = vor.u32 %v2672_v28, %v2668_v4 }
 0x269   : > { %v2677_v24 = vrot.slane %v2675_v57, 1  ;;  %v2658_v34 = vshll.u32 %v6297_v12, 16  ;;  %v2663_v44 = vshll.u32 %v2527_v29, 16  ;;  %v2091_v50 = vmul.f32 %v5788_v8, %v6258_v55 }
 0x26a   : > { %v2172_v33 = vmax.f32 %v2136_v9, 0.0  ;;  %v2438_v21 = vrot.slane %v2436_v6, 7  ;;  %v2317_v41 = vsel %vm6393_vm11, %v2171_v0, 0.0  ;;  %v2824_v61 = vrot.slane %v6290_v2, 1 }
 0x26b   : > { %v2678_v7 = vsel %vm891_vm5, %v2673_v40, %v2677_v24  ;;  %v2656_v47 = vshrl.u32 %v6297_v12, 16  ;;  %v2660_v45 = vrot.slane %v2658_v34, 1  ;;  %v2134_v10 = vadd.f32 %v5794_v38, %v2091_v50 }
 0x26c   : > { %2749 = vrot.lane.b32.xlu0 %v2678_v7, %s5120_s24  ;;  %v2318_v35 = vsel %vm6393_vm11, %v2172_v33, 0.0  ;;  %v2439_v11 = vshll.u32 %v2333_v52, 16  ;;  %v2315_v8 = vsel %vm6403_vm12, %v2169_v17, 0.0  ;;  %v2825_v16 = vrot.slane %v2528_v27, 1 }
 0x26d   : > { %v2336_v55 = vpack.c.bf16 %v2318_v35, %v2317_v41  ;;  %v2661_v49 = vor.u32 %v2660_v45, %v2656_v47  ;;  %v2665_v15 = vrot.slane %v2663_v44, 1  ;;  %v2170_v42 = vmax.f32 %v2134_v10, 0.0 }
 0x26e   : > { %v2530_v54 = vsel %vm5249_vm3, %v6303_v25, 0  ;;  %v2441_v58 = vor.u32 %v2439_v11, %v2438_v21  ;;  %v2826_v36 = vsel %vm1180_vm4, %v2824_v61, %v2825_v16  ;;  %v2821_v63 = vrot.slane %v6297_v12, 1 }
 0x26f   : > { %v2694_v38 = vshll.u32 %v6382_v32, 16  ;;  %v2457_v52 = vshrl.u32 %v2336_v55, 16  ;;  %v2666_v60 = vsel %vm891_vm5, %v2661_v49, %v2665_v15  ;;  %v2316_v27 = vsel %vm6403_vm12, %v2170_v42, 0.0 }
 0x270   : > { %2861 = vrot.lane.b32.xlu0 %v2826_v36, %s5121_s30  ;;  %v2699_v43 = vshll.u32 %v2530_v54, 16  ;;  %2747 = vrot.lane.b32.xlu1 %v2666_v60, %s5120_s24  ;;  %v2335_v57 = vpack.c.bf16 %v2316_v27, %v2315_v8  ;;  %v2692_v25 = vshrl.u32 %v6382_v32, 16  ;;  %v2529_v3 = vsel %vm5249_vm3, %v6319_v39, 0 }
 0x271   : > { %v2696_v1 = vrot.slane %v2694_v38, 1  ;;  %v6438_v4 = vsel %vm5249_vm3, 0, %v2448_v59  ;;  %v2822_v23 = vrot.slane %v2527_v29, 1  ;;  %v2682_v6 = vshll.u32 %v6386_v30, 16 }
 0x272   : > { %v2687_v0 = vshll.u32 %v2529_v3, 16  ;;  %v6443_v28 = vsel %vm5249_vm3, 0, %v2441_v58  ;;  %v2450_v20 = vshrl.u32 %v2335_v57, 16  ;;  %v2701_v17 = vrot.slane %v2699_v43, 1 }
 0x273   : > { %v2697_v9 = vor.u32 %v2696_v1, %v2692_v25  ;;  %v2823_v40 = vsel %vm1180_vm4, %v2821_v63, %v2822_v23  ;;  %v2680_v24 = vshrl.u32 %v6386_v30, 16  ;;  %v2684_v39 = vrot.slane %v2682_v6, 1 }
 0x274   : > { %v2830_v19 = vrot.slane %v6382_v32, 1  ;;  %v2459_v59 = vrot.slane %v2457_v52, 7  ;;  %v2452_v33 = vrot.slane %v2450_v20, 7  ;;  %v2453_v29 = vshll.u32 %v2335_v57, 16  ;;  %2859 = vrot.lane.b32.xlu1 %v2823_v40, %s5121_s30 }
 0x275   : > { %v2702_v34 = vsel %vm891_vm5, %v2697_v9, %v2701_v17  ;;  %v2685_v44 = vor.u32 %v2684_v39, %v2680_v24  ;;  %v2689_v50 = vrot.slane %v2687_v0, 1  ;;  %v2831_v41 = vrot.slane %v2530_v54, 1 }
 0x276   : > { %2753 = vrot.lane.b32.xlu0 %v2702_v34, %s5120_s24  ;;  %v6454_v7 = vsel %vm5249_vm3, %v6359_v62, 0  ;;  %v2460_v61 = vshll.u32 %v2336_v55, 16  ;;  %v2455_v35 = vor.u32 %v2453_v29, %v2452_v33  ;;  %v2718_v47 = vshll.u32 %v6438_v4, 16 }
 0x277   : > { %v2723_v45 = vshll.u32 %v6454_v7, 16  ;;  %v2690_v10 = vsel %vm891_vm5, %v2685_v44, %v2689_v50  ;;  %v2832_v11 = vsel %vm1180_vm4, %v2830_v19, %v2831_v41  ;;  %v2827_v8 = vrot.slane %v6386_v30, 1 }
 0x278   : > { %v2531_v16 = vsel %vm5249_vm3, %v2438_v21, 0  ;;  %v6465_v49 = vsel %vm5249_vm3, 0, %v2455_v35  ;;  %2751 = vrot.lane.b32.xlu1 %v2690_v10, %s5120_s24  ;;  %v2716_v62 = vshrl.u32 %v6438_v4, 16  ;;  %v2720_v55 = vrot.slane %v2718_v47, 1 }
 0x279   : > { %v2706_v15 = vshll.u32 %v6443_v28, 16  ;;  %v2462_v42 = vor.u32 %v2460_v61, %v2459_v59  ;;  %v2828_v54 = vrot.slane %v2529_v3, 1  ;;  %v2704_v58 = vshrl.u32 %v6443_v28, 16 }
 0x27a   : > { %2865 = vrot.lane.b32.xlu0 %v2832_v11, %s5121_s30  ;;  %v2711_v36 = vshll.u32 %v2531_v16, 16  ;;  %v2721_v63 = vor.u32 %v2720_v55, %v2716_v62  ;;  %v2725_v21 = vrot.slane %v2723_v45, 1  ;;  %v2533_v52 = vsel %vm5249_vm3, %v2452_v33, 0 }
 0x27b   : > { %v2708_v38 = vrot.slane %v2706_v15, 1  ;;  %v6477_v60 = vsel %vm5249_vm3, 0, %v6378_v5  ;;  %v2829_v27 = vsel %vm1180_vm4, %v2827_v8, %v2828_v54  ;;  %v2952_v43 = vshll.u32 %v6465_v49, 16 }
 0x27c   : > { %2863 = vrot.lane.b32.xlu1 %v2829_v27, %s5121_s30  ;;  %v2726_v57 = vsel %vm891_vm5, %v2721_v63, %v2725_v21  ;;  %v2713_v1 = vrot.slane %v2711_v36, 1  ;;  %v2957_v3 = vshll.u32 %v2533_v52, 16  ;;  %v2950_v23 = vshrl.u32 %v6465_v49, 16 }
 0x27d   : > { %v2709_v25 = vor.u32 %v2708_v38, %v2704_v58  ;;  %v2954_v6 = vrot.slane %v2952_v43, 1  ;;  %v2517_v5 = vsel %vm5249_vm3, %v6027_v22, 0  ;;  %v6490_v0 = vsel %vm5249_vm3, 0, %v2462_v42 }
 0x27e   : > { %2757 = vrot.lane.b32.xlu0 %v2726_v57, %s5120_s24  ;;  %v2833_v9 = vrot.slane %v6443_v28, 1  ;;  %v2538_v17 = vshll.u32 %v6477_v60, 16  ;;  %v2959_v24 = vrot.slane %v2957_v3, 1  ;;  %v2543_v39 = vshll.u32 %v2517_v5, 16 }
 0x27f   : > { %v2714_v20 = vsel %vm891_vm5, %v2709_v25, %v2713_v1  ;;  %v2955_v40 = vor.u32 %v2954_v6, %v2950_v23  ;;  %v2834_v19 = vrot.slane %v2531_v16, 1  ;;  %v2536_v33 = vshrl.u32 %v6477_v60, 16  ;;  %v5067_v6 = vld [vmem:[%s6941_s6 + $0x8] sm:$0xff]  }
 0x280   : > { %2755 = vrot.lane.b32.xlu1 %v2714_v20, %s5120_s24  ;;  %v2540_v29 = vrot.slane %v2538_v17, 1  ;;  %v2534_v22 = vsel %vm5249_vm3, %v2459_v59, 0  ;;  %v3419_v44 = vshll.u32 %v6490_v0, 16  ;;  %v2836_v41 = vrot.slane %v6438_v4, 1 }
 0x281   : > { %v2960_v34 = vsel %vm891_vm5, %v2955_v40, %v2959_v24  ;;  %v2835_v50 = vsel %vm1180_vm4, %v2833_v9, %v2834_v19  ;;  %v2545_v35 = vrot.slane %v2543_v39, 1  ;;  %v3417_v47 = vshrl.u32 %v6490_v0, 16  ;;  %v5069_v9 = vld [vmem:[%s6941_s6 + $0x18] sm:$0xff]   ;;  %v5070_v39 = vld [vmem:[%s6941_s6 + $0x20] sm:$0xff]  }
 0x282   : > { %2961 = vrot.lane.b32.xlu0 %v2960_v34, %s5120_s24  ;;  %v2541_v61 = vor.u32 %v2540_v29, %v2536_v33  ;;  %v3421_v45 = vrot.slane %v3419_v44, 1  ;;  %v3424_v10 = vshll.u32 %v2534_v22, 16  ;;  %v2837_v13 = vrot.slane %v6454_v7, 1 }
 0x283   : > { %v2965_v16 = vrot.slane %v6465_v49, 1  ;;  %v2966_v55 = vrot.slane %v2533_v52, 1  ;;  %v2791_v7 = vrot.slane %v6477_v60, 1  ;;  %v2792_v54 = vrot.slane %v2517_v5, 1 }
 0x284   : > { %2867 = vrot.lane.b32.xlu1 %v2835_v50, %s5121_s30  ;;  %v2546_v59 = vsel %vm891_vm5, %v2541_v61, %v2545_v35  ;;  %v3422_v11 = vor.u32 %v3421_v45, %v3417_v47  ;;  %v2838_v8 = vsel %vm1180_vm4, %v2836_v41, %v2837_v13  ;;  %v3426_v62 = vrot.slane %v3424_v10, 1 }
 0x285   : > { %v2967_v42 = vsel %vm1180_vm4, %v2965_v16, %v2966_v55  ;;  %v2793_v58 = vsel %vm1180_vm4, %v2791_v7, %v2792_v54  ;;  %v3432_v36 = vrot.slane %v6490_v0, 1  ;;  %v3433_v63 = vrot.slane %v2534_v22, 1 }
 0x286   : > { %2727 = vrot.lane.b32.xlu0 %v2546_v59, %s5120_s24  ;;  %v3427_v15 = vsel %vm891_vm5, %v3422_v11, %v3426_v62  ;;  %vm2871_vm3 = vcmask 261120   ;;  %vm2904_vm5 = vcmask 523264   ;;  %vm3023_vm13 = vcmask 785408  }
 0x287   : > { %v3434_v21 = vsel %vm1180_vm4, %v3432_v36, %v3433_v63  ;;  %vm4019_vm15 = vcmask 257024  }
 0x288   : > { %2869 = vrot.lane.b32.xlu1 %v2838_v8, %s5121_s30 }
 0x28a   : > { %3428 = vrot.lane.b32.xlu0 %v3427_v15, %s5120_s24 }
 0x28c   : > { %2968 = vrot.lane.b32.xlu1 %v2967_v42, %s5121_s30 }
 0x290   : > { %2839 = vrot.lane.b32.xlu1 %v2793_v58, %s5121_s30 }
 0x294   : > { %3435 = vrot.lane.b32.xlu1 %v3434_v21, %s5121_s30 }
 0x299   : > { %v2730_v38 = vpop.permute.xlu0 %2729 }
 0x29a   : > { %v2875_v52 = vsel %vm2871_vm3, %v5925_v53, %v2730_v38 }
 0x29e   : > { %v2842_v27 = vpop.permute.xlu0 %2841 }
 0x29f   : > { %v6525_v43 = vsel %vm2904_vm5, %v2875_v52, %v2842_v27 }
 0x2a0   : > { %4735 = vmatprep.mubr.msk.bf16.mxu1 %vm3023_vm13, %v6525_v43 }
 0x2a7   : > { %v2734_v57 = vpop.permute.xlu0 %2733 }
 0x2a8   : > { %v2879_v53 = vsel %vm2871_vm3, %v5979_v51, %v2734_v57 }
 0x2ac   : > { %v2846_v1 = vpop.permute.xlu0 %2845 }
 0x2ad   : > { %v2732_v25 = vpop.permute.xlu1 %2731  ;;  %v6540_v20 = vsel %vm2904_vm5, %v2879_v53, %v2846_v1 }
 0x2ae   : > { %v2877_v3 = vsel %vm2871_vm3, %v6042_v31, %v2732_v25  ;;  %v5068_v31 = vld [vmem:[%s6941_s6 + $0x10] sm:$0xff]  }
 0x2b1   : > { %v2844_v23 = vpop.permute.xlu1 %2843 }
 0x2b2   : > { %v6537_v5 = vsel %vm2904_vm5, %v2877_v3, %v2844_v23 }
 0x2b3   : > { %4736 = vmatmul.mubr.msk.bf16.vlgmr.msra.gmra.mrb[0].mxu1 %vm3023_vm13, %v6537_v5 }
 0x2b4   : > { %4768 = vmatpush3.bf16.msra.mxu1 %v6058_v56  ;;  %4739 = vmatprep.mubr.msk.bf16.mxu1 %vm3023_vm13, %v6540_v20 }
 0x2b5   : > { %4769 = vmatprep.subr.bf16.mxu1 %v5067_v6  ;;  %v2738_v51 = vpop.permute.xlu0 %2737 }
 0x2b6   : > { %v2883_v19 = vsel %vm2871_vm3, %v6047_v37, %v2738_v51  ;;  %v6576_v37 = vld [vmem:[%s6941_s6 + $0x60] sm:$0xff]  }
 0x2b8   : > { %4770 = vmatpush3.bf16.msra.mxu1 %v5067_v6 }
 0x2b9   : > { %4771 = vmatprep.subr.bf16.mxu1 %v5068_v31 }
 0x2ba   : > { %v2736_v17 = vpop.permute.xlu1 %2735 }
 0x2bb   : > { %v2850_v40 = vpop.permute.xlu0 %2849  ;;  %v2881_v56 = vsel %vm2871_vm3, %v6053_v48, %v2736_v17  ;;  %v5071_v48 = vld [vmem:[%s6941_s6 + $0x28] sm:$0xff]  }
 0x2bc   : > { %4772 = vmatpush3.bf16.msra.mxu1 %v5068_v31  ;;  %v6564_v29 = vsel %vm2904_vm5, %v2883_v19, %v2850_v40  ;;  %v5073_v17 = vld [vmem:[%s6941_s6 + $0x68] sm:$0xff]   ;;  %v6732_v19 = vld [vmem:[%s6942_s7] ss:$0 sm:$0xff] }
 0x2bd   : > { %4773 = vmatprep.subr.bf16.mxu1 %v5069_v9  ;;  %v5077_v40 = vld [vmem:[%s6941_s6 + $0x88] sm:$0xff]  }
 0x2be   : > { %v2848_v24 = vpop.permute.xlu1 %2847 }
 0x2bf   : > { %v6561_v33 = vsel %vm2904_vm5, %v2881_v56, %v2848_v24 }
 0x2c0   : > { %4740 = vmatmul.mubr.msk.bf16.gmra.mrb[4].mxu1 %vm3023_vm13, %v6561_v33 }
 0x2c1   : > { %4743 = vmatprep.mubr.msk.bf16.mxu1 %vm3023_vm13, %v6564_v29  ;;  %4774 = vmatpush3.bf16.msra.mxu1 %v5069_v9 }
 0x2c2   : > { %4775 = vmatprep.subr.bf16.mxu1 %v5070_v39 }
 0x2c3   : > { %v2742_v22 = vpop.permute.xlu0 %2741 }
 0x2c4   : > { %v2887_v61 = vsel %vm2871_vm3, %v6122_v26, %v2742_v22 }
 0x2c5   : > { %4776 = vmatpush3.bf16.msra.mxu1 %v5070_v39  ;;  %v6727_v39 = vstv %s5208_s18 }
 0x2c6   : > { %4777 = vmatprep.subr.bf16.mxu1 %v5071_v48  ;;  %vm3811_vm14 = vcmp.lt.s32.totalorder %v6727_v39, 20 }
 0x2c8   : > { %v2740_v34 = vpop.permute.xlu1 %2739  ;;  %v2854_v44 = vpop.permute.xlu0 %2853 }
 0x2c9   : > { %4778 = vmatpush3.bf16.msra.mxu1 %v5071_v48  ;;  %v2885_v50 = vsel %vm2871_vm3, %v6127_v46, %v2740_v34  ;;  %v6587_v47 = vsel %vm2904_vm5, %v2887_v61, %v2854_v44  ;;  %v3796_v48 = vadd.s32 1, %v6727_v39 }
 0x2ca   : > { %4811 = vmatprep.subr.bf16.mxu1 %v6576_v37 }
 0x2cb   : > { %vm3812_vm4 = vcmp.lt.s32.totalorder %v3796_v48, 20 }
 0x2cc   : > { %v2852_v41 = vpop.permute.xlu1 %2851 }
 0x2cd   : > { %v6584_v35 = vsel %vm2904_vm5, %v2885_v50, %v2852_v41 }
 0x2ce   : > { %4744 = vmatmul.mubr.msk.bf16.gmra.mrb[8].mxu1 %vm3023_vm13, %v6584_v35 }
 0x2cf   : > { %4747 = vmatprep.mubr.msk.bf16.mxu1 %vm3023_vm13, %v6587_v47 }
 0x2d0   : > { %v2746_v45 = vpop.permute.xlu0 %2745 }
 0x2d1   : > { %v2891_v26 = vsel %vm2871_vm3, %v6221_v14, %v2746_v45 }
 0x2d5   : > { %v2744_v10 = vpop.permute.xlu1 %2743 }
 0x2d6   : > { %v2858_v13 = vpop.permute.xlu0 %2857  ;;  %v2889_v46 = vsel %vm2871_vm3, %v6225_v18, %v2744_v10 }
 0x2d7   : > { %v6601_v8 = vsel %vm2904_vm5, %v2891_v26, %v2858_v13 }
 0x2d9   : > { %v2856_v59 = vpop.permute.xlu1 %2855 }
 0x2da   : > { %v6598_v11 = vsel %vm2904_vm5, %v2889_v46, %v2856_v59 }
 0x2db   : > { %4748 = vmatmul.mubr.msk.bf16.gmra.mrb[12].mxu1 %vm3023_vm13, %v6598_v11 }
 0x2dc   : > { %4751 = vmatprep.mubr.msk.bf16.mxu1 %vm3023_vm13, %v6601_v8 }
 0x2de   : > { %v2750_v16 = vpop.permute.xlu0 %2749 }
 0x2df   : > { %v2895_v14 = vsel %vm2871_vm3, %v6290_v2, %v2750_v16 }
 0x2e2   : > { %v2862_v62 = vpop.permute.xlu0 %2861  ;;  %v2748_v55 = vpop.permute.xlu1 %2747 }
 0x2e3   : > { %v2893_v18 = vsel %vm2871_vm3, %v6297_v12, %v2748_v55  ;;  %v6615_v54 = vsel %vm2904_vm5, %v2895_v14, %v2862_v62  ;;  %v3798_v62 = vadd.s32 3, %v6727_v39 }
 0x2e5   : > { %vm3814_vm0 = vcmp.lt.s32.totalorder %v3798_v62, 20 }
 0x2e6   : > { %v2860_v15 = vpop.permute.xlu1 %2859 }
 0x2e7   : > { %v6612_v42 = vsel %vm2904_vm5, %v2893_v18, %v2860_v15 }
 0x2e8   : > { %v2754_v7 = vpop.permute.xlu0 %2753  ;;  %4752 = vmatmul.mubr.msk.bf16.gmra.mrb[16].mxu1 %vm3023_vm13, %v6612_v42 }
 0x2e9   : > { %4755 = vmatprep.mubr.msk.bf16.mxu1 %vm3023_vm13, %v6615_v54  ;;  %v2899_v2 = vsel %vm2871_vm3, %v6382_v32, %v2754_v7 }
 0x2ea   : > { %v2752_v58 = vpop.permute.xlu1 %2751 }
 0x2eb   : > { %v2897_v12 = vsel %vm2871_vm3, %v6386_v30, %v2752_v58 }
 0x2ec   : > { %v2866_v36 = vpop.permute.xlu0 %2865 }
 0x2ed   : > { %v6629_v38 = vsel %vm2904_vm5, %v2899_v2, %v2866_v36 }
 0x2ee   : > { %v2864_v63 = vpop.permute.xlu1 %2863 }
 0x2ef   : > { %v6626_v21 = vsel %vm2904_vm5, %v2897_v12, %v2864_v63 }
 0x2f0   : > { %4756 = vmatmul.mubr.msk.bf16.gmra.mrb[20].mxu1 %vm3023_vm13, %v6626_v21  ;;  %v2758_v27 = vpop.permute.xlu0 %2757 }
 0x2f1   : > { %4759 = vmatprep.mubr.msk.bf16.mxu1 %vm3023_vm13, %v6629_v38  ;;  %v2903_v1 = vsel %vm2871_vm3, %v6438_v4, %v2758_v27 }
 0x2f2   : > { %v2756_v52 = vpop.permute.xlu1 %2755 }
 0x2f3   : > { %v2901_v30 = vsel %vm2871_vm3, %v6443_v28, %v2756_v52 }
 0x2f4   : > { %v2962_v25 = vpop.permute.xlu0 %2961 }
 0x2f5   : > { %v2971_v6 = vsel %vm2871_vm3, %v6465_v49, %v2962_v25  ;;  %v5074_v49 = vld [vmem:[%s6941_s6 + $0x70] sm:$0xff]  }
 0x2f6   : > { %v2868_v57 = vpop.permute.xlu1 %2867 }
 0x2f7   : > { %v2934_v32 = vsel %vm2904_vm5, %v2901_v30, %v2868_v57 }
 0x2f8   : > { %4760 = vmatmul.mubr.msk.bf16.gmra.mrb[24].mxu1 %vm3023_vm13, %v2934_v32  ;;  %v2728_v31 = vpop.permute.xlu0 %2727 }
 0x2f9   : > { %v2873_v51 = vsel %vm2871_vm3, %v6477_v60, %v2728_v31  ;;  %v5075_v60 = vld [vmem:[%s6941_s6 + $0x78] sm:$0xff]  }
 0x2fa   : > { %v2870_v3 = vpop.permute.xlu1 %2869 }
 0x2fb   : > { %v2936_v23 = vsel %vm2904_vm5, %v2903_v1, %v2870_v3 }
 0x2fc   : > { %4763 = vmatprep.mubr.msk.bf16.mxu1 %vm3023_vm13, %v2936_v23 }
 0x2fe   : > { %v2969_v53 = vpop.permute.xlu1 %2968 }
 0x2ff   : > { %v2973_v28 = vsel %vm2904_vm5, %v2971_v6, %v2969_v53 }
 0x300   : > { %4764 = vmatmul.mubr.msk.bf16.gmra.mrb[28].mxu1 %vm3023_vm13, %v2973_v28 }
 0x302   : > { %v2840_v9 = vpop.permute.xlu1 %2839 }
 0x303   : > { %v2906_v4 = vsel %vm2904_vm5, %v2873_v51, %v2840_v9 }
 0x304   : > { %4779 = vmatprep.mubr.msk.bf16.mxu1 %vm3023_vm13, %v2906_v4 }
 0x308   : > { %4780 = vmatmul.mubr.msk.bf16.vlgmr.msra.gmra.mrb[0].mxu1 %vm3023_vm13, %v6525_v43  ;;  %v5076_v43 = vld [vmem:[%s6941_s6 + $0x80] sm:$0xff]  }
 0x309   : > { %4812 = vmatpush3.bf16.msra.mxu1 %v6576_v37  ;;  %4783 = vmatprep.mubr.msk.bf16.mxu1 %vm3023_vm13, %v6537_v5 }
 0x30a   : > { %4813 = vmatprep.subr.bf16.mxu1 %v5073_v17 }
 0x30d   : > { %4814 = vmatpush3.bf16.msra.mxu1 %v5073_v17  ;;  %v3799_v17 = vadd.s32 4, %v6727_v39 }
 0x30e   : > { %4815 = vmatprep.subr.bf16.mxu1 %v5074_v49 }
 0x30f   : > { %vm3815_vm6 = vcmp.lt.s32.totalorder %v3799_v17, 20 }
 0x310   : > { %4784 = vmatmul.mubr.msk.bf16.gmra.mrb[4].mxu1 %vm3023_vm13, %v6540_v20 }
 0x311   : > { %4787 = vmatprep.mubr.msk.bf16.mxu1 %vm3023_vm13, %v6561_v33  ;;  %4816 = vmatpush3.bf16.msra.mxu1 %v5074_v49 }
 0x312   : > { %4817 = vmatprep.subr.bf16.mxu1 %v5075_v60 }
 0x315   : > { %4818 = vmatpush3.bf16.msra.mxu1 %v5075_v60 }
 0x316   : > { %4819 = vmatprep.subr.bf16.mxu1 %v5076_v43 }
 0x318   : > { %4788 = vmatmul.mubr.msk.bf16.gmra.mrb[8].mxu1 %vm3023_vm13, %v6564_v29 }
 0x319   : > { %4791 = vmatprep.mubr.msk.bf16.mxu1 %vm3023_vm13, %v6584_v35  ;;  %4820 = vmatpush3.bf16.msra.mxu1 %v5076_v43 }
 0x31a   : > { %4821 = vmatprep.subr.bf16.mxu1 %v5077_v40 }
 0x31d   : > { %4822 = vmatpush3.bf16.msra.mxu1 %v5077_v40 }
 0x320   : > { %4792 = vmatmul.mubr.msk.bf16.gmra.mrb[12].mxu1 %vm3023_vm13, %v6587_v47 }
 0x321   : > { %4795 = vmatprep.mubr.msk.bf16.mxu1 %vm3023_vm13, %v6598_v11 }
 0x328   : > { %4796 = vmatmul.mubr.msk.bf16.gmra.mrb[16].mxu1 %vm3023_vm13, %v6601_v8 }
 0x329   : > { %4799 = vmatprep.mubr.msk.bf16.mxu1 %vm3023_vm13, %v6612_v42 }
 0x330   : > { %4800 = vmatmul.mubr.msk.bf16.gmra.mrb[20].mxu1 %vm3023_vm13, %v6615_v54 }
 0x331   : > { %4803 = vmatprep.mubr.msk.bf16.mxu1 %vm3023_vm13, %v6626_v21 }
 0x338   : > { %4804 = vmatmul.mubr.msk.bf16.gmra.mrb[24].mxu1 %vm3023_vm13, %v6629_v38 }
 0x339   : > { %4807 = vmatprep.mubr.msk.bf16.mxu1 %vm3023_vm13, %v2934_v32 }
 0x340   : > { %4808 = vmatmul.mubr.msk.bf16.gmra.mrb[28].mxu1 %vm3023_vm13, %v2936_v23 }
 0x341   : > { %4823 = vmatprep.mubr.msk.bf16.mxu1 %vm3023_vm13, %v6537_v5  ;;  %v3429_v5 = vpop.permute.xlu0 %3428 }
 0x342   : > { %v3438_v56 = vsel %vm2871_vm3, %v6490_v0, %v3429_v5 }
 0x348   : > { %4824 = vmatmul.mubr.msk.bf16.vlgmr.msra.gmra.mrb[0].mxu1 %vm3023_vm13, %v6540_v20  ;;  %v3436_v20 = vpop.permute.xlu1 %3435 }
 0x349   : > { %4827 = vmatprep.mubr.msk.bf16.mxu1 %vm3023_vm13, %v6561_v33  ;;  %v3440_v24 = vsel %vm2904_vm5, %v3438_v56, %v3436_v20 }
 0x350   : > { %4828 = vmatmul.mubr.msk.bf16.gmra.mrb[4].mxu1 %vm3023_vm13, %v6564_v29  ;;  %v6737_v29 = vld [vmem:[%s6943_s8] ss:$0 sm:$0xff] }
 0x351   : > { %4831 = vmatprep.mubr.msk.bf16.mxu1 %vm3023_vm13, %v6584_v35 }
 0x358   : > { %4832 = vmatmul.mubr.msk.bf16.gmra.mrb[8].mxu1 %vm3023_vm13, %v6587_v47 }
 0x359   : > { %4835 = vmatprep.mubr.msk.bf16.mxu1 %vm3023_vm13, %v6598_v11 }
 0x360   : > { %4836 = vmatmul.mubr.msk.bf16.gmra.mrb[12].mxu1 %vm3023_vm13, %v6601_v8 }
 0x361   : > { %4839 = vmatprep.mubr.msk.bf16.mxu1 %vm3023_vm13, %v6612_v42  ;;  %v3797_v42 = vadd.s32 2, %v6727_v39 }
 0x363   : > { %vm3813_vm1 = vcmp.lt.s32.totalorder %v3797_v42, 20 }
 0x368   : > { %4840 = vmatmul.mubr.msk.bf16.gmra.mrb[16].mxu1 %vm3023_vm13, %v6615_v54 }
 0x369   : > { %4843 = vmatprep.mubr.msk.bf16.mxu1 %vm3023_vm13, %v6626_v21 }
 0x370   : > { %4844 = vmatmul.mubr.msk.bf16.gmra.mrb[20].mxu1 %vm3023_vm13, %v6629_v38 }
 0x371   : > { %4847 = vmatprep.mubr.msk.bf16.mxu1 %vm3023_vm13, %v2934_v32 }
 0x378   : > { %4848 = vmatmul.mubr.msk.bf16.gmra.mrb[24].mxu1 %vm3023_vm13, %v2936_v23 }
 0x379   : > { %4851 = vmatprep.mubr.msk.bf16.mxu1 %vm3023_vm13, %v2973_v28  ;;  %v3800_v28 = vadd.s32 5, %v6727_v39 }
 0x37b   : > { %vm3816_vm2 = vcmp.lt.s32.totalorder %v3800_v28, 20 }
 0x380   : > { %4852 = vmatmul.mubr.msk.bf16.gmra.mrb[28].mxu1 %vm3023_vm13, %v3440_v24 }
 0x41b   : > { %v4825_v33 = vpop.f32.mrb[0].mxu1 }
 0x41c   : > { %v3694_v0 = vmul.f32 %v4825_v33, %v6732_v19  ;;  %v3526_v22 = vpop.f32.mrb[1].mxu1 }
 0x41d   : > { %v3692_v37 = vmul.f32 %v6732_v19, %v3526_v22  ;;  %v4826_v34 = vpop.f32.mrb[2].mxu1 }
 0x41e   : > { %v3733_v44 = vadd.f32 %v6737_v29, %v3694_v0  ;;  %v3695_v50 = vmul.f32 %v4826_v34, %v6732_v19  ;;  %v3529_v41 = vpop.f32.mrb[3].mxu1 }
 0x41f   : > { %v3731_v61 = vadd.f32 %v6737_v29, %v3692_v37  ;;  %v3693_v35 = vmul.f32 %v6732_v19, %v3529_v41 }
 0x420   : > { %v3765_v47 = vmax.f32 %v3733_v44, 0.0  ;;  %v3734_v45 = vadd.f32 %v6737_v29, %v3695_v50 }
 0x421   : > { %v3763_v10 = vmax.f32 %v3731_v61, 0.0  ;;  %v3732_v13 = vadd.f32 %v6737_v29, %v3693_v35 }
 0x422   : > { %v3861_v46 = vsel %vm3812_vm4, %v3765_v47, 0.0  ;;  %v3766_v59 = vmax.f32 %v3734_v45, 0.0  ;;  %v3802_v45 = vadd.s32 7, %v6727_v39 }
 0x423   : > { %v4447_v26 = vpack.c.bf16 %v3861_v46, %v3861_v46  ;;  %v3859_v11 = vsel %vm3811_vm14, %v3763_v10, 0.0  ;;  %v3764_v8 = vmax.f32 %v3732_v13, 0.0  ;;  %v4829_v16 = vpop.f32.mrb[4].mxu1 }
 0x424   : > { %v4445_v55 = vpack.c.bf16 %v3859_v11, %v3859_v11  ;;  %v3862_v18 = vsel %vm3812_vm4, %v3766_v59, 0.0  ;;  %v3698_v15 = vmul.f32 %v4829_v16, %v6732_v19  ;;  %v3542_v14 = vpop.f32.mrb[5].mxu1  ;;  %vm3818_vm7 = vcmp.lt.s32.totalorder %v3802_v45, 20 }
 0x425   : > { %4022 = vst.msk [vmem:[%s6754_s17 + $0x8] sm:$0xf] %vm4019_vm15, %v4447_v26  ;;  %v4448_v7 = vpack.c.bf16 %v3862_v18, %v3862_v18  ;;  %v3860_v54 = vsel %vm3811_vm14, %v3764_v8, 0.0  ;;  %v3696_v58 = vmul.f32 %v6732_v19, %v3542_v14  ;;  %v4830_v36 = vpop.f32.mrb[6].mxu1  ;;  %v3801_v26 = vadd.s32 6, %v6727_v39 }
 0x426   : > { %4020 = vst.msk [vmem:[%s6754_s17] sm:$0xf] %vm4019_vm15, %v4445_v55  ;;  %v4446_v12 = vpack.c.bf16 %v3860_v54, %v3860_v54  ;;  %v3737_v63 = vadd.f32 %v6737_v29, %v3698_v15  ;;  %v3699_v2 = vmul.f32 %v4830_v36, %v6732_v19  ;;  %v3545_v21 = vpop.f32.mrb[7].mxu1 }
 0x427   : > { %4023 = vst.msk [vmem:[%s6754_s17 + $0xc] sm:$0xf] %vm4019_vm15, %v4448_v7  ;;  %v3735_v38 = vadd.f32 %v6737_v29, %v3696_v58  ;;  %v3697_v52 = vmul.f32 %v6732_v19, %v3545_v21  ;;  %vm3817_vm8 = vcmp.lt.s32.totalorder %v3801_v26, 20 }
 0x428   : > { %4021 = vst.msk [vmem:[%s6754_s17 + $0x4] sm:$0xf] %vm4019_vm15, %v4446_v12  ;;  %v3769_v27 = vmax.f32 %v3737_v63, 0.0  ;;  %v3738_v30 = vadd.f32 %v6737_v29, %v3699_v2 }
 0x429   : > { %v3767_v57 = vmax.f32 %v3735_v38, 0.0  ;;  %v3736_v32 = vadd.f32 %v6737_v29, %v3697_v52 }
 0x42a   : > { %v3865_v25 = vsel %vm3814_vm0, %v3769_v27, 0.0  ;;  %v3770_v1 = vmax.f32 %v3738_v30, 0.0  ;;  %v3804_v30 = vadd.s32 9, %v6727_v39 }
 0x42b   : > { %v4451_v3 = vpack.c.bf16 %v3865_v25, %v3865_v25  ;;  %v3863_v23 = vsel %vm3813_vm1, %v3767_v57, 0.0  ;;  %v3768_v6 = vmax.f32 %v3736_v32, 0.0  ;;  %v4833_v53 = vpop.f32.mrb[8].mxu1 }
 0x42c   : > { %v4449_v31 = vpack.c.bf16 %v3863_v23, %v3863_v23  ;;  %v3866_v51 = vsel %vm3814_vm0, %v3770_v1, 0.0  ;;  %v3702_v9 = vmul.f32 %v4833_v53, %v6732_v19  ;;  %v3558_v4 = vpop.f32.mrb[9].mxu1  ;;  %vm3820_vm9 = vcmp.lt.s32.totalorder %v3804_v30, 20 }
 0x42d   : > { %4026 = vst.msk [vmem:[%s6754_s17 + $0x18] sm:$0xf] %vm4019_vm15, %v4451_v3  ;;  %v4452_v49 = vpack.c.bf16 %v3866_v51, %v3866_v51  ;;  %v3864_v60 = vsel %vm3813_vm1, %v3768_v6, 0.0  ;;  %v3700_v43 = vmul.f32 %v6732_v19, %v3558_v4  ;;  %v4834_v40 = vpop.f32.mrb[10].mxu1  ;;  %v3803_v3 = vadd.s32 8, %v6727_v39 }
 0x42e   : > { %4024 = vst.msk [vmem:[%s6754_s17 + $0x10] sm:$0xf] %vm4019_vm15, %v4449_v31  ;;  %v4450_v5 = vpack.c.bf16 %v3864_v60, %v3864_v60  ;;  %v3741_v20 = vadd.f32 %v6737_v29, %v3702_v9  ;;  %v3703_v56 = vmul.f32 %v4834_v40, %v6732_v19  ;;  %v3561_v24 = vpop.f32.mrb[11].mxu1 }
 0x42f   : > { %4027 = vst.msk [vmem:[%s6754_s17 + $0x1c] sm:$0xf] %vm4019_vm15, %v4452_v49  ;;  %v3739_v33 = vadd.f32 %v6737_v29, %v3700_v43  ;;  %v3701_v48 = vmul.f32 %v6732_v19, %v3561_v24  ;;  %vm3819_vm10 = vcmp.lt.s32.totalorder %v3803_v3, 20 }
 0x430   : > { %4025 = vst.msk [vmem:[%s6754_s17 + $0x14] sm:$0xf] %vm4019_vm15, %v4450_v5  ;;  %v3773_v0 = vmax.f32 %v3741_v20, 0.0  ;;  %v3742_v22 = vadd.f32 %v6737_v29, %v3703_v56 }
 0x431   : > { %v3771_v37 = vmax.f32 %v3739_v33, 0.0  ;;  %v3740_v34 = vadd.f32 %v6737_v29, %v3701_v48 }
 0x432   : > { %v3869_v44 = vsel %vm3816_vm2, %v3773_v0, 0.0  ;;  %v3774_v50 = vmax.f32 %v3742_v22, 0.0  ;;  %v3806_v22 = vadd.s32 11, %v6727_v39 }
 0x433   : > { %v4455_v41 = vpack.c.bf16 %v3869_v44, %v3869_v44  ;;  %v3867_v61 = vsel %vm3815_vm6, %v3771_v37, 0.0  ;;  %v3772_v35 = vmax.f32 %v3740_v34, 0.0  ;;  %v4837_v47 = vpop.f32.mrb[12].mxu1 }
 0x434   : > { %v4453_v10 = vpack.c.bf16 %v3867_v61, %v3867_v61  ;;  %v3870_v13 = vsel %vm3816_vm2, %v3774_v50, 0.0  ;;  %v3706_v46 = vmul.f32 %v4837_v47, %v6732_v19  ;;  %v3574_v59 = vpop.f32.mrb[13].mxu1  ;;  %vm3822_vm11 = vcmp.lt.s32.totalorder %v3806_v22, 20 }
 0x435   : > { %4030 = vst.msk [vmem:[%s6754_s17 + $0x28] sm:$0xf] %vm4019_vm15, %v4455_v41  ;;  %v4456_v11 = vpack.c.bf16 %v3870_v13, %v3870_v13  ;;  %v3868_v8 = vsel %vm3815_vm6, %v3772_v35, 0.0  ;;  %v3704_v16 = vmul.f32 %v6732_v19, %v3574_v59  ;;  %v4838_v62 = vpop.f32.mrb[14].mxu1  ;;  %v3805_v41 = vadd.s32 10, %v6727_v39 }
 0x436   : > { %4028 = vst.msk [vmem:[%s6754_s17 + $0x20] sm:$0xf] %vm4019_vm15, %v4453_v10  ;;  %v4454_v55 = vpack.c.bf16 %v3868_v8, %v3868_v8  ;;  %v3745_v18 = vadd.f32 %v6737_v29, %v3706_v46  ;;  %v3707_v15 = vmul.f32 %v4838_v62, %v6732_v19  ;;  %v3577_v14 = vpop.f32.mrb[15].mxu1 }
 0x437   : > { %4031 = vst.msk [vmem:[%s6754_s17 + $0x2c] sm:$0xf] %vm4019_vm15, %v4456_v11  ;;  %v3743_v42 = vadd.f32 %v6737_v29, %v3704_v16  ;;  %v3705_v7 = vmul.f32 %v6732_v19, %v3577_v14  ;;  %vm3821_vm12 = vcmp.lt.s32.totalorder %v3805_v41, 20 }
 0x438   : > { %4029 = vst.msk [vmem:[%s6754_s17 + $0x24] sm:$0xf] %vm4019_vm15, %v4454_v55  ;;  %v3777_v54 = vmax.f32 %v3745_v18, 0.0  ;;  %v3746_v58 = vadd.f32 %v6737_v29, %v3707_v15 }
 0x439   : > { %v3775_v36 = vmax.f32 %v3743_v42, 0.0  ;;  %v3744_v12 = vadd.f32 %v6737_v29, %v3705_v7 }
 0x43a   : > { %v3873_v63 = vsel %vm3818_vm7, %v3777_v54, 0.0  ;;  %v3778_v2 = vmax.f32 %v3746_v58, 0.0  ;;  %v3808_v58 = vadd.s32 13, %v6727_v39 }
 0x43b   : > { %v4459_v21 = vpack.c.bf16 %v3873_v63, %v3873_v63  ;;  %v3871_v38 = vsel %vm3817_vm8, %v3775_v36, 0.0  ;;  %v3776_v52 = vmax.f32 %v3744_v12, 0.0  ;;  %v4841_v27 = vpop.f32.mrb[16].mxu1 }
 0x43c   : > { %v4457_v57 = vpack.c.bf16 %v3871_v38, %v3871_v38  ;;  %v3874_v32 = vsel %vm3818_vm7, %v3778_v2, 0.0  ;;  %v3710_v25 = vmul.f32 %v4841_v27, %v6732_v19  ;;  %v3590_v1 = vpop.f32.mrb[17].mxu1  ;;  %vm3824_vm3 = vcmp.lt.s32.totalorder %v3808_v58, 20 }
 0x43d   : > { %4034 = vst.msk [vmem:[%s6754_s17 + $0x38] sm:$0xf] %vm4019_vm15, %v4459_v21  ;;  %v4460_v23 = vpack.c.bf16 %v3874_v32, %v3874_v32  ;;  %v3872_v6 = vsel %vm3817_vm8, %v3776_v52, 0.0  ;;  %v3708_v53 = vmul.f32 %v6732_v19, %v3590_v1  ;;  %v4842_v28 = vpop.f32.mrb[18].mxu1  ;;  %v3807_v21 = vadd.s32 12, %v6727_v39 }
 0x43e   : > { %4032 = vst.msk [vmem:[%s6754_s17 + $0x30] sm:$0xf] %vm4019_vm15, %v4457_v57  ;;  %v4458_v31 = vpack.c.bf16 %v3872_v6, %v3872_v6  ;;  %v3749_v51 = vadd.f32 %v6737_v29, %v3710_v25  ;;  %v3711_v9 = vmul.f32 %v4842_v28, %v6732_v19  ;;  %v3593_v4 = vpop.f32.mrb[19].mxu1 }
 0x43f   : > { %4035 = vst.msk [vmem:[%s6754_s17 + $0x3c] sm:$0xf] %vm4019_vm15, %v4460_v23  ;;  %v3747_v17 = vadd.f32 %v6737_v29, %v3708_v53  ;;  %v3709_v49 = vmul.f32 %v6732_v19, %v3593_v4  ;;  %vm3823_vm5 = vcmp.lt.s32.totalorder %v3807_v21, 20 }
 0x440   : > { %4033 = vst.msk [vmem:[%s6754_s17 + $0x34] sm:$0xf] %vm4019_vm15, %v4458_v31  ;;  %v3781_v60 = vmax.f32 %v3749_v51, 0.0  ;;  %v3750_v43 = vadd.f32 %v6737_v29, %v3711_v9 }
 0x441   : > { %v3779_v40 = vmax.f32 %v3747_v17, 0.0  ;;  %v3748_v5 = vadd.f32 %v6737_v29, %v3709_v49 }
 0x442   : > { %v3877_v20 = vsel %vm3820_vm9, %v3781_v60, 0.0  ;;  %v3782_v56 = vmax.f32 %v3750_v43, 0.0  ;;  %v3810_v43 = vadd.s32 15, %v6727_v39 }
 0x443   : > { %v4463_v24 = vpack.c.bf16 %v3877_v20, %v3877_v20  ;;  %v3875_v33 = vsel %vm3819_vm10, %v3779_v40, 0.0  ;;  %v3780_v48 = vmax.f32 %v3748_v5, 0.0  ;;  %v4845_v0 = vpop.f32.mrb[20].mxu1 }
 0x444   : > { %v4461_v37 = vpack.c.bf16 %v3875_v33, %v3875_v33  ;;  %v3878_v34 = vsel %vm3820_vm9, %v3782_v56, 0.0  ;;  %v3714_v44 = vmul.f32 %v4845_v0, %v6732_v19  ;;  %v3606_v50 = vpop.f32.mrb[21].mxu1  ;;  %vm3826_vm13 = vcmp.lt.s32.totalorder %v3810_v43, 20 }
 0x445   : > { %4038 = vst.msk [vmem:[%s6754_s17 + $0x48] sm:$0xf] %vm4019_vm15, %v4463_v24  ;;  %v4464_v61 = vpack.c.bf16 %v3878_v34, %v3878_v34  ;;  %v3876_v35 = vsel %vm3819_vm10, %v3780_v48, 0.0  ;;  %v3712_v47 = vmul.f32 %v6732_v19, %v3606_v50  ;;  %v4846_v45 = vpop.f32.mrb[22].mxu1  ;;  %v3809_v24 = vadd.s32 14, %v6727_v39 }
 0x446   : > { %4036 = vst.msk [vmem:[%s6754_s17 + $0x40] sm:$0xf] %vm4019_vm15, %v4461_v37  ;;  %v4462_v10 = vpack.c.bf16 %v3876_v35, %v3876_v35  ;;  %v3753_v13 = vadd.f32 %v6737_v29, %v3714_v44  ;;  %v3715_v46 = vmul.f32 %v4846_v45, %v6732_v19  ;;  %v3609_v59 = vpop.f32.mrb[23].mxu1 }
 0x447   : > { %4039 = vst.msk [vmem:[%s6754_s17 + $0x4c] sm:$0xf] %vm4019_vm15, %v4464_v61  ;;  %v3751_v26 = vadd.f32 %v6737_v29, %v3712_v47  ;;  %v3713_v11 = vmul.f32 %v6732_v19, %v3609_v59  ;;  %vm3825_vm4 = vcmp.lt.s32.totalorder %v3809_v24, 20 }
 0x448   : > { %4037 = vst.msk [vmem:[%s6754_s17 + $0x44] sm:$0xf] %vm4019_vm15, %v4462_v10  ;;  %v3785_v8 = vmax.f32 %v3753_v13, 0.0  ;;  %v3754_v16 = vadd.f32 %v6737_v29, %v3715_v46 }
 0x449   : > { %v3783_v62 = vmax.f32 %v3751_v26, 0.0  ;;  %v3752_v55 = vadd.f32 %v6737_v29, %v3713_v11 }
 0x44a   : > { %v3881_v18 = vsel %vm3822_vm11, %v3785_v8, 0.0  ;;  %v3786_v15 = vmax.f32 %v3754_v16, 0.0 }
 0x44b   : > { %v4467_v14 = vpack.c.bf16 %v3881_v18, %v3881_v18  ;;  %v3879_v42 = vsel %vm3821_vm12, %v3783_v62, 0.0  ;;  %v3784_v7 = vmax.f32 %v3752_v55, 0.0  ;;  %v4849_v54 = vpop.f32.mrb[24].mxu1 }
 0x44c   : > { %v4465_v36 = vpack.c.bf16 %v3879_v42, %v3879_v42  ;;  %v3882_v12 = vsel %vm3822_vm11, %v3786_v15, 0.0  ;;  %v3718_v63 = vmul.f32 %v4849_v54, %v6732_v19  ;;  %v3622_v2 = vpop.f32.mrb[25].mxu1 }
 0x44d   : > { %4042 = vst.msk [vmem:[%s6754_s17 + $0x58] sm:$0xf] %vm4019_vm15, %v4467_v14  ;;  %v4468_v38 = vpack.c.bf16 %v3882_v12, %v3882_v12  ;;  %v3880_v52 = vsel %vm3821_vm12, %v3784_v7, 0.0  ;;  %v3716_v27 = vmul.f32 %v6732_v19, %v3622_v2  ;;  %v4850_v30 = vpop.f32.mrb[26].mxu1 }
 0x44e   : > { %4040 = vst.msk [vmem:[%s6754_s17 + $0x50] sm:$0xf] %vm4019_vm15, %v4465_v36  ;;  %v4466_v57 = vpack.c.bf16 %v3880_v52, %v3880_v52  ;;  %v3757_v32 = vadd.f32 %v6737_v29, %v3718_v63  ;;  %v3719_v25 = vmul.f32 %v4850_v30, %v6732_v19  ;;  %v3625_v1 = vpop.f32.mrb[27].mxu1 }
 0x44f   : > { %4043 = vst.msk [vmem:[%s6754_s17 + $0x5c] sm:$0xf] %vm4019_vm15, %v4468_v38  ;;  %v3755_v3 = vadd.f32 %v6737_v29, %v3716_v27  ;;  %v3717_v23 = vmul.f32 %v6732_v19, %v3625_v1 }
 0x450   : > { %4041 = vst.msk [vmem:[%s6754_s17 + $0x54] sm:$0xf] %vm4019_vm15, %v4466_v57  ;;  %v3789_v6 = vmax.f32 %v3757_v32, 0.0  ;;  %v3758_v53 = vadd.f32 %v6737_v29, %v3719_v25 }
 0x451   : > { %v3787_v28 = vmax.f32 %v3755_v3, 0.0  ;;  %v3756_v31 = vadd.f32 %v6737_v29, %v3717_v23 }
 0x452   : > { %v3885_v51 = vsel %vm3824_vm3, %v3789_v6, 0.0  ;;  %v3790_v9 = vmax.f32 %v3758_v53, 0.0 }
 0x453   : > { %v4471_v4 = vpack.c.bf16 %v3885_v51, %v3885_v51  ;;  %v3883_v17 = vsel %vm3823_vm5, %v3787_v28, 0.0  ;;  %v3788_v49 = vmax.f32 %v3756_v31, 0.0  ;;  %v4853_v60 = vpop.f32.mrb[28].mxu1 }
 0x454   : > { %v4469_v40 = vpack.c.bf16 %v3883_v17, %v3883_v17  ;;  %v3886_v5 = vsel %vm3824_vm3, %v3790_v9, 0.0  ;;  %v3722_v20 = vmul.f32 %v4853_v60, %v6732_v19  ;;  %v3638_v56 = vpop.f32.mrb[29].mxu1 }
 0x455   : > { %4046 = vst.msk [vmem:[%s6754_s17 + $0x68] sm:$0xf] %vm4019_vm15, %v4471_v4  ;;  %v4472_v33 = vpack.c.bf16 %v3886_v5, %v3886_v5  ;;  %v3884_v48 = vsel %vm3823_vm5, %v3788_v49, 0.0  ;;  %v3720_v0 = vmul.f32 %v6732_v19, %v3638_v56  ;;  %v4854_v22 = vpop.f32.mrb[30].mxu1 }
 0x456   : > { %4044 = vst.msk [vmem:[%s6754_s17 + $0x60] sm:$0xf] %vm4019_vm15, %v4469_v40  ;;  %v4470_v37 = vpack.c.bf16 %v3884_v48, %v3884_v48  ;;  %v3761_v34 = vadd.f32 %v6737_v29, %v3722_v20  ;;  %v3723_v44 = vmul.f32 %v4854_v22, %v6732_v19  ;;  %v3641_v50 = vpop.f32.mrb[31].mxu1 }
 0x457   : > { %4047 = vst.msk [vmem:[%s6754_s17 + $0x6c] sm:$0xf] %vm4019_vm15, %v4472_v33  ;;  %v3759_v39 = vadd.f32 %v6737_v29, %v3720_v0  ;;  %v3721_v41 = vmul.f32 %v6732_v19, %v3641_v50 }
 0x458   : > { %4045 = vst.msk [vmem:[%s6754_s17 + $0x64] sm:$0xf] %vm4019_vm15, %v4470_v37  ;;  %v3793_v61 = vmax.f32 %v3761_v34, 0.0  ;;  %v3762_v35 = vadd.f32 %v6737_v29, %v3723_v44 }
 0x459   : > { %v3791_v47 = vmax.f32 %v3759_v39, 0.0  ;;  %v3760_v45 = vadd.f32 %v6737_v29, %v3721_v41 }
 0x45a   : > { %v3889_v10 = vsel %vm3826_vm13, %v3793_v61, 0.0  ;;  %v3794_v13 = vmax.f32 %v3762_v35, 0.0 }
 0x45b   : > { %v4475_v46 = vpack.c.bf16 %v3889_v10, %v3889_v10  ;;  %v3887_v59 = vsel %vm3825_vm4, %v3791_v47, 0.0  ;;  %v3792_v26 = vmax.f32 %v3760_v45, 0.0 }
 0x45c   : > { %v4473_v11 = vpack.c.bf16 %v3887_v59, %v3887_v59  ;;  %v3890_v8 = vsel %vm3826_vm13, %v3794_v13, 0.0 }
 0x45d   : > { %4050 = vst.msk [vmem:[%s6754_s17 + $0x78] sm:$0xf] %vm4019_vm15, %v4475_v46  ;;  %v4476_v19 = vpack.c.bf16 %v3890_v8, %v3890_v8  ;;  %v3888_v16 = vsel %vm3825_vm4, %v3792_v26, 0.0 }
 0x45e   : > { %4048 = vst.msk [vmem:[%s6754_s17 + $0x70] sm:$0xf] %vm4019_vm15, %v4473_v11  ;;  %v4474_v62 = vpack.c.bf16 %v3888_v16, %v3888_v16 }
 0x45f   : > { %4051 = vst.msk [vmem:[%s6754_s17 + $0x7c] sm:$0xf] %vm4019_vm15, %v4476_v19 }
 0x460   : > { %4049 = vst.msk [vmem:[%s6754_s17 + $0x74] sm:$0xf] %vm4019_vm15, %v4474_v62 }
 0x461 PF: > { %s19_s13 = sadd.s32 1, %s5116_s13   ;;  %s6989_s30 = smov %s5108_s11 }
 0x462   : > { %p16_p13 = scmp.ge.s32.totalorder %s19_s13, 6   ;;  %s6990_s10 = smov %s5112_s12 }
 0x463   : > { %s6991_s11 = smov %s6994_s14  ;;  %s6992_s12 = smov %s6998_s15 }
 0x464   :  { %18 = sbr.rel (!%p16_p13) target bundleno = 3 (0x3), region = 96 }

</bundles_post_ra>
